<compile_context>
chip_gen: v6e
topology: v6e:2x2x1
jax: 0.10.0
libtpu: 0.0.40
codegen_flags: <defaults>
</compile_context>

<pallas_src>
import functools

import jax
import jax.numpy as jnp
from jax.experimental import pallas as pl


# ----------------------------------------------------------------------------
# In-kernel helpers
# ----------------------------------------------------------------------------
def _g_gate_mask(h):
    """Lane mask (1, 4h): True where the 'g' (cell candidate) gate lives."""
    lane = jax.lax.broadcasted_iota(jnp.int32, (1, 4 * h), 1)
    return (lane >= 2 * h) & (lane < 3 * h)


def _cell_from_gates(gates, c, g_mask, n):
    """Finish one LSTM cell from pre-activation gates (PyTorch order i,f,g,o).

    The g-gate columns of the weights/bias were pre-scaled by 2 at init, so a
    single sigmoid pass suffices: tanh(x_g) == 2*sigmoid(2*x_g) - 1.
    """
    s = jax.nn.sigmoid(gates)                       # one EUP pass, full width
    act = jnp.where(g_mask, 2.0 * s - 1.0, s)       # [i_s | f_s | g_t | o_s]
    i = act[:, 0 * n:1 * n]
    f = act[:, 1 * n:2 * n]
    g = act[:, 2 * n:3 * n]
    o = act[:, 3 * n:4 * n]
    c_new = f * c + i * g
    h_new = o * jnp.tanh(c_new)
    return h_new, c_new


def _lstm_cell(x_t, h, c, wih_ref, whh_ref, b_ref, g_mask, n):
    """Generic cell: gates = x@Wih + h@Whh + b.  Weights read from VMEM refs
    inside the cell so their vreg live-ranges stay local (no 48-cell pinning)."""
    gates = (jnp.dot(x_t, wih_ref[...], preferred_element_type=jnp.float32)
             + jnp.dot(h, whh_ref[...], preferred_element_type=jnp.float32)
             + b_ref[...])
    return _cell_from_gates(gates, c, g_mask, n)


def _lstm_cell_pre(xp_t, h, c, whh_ref, g_mask, n):
    """Cell whose input projection (x@Wih + b) was precomputed (xp_t).
    Only the recurrent h@Whh matmul remains on the critical path."""
    gates = xp_t + jnp.dot(h, whh_ref[...], preferred_element_type=jnp.float32)
    return _cell_from_gates(gates, c, g_mask, n)


# ----------------------------------------------------------------------------
# Fused LSTMVAE forward kernel
# ----------------------------------------------------------------------------
def _lstmvae_kernel(
        # inputs
        x_ref, eps_ref,
        e_wih0, e_whh0, e_b0, e_wih1, e_whh1, e_b1,          # encoder LSTM
        wms_ref, bms_ref,                                    # fused [mean|sigma] head
        d_wih0, d_whh0, d_b0, d_wih1, d_whh1, d_b1,          # hidden LSTM
        o_wih0, o_whh0, o_b0, o_wih1, o_whh1, o_b1,          # output LSTM
        # outputs
        xhat_ref, ms_ref,
        *, T, B, H, L, IS):
    f32 = jnp.float32

    def zeros(n):
        return jnp.zeros((B, n), f32)

    mask_h = _g_gate_mask(H)          # (1, 4H)   encoder / hidden stacks
    mask_o = _g_gate_mask(IS)         # (1, 4*IS) output stack

    # ---------------- encoder: 2-layer LSTM (only last-step h1 is needed) ----
    # Pre-batched layer-0 input projection: one (T*B,F)x(F,4H) matmul + bias,
    # off the recurrent critical path; bias is folded in here.
    xproj = (jnp.dot(x_ref[...], e_wih0[...], preferred_element_type=f32)
             + e_b0[...])                                    # (T*B, 4H)

    h0, c0 = zeros(H), zeros(H)
    h1, c1 = zeros(H), zeros(H)
    for t in range(T):
        xp_t = xproj[t * B:(t + 1) * B, :]                   # (B, 4H)
        h0, c0 = _lstm_cell_pre(xp_t, h0, c0, e_whh0, mask_h, H)
        h1, c1 = _lstm_cell(h0, h1, c1, e_wih1, e_whh1, e_b1, mask_h, H)
    enc_last = jnp.tanh(h1)                                  # tanh(encode_h)[:, -1, :]

    # ---------------- fused mean/sigma heads + re-parameterization -----------
    # NOTE: ReLU is applied to BOTH heads (incl. sigma), matching the PyTorch
    # reference exactly (it ReLUs the log-variance head too).
    ms = jnp.maximum(
        jnp.dot(enc_last, wms_ref[...], preferred_element_type=f32)
        + bms_ref[...], 0.0)                                 # (B, 2L)
    ms_ref[...] = ms                                         # one fused store
    mean = ms[:, :L]
    sigma = ms[:, L:]
    z = mean + jnp.exp(sigma * 0.5) * eps_ref[...]           # (B, L)

    # ---------------- fused decoder: hidden_LSTM(H) -> tanh -> output_LSTM(IS)
    # z is constant over time: layer-0 input projection hoisted out of the loop.
    zproj = (jnp.dot(z, d_wih0[...], preferred_element_type=f32)
             + d_b0[...])                                    # (B, 4H), reused T times

    dh0, dc0 = zeros(H), zeros(H)
    dh1, dc1 = zeros(H), zeros(H)
    oh0, oc0 = zeros(IS), zeros(IS)
    oh1, oc1 = zeros(IS), zeros(IS)
    outs = []
    for t in range(T):
        dh0, dc0 = _lstm_cell_pre(zproj, dh0, dc0, d_whh0, mask_h, H)
        dh1, dc1 = _lstm_cell(dh0, dh1, dc1, d_wih1, d_whh1, d_b1, mask_h, H)
        dec_t = jnp.tanh(dh1)                                # tanh(decode_h[:, t, :])
        oh0, oc0 = _lstm_cell(dec_t, oh0, oc0, o_wih0, o_whh0, o_b0, mask_o, IS)
        oh1, oc1 = _lstm_cell(oh0, oh1, oc1, o_wih1, o_whh1, o_b1, mask_o, IS)
        outs.append(jnp.tanh(oh1))                           # (B, IS)
    # One lane-dense unmasked (B, T*IS) store instead of T masked partial stores.
    xhat_ref[...] = jnp.concatenate(outs, axis=1)


# ----------------------------------------------------------------------------
# Wrapper
# ----------------------------------------------------------------------------
def lstmvae_forward(params, x, eps):
    """x: (B, T, input_size), eps: (B, latent).  Returns x_hat, mean, sigma."""
    B, T, _ = x.shape
    F = params["enc"]["wih0"].shape[0]          # wih stored pre-transposed (F, 4H)
    H = params["enc"]["whh0"].shape[0]          # whh stored pre-transposed (H, 4H)
    L = params["wms"].shape[1] // 2
    IS = params["out"]["whh0"].shape[0]         # output LSTM hidden == input_size

    # Feature gather + time-major flatten stay in (jitted) XLA glue; the
    # gathered sequence is tiny and feeds the kernel as one VMEM block shaped
    # (T*B, F) so the kernel can do a single batched input projection.
    x_sel = jnp.take(x, params["random_samples"], axis=2)    # (B, T, F)
    x_flat = jnp.transpose(x_sel, (1, 0, 2)).reshape(T * B, F)

    kernel = functools.partial(_lstmvae_kernel, T=T, B=B, H=H, L=L, IS=IS)

    xhat_flat, ms = pl.pallas_call(
        kernel,
        out_shape=(
            jax.ShapeDtypeStruct((B, T * IS), jnp.float32),   # lane-dense slab
            jax.ShapeDtypeStruct((B, 2 * L), jnp.float32),    # [mean | sigma]
        ),
    )(x_flat, eps,
      params["enc"]["wih0"], params["enc"]["whh0"], params["enc"]["b0"],
      params["enc"]["wih1"], params["enc"]["whh1"], params["enc"]["b1"],
      params["wms"], params["bms"],
      params["hid"]["wih0"], params["hid"]["whh0"], params["hid"]["b0"],
      params["hid"]["wih1"], params["hid"]["whh1"], params["hid"]["b1"],
      params["out"]["wih0"], params["out"]["whh0"], params["out"]["b0"],
      params["out"]["wih1"], params["out"]["whh1"], params["out"]["b1"])

    x_hat = xhat_flat.reshape(B, T, IS)
    mean = ms[:, :L]
    sigma = ms[:, L:]
    return x_hat, mean, sigma


# ----------------------------------------------------------------------------
# Parameter initialization (deterministic, PyTorch-style uniform ranges)
# ----------------------------------------------------------------------------
def _uniform(key, shape, bound):
    return jax.random.uniform(key, shape, jnp.float32, -bound, bound)


def _scale_g(w, h):
    """Scale the g-gate block (rows/elements [2h, 3h) in PyTorch i,f,g,o order)
    by 2, enabling the single-sigmoid gate activation in the kernel
    (tanh(x) == 2*sigmoid(2x) - 1)."""
    return w.at[2 * h:3 * h].multiply(2.0)


def init_lstm2(key, d_in, h):
    """2-layer nn.LSTM params, pre-transposed for x @ W, combined biases, and
    g-gate columns pre-scaled by 2 (kernel-facing layout)."""
    ks = jax.random.split(key, 8)
    bound = 1.0 / (h ** 0.5)
    wih0 = _uniform(ks[0], (4 * h, d_in), bound)
    whh0 = _uniform(ks[1], (4 * h, h), bound)
    b0 = _uniform(ks[2], (4 * h,), bound) + _uniform(ks[3], (4 * h,), bound)
    wih1 = _uniform(ks[4], (4 * h, h), bound)
    whh1 = _uniform(ks[5], (4 * h, h), bound)
    b1 = _uniform(ks[6], (4 * h,), bound) + _uniform(ks[7], (4 * h,), bound)

    def prep_w(w):
        return _scale_g(w, h).T                     # (d, 4h)

    def prep_b(b):
        return _scale_g(b, h).reshape(1, 4 * h)

    return dict(
        wih0=prep_w(wih0), whh0=prep_w(whh0), b0=prep_b(b0),
        wih1=prep_w(wih1), whh1=prep_w(whh1), b1=prep_b(b1),
    )


def init_lstmvae(key, time_step, input_size, hidden_size, latent_size,
                 max_features):
    del time_step  # shapes carried by the data
    ks = jax.random.split(key, 8)
    lb = 1.0 / (hidden_size ** 0.5)
    wm = _uniform(ks[3], (latent_size, hidden_size), lb)
    bm = _uniform(ks[4], (latent_size,), lb)
    ws = _uniform(ks[5], (latent_size, hidden_size), lb)
    bs = _uniform(ks[6], (latent_size,), lb)
    return {
        "enc": init_lstm2(ks[0], max_features, hidden_size),
        "hid": init_lstm2(ks[1], latent_size, hidden_size),
        "out": init_lstm2(ks[2], hidden_size, input_size),
        # fused [mean | sigma] head: weight (H, 2L), bias (1, 2L)
        "wms": jnp.concatenate([wm.T, ws.T], axis=1),
        "bms": jnp.concatenate([bm, bs]).reshape(1, 2 * latent_size),
        # np.random.choice(input_size, replace=False, size=max_features)
        "random_samples": jax.random.permutation(ks[7],
                                                 input_size)[:max_features],
    }


if __name__ == "__main__":
    batch = 2
    time_step = 8
    input_size = 16
    hidden_size = 32
    latent_size = 8
    max_features = 4

    root = jax.random.PRNGKey(0)
    k_params, k_x, k_eps = jax.random.split(root, 3)

    params = init_lstmvae(k_params, time_step, input_size, hidden_size,
                          latent_size, max_features)
    x = jax.random.normal(k_x, (batch, time_step, input_size), jnp.float32)
    eps = jax.random.normal(k_eps, (batch, latent_size), jnp.float32)

    fwd = jax.jit(lstmvae_forward)
    x_hat, mean, sigma = fwd(params, x, eps)
    jax.block_until_ready((x_hat, mean, sigma))

    assert x_hat.shape == (batch, time_step, input_size)
    assert mean.shape == (batch, latent_size)
    assert sigma.shape == (batch, latent_size)
    assert bool(jnp.all(jnp.isfinite(x_hat)))
    assert bool(jnp.all(jnp.isfinite(mean))) and bool(jnp.all(jnp.isfinite(sigma)))
    # tanh output range sanity
    assert bool(jnp.all(jnp.abs(x_hat) <= 1.0))
    print("KERNEL_OK")
</pallas_src>

<mosaic_0001>
module attributes {stable_mosaic.version = 11 : i64} {
  func.func @_lstmvae_kernel(%arg0: memref<16x4xf32, #tpu.memory_space<vmem>>, %arg1: memref<2x8xf32, #tpu.memory_space<vmem>>, %arg2: memref<4x128xf32, #tpu.memory_space<vmem>>, %arg3: memref<32x128xf32, #tpu.memory_space<vmem>>, %arg4: memref<1x128xf32, #tpu.memory_space<vmem>>, %arg5: memref<32x128xf32, #tpu.memory_space<vmem>>, %arg6: memref<32x128xf32, #tpu.memory_space<vmem>>, %arg7: memref<1x128xf32, #tpu.memory_space<vmem>>, %arg8: memref<32x16xf32, #tpu.memory_space<vmem>>, %arg9: memref<1x16xf32, #tpu.memory_space<vmem>>, %arg10: memref<8x128xf32, #tpu.memory_space<vmem>>, %arg11: memref<32x128xf32, #tpu.memory_space<vmem>>, %arg12: memref<1x128xf32, #tpu.memory_space<vmem>>, %arg13: memref<32x128xf32, #tpu.memory_space<vmem>>, %arg14: memref<32x128xf32, #tpu.memory_space<vmem>>, %arg15: memref<1x128xf32, #tpu.memory_space<vmem>>, %arg16: memref<32x64xf32, #tpu.memory_space<vmem>>, %arg17: memref<16x64xf32, #tpu.memory_space<vmem>>, %arg18: memref<1x64xf32, #tpu.memory_space<vmem>>, %arg19: memref<16x64xf32, #tpu.memory_space<vmem>>, %arg20: memref<16x64xf32, #tpu.memory_space<vmem>>, %arg21: memref<1x64xf32, #tpu.memory_space<vmem>>, %arg22: memref<2x128xf32, #tpu.memory_space<vmem>>, %arg23: memref<2x16xf32, #tpu.memory_space<vmem>>) attributes {dimension_semantics = [], scalar_prefetch = 0 : i64, scratch_operands = 0 : i64, tpu.core_type = #tpu.core_type<tc>} {
    %0 = tpu.iota {dimensions = array<i32: 1>} : vector<1x128xi32>
    %c64_i32 = arith.constant 64 : i32
    %1 = vector.broadcast %c64_i32 : i32 to vector<1x128xi32>
    %2 = arith.cmpi sge, %0, %1 : vector<1x128xi32>
    %c96_i32 = arith.constant 96 : i32
    %3 = vector.broadcast %c96_i32 : i32 to vector<1x128xi32>
    %4 = arith.cmpi slt, %0, %3 : vector<1x128xi32>
    %5 = arith.andi %2, %4 : vector<1x128xi1>
    %6 = tpu.iota {dimensions = array<i32: 1>} : vector<1x64xi32>
    %c32_i32 = arith.constant 32 : i32
    %7 = vector.broadcast %c32_i32 : i32 to vector<1x64xi32>
    %8 = arith.cmpi sge, %6, %7 : vector<1x64xi32>
    %c48_i32 = arith.constant 48 : i32
    %9 = vector.broadcast %c48_i32 : i32 to vector<1x64xi32>
    %10 = arith.cmpi slt, %6, %9 : vector<1x64xi32>
    %11 = arith.andi %8, %10 : vector<1x64xi1>
    %c0 = arith.constant 0 : index
    %c0_0 = arith.constant 0 : index
    %12 = vector.load %arg0[%c0, %c0_0] : memref<16x4xf32, #tpu.memory_space<vmem>>, vector<16x4xf32>
    %c0_1 = arith.constant 0 : index
    %c0_2 = arith.constant 0 : index
    %13 = vector.load %arg2[%c0_1, %c0_2] : memref<4x128xf32, #tpu.memory_space<vmem>>, vector<4x128xf32>
    %cst = arith.constant dense<0.000000e+00> : vector<16x128xf32>
    %14 = tpu.matmul %12, %13, %cst {dimension_numbers = #tpu.dot_dimension_numbers<[1], [0], [0], [1], [0, 0, 1, 1], [], []>} : vector<16x4xf32>, vector<4x128xf32>, vector<16x128xf32> -> vector<16x128xf32>
    %c0_3 = arith.constant 0 : index
    %c0_4 = arith.constant 0 : index
    %15 = vector.load %arg4[%c0_3, %c0_4] : memref<1x128xf32, #tpu.memory_space<vmem>>, vector<1x128xf32>
    %16 = vector.broadcast %15 : vector<1x128xf32> to vector<16x128xf32>
    %17 = arith.addf %14, %16 : vector<16x128xf32>
    %cst_5 = arith.constant 0.000000e+00 : f32
    %18 = vector.broadcast %cst_5 : f32 to vector<2x32xf32>
    %cst_6 = arith.constant 0.000000e+00 : f32
    %19 = vector.broadcast %cst_6 : f32 to vector<2x32xf32>
    %cst_7 = arith.constant 0.000000e+00 : f32
    %20 = vector.broadcast %cst_7 : f32 to vector<2x32xf32>
    %cst_8 = arith.constant 0.000000e+00 : f32
    %21 = vector.broadcast %cst_8 : f32 to vector<2x32xf32>
    %22 = vector.extract_strided_slice %17 {offsets = [0, 0], sizes = [2, 128], strides = [1, 1]} : vector<16x128xf32> to vector<2x128xf32>
    %c0_9 = arith.constant 0 : index
    %c0_10 = arith.constant 0 : index
    %23 = vector.load %arg3[%c0_9, %c0_10] : memref<32x128xf32, #tpu.memory_space<vmem>>, vector<32x128xf32>
    %cst_11 = arith.constant dense<0.000000e+00> : vector<2x128xf32>
    %24 = tpu.matmul %18, %23, %cst_11 {dimension_numbers = #tpu.dot_dimension_numbers<[1], [0], [0], [1], [0, 0, 1, 1], [], []>} : vector<2x32xf32>, vector<32x128xf32>, vector<2x128xf32> -> vector<2x128xf32>
    %25 = arith.addf %22, %24 : vector<2x128xf32>
    %26 = arith.negf %25 : vector<2x128xf32>
    %27 = math.exp %26 : vector<2x128xf32>
    %cst_12 = arith.constant 1.000000e+00 : f32
    %28 = vector.broadcast %cst_12 : f32 to vector<2x128xf32>
    %29 = arith.addf %28, %27 : vector<2x128xf32>
    %30 = arith.divf %28, %29 : vector<2x128xf32>
    %cst_13 = arith.constant 2.000000e+00 : f32
    %31 = vector.broadcast %cst_13 : f32 to vector<2x128xf32>
    %32 = arith.mulf %31, %30 : vector<2x128xf32>
    %cst_14 = arith.constant 1.000000e+00 : f32
    %33 = vector.broadcast %cst_14 : f32 to vector<2x128xf32>
    %34 = arith.subf %32, %33 : vector<2x128xf32>
    %35 = vector.shape_cast %5 : vector<1x128xi1> to vector<1x128xi1>
    %36 = vector.broadcast %35 : vector<1x128xi1> to vector<2x128xi1>
    %37 = arith.select %36, %34, %30 : vector<2x128xi1>, vector<2x128xf32>
    %38 = vector.extract_strided_slice %37 {offsets = [0, 0], sizes = [2, 32], strides = [1, 1]} : vector<2x128xf32> to vector<2x32xf32>
    %39 = vector.extract_strided_slice %37 {offsets = [0, 32], sizes = [2, 32], strides = [1, 1]} : vector<2x128xf32> to vector<2x32xf32>
    %40 = vector.extract_strided_slice %37 {offsets = [0, 64], sizes = [2, 32], strides = [1, 1]} : vector<2x128xf32> to vector<2x32xf32>
    %41 = vector.extract_strided_slice %37 {offsets = [0, 96], sizes = [2, 32], strides = [1, 1]} : vector<2x128xf32> to vector<2x32xf32>
    %42 = arith.mulf %39, %19 : vector<2x32xf32>
    %43 = arith.mulf %38, %40 : vector<2x32xf32>
    %44 = arith.addf %42, %43 : vector<2x32xf32>
    %45 = math.tanh %44 : vector<2x32xf32>
    %46 = arith.mulf %41, %45 : vector<2x32xf32>
    %c0_15 = arith.constant 0 : index
    %c0_16 = arith.constant 0 : index
    %47 = vector.load %arg5[%c0_15, %c0_16] : memref<32x128xf32, #tpu.memory_space<vmem>>, vector<32x128xf32>
    %cst_17 = arith.constant dense<0.000000e+00> : vector<2x128xf32>
    %48 = tpu.matmul %46, %47, %cst_17 {dimension_numbers = #tpu.dot_dimension_numbers<[1], [0], [0], [1], [0, 0, 1, 1], [], []>} : vector<2x32xf32>, vector<32x128xf32>, vector<2x128xf32> -> vector<2x128xf32>
    %c0_18 = arith.constant 0 : index
    %c0_19 = arith.constant 0 : index
    %49 = vector.load %arg6[%c0_18, %c0_19] : memref<32x128xf32, #tpu.memory_space<vmem>>, vector<32x128xf32>
    %cst_20 = arith.constant dense<0.000000e+00> : vector<2x128xf32>
    %50 = tpu.matmul %20, %49, %cst_20 {dimension_numbers = #tpu.dot_dimension_numbers<[1], [0], [0], [1], [0, 0, 1, 1], [], []>} : vector<2x32xf32>, vector<32x128xf32>, vector<2x128xf32> -> vector<2x128xf32>
    %51 = arith.addf %48, %50 : vector<2x128xf32>
    %c0_21 = arith.constant 0 : index
    %c0_22 = arith.constant 0 : index
    %52 = vector.load %arg7[%c0_21, %c0_22] : memref<1x128xf32, #tpu.memory_space<vmem>>, vector<1x128xf32>
    %53 = vector.broadcast %52 : vector<1x128xf32> to vector<2x128xf32>
    %54 = arith.addf %51, %53 : vector<2x128xf32>
    %55 = arith.negf %54 : vector<2x128xf32>
    %56 = math.exp %55 : vector<2x128xf32>
    %cst_23 = arith.constant 1.000000e+00 : f32
    %57 = vector.broadcast %cst_23 : f32 to vector<2x128xf32>
    %58 = arith.addf %57, %56 : vector<2x128xf32>
    %59 = arith.divf %57, %58 : vector<2x128xf32>
    %cst_24 = arith.constant 2.000000e+00 : f32
    %60 = vector.broadcast %cst_24 : f32 to vector<2x128xf32>
    %61 = arith.mulf %60, %59 : vector<2x128xf32>
    %cst_25 = arith.constant 1.000000e+00 : f32
    %62 = vector.broadcast %cst_25 : f32 to vector<2x128xf32>
    %63 = arith.subf %61, %62 : vector<2x128xf32>
    %64 = vector.shape_cast %5 : vector<1x128xi1> to vector<1x128xi1>
    %65 = vector.broadcast %64 : vector<1x128xi1> to vector<2x128xi1>
    %66 = arith.select %65, %63, %59 : vector<2x128xi1>, vector<2x128xf32>
    %67 = vector.extract_strided_slice %66 {offsets = [0, 0], sizes = [2, 32], strides = [1, 1]} : vector<2x128xf32> to vector<2x32xf32>
    %68 = vector.extract_strided_slice %66 {offsets = [0, 32], sizes = [2, 32], strides = [1, 1]} : vector<2x128xf32> to vector<2x32xf32>
    %69 = vector.extract_strided_slice %66 {offsets = [0, 64], sizes = [2, 32], strides = [1, 1]} : vector<2x128xf32> to vector<2x32xf32>
    %70 = vector.extract_strided_slice %66 {offsets = [0, 96], sizes = [2, 32], strides = [1, 1]} : vector<2x128xf32> to vector<2x32xf32>
    %71 = arith.mulf %68, %21 : vector<2x32xf32>
    %72 = arith.mulf %67, %69 : vector<2x32xf32>
    %73 = arith.addf %71, %72 : vector<2x32xf32>
    %74 = math.tanh %73 : vector<2x32xf32>
    %75 = arith.mulf %70, %74 : vector<2x32xf32>
    %76 = vector.extract_strided_slice %17 {offsets = [2, 0], sizes = [2, 128], strides = [1, 1]} : vector<16x128xf32> to vector<2x128xf32>
    %c0_26 = arith.constant 0 : index
    %c0_27 = arith.constant 0 : index
    %77 = vector.load %arg3[%c0_26, %c0_27] : memref<32x128xf32, #tpu.memory_space<vmem>>, vector<32x128xf32>
    %cst_28 = arith.constant dense<0.000000e+00> : vector<2x128xf32>
    %78 = tpu.matmul %46, %77, %cst_28 {dimension_numbers = #tpu.dot_dimension_numbers<[1], [0], [0], [1], [0, 0, 1, 1], [], []>} : vector<2x32xf32>, vector<32x128xf32>, vector<2x128xf32> -> vector<2x128xf32>
    %79 = arith.addf %76, %78 : vector<2x128xf32>
    %80 = arith.negf %79 : vector<2x128xf32>
    %81 = math.exp %80 : vector<2x128xf32>
    %cst_29 = arith.constant 1.000000e+00 : f32
    %82 = vector.broadcast %cst_29 : f32 to vector<2x128xf32>
    %83 = arith.addf %82, %81 : vector<2x128xf32>
    %84 = arith.divf %82, %83 : vector<2x128xf32>
    %cst_30 = arith.constant 2.000000e+00 : f32
    %85 = vector.broadcast %cst_30 : f32 to vector<2x128xf32>
    %86 = arith.mulf %85, %84 : vector<2x128xf32>
    %cst_31 = arith.constant 1.000000e+00 : f32
    %87 = vector.broadcast %cst_31 : f32 to vector<2x128xf32>
    %88 = arith.subf %86, %87 : vector<2x128xf32>
    %89 = vector.shape_cast %5 : vector<1x128xi1> to vector<1x128xi1>
    %90 = vector.broadcast %89 : vector<1x128xi1> to vector<2x128xi1>
    %91 = arith.select %90, %88, %84 : vector<2x128xi1>, vector<2x128xf32>
    %92 = vector.extract_strided_slice %91 {offsets = [0, 0], sizes = [2, 32], strides = [1, 1]} : vector<2x128xf32> to vector<2x32xf32>
    %93 = vector.extract_strided_slice %91 {offsets = [0, 32], sizes = [2, 32], strides = [1, 1]} : vector<2x128xf32> to vector<2x32xf32>
    %94 = vector.extract_strided_slice %91 {offsets = [0, 64], sizes = [2, 32], strides = [1, 1]} : vector<2x128xf32> to vector<2x32xf32>
    %95 = vector.extract_strided_slice %91 {offsets = [0, 96], sizes = [2, 32], strides = [1, 1]} : vector<2x128xf32> to vector<2x32xf32>
    %96 = arith.mulf %93, %44 : vector<2x32xf32>
    %97 = arith.mulf %92, %94 : vector<2x32xf32>
    %98 = arith.addf %96, %97 : vector<2x32xf32>
    %99 = math.tanh %98 : vector<2x32xf32>
    %100 = arith.mulf %95, %99 : vector<2x32xf32>
    %c0_32 = arith.constant 0 : index
    %c0_33 = arith.constant 0 : index
    %101 = vector.load %arg5[%c0_32, %c0_33] : memref<32x128xf32, #tpu.memory_space<vmem>>, vector<32x128xf32>
    %cst_34 = arith.constant dense<0.000000e+00> : vector<2x128xf32>
    %102 = tpu.matmul %100, %101, %cst_34 {dimension_numbers = #tpu.dot_dimension_numbers<[1], [0], [0], [1], [0, 0, 1, 1], [], []>} : vector<2x32xf32>, vector<32x128xf32>, vector<2x128xf32> -> vector<2x128xf32>
    %c0_35 = arith.constant 0 : index
    %c0_36 = arith.constant 0 : index
    %103 = vector.load %arg6[%c0_35, %c0_36] : memref<32x128xf32, #tpu.memory_space<vmem>>, vector<32x128xf32>
    %cst_37 = arith.constant dense<0.000000e+00> : vector<2x128xf32>
    %104 = tpu.matmul %75, %103, %cst_37 {dimension_numbers = #tpu.dot_dimension_numbers<[1], [0], [0], [1], [0, 0, 1, 1], [], []>} : vector<2x32xf32>, vector<32x128xf32>, vector<2x128xf32> -> vector<2x128xf32>
    %105 = arith.addf %102, %104 : vector<2x128xf32>
    %c0_38 = arith.constant 0 : index
    %c0_39 = arith.constant 0 : index
    %106 = vector.load %arg7[%c0_38, %c0_39] : memref<1x128xf32, #tpu.memory_space<vmem>>, vector<1x128xf32>
    %107 = vector.broadcast %106 : vector<1x128xf32> to vector<2x128xf32>
    %108 = arith.addf %105, %107 : vector<2x128xf32>
    %109 = arith.negf %108 : vector<2x128xf32>
    %110 = math.exp %109 : vector<2x128xf32>
    %cst_40 = arith.constant 1.000000e+00 : f32
    %111 = vector.broadcast %cst_40 : f32 to vector<2x128xf32>
    %112 = arith.addf %111, %110 : vector<2x128xf32>
    %113 = arith.divf %111, %112 : vector<2x128xf32>
    %cst_41 = arith.constant 2.000000e+00 : f32
    %114 = vector.broadcast %cst_41 : f32 to vector<2x128xf32>
    %115 = arith.mulf %114, %113 : vector<2x128xf32>
    %cst_42 = arith.constant 1.000000e+00 : f32
    %116 = vector.broadcast %cst_42 : f32 to vector<2x128xf32>
    %117 = arith.subf %115, %116 : vector<2x128xf32>
    %118 = vector.shape_cast %5 : vector<1x128xi1> to vector<1x128xi1>
    %119 = vector.broadcast %118 : vector<1x128xi1> to vector<2x128xi1>
    %120 = arith.select %119, %117, %113 : vector<2x128xi1>, vector<2x128xf32>
    %121 = vector.extract_strided_slice %120 {offsets = [0, 0], sizes = [2, 32], strides = [1, 1]} : vector<2x128xf32> to vector<2x32xf32>
    %122 = vector.extract_strided_slice %120 {offsets = [0, 32], sizes = [2, 32], strides = [1, 1]} : vector<2x128xf32> to vector<2x32xf32>
    %123 = vector.extract_strided_slice %120 {offsets = [0, 64], sizes = [2, 32], strides = [1, 1]} : vector<2x128xf32> to vector<2x32xf32>
    %124 = vector.extract_strided_slice %120 {offsets = [0, 96], sizes = [2, 32], strides = [1, 1]} : vector<2x128xf32> to vector<2x32xf32>
    %125 = arith.mulf %122, %73 : vector<2x32xf32>
    %126 = arith.mulf %121, %123 : vector<2x32xf32>
    %127 = arith.addf %125, %126 : vector<2x32xf32>
    %128 = math.tanh %127 : vector<2x32xf32>
    %129 = arith.mulf %124, %128 : vector<2x32xf32>
    %130 = vector.extract_strided_slice %17 {offsets = [4, 0], sizes = [2, 128], strides = [1, 1]} : vector<16x128xf32> to vector<2x128xf32>
    %c0_43 = arith.constant 0 : index
    %c0_44 = arith.constant 0 : index
    %131 = vector.load %arg3[%c0_43, %c0_44] : memref<32x128xf32, #tpu.memory_space<vmem>>, vector<32x128xf32>
    %cst_45 = arith.constant dense<0.000000e+00> : vector<2x128xf32>
    %132 = tpu.matmul %100, %131, %cst_45 {dimension_numbers = #tpu.dot_dimension_numbers<[1], [0], [0], [1], [0, 0, 1, 1], [], []>} : vector<2x32xf32>, vector<32x128xf32>, vector<2x128xf32> -> vector<2x128xf32>
    %133 = arith.addf %130, %132 : vector<2x128xf32>
    %134 = arith.negf %133 : vector<2x128xf32>
    %135 = math.exp %134 : vector<2x128xf32>
    %cst_46 = arith.constant 1.000000e+00 : f32
    %136 = vector.broadcast %cst_46 : f32 to vector<2x128xf32>
    %137 = arith.addf %136, %135 : vector<2x128xf32>
    %138 = arith.divf %136, %137 : vector<2x128xf32>
    %cst_47 = arith.constant 2.000000e+00 : f32
    %139 = vector.broadcast %cst_47 : f32 to vector<2x128xf32>
    %140 = arith.mulf %139, %138 : vector<2x128xf32>
    %cst_48 = arith.constant 1.000000e+00 : f32
    %141 = vector.broadcast %cst_48 : f32 to vector<2x128xf32>
    %142 = arith.subf %140, %141 : vector<2x128xf32>
    %143 = vector.shape_cast %5 : vector<1x128xi1> to vector<1x128xi1>
    %144 = vector.broadcast %143 : vector<1x128xi1> to vector<2x128xi1>
    %145 = arith.select %144, %142, %138 : vector<2x128xi1>, vector<2x128xf32>
    %146 = vector.extract_strided_slice %145 {offsets = [0, 0], sizes = [2, 32], strides = [1, 1]} : vector<2x128xf32> to vector<2x32xf32>
    %147 = vector.extract_strided_slice %145 {offsets = [0, 32], sizes = [2, 32], strides = [1, 1]} : vector<2x128xf32> to vector<2x32xf32>
    %148 = vector.extract_strided_slice %145 {offsets = [0, 64], sizes = [2, 32], strides = [1, 1]} : vector<2x128xf32> to vector<2x32xf32>
    %149 = vector.extract_strided_slice %145 {offsets = [0, 96], sizes = [2, 32], strides = [1, 1]} : vector<2x128xf32> to vector<2x32xf32>
    %150 = arith.mulf %147, %98 : vector<2x32xf32>
    %151 = arith.mulf %146, %148 : vector<2x32xf32>
    %152 = arith.addf %150, %151 : vector<2x32xf32>
    %153 = math.tanh %152 : vector<2x32xf32>
    %154 = arith.mulf %149, %153 : vector<2x32xf32>
    %c0_49 = arith.constant 0 : index
    %c0_50 = arith.constant 0 : index
    %155 = vector.load %arg5[%c0_49, %c0_50] : memref<32x128xf32, #tpu.memory_space<vmem>>, vector<32x128xf32>
    %cst_51 = arith.constant dense<0.000000e+00> : vector<2x128xf32>
    %156 = tpu.matmul %154, %155, %cst_51 {dimension_numbers = #tpu.dot_dimension_numbers<[1], [0], [0], [1], [0, 0, 1, 1], [], []>} : vector<2x32xf32>, vector<32x128xf32>, vector<2x128xf32> -> vector<2x128xf32>
    %c0_52 = arith.constant 0 : index
    %c0_53 = arith.constant 0 : index
    %157 = vector.load %arg6[%c0_52, %c0_53] : memref<32x128xf32, #tpu.memory_space<vmem>>, vector<32x128xf32>
    %cst_54 = arith.constant dense<0.000000e+00> : vector<2x128xf32>
    %158 = tpu.matmul %129, %157, %cst_54 {dimension_numbers = #tpu.dot_dimension_numbers<[1], [0], [0], [1], [0, 0, 1, 1], [], []>} : vector<2x32xf32>, vector<32x128xf32>, vector<2x128xf32> -> vector<2x128xf32>
    %159 = arith.addf %156, %158 : vector<2x128xf32>
    %c0_55 = arith.constant 0 : index
    %c0_56 = arith.constant 0 : index
    %160 = vector.load %arg7[%c0_55, %c0_56] : memref<1x128xf32, #tpu.memory_space<vmem>>, vector<1x128xf32>
    %161 = vector.broadcast %160 : vector<1x128xf32> to vector<2x128xf32>
    %162 = arith.addf %159, %161 : vector<2x128xf32>
    %163 = arith.negf %162 : vector<2x128xf32>
    %164 = math.exp %163 : vector<2x128xf32>
    %cst_57 = arith.constant 1.000000e+00 : f32
    %165 = vector.broadcast %cst_57 : f32 to vector<2x128xf32>
    %166 = arith.addf %165, %164 : vector<2x128xf32>
    %167 = arith.divf %165, %166 : vector<2x128xf32>
    %cst_58 = arith.constant 2.000000e+00 : f32
    %168 = vector.broadcast %cst_58 : f32 to vector<2x128xf32>
    %169 = arith.mulf %168, %167 : vector<2x128xf32>
    %cst_59 = arith.constant 1.000000e+00 : f32
    %170 = vector.broadcast %cst_59 : f32 to vector<2x128xf32>
    %171 = arith.subf %169, %170 : vector<2x128xf32>
    %172 = vector.shape_cast %5 : vector<1x128xi1> to vector<1x128xi1>
    %173 = vector.broadcast %172 : vector<1x128xi1> to vector<2x128xi1>
    %174 = arith.select %173, %171, %167 : vector<2x128xi1>, vector<2x128xf32>
    %175 = vector.extract_strided_slice %174 {offsets = [0, 0], sizes = [2, 32], strides = [1, 1]} : vector<2x128xf32> to vector<2x32xf32>
    %176 = vector.extract_strided_slice %174 {offsets = [0, 32], sizes = [2, 32], strides = [1, 1]} : vector<2x128xf32> to vector<2x32xf32>
    %177 = vector.extract_strided_slice %174 {offsets = [0, 64], sizes = [2, 32], strides = [1, 1]} : vector<2x128xf32> to vector<2x32xf32>
    %178 = vector.extract_strided_slice %174 {offsets = [0, 96], sizes = [2, 32], strides = [1, 1]} : vector<2x128xf32> to vector<2x32xf32>
    %179 = arith.mulf %176, %127 : vector<2x32xf32>
    %180 = arith.mulf %175, %177 : vector<2x32xf32>
    %181 = arith.addf %179, %180 : vector<2x32xf32>
    %182 = math.tanh %181 : vector<2x32xf32>
    %183 = arith.mulf %178, %182 : vector<2x32xf32>
    %184 = vector.extract_strided_slice %17 {offsets = [6, 0], sizes = [2, 128], strides = [1, 1]} : vector<16x128xf32> to vector<2x128xf32>
    %c0_60 = arith.constant 0 : index
    %c0_61 = arith.constant 0 : index
    %185 = vector.load %arg3[%c0_60, %c0_61] : memref<32x128xf32, #tpu.memory_space<vmem>>, vector<32x128xf32>
    %cst_62 = arith.constant dense<0.000000e+00> : vector<2x128xf32>
    %186 = tpu.matmul %154, %185, %cst_62 {dimension_numbers = #tpu.dot_dimension_numbers<[1], [0], [0], [1], [0, 0, 1, 1], [], []>} : vector<2x32xf32>, vector<32x128xf32>, vector<2x128xf32> -> vector<2x128xf32>
    %187 = arith.addf %184, %186 : vector<2x128xf32>
    %188 = arith.negf %187 : vector<2x128xf32>
    %189 = math.exp %188 : vector<2x128xf32>
    %cst_63 = arith.constant 1.000000e+00 : f32
    %190 = vector.broadcast %cst_63 : f32 to vector<2x128xf32>
    %191 = arith.addf %190, %189 : vector<2x128xf32>
    %192 = arith.divf %190, %191 : vector<2x128xf32>
    %cst_64 = arith.constant 2.000000e+00 : f32
    %193 = vector.broadcast %cst_64 : f32 to vector<2x128xf32>
    %194 = arith.mulf %193, %192 : vector<2x128xf32>
    %cst_65 = arith.constant 1.000000e+00 : f32
    %195 = vector.broadcast %cst_65 : f32 to vector<2x128xf32>
    %196 = arith.subf %194, %195 : vector<2x128xf32>
    %197 = vector.shape_cast %5 : vector<1x128xi1> to vector<1x128xi1>
    %198 = vector.broadcast %197 : vector<1x128xi1> to vector<2x128xi1>
    %199 = arith.select %198, %196, %192 : vector<2x128xi1>, vector<2x128xf32>
    %200 = vector.extract_strided_slice %199 {offsets = [0, 0], sizes = [2, 32], strides = [1, 1]} : vector<2x128xf32> to vector<2x32xf32>
    %201 = vector.extract_strided_slice %199 {offsets = [0, 32], sizes = [2, 32], strides = [1, 1]} : vector<2x128xf32> to vector<2x32xf32>
    %202 = vector.extract_strided_slice %199 {offsets = [0, 64], sizes = [2, 32], strides = [1, 1]} : vector<2x128xf32> to vector<2x32xf32>
    %203 = vector.extract_strided_slice %199 {offsets = [0, 96], sizes = [2, 32], strides = [1, 1]} : vector<2x128xf32> to vector<2x32xf32>
    %204 = arith.mulf %201, %152 : vector<2x32xf32>
    %205 = arith.mulf %200, %202 : vector<2x32xf32>
    %206 = arith.addf %204, %205 : vector<2x32xf32>
    %207 = math.tanh %206 : vector<2x32xf32>
    %208 = arith.mulf %203, %207 : vector<2x32xf32>
    %c0_66 = arith.constant 0 : index
    %c0_67 = arith.constant 0 : index
    %209 = vector.load %arg5[%c0_66, %c0_67] : memref<32x128xf32, #tpu.memory_space<vmem>>, vector<32x128xf32>
    %cst_68 = arith.constant dense<0.000000e+00> : vector<2x128xf32>
    %210 = tpu.matmul %208, %209, %cst_68 {dimension_numbers = #tpu.dot_dimension_numbers<[1], [0], [0], [1], [0, 0, 1, 1], [], []>} : vector<2x32xf32>, vector<32x128xf32>, vector<2x128xf32> -> vector<2x128xf32>
    %c0_69 = arith.constant 0 : index
    %c0_70 = arith.constant 0 : index
    %211 = vector.load %arg6[%c0_69, %c0_70] : memref<32x128xf32, #tpu.memory_space<vmem>>, vector<32x128xf32>
    %cst_71 = arith.constant dense<0.000000e+00> : vector<2x128xf32>
    %212 = tpu.matmul %183, %211, %cst_71 {dimension_numbers = #tpu.dot_dimension_numbers<[1], [0], [0], [1], [0, 0, 1, 1], [], []>} : vector<2x32xf32>, vector<32x128xf32>, vector<2x128xf32> -> vector<2x128xf32>
    %213 = arith.addf %210, %212 : vector<2x128xf32>
    %c0_72 = arith.constant 0 : index
    %c0_73 = arith.constant 0 : index
    %214 = vector.load %arg7[%c0_72, %c0_73] : memref<1x128xf32, #tpu.memory_space<vmem>>, vector<1x128xf32>
    %215 = vector.broadcast %214 : vector<1x128xf32> to vector<2x128xf32>
    %216 = arith.addf %213, %215 : vector<2x128xf32>
    %217 = arith.negf %216 : vector<2x128xf32>
    %218 = math.exp %217 : vector<2x128xf32>
    %cst_74 = arith.constant 1.000000e+00 : f32
    %219 = vector.broadcast %cst_74 : f32 to vector<2x128xf32>
    %220 = arith.addf %219, %218 : vector<2x128xf32>
    %221 = arith.divf %219, %220 : vector<2x128xf32>
    %cst_75 = arith.constant 2.000000e+00 : f32
    %222 = vector.broadcast %cst_75 : f32 to vector<2x128xf32>
    %223 = arith.mulf %222, %221 : vector<2x128xf32>
    %cst_76 = arith.constant 1.000000e+00 : f32
    %224 = vector.broadcast %cst_76 : f32 to vector<2x128xf32>
    %225 = arith.subf %223, %224 : vector<2x128xf32>
    %226 = vector.shape_cast %5 : vector<1x128xi1> to vector<1x128xi1>
    %227 = vector.broadcast %226 : vector<1x128xi1> to vector<2x128xi1>
    %228 = arith.select %227, %225, %221 : vector<2x128xi1>, vector<2x128xf32>
    %229 = vector.extract_strided_slice %228 {offsets = [0, 0], sizes = [2, 32], strides = [1, 1]} : vector<2x128xf32> to vector<2x32xf32>
    %230 = vector.extract_strided_slice %228 {offsets = [0, 32], sizes = [2, 32], strides = [1, 1]} : vector<2x128xf32> to vector<2x32xf32>
    %231 = vector.extract_strided_slice %228 {offsets = [0, 64], sizes = [2, 32], strides = [1, 1]} : vector<2x128xf32> to vector<2x32xf32>
    %232 = vector.extract_strided_slice %228 {offsets = [0, 96], sizes = [2, 32], strides = [1, 1]} : vector<2x128xf32> to vector<2x32xf32>
    %233 = arith.mulf %230, %181 : vector<2x32xf32>
    %234 = arith.mulf %229, %231 : vector<2x32xf32>
    %235 = arith.addf %233, %234 : vector<2x32xf32>
    %236 = math.tanh %235 : vector<2x32xf32>
    %237 = arith.mulf %232, %236 : vector<2x32xf32>
    %238 = vector.extract_strided_slice %17 {offsets = [8, 0], sizes = [2, 128], strides = [1, 1]} : vector<16x128xf32> to vector<2x128xf32>
    %c0_77 = arith.constant 0 : index
    %c0_78 = arith.constant 0 : index
    %239 = vector.load %arg3[%c0_77, %c0_78] : memref<32x128xf32, #tpu.memory_space<vmem>>, vector<32x128xf32>
    %cst_79 = arith.constant dense<0.000000e+00> : vector<2x128xf32>
    %240 = tpu.matmul %208, %239, %cst_79 {dimension_numbers = #tpu.dot_dimension_numbers<[1], [0], [0], [1], [0, 0, 1, 1], [], []>} : vector<2x32xf32>, vector<32x128xf32>, vector<2x128xf32> -> vector<2x128xf32>
    %241 = arith.addf %238, %240 : vector<2x128xf32>
    %242 = arith.negf %241 : vector<2x128xf32>
    %243 = math.exp %242 : vector<2x128xf32>
    %cst_80 = arith.constant 1.000000e+00 : f32
    %244 = vector.broadcast %cst_80 : f32 to vector<2x128xf32>
    %245 = arith.addf %244, %243 : vector<2x128xf32>
    %246 = arith.divf %244, %245 : vector<2x128xf32>
    %cst_81 = arith.constant 2.000000e+00 : f32
    %247 = vector.broadcast %cst_81 : f32 to vector<2x128xf32>
    %248 = arith.mulf %247, %246 : vector<2x128xf32>
    %cst_82 = arith.constant 1.000000e+00 : f32
    %249 = vector.broadcast %cst_82 : f32 to vector<2x128xf32>
    %250 = arith.subf %248, %249 : vector<2x128xf32>
    %251 = vector.shape_cast %5 : vector<1x128xi1> to vector<1x128xi1>
    %252 = vector.broadcast %251 : vector<1x128xi1> to vector<2x128xi1>
    %253 = arith.select %252, %250, %246 : vector<2x128xi1>, vector<2x128xf32>
    %254 = vector.extract_strided_slice %253 {offsets = [0, 0], sizes = [2, 32], strides = [1, 1]} : vector<2x128xf32> to vector<2x32xf32>
    %255 = vector.extract_strided_slice %253 {offsets = [0, 32], sizes = [2, 32], strides = [1, 1]} : vector<2x128xf32> to vector<2x32xf32>
    %256 = vector.extract_strided_slice %253 {offsets = [0, 64], sizes = [2, 32], strides = [1, 1]} : vector<2x128xf32> to vector<2x32xf32>
    %257 = vector.extract_strided_slice %253 {offsets = [0, 96], sizes = [2, 32], strides = [1, 1]} : vector<2x128xf32> to vector<2x32xf32>
    %258 = arith.mulf %255, %206 : vector<2x32xf32>
    %259 = arith.mulf %254, %256 : vector<2x32xf32>
    %260 = arith.addf %258, %259 : vector<2x32xf32>
    %261 = math.tanh %260 : vector<2x32xf32>
    %262 = arith.mulf %257, %261 : vector<2x32xf32>
    %c0_83 = arith.constant 0 : index
    %c0_84 = arith.constant 0 : index
    %263 = vector.load %arg5[%c0_83, %c0_84] : memref<32x128xf32, #tpu.memory_space<vmem>>, vector<32x128xf32>
    %cst_85 = arith.constant dense<0.000000e+00> : vector<2x128xf32>
    %264 = tpu.matmul %262, %263, %cst_85 {dimension_numbers = #tpu.dot_dimension_numbers<[1], [0], [0], [1], [0, 0, 1, 1], [], []>} : vector<2x32xf32>, vector<32x128xf32>, vector<2x128xf32> -> vector<2x128xf32>
    %c0_86 = arith.constant 0 : index
    %c0_87 = arith.constant 0 : index
    %265 = vector.load %arg6[%c0_86, %c0_87] : memref<32x128xf32, #tpu.memory_space<vmem>>, vector<32x128xf32>
    %cst_88 = arith.constant dense<0.000000e+00> : vector<2x128xf32>
    %266 = tpu.matmul %237, %265, %cst_88 {dimension_numbers = #tpu.dot_dimension_numbers<[1], [0], [0], [1], [0, 0, 1, 1], [], []>} : vector<2x32xf32>, vector<32x128xf32>, vector<2x128xf32> -> vector<2x128xf32>
    %267 = arith.addf %264, %266 : vector<2x128xf32>
    %c0_89 = arith.constant 0 : index
    %c0_90 = arith.constant 0 : index
    %268 = vector.load %arg7[%c0_89, %c0_90] : memref<1x128xf32, #tpu.memory_space<vmem>>, vector<1x128xf32>
    %269 = vector.broadcast %268 : vector<1x128xf32> to vector<2x128xf32>
    %270 = arith.addf %267, %269 : vector<2x128xf32>
    %271 = arith.negf %270 : vector<2x128xf32>
    %272 = math.exp %271 : vector<2x128xf32>
    %cst_91 = arith.constant 1.000000e+00 : f32
    %273 = vector.broadcast %cst_91 : f32 to vector<2x128xf32>
    %274 = arith.addf %273, %272 : vector<2x128xf32>
    %275 = arith.divf %273, %274 : vector<2x128xf32>
    %cst_92 = arith.constant 2.000000e+00 : f32
    %276 = vector.broadcast %cst_92 : f32 to vector<2x128xf32>
    %277 = arith.mulf %276, %275 : vector<2x128xf32>
    %cst_93 = arith.constant 1.000000e+00 : f32
    %278 = vector.broadcast %cst_93 : f32 to vector<2x128xf32>
    %279 = arith.subf %277, %278 : vector<2x128xf32>
    %280 = vector.shape_cast %5 : vector<1x128xi1> to vector<1x128xi1>
    %281 = vector.broadcast %280 : vector<1x128xi1> to vector<2x128xi1>
    %282 = arith.select %281, %279, %275 : vector<2x128xi1>, vector<2x128xf32>
    %283 = vector.extract_strided_slice %282 {offsets = [0, 0], sizes = [2, 32], strides = [1, 1]} : vector<2x128xf32> to vector<2x32xf32>
    %284 = vector.extract_strided_slice %282 {offsets = [0, 32], sizes = [2, 32], strides = [1, 1]} : vector<2x128xf32> to vector<2x32xf32>
    %285 = vector.extract_strided_slice %282 {offsets = [0, 64], sizes = [2, 32], strides = [1, 1]} : vector<2x128xf32> to vector<2x32xf32>
    %286 = vector.extract_strided_slice %282 {offsets = [0, 96], sizes = [2, 32], strides = [1, 1]} : vector<2x128xf32> to vector<2x32xf32>
    %287 = arith.mulf %284, %235 : vector<2x32xf32>
    %288 = arith.mulf %283, %285 : vector<2x32xf32>
    %289 = arith.addf %287, %288 : vector<2x32xf32>
    %290 = math.tanh %289 : vector<2x32xf32>
    %291 = arith.mulf %286, %290 : vector<2x32xf32>
    %292 = vector.extract_strided_slice %17 {offsets = [10, 0], sizes = [2, 128], strides = [1, 1]} : vector<16x128xf32> to vector<2x128xf32>
    %c0_94 = arith.constant 0 : index
    %c0_95 = arith.constant 0 : index
    %293 = vector.load %arg3[%c0_94, %c0_95] : memref<32x128xf32, #tpu.memory_space<vmem>>, vector<32x128xf32>
    %cst_96 = arith.constant dense<0.000000e+00> : vector<2x128xf32>
    %294 = tpu.matmul %262, %293, %cst_96 {dimension_numbers = #tpu.dot_dimension_numbers<[1], [0], [0], [1], [0, 0, 1, 1], [], []>} : vector<2x32xf32>, vector<32x128xf32>, vector<2x128xf32> -> vector<2x128xf32>
    %295 = arith.addf %292, %294 : vector<2x128xf32>
    %296 = arith.negf %295 : vector<2x128xf32>
    %297 = math.exp %296 : vector<2x128xf32>
    %cst_97 = arith.constant 1.000000e+00 : f32
    %298 = vector.broadcast %cst_97 : f32 to vector<2x128xf32>
    %299 = arith.addf %298, %297 : vector<2x128xf32>
    %300 = arith.divf %298, %299 : vector<2x128xf32>
    %cst_98 = arith.constant 2.000000e+00 : f32
    %301 = vector.broadcast %cst_98 : f32 to vector<2x128xf32>
    %302 = arith.mulf %301, %300 : vector<2x128xf32>
    %cst_99 = arith.constant 1.000000e+00 : f32
    %303 = vector.broadcast %cst_99 : f32 to vector<2x128xf32>
    %304 = arith.subf %302, %303 : vector<2x128xf32>
    %305 = vector.shape_cast %5 : vector<1x128xi1> to vector<1x128xi1>
    %306 = vector.broadcast %305 : vector<1x128xi1> to vector<2x128xi1>
    %307 = arith.select %306, %304, %300 : vector<2x128xi1>, vector<2x128xf32>
    %308 = vector.extract_strided_slice %307 {offsets = [0, 0], sizes = [2, 32], strides = [1, 1]} : vector<2x128xf32> to vector<2x32xf32>
    %309 = vector.extract_strided_slice %307 {offsets = [0, 32], sizes = [2, 32], strides = [1, 1]} : vector<2x128xf32> to vector<2x32xf32>
    %310 = vector.extract_strided_slice %307 {offsets = [0, 64], sizes = [2, 32], strides = [1, 1]} : vector<2x128xf32> to vector<2x32xf32>
    %311 = vector.extract_strided_slice %307 {offsets = [0, 96], sizes = [2, 32], strides = [1, 1]} : vector<2x128xf32> to vector<2x32xf32>
    %312 = arith.mulf %309, %260 : vector<2x32xf32>
    %313 = arith.mulf %308, %310 : vector<2x32xf32>
    %314 = arith.addf %312, %313 : vector<2x32xf32>
    %315 = math.tanh %314 : vector<2x32xf32>
    %316 = arith.mulf %311, %315 : vector<2x32xf32>
    %c0_100 = arith.constant 0 : index
    %c0_101 = arith.constant 0 : index
    %317 = vector.load %arg5[%c0_100, %c0_101] : memref<32x128xf32, #tpu.memory_space<vmem>>, vector<32x128xf32>
    %cst_102 = arith.constant dense<0.000000e+00> : vector<2x128xf32>
    %318 = tpu.matmul %316, %317, %cst_102 {dimension_numbers = #tpu.dot_dimension_numbers<[1], [0], [0], [1], [0, 0, 1, 1], [], []>} : vector<2x32xf32>, vector<32x128xf32>, vector<2x128xf32> -> vector<2x128xf32>
    %c0_103 = arith.constant 0 : index
    %c0_104 = arith.constant 0 : index
    %319 = vector.load %arg6[%c0_103, %c0_104] : memref<32x128xf32, #tpu.memory_space<vmem>>, vector<32x128xf32>
    %cst_105 = arith.constant dense<0.000000e+00> : vector<2x128xf32>
    %320 = tpu.matmul %291, %319, %cst_105 {dimension_numbers = #tpu.dot_dimension_numbers<[1], [0], [0], [1], [0, 0, 1, 1], [], []>} : vector<2x32xf32>, vector<32x128xf32>, vector<2x128xf32> -> vector<2x128xf32>
    %321 = arith.addf %318, %320 : vector<2x128xf32>
    %c0_106 = arith.constant 0 : index
    %c0_107 = arith.constant 0 : index
    %322 = vector.load %arg7[%c0_106, %c0_107] : memref<1x128xf32, #tpu.memory_space<vmem>>, vector<1x128xf32>
    %323 = vector.broadcast %322 : vector<1x128xf32> to vector<2x128xf32>
    %324 = arith.addf %321, %323 : vector<2x128xf32>
    %325 = arith.negf %324 : vector<2x128xf32>
    %326 = math.exp %325 : vector<2x128xf32>
    %cst_108 = arith.constant 1.000000e+00 : f32
    %327 = vector.broadcast %cst_108 : f32 to vector<2x128xf32>
    %328 = arith.addf %327, %326 : vector<2x128xf32>
    %329 = arith.divf %327, %328 : vector<2x128xf32>
    %cst_109 = arith.constant 2.000000e+00 : f32
    %330 = vector.broadcast %cst_109 : f32 to vector<2x128xf32>
    %331 = arith.mulf %330, %329 : vector<2x128xf32>
    %cst_110 = arith.constant 1.000000e+00 : f32
    %332 = vector.broadcast %cst_110 : f32 to vector<2x128xf32>
    %333 = arith.subf %331, %332 : vector<2x128xf32>
    %334 = vector.shape_cast %5 : vector<1x128xi1> to vector<1x128xi1>
    %335 = vector.broadcast %334 : vector<1x128xi1> to vector<2x128xi1>
    %336 = arith.select %335, %333, %329 : vector<2x128xi1>, vector<2x128xf32>
    %337 = vector.extract_strided_slice %336 {offsets = [0, 0], sizes = [2, 32], strides = [1, 1]} : vector<2x128xf32> to vector<2x32xf32>
    %338 = vector.extract_strided_slice %336 {offsets = [0, 32], sizes = [2, 32], strides = [1, 1]} : vector<2x128xf32> to vector<2x32xf32>
    %339 = vector.extract_strided_slice %336 {offsets = [0, 64], sizes = [2, 32], strides = [1, 1]} : vector<2x128xf32> to vector<2x32xf32>
    %340 = vector.extract_strided_slice %336 {offsets = [0, 96], sizes = [2, 32], strides = [1, 1]} : vector<2x128xf32> to vector<2x32xf32>
    %341 = arith.mulf %338, %289 : vector<2x32xf32>
    %342 = arith.mulf %337, %339 : vector<2x32xf32>
    %343 = arith.addf %341, %342 : vector<2x32xf32>
    %344 = math.tanh %343 : vector<2x32xf32>
    %345 = arith.mulf %340, %344 : vector<2x32xf32>
    %346 = vector.extract_strided_slice %17 {offsets = [12, 0], sizes = [2, 128], strides = [1, 1]} : vector<16x128xf32> to vector<2x128xf32>
    %c0_111 = arith.constant 0 : index
    %c0_112 = arith.constant 0 : index
    %347 = vector.load %arg3[%c0_111, %c0_112] : memref<32x128xf32, #tpu.memory_space<vmem>>, vector<32x128xf32>
    %cst_113 = arith.constant dense<0.000000e+00> : vector<2x128xf32>
    %348 = tpu.matmul %316, %347, %cst_113 {dimension_numbers = #tpu.dot_dimension_numbers<[1], [0], [0], [1], [0, 0, 1, 1], [], []>} : vector<2x32xf32>, vector<32x128xf32>, vector<2x128xf32> -> vector<2x128xf32>
    %349 = arith.addf %346, %348 : vector<2x128xf32>
    %350 = arith.negf %349 : vector<2x128xf32>
    %351 = math.exp %350 : vector<2x128xf32>
    %cst_114 = arith.constant 1.000000e+00 : f32
    %352 = vector.broadcast %cst_114 : f32 to vector<2x128xf32>
    %353 = arith.addf %352, %351 : vector<2x128xf32>
    %354 = arith.divf %352, %353 : vector<2x128xf32>
    %cst_115 = arith.constant 2.000000e+00 : f32
    %355 = vector.broadcast %cst_115 : f32 to vector<2x128xf32>
    %356 = arith.mulf %355, %354 : vector<2x128xf32>
    %cst_116 = arith.constant 1.000000e+00 : f32
    %357 = vector.broadcast %cst_116 : f32 to vector<2x128xf32>
    %358 = arith.subf %356, %357 : vector<2x128xf32>
    %359 = vector.shape_cast %5 : vector<1x128xi1> to vector<1x128xi1>
    %360 = vector.broadcast %359 : vector<1x128xi1> to vector<2x128xi1>
    %361 = arith.select %360, %358, %354 : vector<2x128xi1>, vector<2x128xf32>
    %362 = vector.extract_strided_slice %361 {offsets = [0, 0], sizes = [2, 32], strides = [1, 1]} : vector<2x128xf32> to vector<2x32xf32>
    %363 = vector.extract_strided_slice %361 {offsets = [0, 32], sizes = [2, 32], strides = [1, 1]} : vector<2x128xf32> to vector<2x32xf32>
    %364 = vector.extract_strided_slice %361 {offsets = [0, 64], sizes = [2, 32], strides = [1, 1]} : vector<2x128xf32> to vector<2x32xf32>
    %365 = vector.extract_strided_slice %361 {offsets = [0, 96], sizes = [2, 32], strides = [1, 1]} : vector<2x128xf32> to vector<2x32xf32>
    %366 = arith.mulf %363, %314 : vector<2x32xf32>
    %367 = arith.mulf %362, %364 : vector<2x32xf32>
    %368 = arith.addf %366, %367 : vector<2x32xf32>
    %369 = math.tanh %368 : vector<2x32xf32>
    %370 = arith.mulf %365, %369 : vector<2x32xf32>
    %c0_117 = arith.constant 0 : index
    %c0_118 = arith.constant 0 : index
    %371 = vector.load %arg5[%c0_117, %c0_118] : memref<32x128xf32, #tpu.memory_space<vmem>>, vector<32x128xf32>
    %cst_119 = arith.constant dense<0.000000e+00> : vector<2x128xf32>
    %372 = tpu.matmul %370, %371, %cst_119 {dimension_numbers = #tpu.dot_dimension_numbers<[1], [0], [0], [1], [0, 0, 1, 1], [], []>} : vector<2x32xf32>, vector<32x128xf32>, vector<2x128xf32> -> vector<2x128xf32>
    %c0_120 = arith.constant 0 : index
    %c0_121 = arith.constant 0 : index
    %373 = vector.load %arg6[%c0_120, %c0_121] : memref<32x128xf32, #tpu.memory_space<vmem>>, vector<32x128xf32>
    %cst_122 = arith.constant dense<0.000000e+00> : vector<2x128xf32>
    %374 = tpu.matmul %345, %373, %cst_122 {dimension_numbers = #tpu.dot_dimension_numbers<[1], [0], [0], [1], [0, 0, 1, 1], [], []>} : vector<2x32xf32>, vector<32x128xf32>, vector<2x128xf32> -> vector<2x128xf32>
    %375 = arith.addf %372, %374 : vector<2x128xf32>
    %c0_123 = arith.constant 0 : index
    %c0_124 = arith.constant 0 : index
    %376 = vector.load %arg7[%c0_123, %c0_124] : memref<1x128xf32, #tpu.memory_space<vmem>>, vector<1x128xf32>
    %377 = vector.broadcast %376 : vector<1x128xf32> to vector<2x128xf32>
    %378 = arith.addf %375, %377 : vector<2x128xf32>
    %379 = arith.negf %378 : vector<2x128xf32>
    %380 = math.exp %379 : vector<2x128xf32>
    %cst_125 = arith.constant 1.000000e+00 : f32
    %381 = vector.broadcast %cst_125 : f32 to vector<2x128xf32>
    %382 = arith.addf %381, %380 : vector<2x128xf32>
    %383 = arith.divf %381, %382 : vector<2x128xf32>
    %cst_126 = arith.constant 2.000000e+00 : f32
    %384 = vector.broadcast %cst_126 : f32 to vector<2x128xf32>
    %385 = arith.mulf %384, %383 : vector<2x128xf32>
    %cst_127 = arith.constant 1.000000e+00 : f32
    %386 = vector.broadcast %cst_127 : f32 to vector<2x128xf32>
    %387 = arith.subf %385, %386 : vector<2x128xf32>
    %388 = vector.shape_cast %5 : vector<1x128xi1> to vector<1x128xi1>
    %389 = vector.broadcast %388 : vector<1x128xi1> to vector<2x128xi1>
    %390 = arith.select %389, %387, %383 : vector<2x128xi1>, vector<2x128xf32>
    %391 = vector.extract_strided_slice %390 {offsets = [0, 0], sizes = [2, 32], strides = [1, 1]} : vector<2x128xf32> to vector<2x32xf32>
    %392 = vector.extract_strided_slice %390 {offsets = [0, 32], sizes = [2, 32], strides = [1, 1]} : vector<2x128xf32> to vector<2x32xf32>
    %393 = vector.extract_strided_slice %390 {offsets = [0, 64], sizes = [2, 32], strides = [1, 1]} : vector<2x128xf32> to vector<2x32xf32>
    %394 = vector.extract_strided_slice %390 {offsets = [0, 96], sizes = [2, 32], strides = [1, 1]} : vector<2x128xf32> to vector<2x32xf32>
    %395 = arith.mulf %392, %343 : vector<2x32xf32>
    %396 = arith.mulf %391, %393 : vector<2x32xf32>
    %397 = arith.addf %395, %396 : vector<2x32xf32>
    %398 = math.tanh %397 : vector<2x32xf32>
    %399 = arith.mulf %394, %398 : vector<2x32xf32>
    %400 = vector.extract_strided_slice %17 {offsets = [14, 0], sizes = [2, 128], strides = [1, 1]} : vector<16x128xf32> to vector<2x128xf32>
    %c0_128 = arith.constant 0 : index
    %c0_129 = arith.constant 0 : index
    %401 = vector.load %arg3[%c0_128, %c0_129] : memref<32x128xf32, #tpu.memory_space<vmem>>, vector<32x128xf32>
    %cst_130 = arith.constant dense<0.000000e+00> : vector<2x128xf32>
    %402 = tpu.matmul %370, %401, %cst_130 {dimension_numbers = #tpu.dot_dimension_numbers<[1], [0], [0], [1], [0, 0, 1, 1], [], []>} : vector<2x32xf32>, vector<32x128xf32>, vector<2x128xf32> -> vector<2x128xf32>
    %403 = arith.addf %400, %402 : vector<2x128xf32>
    %404 = arith.negf %403 : vector<2x128xf32>
    %405 = math.exp %404 : vector<2x128xf32>
    %cst_131 = arith.constant 1.000000e+00 : f32
    %406 = vector.broadcast %cst_131 : f32 to vector<2x128xf32>
    %407 = arith.addf %406, %405 : vector<2x128xf32>
    %408 = arith.divf %406, %407 : vector<2x128xf32>
    %cst_132 = arith.constant 2.000000e+00 : f32
    %409 = vector.broadcast %cst_132 : f32 to vector<2x128xf32>
    %410 = arith.mulf %409, %408 : vector<2x128xf32>
    %cst_133 = arith.constant 1.000000e+00 : f32
    %411 = vector.broadcast %cst_133 : f32 to vector<2x128xf32>
    %412 = arith.subf %410, %411 : vector<2x128xf32>
    %413 = vector.shape_cast %5 : vector<1x128xi1> to vector<1x128xi1>
    %414 = vector.broadcast %413 : vector<1x128xi1> to vector<2x128xi1>
    %415 = arith.select %414, %412, %408 : vector<2x128xi1>, vector<2x128xf32>
    %416 = vector.extract_strided_slice %415 {offsets = [0, 0], sizes = [2, 32], strides = [1, 1]} : vector<2x128xf32> to vector<2x32xf32>
    %417 = vector.extract_strided_slice %415 {offsets = [0, 32], sizes = [2, 32], strides = [1, 1]} : vector<2x128xf32> to vector<2x32xf32>
    %418 = vector.extract_strided_slice %415 {offsets = [0, 64], sizes = [2, 32], strides = [1, 1]} : vector<2x128xf32> to vector<2x32xf32>
    %419 = vector.extract_strided_slice %415 {offsets = [0, 96], sizes = [2, 32], strides = [1, 1]} : vector<2x128xf32> to vector<2x32xf32>
    %420 = arith.mulf %417, %368 : vector<2x32xf32>
    %421 = arith.mulf %416, %418 : vector<2x32xf32>
    %422 = arith.addf %420, %421 : vector<2x32xf32>
    %423 = math.tanh %422 : vector<2x32xf32>
    %424 = arith.mulf %419, %423 : vector<2x32xf32>
    %c0_134 = arith.constant 0 : index
    %c0_135 = arith.constant 0 : index
    %425 = vector.load %arg5[%c0_134, %c0_135] : memref<32x128xf32, #tpu.memory_space<vmem>>, vector<32x128xf32>
    %cst_136 = arith.constant dense<0.000000e+00> : vector<2x128xf32>
    %426 = tpu.matmul %424, %425, %cst_136 {dimension_numbers = #tpu.dot_dimension_numbers<[1], [0], [0], [1], [0, 0, 1, 1], [], []>} : vector<2x32xf32>, vector<32x128xf32>, vector<2x128xf32> -> vector<2x128xf32>
    %c0_137 = arith.constant 0 : index
    %c0_138 = arith.constant 0 : index
    %427 = vector.load %arg6[%c0_137, %c0_138] : memref<32x128xf32, #tpu.memory_space<vmem>>, vector<32x128xf32>
    %cst_139 = arith.constant dense<0.000000e+00> : vector<2x128xf32>
    %428 = tpu.matmul %399, %427, %cst_139 {dimension_numbers = #tpu.dot_dimension_numbers<[1], [0], [0], [1], [0, 0, 1, 1], [], []>} : vector<2x32xf32>, vector<32x128xf32>, vector<2x128xf32> -> vector<2x128xf32>
    %429 = arith.addf %426, %428 : vector<2x128xf32>
    %c0_140 = arith.constant 0 : index
    %c0_141 = arith.constant 0 : index
    %430 = vector.load %arg7[%c0_140, %c0_141] : memref<1x128xf32, #tpu.memory_space<vmem>>, vector<1x128xf32>
    %431 = vector.broadcast %430 : vector<1x128xf32> to vector<2x128xf32>
    %432 = arith.addf %429, %431 : vector<2x128xf32>
    %433 = arith.negf %432 : vector<2x128xf32>
    %434 = math.exp %433 : vector<2x128xf32>
    %cst_142 = arith.constant 1.000000e+00 : f32
    %435 = vector.broadcast %cst_142 : f32 to vector<2x128xf32>
    %436 = arith.addf %435, %434 : vector<2x128xf32>
    %437 = arith.divf %435, %436 : vector<2x128xf32>
    %cst_143 = arith.constant 2.000000e+00 : f32
    %438 = vector.broadcast %cst_143 : f32 to vector<2x128xf32>
    %439 = arith.mulf %438, %437 : vector<2x128xf32>
    %cst_144 = arith.constant 1.000000e+00 : f32
    %440 = vector.broadcast %cst_144 : f32 to vector<2x128xf32>
    %441 = arith.subf %439, %440 : vector<2x128xf32>
    %442 = vector.shape_cast %5 : vector<1x128xi1> to vector<1x128xi1>
    %443 = vector.broadcast %442 : vector<1x128xi1> to vector<2x128xi1>
    %444 = arith.select %443, %441, %437 : vector<2x128xi1>, vector<2x128xf32>
    %445 = vector.extract_strided_slice %444 {offsets = [0, 0], sizes = [2, 32], strides = [1, 1]} : vector<2x128xf32> to vector<2x32xf32>
    %446 = vector.extract_strided_slice %444 {offsets = [0, 32], sizes = [2, 32], strides = [1, 1]} : vector<2x128xf32> to vector<2x32xf32>
    %447 = vector.extract_strided_slice %444 {offsets = [0, 64], sizes = [2, 32], strides = [1, 1]} : vector<2x128xf32> to vector<2x32xf32>
    %448 = vector.extract_strided_slice %444 {offsets = [0, 96], sizes = [2, 32], strides = [1, 1]} : vector<2x128xf32> to vector<2x32xf32>
    %449 = arith.mulf %446, %397 : vector<2x32xf32>
    %450 = arith.mulf %445, %447 : vector<2x32xf32>
    %451 = arith.addf %449, %450 : vector<2x32xf32>
    %452 = math.tanh %451 : vector<2x32xf32>
    %453 = arith.mulf %448, %452 : vector<2x32xf32>
    %454 = math.tanh %453 : vector<2x32xf32>
    %c0_145 = arith.constant 0 : index
    %c0_146 = arith.constant 0 : index
    %455 = vector.load %arg8[%c0_145, %c0_146] : memref<32x16xf32, #tpu.memory_space<vmem>>, vector<32x16xf32>
    %cst_147 = arith.constant dense<0.000000e+00> : vector<2x16xf32>
    %456 = tpu.matmul %454, %455, %cst_147 {dimension_numbers = #tpu.dot_dimension_numbers<[1], [0], [0], [1], [0, 0, 1, 1], [], []>} : vector<2x32xf32>, vector<32x16xf32>, vector<2x16xf32> -> vector<2x16xf32>
    %c0_148 = arith.constant 0 : index
    %c0_149 = arith.constant 0 : index
    %457 = vector.load %arg9[%c0_148, %c0_149] : memref<1x16xf32, #tpu.memory_space<vmem>>, vector<1x16xf32>
    %458 = vector.broadcast %457 : vector<1x16xf32> to vector<2x16xf32>
    %459 = arith.addf %456, %458 : vector<2x16xf32>
    %cst_150 = arith.constant 0.000000e+00 : f32
    %460 = vector.broadcast %cst_150 : f32 to vector<2x16xf32>
    %461 = arith.maximumf %459, %460 : vector<2x16xf32>
    %c0_151 = arith.constant 0 : index
    %c0_152 = arith.constant 0 : index
    %462 = vector.load %arg23[%c0_151, %c0_152] : memref<2x16xf32, #tpu.memory_space<vmem>>, vector<2x16xf32>
    tpu.vector_store %arg23[%c0_151, %c0_152], %461 {strides = array<i32>} : memref<2x16xf32, #tpu.memory_space<vmem>>, vector<2x16xf32>,
    %463 = vector.extract_strided_slice %461 {offsets = [0, 0], sizes = [2, 8], strides = [1, 1]} : vector<2x16xf32> to vector<2x8xf32>
    %464 = vector.extract_strided_slice %461 {offsets = [0, 8], sizes = [2, 8], strides = [1, 1]} : vector<2x16xf32> to vector<2x8xf32>
    %cst_153 = arith.constant 5.000000e-01 : f32
    %465 = vector.broadcast %cst_153 : f32 to vector<2x8xf32>
    %466 = arith.mulf %464, %465 : vector<2x8xf32>
    %467 = math.exp %466 : vector<2x8xf32>
    %c0_154 = arith.constant 0 : index
    %c0_155 = arith.constant 0 : index
    %468 = vector.load %arg1[%c0_154, %c0_155] : memref<2x8xf32, #tpu.memory_space<vmem>>, vector<2x8xf32>
    %469 = arith.mulf %467, %468 : vector<2x8xf32>
    %470 = arith.addf %463, %469 : vector<2x8xf32>
    %c0_156 = arith.constant 0 : index
    %c0_157 = arith.constant 0 : index
    %471 = vector.load %arg10[%c0_156, %c0_157] : memref<8x128xf32, #tpu.memory_space<vmem>>, vector<8x128xf32>
    %cst_158 = arith.constant dense<0.000000e+00> : vector<2x128xf32>
    %472 = tpu.matmul %470, %471, %cst_158 {dimension_numbers = #tpu.dot_dimension_numbers<[1], [0], [0], [1], [0, 0, 1, 1], [], []>} : vector<2x8xf32>, vector<8x128xf32>, vector<2x128xf32> -> vector<2x128xf32>
    %c0_159 = arith.constant 0 : index
    %c0_160 = arith.constant 0 : index
    %473 = vector.load %arg12[%c0_159, %c0_160] : memref<1x128xf32, #tpu.memory_space<vmem>>, vector<1x128xf32>
    %474 = vector.broadcast %473 : vector<1x128xf32> to vector<2x128xf32>
    %475 = arith.addf %472, %474 : vector<2x128xf32>
    %cst_161 = arith.constant 0.000000e+00 : f32
    %476 = vector.broadcast %cst_161 : f32 to vector<2x32xf32>
    %cst_162 = arith.constant 0.000000e+00 : f32
    %477 = vector.broadcast %cst_162 : f32 to vector<2x32xf32>
    %cst_163 = arith.constant 0.000000e+00 : f32
    %478 = vector.broadcast %cst_163 : f32 to vector<2x32xf32>
    %cst_164 = arith.constant 0.000000e+00 : f32
    %479 = vector.broadcast %cst_164 : f32 to vector<2x32xf32>
    %cst_165 = arith.constant 0.000000e+00 : f32
    %480 = vector.broadcast %cst_165 : f32 to vector<2x16xf32>
    %cst_166 = arith.constant 0.000000e+00 : f32
    %481 = vector.broadcast %cst_166 : f32 to vector<2x16xf32>
    %cst_167 = arith.constant 0.000000e+00 : f32
    %482 = vector.broadcast %cst_167 : f32 to vector<2x16xf32>
    %cst_168 = arith.constant 0.000000e+00 : f32
    %483 = vector.broadcast %cst_168 : f32 to vector<2x16xf32>
    %c0_169 = arith.constant 0 : index
    %c0_170 = arith.constant 0 : index
    %484 = vector.load %arg11[%c0_169, %c0_170] : memref<32x128xf32, #tpu.memory_space<vmem>>, vector<32x128xf32>
    %cst_171 = arith.constant dense<0.000000e+00> : vector<2x128xf32>
    %485 = tpu.matmul %476, %484, %cst_171 {dimension_numbers = #tpu.dot_dimension_numbers<[1], [0], [0], [1], [0, 0, 1, 1], [], []>} : vector<2x32xf32>, vector<32x128xf32>, vector<2x128xf32> -> vector<2x128xf32>
    %486 = arith.addf %475, %485 : vector<2x128xf32>
    %487 = arith.negf %486 : vector<2x128xf32>
    %488 = math.exp %487 : vector<2x128xf32>
    %cst_172 = arith.constant 1.000000e+00 : f32
    %489 = vector.broadcast %cst_172 : f32 to vector<2x128xf32>
    %490 = arith.addf %489, %488 : vector<2x128xf32>
    %491 = arith.divf %489, %490 : vector<2x128xf32>
    %cst_173 = arith.constant 2.000000e+00 : f32
    %492 = vector.broadcast %cst_173 : f32 to vector<2x128xf32>
    %493 = arith.mulf %492, %491 : vector<2x128xf32>
    %cst_174 = arith.constant 1.000000e+00 : f32
    %494 = vector.broadcast %cst_174 : f32 to vector<2x128xf32>
    %495 = arith.subf %493, %494 : vector<2x128xf32>
    %496 = vector.shape_cast %5 : vector<1x128xi1> to vector<1x128xi1>
    %497 = vector.broadcast %496 : vector<1x128xi1> to vector<2x128xi1>
    %498 = arith.select %497, %495, %491 : vector<2x128xi1>, vector<2x128xf32>
    %499 = vector.extract_strided_slice %498 {offsets = [0, 0], sizes = [2, 32], strides = [1, 1]} : vector<2x128xf32> to vector<2x32xf32>
    %500 = vector.extract_strided_slice %498 {offsets = [0, 32], sizes = [2, 32], strides = [1, 1]} : vector<2x128xf32> to vector<2x32xf32>
    %501 = vector.extract_strided_slice %498 {offsets = [0, 64], sizes = [2, 32], strides = [1, 1]} : vector<2x128xf32> to vector<2x32xf32>
    %502 = vector.extract_strided_slice %498 {offsets = [0, 96], sizes = [2, 32], strides = [1, 1]} : vector<2x128xf32> to vector<2x32xf32>
    %503 = arith.mulf %500, %477 : vector<2x32xf32>
    %504 = arith.mulf %499, %501 : vector<2x32xf32>
    %505 = arith.addf %503, %504 : vector<2x32xf32>
    %506 = math.tanh %505 : vector<2x32xf32>
    %507 = arith.mulf %502, %506 : vector<2x32xf32>
    %c0_175 = arith.constant 0 : index
    %c0_176 = arith.constant 0 : index
    %508 = vector.load %arg13[%c0_175, %c0_176] : memref<32x128xf32, #tpu.memory_space<vmem>>, vector<32x128xf32>
    %cst_177 = arith.constant dense<0.000000e+00> : vector<2x128xf32>
    %509 = tpu.matmul %507, %508, %cst_177 {dimension_numbers = #tpu.dot_dimension_numbers<[1], [0], [0], [1], [0, 0, 1, 1], [], []>} : vector<2x32xf32>, vector<32x128xf32>, vector<2x128xf32> -> vector<2x128xf32>
    %c0_178 = arith.constant 0 : index
    %c0_179 = arith.constant 0 : index
    %510 = vector.load %arg14[%c0_178, %c0_179] : memref<32x128xf32, #tpu.memory_space<vmem>>, vector<32x128xf32>
    %cst_180 = arith.constant dense<0.000000e+00> : vector<2x128xf32>
    %511 = tpu.matmul %478, %510, %cst_180 {dimension_numbers = #tpu.dot_dimension_numbers<[1], [0], [0], [1], [0, 0, 1, 1], [], []>} : vector<2x32xf32>, vector<32x128xf32>, vector<2x128xf32> -> vector<2x128xf32>
    %512 = arith.addf %509, %511 : vector<2x128xf32>
    %c0_181 = arith.constant 0 : index
    %c0_182 = arith.constant 0 : index
    %513 = vector.load %arg15[%c0_181, %c0_182] : memref<1x128xf32, #tpu.memory_space<vmem>>, vector<1x128xf32>
    %514 = vector.broadcast %513 : vector<1x128xf32> to vector<2x128xf32>
    %515 = arith.addf %512, %514 : vector<2x128xf32>
    %516 = arith.negf %515 : vector<2x128xf32>
    %517 = math.exp %516 : vector<2x128xf32>
    %cst_183 = arith.constant 1.000000e+00 : f32
    %518 = vector.broadcast %cst_183 : f32 to vector<2x128xf32>
    %519 = arith.addf %518, %517 : vector<2x128xf32>
    %520 = arith.divf %518, %519 : vector<2x128xf32>
    %cst_184 = arith.constant 2.000000e+00 : f32
    %521 = vector.broadcast %cst_184 : f32 to vector<2x128xf32>
    %522 = arith.mulf %521, %520 : vector<2x128xf32>
    %cst_185 = arith.constant 1.000000e+00 : f32
    %523 = vector.broadcast %cst_185 : f32 to vector<2x128xf32>
    %524 = arith.subf %522, %523 : vector<2x128xf32>
    %525 = vector.shape_cast %5 : vector<1x128xi1> to vector<1x128xi1>
    %526 = vector.broadcast %525 : vector<1x128xi1> to vector<2x128xi1>
    %527 = arith.select %526, %524, %520 : vector<2x128xi1>, vector<2x128xf32>
    %528 = vector.extract_strided_slice %527 {offsets = [0, 0], sizes = [2, 32], strides = [1, 1]} : vector<2x128xf32> to vector<2x32xf32>
    %529 = vector.extract_strided_slice %527 {offsets = [0, 32], sizes = [2, 32], strides = [1, 1]} : vector<2x128xf32> to vector<2x32xf32>
    %530 = vector.extract_strided_slice %527 {offsets = [0, 64], sizes = [2, 32], strides = [1, 1]} : vector<2x128xf32> to vector<2x32xf32>
    %531 = vector.extract_strided_slice %527 {offsets = [0, 96], sizes = [2, 32], strides = [1, 1]} : vector<2x128xf32> to vector<2x32xf32>
    %532 = arith.mulf %529, %479 : vector<2x32xf32>
    %533 = arith.mulf %528, %530 : vector<2x32xf32>
    %534 = arith.addf %532, %533 : vector<2x32xf32>
    %535 = math.tanh %534 : vector<2x32xf32>
    %536 = arith.mulf %531, %535 : vector<2x32xf32>
    %537 = math.tanh %536 : vector<2x32xf32>
    %c0_186 = arith.constant 0 : index
    %c0_187 = arith.constant 0 : index
    %538 = vector.load %arg16[%c0_186, %c0_187] : memref<32x64xf32, #tpu.memory_space<vmem>>, vector<32x64xf32>
    %cst_188 = arith.constant dense<0.000000e+00> : vector<2x64xf32>
    %539 = tpu.matmul %537, %538, %cst_188 {dimension_numbers = #tpu.dot_dimension_numbers<[1], [0], [0], [1], [0, 0, 1, 1], [], []>} : vector<2x32xf32>, vector<32x64xf32>, vector<2x64xf32> -> vector<2x64xf32>
    %c0_189 = arith.constant 0 : index
    %c0_190 = arith.constant 0 : index
    %540 = vector.load %arg17[%c0_189, %c0_190] : memref<16x64xf32, #tpu.memory_space<vmem>>, vector<16x64xf32>
    %cst_191 = arith.constant dense<0.000000e+00> : vector<2x64xf32>
    %541 = tpu.matmul %480, %540, %cst_191 {dimension_numbers = #tpu.dot_dimension_numbers<[1], [0], [0], [1], [0, 0, 1, 1], [], []>} : vector<2x16xf32>, vector<16x64xf32>, vector<2x64xf32> -> vector<2x64xf32>
    %542 = arith.addf %539, %541 : vector<2x64xf32>
    %c0_192 = arith.constant 0 : index
    %c0_193 = arith.constant 0 : index
    %543 = vector.load %arg18[%c0_192, %c0_193] : memref<1x64xf32, #tpu.memory_space<vmem>>, vector<1x64xf32>
    %544 = vector.broadcast %543 : vector<1x64xf32> to vector<2x64xf32>
    %545 = arith.addf %542, %544 : vector<2x64xf32>
    %546 = arith.negf %545 : vector<2x64xf32>
    %547 = math.exp %546 : vector<2x64xf32>
    %cst_194 = arith.constant 1.000000e+00 : f32
    %548 = vector.broadcast %cst_194 : f32 to vector<2x64xf32>
    %549 = arith.addf %548, %547 : vector<2x64xf32>
    %550 = arith.divf %548, %549 : vector<2x64xf32>
    %cst_195 = arith.constant 2.000000e+00 : f32
    %551 = vector.broadcast %cst_195 : f32 to vector<2x64xf32>
    %552 = arith.mulf %551, %550 : vector<2x64xf32>
    %cst_196 = arith.constant 1.000000e+00 : f32
    %553 = vector.broadcast %cst_196 : f32 to vector<2x64xf32>
    %554 = arith.subf %552, %553 : vector<2x64xf32>
    %555 = vector.shape_cast %11 : vector<1x64xi1> to vector<1x64xi1>
    %556 = vector.broadcast %555 : vector<1x64xi1> to vector<2x64xi1>
    %557 = arith.select %556, %554, %550 : vector<2x64xi1>, vector<2x64xf32>
    %558 = vector.extract_strided_slice %557 {offsets = [0, 0], sizes = [2, 16], strides = [1, 1]} : vector<2x64xf32> to vector<2x16xf32>
    %559 = vector.extract_strided_slice %557 {offsets = [0, 16], sizes = [2, 16], strides = [1, 1]} : vector<2x64xf32> to vector<2x16xf32>
    %560 = vector.extract_strided_slice %557 {offsets = [0, 32], sizes = [2, 16], strides = [1, 1]} : vector<2x64xf32> to vector<2x16xf32>
    %561 = vector.extract_strided_slice %557 {offsets = [0, 48], sizes = [2, 16], strides = [1, 1]} : vector<2x64xf32> to vector<2x16xf32>
    %562 = arith.mulf %559, %481 : vector<2x16xf32>
    %563 = arith.mulf %558, %560 : vector<2x16xf32>
    %564 = arith.addf %562, %563 : vector<2x16xf32>
    %565 = math.tanh %564 : vector<2x16xf32>
    %566 = arith.mulf %561, %565 : vector<2x16xf32>
    %c0_197 = arith.constant 0 : index
    %c0_198 = arith.constant 0 : index
    %567 = vector.load %arg19[%c0_197, %c0_198] : memref<16x64xf32, #tpu.memory_space<vmem>>, vector<16x64xf32>
    %cst_199 = arith.constant dense<0.000000e+00> : vector<2x64xf32>
    %568 = tpu.matmul %566, %567, %cst_199 {dimension_numbers = #tpu.dot_dimension_numbers<[1], [0], [0], [1], [0, 0, 1, 1], [], []>} : vector<2x16xf32>, vector<16x64xf32>, vector<2x64xf32> -> vector<2x64xf32>
    %c0_200 = arith.constant 0 : index
    %c0_201 = arith.constant 0 : index
    %569 = vector.load %arg20[%c0_200, %c0_201] : memref<16x64xf32, #tpu.memory_space<vmem>>, vector<16x64xf32>
    %cst_202 = arith.constant dense<0.000000e+00> : vector<2x64xf32>
    %570 = tpu.matmul %482, %569, %cst_202 {dimension_numbers = #tpu.dot_dimension_numbers<[1], [0], [0], [1], [0, 0, 1, 1], [], []>} : vector<2x16xf32>, vector<16x64xf32>, vector<2x64xf32> -> vector<2x64xf32>
    %571 = arith.addf %568, %570 : vector<2x64xf32>
    %c0_203 = arith.constant 0 : index
    %c0_204 = arith.constant 0 : index
    %572 = vector.load %arg21[%c0_203, %c0_204] : memref<1x64xf32, #tpu.memory_space<vmem>>, vector<1x64xf32>
    %573 = vector.broadcast %572 : vector<1x64xf32> to vector<2x64xf32>
    %574 = arith.addf %571, %573 : vector<2x64xf32>
    %575 = arith.negf %574 : vector<2x64xf32>
    %576 = math.exp %575 : vector<2x64xf32>
    %cst_205 = arith.constant 1.000000e+00 : f32
    %577 = vector.broadcast %cst_205 : f32 to vector<2x64xf32>
    %578 = arith.addf %577, %576 : vector<2x64xf32>
    %579 = arith.divf %577, %578 : vector<2x64xf32>
    %cst_206 = arith.constant 2.000000e+00 : f32
    %580 = vector.broadcast %cst_206 : f32 to vector<2x64xf32>
    %581 = arith.mulf %580, %579 : vector<2x64xf32>
    %cst_207 = arith.constant 1.000000e+00 : f32
    %582 = vector.broadcast %cst_207 : f32 to vector<2x64xf32>
    %583 = arith.subf %581, %582 : vector<2x64xf32>
    %584 = vector.shape_cast %11 : vector<1x64xi1> to vector<1x64xi1>
    %585 = vector.broadcast %584 : vector<1x64xi1> to vector<2x64xi1>
    %586 = arith.select %585, %583, %579 : vector<2x64xi1>, vector<2x64xf32>
    %587 = vector.extract_strided_slice %586 {offsets = [0, 0], sizes = [2, 16], strides = [1, 1]} : vector<2x64xf32> to vector<2x16xf32>
    %588 = vector.extract_strided_slice %586 {offsets = [0, 16], sizes = [2, 16], strides = [1, 1]} : vector<2x64xf32> to vector<2x16xf32>
    %589 = vector.extract_strided_slice %586 {offsets = [0, 32], sizes = [2, 16], strides = [1, 1]} : vector<2x64xf32> to vector<2x16xf32>
    %590 = vector.extract_strided_slice %586 {offsets = [0, 48], sizes = [2, 16], strides = [1, 1]} : vector<2x64xf32> to vector<2x16xf32>
    %591 = arith.mulf %588, %483 : vector<2x16xf32>
    %592 = arith.mulf %587, %589 : vector<2x16xf32>
    %593 = arith.addf %591, %592 : vector<2x16xf32>
    %594 = math.tanh %593 : vector<2x16xf32>
    %595 = arith.mulf %590, %594 : vector<2x16xf32>
    %596 = math.tanh %595 : vector<2x16xf32>
    %c0_208 = arith.constant 0 : index
    %c0_209 = arith.constant 0 : index
    %597 = vector.load %arg11[%c0_208, %c0_209] : memref<32x128xf32, #tpu.memory_space<vmem>>, vector<32x128xf32>
    %cst_210 = arith.constant dense<0.000000e+00> : vector<2x128xf32>
    %598 = tpu.matmul %507, %597, %cst_210 {dimension_numbers = #tpu.dot_dimension_numbers<[1], [0], [0], [1], [0, 0, 1, 1], [], []>} : vector<2x32xf32>, vector<32x128xf32>, vector<2x128xf32> -> vector<2x128xf32>
    %599 = arith.addf %475, %598 : vector<2x128xf32>
    %600 = arith.negf %599 : vector<2x128xf32>
    %601 = math.exp %600 : vector<2x128xf32>
    %cst_211 = arith.constant 1.000000e+00 : f32
    %602 = vector.broadcast %cst_211 : f32 to vector<2x128xf32>
    %603 = arith.addf %602, %601 : vector<2x128xf32>
    %604 = arith.divf %602, %603 : vector<2x128xf32>
    %cst_212 = arith.constant 2.000000e+00 : f32
    %605 = vector.broadcast %cst_212 : f32 to vector<2x128xf32>
    %606 = arith.mulf %605, %604 : vector<2x128xf32>
    %cst_213 = arith.constant 1.000000e+00 : f32
    %607 = vector.broadcast %cst_213 : f32 to vector<2x128xf32>
    %608 = arith.subf %606, %607 : vector<2x128xf32>
    %609 = vector.shape_cast %5 : vector<1x128xi1> to vector<1x128xi1>
    %610 = vector.broadcast %609 : vector<1x128xi1> to vector<2x128xi1>
    %611 = arith.select %610, %608, %604 : vector<2x128xi1>, vector<2x128xf32>
    %612 = vector.extract_strided_slice %611 {offsets = [0, 0], sizes = [2, 32], strides = [1, 1]} : vector<2x128xf32> to vector<2x32xf32>
    %613 = vector.extract_strided_slice %611 {offsets = [0, 32], sizes = [2, 32], strides = [1, 1]} : vector<2x128xf32> to vector<2x32xf32>
    %614 = vector.extract_strided_slice %611 {offsets = [0, 64], sizes = [2, 32], strides = [1, 1]} : vector<2x128xf32> to vector<2x32xf32>
    %615 = vector.extract_strided_slice %611 {offsets = [0, 96], sizes = [2, 32], strides = [1, 1]} : vector<2x128xf32> to vector<2x32xf32>
    %616 = arith.mulf %613, %505 : vector<2x32xf32>
    %617 = arith.mulf %612, %614 : vector<2x32xf32>
    %618 = arith.addf %616, %617 : vector<2x32xf32>
    %619 = math.tanh %618 : vector<2x32xf32>
    %620 = arith.mulf %615, %619 : vector<2x32xf32>
    %c0_214 = arith.constant 0 : index
    %c0_215 = arith.constant 0 : index
    %621 = vector.load %arg13[%c0_214, %c0_215] : memref<32x128xf32, #tpu.memory_space<vmem>>, vector<32x128xf32>
    %cst_216 = arith.constant dense<0.000000e+00> : vector<2x128xf32>
    %622 = tpu.matmul %620, %621, %cst_216 {dimension_numbers = #tpu.dot_dimension_numbers<[1], [0], [0], [1], [0, 0, 1, 1], [], []>} : vector<2x32xf32>, vector<32x128xf32>, vector<2x128xf32> -> vector<2x128xf32>
    %c0_217 = arith.constant 0 : index
    %c0_218 = arith.constant 0 : index
    %623 = vector.load %arg14[%c0_217, %c0_218] : memref<32x128xf32, #tpu.memory_space<vmem>>, vector<32x128xf32>
    %cst_219 = arith.constant dense<0.000000e+00> : vector<2x128xf32>
    %624 = tpu.matmul %536, %623, %cst_219 {dimension_numbers = #tpu.dot_dimension_numbers<[1], [0], [0], [1], [0, 0, 1, 1], [], []>} : vector<2x32xf32>, vector<32x128xf32>, vector<2x128xf32> -> vector<2x128xf32>
    %625 = arith.addf %622, %624 : vector<2x128xf32>
    %c0_220 = arith.constant 0 : index
    %c0_221 = arith.constant 0 : index
    %626 = vector.load %arg15[%c0_220, %c0_221] : memref<1x128xf32, #tpu.memory_space<vmem>>, vector<1x128xf32>
    %627 = vector.broadcast %626 : vector<1x128xf32> to vector<2x128xf32>
    %628 = arith.addf %625, %627 : vector<2x128xf32>
    %629 = arith.negf %628 : vector<2x128xf32>
    %630 = math.exp %629 : vector<2x128xf32>
    %cst_222 = arith.constant 1.000000e+00 : f32
    %631 = vector.broadcast %cst_222 : f32 to vector<2x128xf32>
    %632 = arith.addf %631, %630 : vector<2x128xf32>
    %633 = arith.divf %631, %632 : vector<2x128xf32>
    %cst_223 = arith.constant 2.000000e+00 : f32
    %634 = vector.broadcast %cst_223 : f32 to vector<2x128xf32>
    %635 = arith.mulf %634, %633 : vector<2x128xf32>
    %cst_224 = arith.constant 1.000000e+00 : f32
    %636 = vector.broadcast %cst_224 : f32 to vector<2x128xf32>
    %637 = arith.subf %635, %636 : vector<2x128xf32>
    %638 = vector.shape_cast %5 : vector<1x128xi1> to vector<1x128xi1>
    %639 = vector.broadcast %638 : vector<1x128xi1> to vector<2x128xi1>
    %640 = arith.select %639, %637, %633 : vector<2x128xi1>, vector<2x128xf32>
    %641 = vector.extract_strided_slice %640 {offsets = [0, 0], sizes = [2, 32], strides = [1, 1]} : vector<2x128xf32> to vector<2x32xf32>
    %642 = vector.extract_strided_slice %640 {offsets = [0, 32], sizes = [2, 32], strides = [1, 1]} : vector<2x128xf32> to vector<2x32xf32>
    %643 = vector.extract_strided_slice %640 {offsets = [0, 64], sizes = [2, 32], strides = [1, 1]} : vector<2x128xf32> to vector<2x32xf32>
    %644 = vector.extract_strided_slice %640 {offsets = [0, 96], sizes = [2, 32], strides = [1, 1]} : vector<2x128xf32> to vector<2x32xf32>
    %645 = arith.mulf %642, %534 : vector<2x32xf32>
    %646 = arith.mulf %641, %643 : vector<2x32xf32>
    %647 = arith.addf %645, %646 : vector<2x32xf32>
    %648 = math.tanh %647 : vector<2x32xf32>
    %649 = arith.mulf %644, %648 : vector<2x32xf32>
    %650 = math.tanh %649 : vector<2x32xf32>
    %c0_225 = arith.constant 0 : index
    %c0_226 = arith.constant 0 : index
    %651 = vector.load %arg16[%c0_225, %c0_226] : memref<32x64xf32, #tpu.memory_space<vmem>>, vector<32x64xf32>
    %cst_227 = arith.constant dense<0.000000e+00> : vector<2x64xf32>
    %652 = tpu.matmul %650, %651, %cst_227 {dimension_numbers = #tpu.dot_dimension_numbers<[1], [0], [0], [1], [0, 0, 1, 1], [], []>} : vector<2x32xf32>, vector<32x64xf32>, vector<2x64xf32> -> vector<2x64xf32>
    %c0_228 = arith.constant 0 : index
    %c0_229 = arith.constant 0 : index
    %653 = vector.load %arg17[%c0_228, %c0_229] : memref<16x64xf32, #tpu.memory_space<vmem>>, vector<16x64xf32>
    %cst_230 = arith.constant dense<0.000000e+00> : vector<2x64xf32>
    %654 = tpu.matmul %566, %653, %cst_230 {dimension_numbers = #tpu.dot_dimension_numbers<[1], [0], [0], [1], [0, 0, 1, 1], [], []>} : vector<2x16xf32>, vector<16x64xf32>, vector<2x64xf32> -> vector<2x64xf32>
    %655 = arith.addf %652, %654 : vector<2x64xf32>
    %c0_231 = arith.constant 0 : index
    %c0_232 = arith.constant 0 : index
    %656 = vector.load %arg18[%c0_231, %c0_232] : memref<1x64xf32, #tpu.memory_space<vmem>>, vector<1x64xf32>
    %657 = vector.broadcast %656 : vector<1x64xf32> to vector<2x64xf32>
    %658 = arith.addf %655, %657 : vector<2x64xf32>
    %659 = arith.negf %658 : vector<2x64xf32>
    %660 = math.exp %659 : vector<2x64xf32>
    %cst_233 = arith.constant 1.000000e+00 : f32
    %661 = vector.broadcast %cst_233 : f32 to vector<2x64xf32>
    %662 = arith.addf %661, %660 : vector<2x64xf32>
    %663 = arith.divf %661, %662 : vector<2x64xf32>
    %cst_234 = arith.constant 2.000000e+00 : f32
    %664 = vector.broadcast %cst_234 : f32 to vector<2x64xf32>
    %665 = arith.mulf %664, %663 : vector<2x64xf32>
    %cst_235 = arith.constant 1.000000e+00 : f32
    %666 = vector.broadcast %cst_235 : f32 to vector<2x64xf32>
    %667 = arith.subf %665, %666 : vector<2x64xf32>
    %668 = vector.shape_cast %11 : vector<1x64xi1> to vector<1x64xi1>
    %669 = vector.broadcast %668 : vector<1x64xi1> to vector<2x64xi1>
    %670 = arith.select %669, %667, %663 : vector<2x64xi1>, vector<2x64xf32>
    %671 = vector.extract_strided_slice %670 {offsets = [0, 0], sizes = [2, 16], strides = [1, 1]} : vector<2x64xf32> to vector<2x16xf32>
    %672 = vector.extract_strided_slice %670 {offsets = [0, 16], sizes = [2, 16], strides = [1, 1]} : vector<2x64xf32> to vector<2x16xf32>
    %673 = vector.extract_strided_slice %670 {offsets = [0, 32], sizes = [2, 16], strides = [1, 1]} : vector<2x64xf32> to vector<2x16xf32>
    %674 = vector.extract_strided_slice %670 {offsets = [0, 48], sizes = [2, 16], strides = [1, 1]} : vector<2x64xf32> to vector<2x16xf32>
    %675 = arith.mulf %672, %564 : vector<2x16xf32>
    %676 = arith.mulf %671, %673 : vector<2x16xf32>
    %677 = arith.addf %675, %676 : vector<2x16xf32>
    %678 = math.tanh %677 : vector<2x16xf32>
    %679 = arith.mulf %674, %678 : vector<2x16xf32>
    %c0_236 = arith.constant 0 : index
    %c0_237 = arith.constant 0 : index
    %680 = vector.load %arg19[%c0_236, %c0_237] : memref<16x64xf32, #tpu.memory_space<vmem>>, vector<16x64xf32>
    %cst_238 = arith.constant dense<0.000000e+00> : vector<2x64xf32>
    %681 = tpu.matmul %679, %680, %cst_238 {dimension_numbers = #tpu.dot_dimension_numbers<[1], [0], [0], [1], [0, 0, 1, 1], [], []>} : vector<2x16xf32>, vector<16x64xf32>, vector<2x64xf32> -> vector<2x64xf32>
    %c0_239 = arith.constant 0 : index
    %c0_240 = arith.constant 0 : index
    %682 = vector.load %arg20[%c0_239, %c0_240] : memref<16x64xf32, #tpu.memory_space<vmem>>, vector<16x64xf32>
    %cst_241 = arith.constant dense<0.000000e+00> : vector<2x64xf32>
    %683 = tpu.matmul %595, %682, %cst_241 {dimension_numbers = #tpu.dot_dimension_numbers<[1], [0], [0], [1], [0, 0, 1, 1], [], []>} : vector<2x16xf32>, vector<16x64xf32>, vector<2x64xf32> -> vector<2x64xf32>
    %684 = arith.addf %681, %683 : vector<2x64xf32>
    %c0_242 = arith.constant 0 : index
    %c0_243 = arith.constant 0 : index
    %685 = vector.load %arg21[%c0_242, %c0_243] : memref<1x64xf32, #tpu.memory_space<vmem>>, vector<1x64xf32>
    %686 = vector.broadcast %685 : vector<1x64xf32> to vector<2x64xf32>
    %687 = arith.addf %684, %686 : vector<2x64xf32>
    %688 = arith.negf %687 : vector<2x64xf32>
    %689 = math.exp %688 : vector<2x64xf32>
    %cst_244 = arith.constant 1.000000e+00 : f32
    %690 = vector.broadcast %cst_244 : f32 to vector<2x64xf32>
    %691 = arith.addf %690, %689 : vector<2x64xf32>
    %692 = arith.divf %690, %691 : vector<2x64xf32>
    %cst_245 = arith.constant 2.000000e+00 : f32
    %693 = vector.broadcast %cst_245 : f32 to vector<2x64xf32>
    %694 = arith.mulf %693, %692 : vector<2x64xf32>
    %cst_246 = arith.constant 1.000000e+00 : f32
    %695 = vector.broadcast %cst_246 : f32 to vector<2x64xf32>
    %696 = arith.subf %694, %695 : vector<2x64xf32>
    %697 = vector.shape_cast %11 : vector<1x64xi1> to vector<1x64xi1>
    %698 = vector.broadcast %697 : vector<1x64xi1> to vector<2x64xi1>
    %699 = arith.select %698, %696, %692 : vector<2x64xi1>, vector<2x64xf32>
    %700 = vector.extract_strided_slice %699 {offsets = [0, 0], sizes = [2, 16], strides = [1, 1]} : vector<2x64xf32> to vector<2x16xf32>
    %701 = vector.extract_strided_slice %699 {offsets = [0, 16], sizes = [2, 16], strides = [1, 1]} : vector<2x64xf32> to vector<2x16xf32>
    %702 = vector.extract_strided_slice %699 {offsets = [0, 32], sizes = [2, 16], strides = [1, 1]} : vector<2x64xf32> to vector<2x16xf32>
    %703 = vector.extract_strided_slice %699 {offsets = [0, 48], sizes = [2, 16], strides = [1, 1]} : vector<2x64xf32> to vector<2x16xf32>
    %704 = arith.mulf %701, %593 : vector<2x16xf32>
    %705 = arith.mulf %700, %702 : vector<2x16xf32>
    %706 = arith.addf %704, %705 : vector<2x16xf32>
    %707 = math.tanh %706 : vector<2x16xf32>
    %708 = arith.mulf %703, %707 : vector<2x16xf32>
    %709 = math.tanh %708 : vector<2x16xf32>
    %c0_247 = arith.constant 0 : index
    %c0_248 = arith.constant 0 : index
    %710 = vector.load %arg11[%c0_247, %c0_248] : memref<32x128xf32, #tpu.memory_space<vmem>>, vector<32x128xf32>
    %cst_249 = arith.constant dense<0.000000e+00> : vector<2x128xf32>
    %711 = tpu.matmul %620, %710, %cst_249 {dimension_numbers = #tpu.dot_dimension_numbers<[1], [0], [0], [1], [0, 0, 1, 1], [], []>} : vector<2x32xf32>, vector<32x128xf32>, vector<2x128xf32> -> vector<2x128xf32>
    %712 = arith.addf %475, %711 : vector<2x128xf32>
    %713 = arith.negf %712 : vector<2x128xf32>
    %714 = math.exp %713 : vector<2x128xf32>
    %cst_250 = arith.constant 1.000000e+00 : f32
    %715 = vector.broadcast %cst_250 : f32 to vector<2x128xf32>
    %716 = arith.addf %715, %714 : vector<2x128xf32>
    %717 = arith.divf %715, %716 : vector<2x128xf32>
    %cst_251 = arith.constant 2.000000e+00 : f32
    %718 = vector.broadcast %cst_251 : f32 to vector<2x128xf32>
    %719 = arith.mulf %718, %717 : vector<2x128xf32>
    %cst_252 = arith.constant 1.000000e+00 : f32
    %720 = vector.broadcast %cst_252 : f32 to vector<2x128xf32>
    %721 = arith.subf %719, %720 : vector<2x128xf32>
    %722 = vector.shape_cast %5 : vector<1x128xi1> to vector<1x128xi1>
    %723 = vector.broadcast %722 : vector<1x128xi1> to vector<2x128xi1>
    %724 = arith.select %723, %721, %717 : vector<2x128xi1>, vector<2x128xf32>
    %725 = vector.extract_strided_slice %724 {offsets = [0, 0], sizes = [2, 32], strides = [1, 1]} : vector<2x128xf32> to vector<2x32xf32>
    %726 = vector.extract_strided_slice %724 {offsets = [0, 32], sizes = [2, 32], strides = [1, 1]} : vector<2x128xf32> to vector<2x32xf32>
    %727 = vector.extract_strided_slice %724 {offsets = [0, 64], sizes = [2, 32], strides = [1, 1]} : vector<2x128xf32> to vector<2x32xf32>
    %728 = vector.extract_strided_slice %724 {offsets = [0, 96], sizes = [2, 32], strides = [1, 1]} : vector<2x128xf32> to vector<2x32xf32>
    %729 = arith.mulf %726, %618 : vector<2x32xf32>
    %730 = arith.mulf %725, %727 : vector<2x32xf32>
    %731 = arith.addf %729, %730 : vector<2x32xf32>
    %732 = math.tanh %731 : vector<2x32xf32>
    %733 = arith.mulf %728, %732 : vector<2x32xf32>
    %c0_253 = arith.constant 0 : index
    %c0_254 = arith.constant 0 : index
    %734 = vector.load %arg13[%c0_253, %c0_254] : memref<32x128xf32, #tpu.memory_space<vmem>>, vector<32x128xf32>
    %cst_255 = arith.constant dense<0.000000e+00> : vector<2x128xf32>
    %735 = tpu.matmul %733, %734, %cst_255 {dimension_numbers = #tpu.dot_dimension_numbers<[1], [0], [0], [1], [0, 0, 1, 1], [], []>} : vector<2x32xf32>, vector<32x128xf32>, vector<2x128xf32> -> vector<2x128xf32>
    %c0_256 = arith.constant 0 : index
    %c0_257 = arith.constant 0 : index
    %736 = vector.load %arg14[%c0_256, %c0_257] : memref<32x128xf32, #tpu.memory_space<vmem>>, vector<32x128xf32>
    %cst_258 = arith.constant dense<0.000000e+00> : vector<2x128xf32>
    %737 = tpu.matmul %649, %736, %cst_258 {dimension_numbers = #tpu.dot_dimension_numbers<[1], [0], [0], [1], [0, 0, 1, 1], [], []>} : vector<2x32xf32>, vector<32x128xf32>, vector<2x128xf32> -> vector<2x128xf32>
    %738 = arith.addf %735, %737 : vector<2x128xf32>
    %c0_259 = arith.constant 0 : index
    %c0_260 = arith.constant 0 : index
    %739 = vector.load %arg15[%c0_259, %c0_260] : memref<1x128xf32, #tpu.memory_space<vmem>>, vector<1x128xf32>
    %740 = vector.broadcast %739 : vector<1x128xf32> to vector<2x128xf32>
    %741 = arith.addf %738, %740 : vector<2x128xf32>
    %742 = arith.negf %741 : vector<2x128xf32>
    %743 = math.exp %742 : vector<2x128xf32>
    %cst_261 = arith.constant 1.000000e+00 : f32
    %744 = vector.broadcast %cst_261 : f32 to vector<2x128xf32>
    %745 = arith.addf %744, %743 : vector<2x128xf32>
    %746 = arith.divf %744, %745 : vector<2x128xf32>
    %cst_262 = arith.constant 2.000000e+00 : f32
    %747 = vector.broadcast %cst_262 : f32 to vector<2x128xf32>
    %748 = arith.mulf %747, %746 : vector<2x128xf32>
    %cst_263 = arith.constant 1.000000e+00 : f32
    %749 = vector.broadcast %cst_263 : f32 to vector<2x128xf32>
    %750 = arith.subf %748, %749 : vector<2x128xf32>
    %751 = vector.shape_cast %5 : vector<1x128xi1> to vector<1x128xi1>
    %752 = vector.broadcast %751 : vector<1x128xi1> to vector<2x128xi1>
    %753 = arith.select %752, %750, %746 : vector<2x128xi1>, vector<2x128xf32>
    %754 = vector.extract_strided_slice %753 {offsets = [0, 0], sizes = [2, 32], strides = [1, 1]} : vector<2x128xf32> to vector<2x32xf32>
    %755 = vector.extract_strided_slice %753 {offsets = [0, 32], sizes = [2, 32], strides = [1, 1]} : vector<2x128xf32> to vector<2x32xf32>
    %756 = vector.extract_strided_slice %753 {offsets = [0, 64], sizes = [2, 32], strides = [1, 1]} : vector<2x128xf32> to vector<2x32xf32>
    %757 = vector.extract_strided_slice %753 {offsets = [0, 96], sizes = [2, 32], strides = [1, 1]} : vector<2x128xf32> to vector<2x32xf32>
    %758 = arith.mulf %755, %647 : vector<2x32xf32>
    %759 = arith.mulf %754, %756 : vector<2x32xf32>
    %760 = arith.addf %758, %759 : vector<2x32xf32>
    %761 = math.tanh %760 : vector<2x32xf32>
    %762 = arith.mulf %757, %761 : vector<2x32xf32>
    %763 = math.tanh %762 : vector<2x32xf32>
    %c0_264 = arith.constant 0 : index
    %c0_265 = arith.constant 0 : index
    %764 = vector.load %arg16[%c0_264, %c0_265] : memref<32x64xf32, #tpu.memory_space<vmem>>, vector<32x64xf32>
    %cst_266 = arith.constant dense<0.000000e+00> : vector<2x64xf32>
    %765 = tpu.matmul %763, %764, %cst_266 {dimension_numbers = #tpu.dot_dimension_numbers<[1], [0], [0], [1], [0, 0, 1, 1], [], []>} : vector<2x32xf32>, vector<32x64xf32>, vector<2x64xf32> -> vector<2x64xf32>
    %c0_267 = arith.constant 0 : index
    %c0_268 = arith.constant 0 : index
    %766 = vector.load %arg17[%c0_267, %c0_268] : memref<16x64xf32, #tpu.memory_space<vmem>>, vector<16x64xf32>
    %cst_269 = arith.constant dense<0.000000e+00> : vector<2x64xf32>
    %767 = tpu.matmul %679, %766, %cst_269 {dimension_numbers = #tpu.dot_dimension_numbers<[1], [0], [0], [1], [0, 0, 1, 1], [], []>} : vector<2x16xf32>, vector<16x64xf32>, vector<2x64xf32> -> vector<2x64xf32>
    %768 = arith.addf %765, %767 : vector<2x64xf32>
    %c0_270 = arith.constant 0 : index
    %c0_271 = arith.constant 0 : index
    %769 = vector.load %arg18[%c0_270, %c0_271] : memref<1x64xf32, #tpu.memory_space<vmem>>, vector<1x64xf32>
    %770 = vector.broadcast %769 : vector<1x64xf32> to vector<2x64xf32>
    %771 = arith.addf %768, %770 : vector<2x64xf32>
    %772 = arith.negf %771 : vector<2x64xf32>
    %773 = math.exp %772 : vector<2x64xf32>
    %cst_272 = arith.constant 1.000000e+00 : f32
    %774 = vector.broadcast %cst_272 : f32 to vector<2x64xf32>
    %775 = arith.addf %774, %773 : vector<2x64xf32>
    %776 = arith.divf %774, %775 : vector<2x64xf32>
    %cst_273 = arith.constant 2.000000e+00 : f32
    %777 = vector.broadcast %cst_273 : f32 to vector<2x64xf32>
    %778 = arith.mulf %777, %776 : vector<2x64xf32>
    %cst_274 = arith.constant 1.000000e+00 : f32
    %779 = vector.broadcast %cst_274 : f32 to vector<2x64xf32>
    %780 = arith.subf %778, %779 : vector<2x64xf32>
    %781 = vector.shape_cast %11 : vector<1x64xi1> to vector<1x64xi1>
    %782 = vector.broadcast %781 : vector<1x64xi1> to vector<2x64xi1>
    %783 = arith.select %782, %780, %776 : vector<2x64xi1>, vector<2x64xf32>
    %784 = vector.extract_strided_slice %783 {offsets = [0, 0], sizes = [2, 16], strides = [1, 1]} : vector<2x64xf32> to vector<2x16xf32>
    %785 = vector.extract_strided_slice %783 {offsets = [0, 16], sizes = [2, 16], strides = [1, 1]} : vector<2x64xf32> to vector<2x16xf32>
    %786 = vector.extract_strided_slice %783 {offsets = [0, 32], sizes = [2, 16], strides = [1, 1]} : vector<2x64xf32> to vector<2x16xf32>
    %787 = vector.extract_strided_slice %783 {offsets = [0, 48], sizes = [2, 16], strides = [1, 1]} : vector<2x64xf32> to vector<2x16xf32>
    %788 = arith.mulf %785, %677 : vector<2x16xf32>
    %789 = arith.mulf %784, %786 : vector<2x16xf32>
    %790 = arith.addf %788, %789 : vector<2x16xf32>
    %791 = math.tanh %790 : vector<2x16xf32>
    %792 = arith.mulf %787, %791 : vector<2x16xf32>
    %c0_275 = arith.constant 0 : index
    %c0_276 = arith.constant 0 : index
    %793 = vector.load %arg19[%c0_275, %c0_276] : memref<16x64xf32, #tpu.memory_space<vmem>>, vector<16x64xf32>
    %cst_277 = arith.constant dense<0.000000e+00> : vector<2x64xf32>
    %794 = tpu.matmul %792, %793, %cst_277 {dimension_numbers = #tpu.dot_dimension_numbers<[1], [0], [0], [1], [0, 0, 1, 1], [], []>} : vector<2x16xf32>, vector<16x64xf32>, vector<2x64xf32> -> vector<2x64xf32>
    %c0_278 = arith.constant 0 : index
    %c0_279 = arith.constant 0 : index
    %795 = vector.load %arg20[%c0_278, %c0_279] : memref<16x64xf32, #tpu.memory_space<vmem>>, vector<16x64xf32>
    %cst_280 = arith.constant dense<0.000000e+00> : vector<2x64xf32>
    %796 = tpu.matmul %708, %795, %cst_280 {dimension_numbers = #tpu.dot_dimension_numbers<[1], [0], [0], [1], [0, 0, 1, 1], [], []>} : vector<2x16xf32>, vector<16x64xf32>, vector<2x64xf32> -> vector<2x64xf32>
    %797 = arith.addf %794, %796 : vector<2x64xf32>
    %c0_281 = arith.constant 0 : index
    %c0_282 = arith.constant 0 : index
    %798 = vector.load %arg21[%c0_281, %c0_282] : memref<1x64xf32, #tpu.memory_space<vmem>>, vector<1x64xf32>
    %799 = vector.broadcast %798 : vector<1x64xf32> to vector<2x64xf32>
    %800 = arith.addf %797, %799 : vector<2x64xf32>
    %801 = arith.negf %800 : vector<2x64xf32>
    %802 = math.exp %801 : vector<2x64xf32>
    %cst_283 = arith.constant 1.000000e+00 : f32
    %803 = vector.broadcast %cst_283 : f32 to vector<2x64xf32>
    %804 = arith.addf %803, %802 : vector<2x64xf32>
    %805 = arith.divf %803, %804 : vector<2x64xf32>
    %cst_284 = arith.constant 2.000000e+00 : f32
    %806 = vector.broadcast %cst_284 : f32 to vector<2x64xf32>
    %807 = arith.mulf %806, %805 : vector<2x64xf32>
    %cst_285 = arith.constant 1.000000e+00 : f32
    %808 = vector.broadcast %cst_285 : f32 to vector<2x64xf32>
    %809 = arith.subf %807, %808 : vector<2x64xf32>
    %810 = vector.shape_cast %11 : vector<1x64xi1> to vector<1x64xi1>
    %811 = vector.broadcast %810 : vector<1x64xi1> to vector<2x64xi1>
    %812 = arith.select %811, %809, %805 : vector<2x64xi1>, vector<2x64xf32>
    %813 = vector.extract_strided_slice %812 {offsets = [0, 0], sizes = [2, 16], strides = [1, 1]} : vector<2x64xf32> to vector<2x16xf32>
    %814 = vector.extract_strided_slice %812 {offsets = [0, 16], sizes = [2, 16], strides = [1, 1]} : vector<2x64xf32> to vector<2x16xf32>
    %815 = vector.extract_strided_slice %812 {offsets = [0, 32], sizes = [2, 16], strides = [1, 1]} : vector<2x64xf32> to vector<2x16xf32>
    %816 = vector.extract_strided_slice %812 {offsets = [0, 48], sizes = [2, 16], strides = [1, 1]} : vector<2x64xf32> to vector<2x16xf32>
    %817 = arith.mulf %814, %706 : vector<2x16xf32>
    %818 = arith.mulf %813, %815 : vector<2x16xf32>
    %819 = arith.addf %817, %818 : vector<2x16xf32>
    %820 = math.tanh %819 : vector<2x16xf32>
    %821 = arith.mulf %816, %820 : vector<2x16xf32>
    %822 = math.tanh %821 : vector<2x16xf32>
    %c0_286 = arith.constant 0 : index
    %c0_287 = arith.constant 0 : index
    %823 = vector.load %arg11[%c0_286, %c0_287] : memref<32x128xf32, #tpu.memory_space<vmem>>, vector<32x128xf32>
    %cst_288 = arith.constant dense<0.000000e+00> : vector<2x128xf32>
    %824 = tpu.matmul %733, %823, %cst_288 {dimension_numbers = #tpu.dot_dimension_numbers<[1], [0], [0], [1], [0, 0, 1, 1], [], []>} : vector<2x32xf32>, vector<32x128xf32>, vector<2x128xf32> -> vector<2x128xf32>
    %825 = arith.addf %475, %824 : vector<2x128xf32>
    %826 = arith.negf %825 : vector<2x128xf32>
    %827 = math.exp %826 : vector<2x128xf32>
    %cst_289 = arith.constant 1.000000e+00 : f32
    %828 = vector.broadcast %cst_289 : f32 to vector<2x128xf32>
    %829 = arith.addf %828, %827 : vector<2x128xf32>
    %830 = arith.divf %828, %829 : vector<2x128xf32>
    %cst_290 = arith.constant 2.000000e+00 : f32
    %831 = vector.broadcast %cst_290 : f32 to vector<2x128xf32>
    %832 = arith.mulf %831, %830 : vector<2x128xf32>
    %cst_291 = arith.constant 1.000000e+00 : f32
    %833 = vector.broadcast %cst_291 : f32 to vector<2x128xf32>
    %834 = arith.subf %832, %833 : vector<2x128xf32>
    %835 = vector.shape_cast %5 : vector<1x128xi1> to vector<1x128xi1>
    %836 = vector.broadcast %835 : vector<1x128xi1> to vector<2x128xi1>
    %837 = arith.select %836, %834, %830 : vector<2x128xi1>, vector<2x128xf32>
    %838 = vector.extract_strided_slice %837 {offsets = [0, 0], sizes = [2, 32], strides = [1, 1]} : vector<2x128xf32> to vector<2x32xf32>
    %839 = vector.extract_strided_slice %837 {offsets = [0, 32], sizes = [2, 32], strides = [1, 1]} : vector<2x128xf32> to vector<2x32xf32>
    %840 = vector.extract_strided_slice %837 {offsets = [0, 64], sizes = [2, 32], strides = [1, 1]} : vector<2x128xf32> to vector<2x32xf32>
    %841 = vector.extract_strided_slice %837 {offsets = [0, 96], sizes = [2, 32], strides = [1, 1]} : vector<2x128xf32> to vector<2x32xf32>
    %842 = arith.mulf %839, %731 : vector<2x32xf32>
    %843 = arith.mulf %838, %840 : vector<2x32xf32>
    %844 = arith.addf %842, %843 : vector<2x32xf32>
    %845 = math.tanh %844 : vector<2x32xf32>
    %846 = arith.mulf %841, %845 : vector<2x32xf32>
    %c0_292 = arith.constant 0 : index
    %c0_293 = arith.constant 0 : index
    %847 = vector.load %arg13[%c0_292, %c0_293] : memref<32x128xf32, #tpu.memory_space<vmem>>, vector<32x128xf32>
    %cst_294 = arith.constant dense<0.000000e+00> : vector<2x128xf32>
    %848 = tpu.matmul %846, %847, %cst_294 {dimension_numbers = #tpu.dot_dimension_numbers<[1], [0], [0], [1], [0, 0, 1, 1], [], []>} : vector<2x32xf32>, vector<32x128xf32>, vector<2x128xf32> -> vector<2x128xf32>
    %c0_295 = arith.constant 0 : index
    %c0_296 = arith.constant 0 : index
    %849 = vector.load %arg14[%c0_295, %c0_296] : memref<32x128xf32, #tpu.memory_space<vmem>>, vector<32x128xf32>
    %cst_297 = arith.constant dense<0.000000e+00> : vector<2x128xf32>
    %850 = tpu.matmul %762, %849, %cst_297 {dimension_numbers = #tpu.dot_dimension_numbers<[1], [0], [0], [1], [0, 0, 1, 1], [], []>} : vector<2x32xf32>, vector<32x128xf32>, vector<2x128xf32> -> vector<2x128xf32>
    %851 = arith.addf %848, %850 : vector<2x128xf32>
    %c0_298 = arith.constant 0 : index
    %c0_299 = arith.constant 0 : index
    %852 = vector.load %arg15[%c0_298, %c0_299] : memref<1x128xf32, #tpu.memory_space<vmem>>, vector<1x128xf32>
    %853 = vector.broadcast %852 : vector<1x128xf32> to vector<2x128xf32>
    %854 = arith.addf %851, %853 : vector<2x128xf32>
    %855 = arith.negf %854 : vector<2x128xf32>
    %856 = math.exp %855 : vector<2x128xf32>
    %cst_300 = arith.constant 1.000000e+00 : f32
    %857 = vector.broadcast %cst_300 : f32 to vector<2x128xf32>
    %858 = arith.addf %857, %856 : vector<2x128xf32>
    %859 = arith.divf %857, %858 : vector<2x128xf32>
    %cst_301 = arith.constant 2.000000e+00 : f32
    %860 = vector.broadcast %cst_301 : f32 to vector<2x128xf32>
    %861 = arith.mulf %860, %859 : vector<2x128xf32>
    %cst_302 = arith.constant 1.000000e+00 : f32
    %862 = vector.broadcast %cst_302 : f32 to vector<2x128xf32>
    %863 = arith.subf %861, %862 : vector<2x128xf32>
    %864 = vector.shape_cast %5 : vector<1x128xi1> to vector<1x128xi1>
    %865 = vector.broadcast %864 : vector<1x128xi1> to vector<2x128xi1>
    %866 = arith.select %865, %863, %859 : vector<2x128xi1>, vector<2x128xf32>
    %867 = vector.extract_strided_slice %866 {offsets = [0, 0], sizes = [2, 32], strides = [1, 1]} : vector<2x128xf32> to vector<2x32xf32>
    %868 = vector.extract_strided_slice %866 {offsets = [0, 32], sizes = [2, 32], strides = [1, 1]} : vector<2x128xf32> to vector<2x32xf32>
    %869 = vector.extract_strided_slice %866 {offsets = [0, 64], sizes = [2, 32], strides = [1, 1]} : vector<2x128xf32> to vector<2x32xf32>
    %870 = vector.extract_strided_slice %866 {offsets = [0, 96], sizes = [2, 32], strides = [1, 1]} : vector<2x128xf32> to vector<2x32xf32>
    %871 = arith.mulf %868, %760 : vector<2x32xf32>
    %872 = arith.mulf %867, %869 : vector<2x32xf32>
    %873 = arith.addf %871, %872 : vector<2x32xf32>
    %874 = math.tanh %873 : vector<2x32xf32>
    %875 = arith.mulf %870, %874 : vector<2x32xf32>
    %876 = math.tanh %875 : vector<2x32xf32>
    %c0_303 = arith.constant 0 : index
    %c0_304 = arith.constant 0 : index
    %877 = vector.load %arg16[%c0_303, %c0_304] : memref<32x64xf32, #tpu.memory_space<vmem>>, vector<32x64xf32>
    %cst_305 = arith.constant dense<0.000000e+00> : vector<2x64xf32>
    %878 = tpu.matmul %876, %877, %cst_305 {dimension_numbers = #tpu.dot_dimension_numbers<[1], [0], [0], [1], [0, 0, 1, 1], [], []>} : vector<2x32xf32>, vector<32x64xf32>, vector<2x64xf32> -> vector<2x64xf32>
    %c0_306 = arith.constant 0 : index
    %c0_307 = arith.constant 0 : index
    %879 = vector.load %arg17[%c0_306, %c0_307] : memref<16x64xf32, #tpu.memory_space<vmem>>, vector<16x64xf32>
    %cst_308 = arith.constant dense<0.000000e+00> : vector<2x64xf32>
    %880 = tpu.matmul %792, %879, %cst_308 {dimension_numbers = #tpu.dot_dimension_numbers<[1], [0], [0], [1], [0, 0, 1, 1], [], []>} : vector<2x16xf32>, vector<16x64xf32>, vector<2x64xf32> -> vector<2x64xf32>
    %881 = arith.addf %878, %880 : vector<2x64xf32>
    %c0_309 = arith.constant 0 : index
    %c0_310 = arith.constant 0 : index
    %882 = vector.load %arg18[%c0_309, %c0_310] : memref<1x64xf32, #tpu.memory_space<vmem>>, vector<1x64xf32>
    %883 = vector.broadcast %882 : vector<1x64xf32> to vector<2x64xf32>
    %884 = arith.addf %881, %883 : vector<2x64xf32>
    %885 = arith.negf %884 : vector<2x64xf32>
    %886 = math.exp %885 : vector<2x64xf32>
    %cst_311 = arith.constant 1.000000e+00 : f32
    %887 = vector.broadcast %cst_311 : f32 to vector<2x64xf32>
    %888 = arith.addf %887, %886 : vector<2x64xf32>
    %889 = arith.divf %887, %888 : vector<2x64xf32>
    %cst_312 = arith.constant 2.000000e+00 : f32
    %890 = vector.broadcast %cst_312 : f32 to vector<2x64xf32>
    %891 = arith.mulf %890, %889 : vector<2x64xf32>
    %cst_313 = arith.constant 1.000000e+00 : f32
    %892 = vector.broadcast %cst_313 : f32 to vector<2x64xf32>
    %893 = arith.subf %891, %892 : vector<2x64xf32>
    %894 = vector.shape_cast %11 : vector<1x64xi1> to vector<1x64xi1>
    %895 = vector.broadcast %894 : vector<1x64xi1> to vector<2x64xi1>
    %896 = arith.select %895, %893, %889 : vector<2x64xi1>, vector<2x64xf32>
    %897 = vector.extract_strided_slice %896 {offsets = [0, 0], sizes = [2, 16], strides = [1, 1]} : vector<2x64xf32> to vector<2x16xf32>
    %898 = vector.extract_strided_slice %896 {offsets = [0, 16], sizes = [2, 16], strides = [1, 1]} : vector<2x64xf32> to vector<2x16xf32>
    %899 = vector.extract_strided_slice %896 {offsets = [0, 32], sizes = [2, 16], strides = [1, 1]} : vector<2x64xf32> to vector<2x16xf32>
    %900 = vector.extract_strided_slice %896 {offsets = [0, 48], sizes = [2, 16], strides = [1, 1]} : vector<2x64xf32> to vector<2x16xf32>
    %901 = arith.mulf %898, %790 : vector<2x16xf32>
    %902 = arith.mulf %897, %899 : vector<2x16xf32>
    %903 = arith.addf %901, %902 : vector<2x16xf32>
    %904 = math.tanh %903 : vector<2x16xf32>
    %905 = arith.mulf %900, %904 : vector<2x16xf32>
    %c0_314 = arith.constant 0 : index
    %c0_315 = arith.constant 0 : index
    %906 = vector.load %arg19[%c0_314, %c0_315] : memref<16x64xf32, #tpu.memory_space<vmem>>, vector<16x64xf32>
    %cst_316 = arith.constant dense<0.000000e+00> : vector<2x64xf32>
    %907 = tpu.matmul %905, %906, %cst_316 {dimension_numbers = #tpu.dot_dimension_numbers<[1], [0], [0], [1], [0, 0, 1, 1], [], []>} : vector<2x16xf32>, vector<16x64xf32>, vector<2x64xf32> -> vector<2x64xf32>
    %c0_317 = arith.constant 0 : index
    %c0_318 = arith.constant 0 : index
    %908 = vector.load %arg20[%c0_317, %c0_318] : memref<16x64xf32, #tpu.memory_space<vmem>>, vector<16x64xf32>
    %cst_319 = arith.constant dense<0.000000e+00> : vector<2x64xf32>
    %909 = tpu.matmul %821, %908, %cst_319 {dimension_numbers = #tpu.dot_dimension_numbers<[1], [0], [0], [1], [0, 0, 1, 1], [], []>} : vector<2x16xf32>, vector<16x64xf32>, vector<2x64xf32> -> vector<2x64xf32>
    %910 = arith.addf %907, %909 : vector<2x64xf32>
    %c0_320 = arith.constant 0 : index
    %c0_321 = arith.constant 0 : index
    %911 = vector.load %arg21[%c0_320, %c0_321] : memref<1x64xf32, #tpu.memory_space<vmem>>, vector<1x64xf32>
    %912 = vector.broadcast %911 : vector<1x64xf32> to vector<2x64xf32>
    %913 = arith.addf %910, %912 : vector<2x64xf32>
    %914 = arith.negf %913 : vector<2x64xf32>
    %915 = math.exp %914 : vector<2x64xf32>
    %cst_322 = arith.constant 1.000000e+00 : f32
    %916 = vector.broadcast %cst_322 : f32 to vector<2x64xf32>
    %917 = arith.addf %916, %915 : vector<2x64xf32>
    %918 = arith.divf %916, %917 : vector<2x64xf32>
    %cst_323 = arith.constant 2.000000e+00 : f32
    %919 = vector.broadcast %cst_323 : f32 to vector<2x64xf32>
    %920 = arith.mulf %919, %918 : vector<2x64xf32>
    %cst_324 = arith.constant 1.000000e+00 : f32
    %921 = vector.broadcast %cst_324 : f32 to vector<2x64xf32>
    %922 = arith.subf %920, %921 : vector<2x64xf32>
    %923 = vector.shape_cast %11 : vector<1x64xi1> to vector<1x64xi1>
    %924 = vector.broadcast %923 : vector<1x64xi1> to vector<2x64xi1>
    %925 = arith.select %924, %922, %918 : vector<2x64xi1>, vector<2x64xf32>
    %926 = vector.extract_strided_slice %925 {offsets = [0, 0], sizes = [2, 16], strides = [1, 1]} : vector<2x64xf32> to vector<2x16xf32>
    %927 = vector.extract_strided_slice %925 {offsets = [0, 16], sizes = [2, 16], strides = [1, 1]} : vector<2x64xf32> to vector<2x16xf32>
    %928 = vector.extract_strided_slice %925 {offsets = [0, 32], sizes = [2, 16], strides = [1, 1]} : vector<2x64xf32> to vector<2x16xf32>
    %929 = vector.extract_strided_slice %925 {offsets = [0, 48], sizes = [2, 16], strides = [1, 1]} : vector<2x64xf32> to vector<2x16xf32>
    %930 = arith.mulf %927, %819 : vector<2x16xf32>
    %931 = arith.mulf %926, %928 : vector<2x16xf32>
    %932 = arith.addf %930, %931 : vector<2x16xf32>
    %933 = math.tanh %932 : vector<2x16xf32>
    %934 = arith.mulf %929, %933 : vector<2x16xf32>
    %935 = math.tanh %934 : vector<2x16xf32>
    %c0_325 = arith.constant 0 : index
    %c0_326 = arith.constant 0 : index
    %936 = vector.load %arg11[%c0_325, %c0_326] : memref<32x128xf32, #tpu.memory_space<vmem>>, vector<32x128xf32>
    %cst_327 = arith.constant dense<0.000000e+00> : vector<2x128xf32>
    %937 = tpu.matmul %846, %936, %cst_327 {dimension_numbers = #tpu.dot_dimension_numbers<[1], [0], [0], [1], [0, 0, 1, 1], [], []>} : vector<2x32xf32>, vector<32x128xf32>, vector<2x128xf32> -> vector<2x128xf32>
    %938 = arith.addf %475, %937 : vector<2x128xf32>
    %939 = arith.negf %938 : vector<2x128xf32>
    %940 = math.exp %939 : vector<2x128xf32>
    %cst_328 = arith.constant 1.000000e+00 : f32
    %941 = vector.broadcast %cst_328 : f32 to vector<2x128xf32>
    %942 = arith.addf %941, %940 : vector<2x128xf32>
    %943 = arith.divf %941, %942 : vector<2x128xf32>
    %cst_329 = arith.constant 2.000000e+00 : f32
    %944 = vector.broadcast %cst_329 : f32 to vector<2x128xf32>
    %945 = arith.mulf %944, %943 : vector<2x128xf32>
    %cst_330 = arith.constant 1.000000e+00 : f32
    %946 = vector.broadcast %cst_330 : f32 to vector<2x128xf32>
    %947 = arith.subf %945, %946 : vector<2x128xf32>
    %948 = vector.shape_cast %5 : vector<1x128xi1> to vector<1x128xi1>
    %949 = vector.broadcast %948 : vector<1x128xi1> to vector<2x128xi1>
    %950 = arith.select %949, %947, %943 : vector<2x128xi1>, vector<2x128xf32>
    %951 = vector.extract_strided_slice %950 {offsets = [0, 0], sizes = [2, 32], strides = [1, 1]} : vector<2x128xf32> to vector<2x32xf32>
    %952 = vector.extract_strided_slice %950 {offsets = [0, 32], sizes = [2, 32], strides = [1, 1]} : vector<2x128xf32> to vector<2x32xf32>
    %953 = vector.extract_strided_slice %950 {offsets = [0, 64], sizes = [2, 32], strides = [1, 1]} : vector<2x128xf32> to vector<2x32xf32>
    %954 = vector.extract_strided_slice %950 {offsets = [0, 96], sizes = [2, 32], strides = [1, 1]} : vector<2x128xf32> to vector<2x32xf32>
    %955 = arith.mulf %952, %844 : vector<2x32xf32>
    %956 = arith.mulf %951, %953 : vector<2x32xf32>
    %957 = arith.addf %955, %956 : vector<2x32xf32>
    %958 = math.tanh %957 : vector<2x32xf32>
    %959 = arith.mulf %954, %958 : vector<2x32xf32>
    %c0_331 = arith.constant 0 : index
    %c0_332 = arith.constant 0 : index
    %960 = vector.load %arg13[%c0_331, %c0_332] : memref<32x128xf32, #tpu.memory_space<vmem>>, vector<32x128xf32>
    %cst_333 = arith.constant dense<0.000000e+00> : vector<2x128xf32>
    %961 = tpu.matmul %959, %960, %cst_333 {dimension_numbers = #tpu.dot_dimension_numbers<[1], [0], [0], [1], [0, 0, 1, 1], [], []>} : vector<2x32xf32>, vector<32x128xf32>, vector<2x128xf32> -> vector<2x128xf32>
    %c0_334 = arith.constant 0 : index
    %c0_335 = arith.constant 0 : index
    %962 = vector.load %arg14[%c0_334, %c0_335] : memref<32x128xf32, #tpu.memory_space<vmem>>, vector<32x128xf32>
    %cst_336 = arith.constant dense<0.000000e+00> : vector<2x128xf32>
    %963 = tpu.matmul %875, %962, %cst_336 {dimension_numbers = #tpu.dot_dimension_numbers<[1], [0], [0], [1], [0, 0, 1, 1], [], []>} : vector<2x32xf32>, vector<32x128xf32>, vector<2x128xf32> -> vector<2x128xf32>
    %964 = arith.addf %961, %963 : vector<2x128xf32>
    %c0_337 = arith.constant 0 : index
    %c0_338 = arith.constant 0 : index
    %965 = vector.load %arg15[%c0_337, %c0_338] : memref<1x128xf32, #tpu.memory_space<vmem>>, vector<1x128xf32>
    %966 = vector.broadcast %965 : vector<1x128xf32> to vector<2x128xf32>
    %967 = arith.addf %964, %966 : vector<2x128xf32>
    %968 = arith.negf %967 : vector<2x128xf32>
    %969 = math.exp %968 : vector<2x128xf32>
    %cst_339 = arith.constant 1.000000e+00 : f32
    %970 = vector.broadcast %cst_339 : f32 to vector<2x128xf32>
    %971 = arith.addf %970, %969 : vector<2x128xf32>
    %972 = arith.divf %970, %971 : vector<2x128xf32>
    %cst_340 = arith.constant 2.000000e+00 : f32
    %973 = vector.broadcast %cst_340 : f32 to vector<2x128xf32>
    %974 = arith.mulf %973, %972 : vector<2x128xf32>
    %cst_341 = arith.constant 1.000000e+00 : f32
    %975 = vector.broadcast %cst_341 : f32 to vector<2x128xf32>
    %976 = arith.subf %974, %975 : vector<2x128xf32>
    %977 = vector.shape_cast %5 : vector<1x128xi1> to vector<1x128xi1>
    %978 = vector.broadcast %977 : vector<1x128xi1> to vector<2x128xi1>
    %979 = arith.select %978, %976, %972 : vector<2x128xi1>, vector<2x128xf32>
    %980 = vector.extract_strided_slice %979 {offsets = [0, 0], sizes = [2, 32], strides = [1, 1]} : vector<2x128xf32> to vector<2x32xf32>
    %981 = vector.extract_strided_slice %979 {offsets = [0, 32], sizes = [2, 32], strides = [1, 1]} : vector<2x128xf32> to vector<2x32xf32>
    %982 = vector.extract_strided_slice %979 {offsets = [0, 64], sizes = [2, 32], strides = [1, 1]} : vector<2x128xf32> to vector<2x32xf32>
    %983 = vector.extract_strided_slice %979 {offsets = [0, 96], sizes = [2, 32], strides = [1, 1]} : vector<2x128xf32> to vector<2x32xf32>
    %984 = arith.mulf %981, %873 : vector<2x32xf32>
    %985 = arith.mulf %980, %982 : vector<2x32xf32>
    %986 = arith.addf %984, %985 : vector<2x32xf32>
    %987 = math.tanh %986 : vector<2x32xf32>
    %988 = arith.mulf %983, %987 : vector<2x32xf32>
    %989 = math.tanh %988 : vector<2x32xf32>
    %c0_342 = arith.constant 0 : index
    %c0_343 = arith.constant 0 : index
    %990 = vector.load %arg16[%c0_342, %c0_343] : memref<32x64xf32, #tpu.memory_space<vmem>>, vector<32x64xf32>
    %cst_344 = arith.constant dense<0.000000e+00> : vector<2x64xf32>
    %991 = tpu.matmul %989, %990, %cst_344 {dimension_numbers = #tpu.dot_dimension_numbers<[1], [0], [0], [1], [0, 0, 1, 1], [], []>} : vector<2x32xf32>, vector<32x64xf32>, vector<2x64xf32> -> vector<2x64xf32>
    %c0_345 = arith.constant 0 : index
    %c0_346 = arith.constant 0 : index
    %992 = vector.load %arg17[%c0_345, %c0_346] : memref<16x64xf32, #tpu.memory_space<vmem>>, vector<16x64xf32>
    %cst_347 = arith.constant dense<0.000000e+00> : vector<2x64xf32>
    %993 = tpu.matmul %905, %992, %cst_347 {dimension_numbers = #tpu.dot_dimension_numbers<[1], [0], [0], [1], [0, 0, 1, 1], [], []>} : vector<2x16xf32>, vector<16x64xf32>, vector<2x64xf32> -> vector<2x64xf32>
    %994 = arith.addf %991, %993 : vector<2x64xf32>
    %c0_348 = arith.constant 0 : index
    %c0_349 = arith.constant 0 : index
    %995 = vector.load %arg18[%c0_348, %c0_349] : memref<1x64xf32, #tpu.memory_space<vmem>>, vector<1x64xf32>
    %996 = vector.broadcast %995 : vector<1x64xf32> to vector<2x64xf32>
    %997 = arith.addf %994, %996 : vector<2x64xf32>
    %998 = arith.negf %997 : vector<2x64xf32>
    %999 = math.exp %998 : vector<2x64xf32>
    %cst_350 = arith.constant 1.000000e+00 : f32
    %1000 = vector.broadcast %cst_350 : f32 to vector<2x64xf32>
    %1001 = arith.addf %1000, %999 : vector<2x64xf32>
    %1002 = arith.divf %1000, %1001 : vector<2x64xf32>
    %cst_351 = arith.constant 2.000000e+00 : f32
    %1003 = vector.broadcast %cst_351 : f32 to vector<2x64xf32>
    %1004 = arith.mulf %1003, %1002 : vector<2x64xf32>
    %cst_352 = arith.constant 1.000000e+00 : f32
    %1005 = vector.broadcast %cst_352 : f32 to vector<2x64xf32>
    %1006 = arith.subf %1004, %1005 : vector<2x64xf32>
    %1007 = vector.shape_cast %11 : vector<1x64xi1> to vector<1x64xi1>
    %1008 = vector.broadcast %1007 : vector<1x64xi1> to vector<2x64xi1>
    %1009 = arith.select %1008, %1006, %1002 : vector<2x64xi1>, vector<2x64xf32>
    %1010 = vector.extract_strided_slice %1009 {offsets = [0, 0], sizes = [2, 16], strides = [1, 1]} : vector<2x64xf32> to vector<2x16xf32>
    %1011 = vector.extract_strided_slice %1009 {offsets = [0, 16], sizes = [2, 16], strides = [1, 1]} : vector<2x64xf32> to vector<2x16xf32>
    %1012 = vector.extract_strided_slice %1009 {offsets = [0, 32], sizes = [2, 16], strides = [1, 1]} : vector<2x64xf32> to vector<2x16xf32>
    %1013 = vector.extract_strided_slice %1009 {offsets = [0, 48], sizes = [2, 16], strides = [1, 1]} : vector<2x64xf32> to vector<2x16xf32>
    %1014 = arith.mulf %1011, %903 : vector<2x16xf32>
    %1015 = arith.mulf %1010, %1012 : vector<2x16xf32>
    %1016 = arith.addf %1014, %1015 : vector<2x16xf32>
    %1017 = math.tanh %1016 : vector<2x16xf32>
    %1018 = arith.mulf %1013, %1017 : vector<2x16xf32>
    %c0_353 = arith.constant 0 : index
    %c0_354 = arith.constant 0 : index
    %1019 = vector.load %arg19[%c0_353, %c0_354] : memref<16x64xf32, #tpu.memory_space<vmem>>, vector<16x64xf32>
    %cst_355 = arith.constant dense<0.000000e+00> : vector<2x64xf32>
    %1020 = tpu.matmul %1018, %1019, %cst_355 {dimension_numbers = #tpu.dot_dimension_numbers<[1], [0], [0], [1], [0, 0, 1, 1], [], []>} : vector<2x16xf32>, vector<16x64xf32>, vector<2x64xf32> -> vector<2x64xf32>
    %c0_356 = arith.constant 0 : index
    %c0_357 = arith.constant 0 : index
    %1021 = vector.load %arg20[%c0_356, %c0_357] : memref<16x64xf32, #tpu.memory_space<vmem>>, vector<16x64xf32>
    %cst_358 = arith.constant dense<0.000000e+00> : vector<2x64xf32>
    %1022 = tpu.matmul %934, %1021, %cst_358 {dimension_numbers = #tpu.dot_dimension_numbers<[1], [0], [0], [1], [0, 0, 1, 1], [], []>} : vector<2x16xf32>, vector<16x64xf32>, vector<2x64xf32> -> vector<2x64xf32>
    %1023 = arith.addf %1020, %1022 : vector<2x64xf32>
    %c0_359 = arith.constant 0 : index
    %c0_360 = arith.constant 0 : index
    %1024 = vector.load %arg21[%c0_359, %c0_360] : memref<1x64xf32, #tpu.memory_space<vmem>>, vector<1x64xf32>
    %1025 = vector.broadcast %1024 : vector<1x64xf32> to vector<2x64xf32>
    %1026 = arith.addf %1023, %1025 : vector<2x64xf32>
    %1027 = arith.negf %1026 : vector<2x64xf32>
    %1028 = math.exp %1027 : vector<2x64xf32>
    %cst_361 = arith.constant 1.000000e+00 : f32
    %1029 = vector.broadcast %cst_361 : f32 to vector<2x64xf32>
    %1030 = arith.addf %1029, %1028 : vector<2x64xf32>
    %1031 = arith.divf %1029, %1030 : vector<2x64xf32>
    %cst_362 = arith.constant 2.000000e+00 : f32
    %1032 = vector.broadcast %cst_362 : f32 to vector<2x64xf32>
    %1033 = arith.mulf %1032, %1031 : vector<2x64xf32>
    %cst_363 = arith.constant 1.000000e+00 : f32
    %1034 = vector.broadcast %cst_363 : f32 to vector<2x64xf32>
    %1035 = arith.subf %1033, %1034 : vector<2x64xf32>
    %1036 = vector.shape_cast %11 : vector<1x64xi1> to vector<1x64xi1>
    %1037 = vector.broadcast %1036 : vector<1x64xi1> to vector<2x64xi1>
    %1038 = arith.select %1037, %1035, %1031 : vector<2x64xi1>, vector<2x64xf32>
    %1039 = vector.extract_strided_slice %1038 {offsets = [0, 0], sizes = [2, 16], strides = [1, 1]} : vector<2x64xf32> to vector<2x16xf32>
    %1040 = vector.extract_strided_slice %1038 {offsets = [0, 16], sizes = [2, 16], strides = [1, 1]} : vector<2x64xf32> to vector<2x16xf32>
    %1041 = vector.extract_strided_slice %1038 {offsets = [0, 32], sizes = [2, 16], strides = [1, 1]} : vector<2x64xf32> to vector<2x16xf32>
    %1042 = vector.extract_strided_slice %1038 {offsets = [0, 48], sizes = [2, 16], strides = [1, 1]} : vector<2x64xf32> to vector<2x16xf32>
    %1043 = arith.mulf %1040, %932 : vector<2x16xf32>
    %1044 = arith.mulf %1039, %1041 : vector<2x16xf32>
    %1045 = arith.addf %1043, %1044 : vector<2x16xf32>
    %1046 = math.tanh %1045 : vector<2x16xf32>
    %1047 = arith.mulf %1042, %1046 : vector<2x16xf32>
    %1048 = math.tanh %1047 : vector<2x16xf32>
    %c0_364 = arith.constant 0 : index
    %c0_365 = arith.constant 0 : index
    %1049 = vector.load %arg11[%c0_364, %c0_365] : memref<32x128xf32, #tpu.memory_space<vmem>>, vector<32x128xf32>
    %cst_366 = arith.constant dense<0.000000e+00> : vector<2x128xf32>
    %1050 = tpu.matmul %959, %1049, %cst_366 {dimension_numbers = #tpu.dot_dimension_numbers<[1], [0], [0], [1], [0, 0, 1, 1], [], []>} : vector<2x32xf32>, vector<32x128xf32>, vector<2x128xf32> -> vector<2x128xf32>
    %1051 = arith.addf %475, %1050 : vector<2x128xf32>
    %1052 = arith.negf %1051 : vector<2x128xf32>
    %1053 = math.exp %1052 : vector<2x128xf32>
    %cst_367 = arith.constant 1.000000e+00 : f32
    %1054 = vector.broadcast %cst_367 : f32 to vector<2x128xf32>
    %1055 = arith.addf %1054, %1053 : vector<2x128xf32>
    %1056 = arith.divf %1054, %1055 : vector<2x128xf32>
    %cst_368 = arith.constant 2.000000e+00 : f32
    %1057 = vector.broadcast %cst_368 : f32 to vector<2x128xf32>
    %1058 = arith.mulf %1057, %1056 : vector<2x128xf32>
    %cst_369 = arith.constant 1.000000e+00 : f32
    %1059 = vector.broadcast %cst_369 : f32 to vector<2x128xf32>
    %1060 = arith.subf %1058, %1059 : vector<2x128xf32>
    %1061 = vector.shape_cast %5 : vector<1x128xi1> to vector<1x128xi1>
    %1062 = vector.broadcast %1061 : vector<1x128xi1> to vector<2x128xi1>
    %1063 = arith.select %1062, %1060, %1056 : vector<2x128xi1>, vector<2x128xf32>
    %1064 = vector.extract_strided_slice %1063 {offsets = [0, 0], sizes = [2, 32], strides = [1, 1]} : vector<2x128xf32> to vector<2x32xf32>
    %1065 = vector.extract_strided_slice %1063 {offsets = [0, 32], sizes = [2, 32], strides = [1, 1]} : vector<2x128xf32> to vector<2x32xf32>
    %1066 = vector.extract_strided_slice %1063 {offsets = [0, 64], sizes = [2, 32], strides = [1, 1]} : vector<2x128xf32> to vector<2x32xf32>
    %1067 = vector.extract_strided_slice %1063 {offsets = [0, 96], sizes = [2, 32], strides = [1, 1]} : vector<2x128xf32> to vector<2x32xf32>
    %1068 = arith.mulf %1065, %957 : vector<2x32xf32>
    %1069 = arith.mulf %1064, %1066 : vector<2x32xf32>
    %1070 = arith.addf %1068, %1069 : vector<2x32xf32>
    %1071 = math.tanh %1070 : vector<2x32xf32>
    %1072 = arith.mulf %1067, %1071 : vector<2x32xf32>
    %c0_370 = arith.constant 0 : index
    %c0_371 = arith.constant 0 : index
    %1073 = vector.load %arg13[%c0_370, %c0_371] : memref<32x128xf32, #tpu.memory_space<vmem>>, vector<32x128xf32>
    %cst_372 = arith.constant dense<0.000000e+00> : vector<2x128xf32>
    %1074 = tpu.matmul %1072, %1073, %cst_372 {dimension_numbers = #tpu.dot_dimension_numbers<[1], [0], [0], [1], [0, 0, 1, 1], [], []>} : vector<2x32xf32>, vector<32x128xf32>, vector<2x128xf32> -> vector<2x128xf32>
    %c0_373 = arith.constant 0 : index
    %c0_374 = arith.constant 0 : index
    %1075 = vector.load %arg14[%c0_373, %c0_374] : memref<32x128xf32, #tpu.memory_space<vmem>>, vector<32x128xf32>
    %cst_375 = arith.constant dense<0.000000e+00> : vector<2x128xf32>
    %1076 = tpu.matmul %988, %1075, %cst_375 {dimension_numbers = #tpu.dot_dimension_numbers<[1], [0], [0], [1], [0, 0, 1, 1], [], []>} : vector<2x32xf32>, vector<32x128xf32>, vector<2x128xf32> -> vector<2x128xf32>
    %1077 = arith.addf %1074, %1076 : vector<2x128xf32>
    %c0_376 = arith.constant 0 : index
    %c0_377 = arith.constant 0 : index
    %1078 = vector.load %arg15[%c0_376, %c0_377] : memref<1x128xf32, #tpu.memory_space<vmem>>, vector<1x128xf32>
    %1079 = vector.broadcast %1078 : vector<1x128xf32> to vector<2x128xf32>
    %1080 = arith.addf %1077, %1079 : vector<2x128xf32>
    %1081 = arith.negf %1080 : vector<2x128xf32>
    %1082 = math.exp %1081 : vector<2x128xf32>
    %cst_378 = arith.constant 1.000000e+00 : f32
    %1083 = vector.broadcast %cst_378 : f32 to vector<2x128xf32>
    %1084 = arith.addf %1083, %1082 : vector<2x128xf32>
    %1085 = arith.divf %1083, %1084 : vector<2x128xf32>
    %cst_379 = arith.constant 2.000000e+00 : f32
    %1086 = vector.broadcast %cst_379 : f32 to vector<2x128xf32>
    %1087 = arith.mulf %1086, %1085 : vector<2x128xf32>
    %cst_380 = arith.constant 1.000000e+00 : f32
    %1088 = vector.broadcast %cst_380 : f32 to vector<2x128xf32>
    %1089 = arith.subf %1087, %1088 : vector<2x128xf32>
    %1090 = vector.shape_cast %5 : vector<1x128xi1> to vector<1x128xi1>
    %1091 = vector.broadcast %1090 : vector<1x128xi1> to vector<2x128xi1>
    %1092 = arith.select %1091, %1089, %1085 : vector<2x128xi1>, vector<2x128xf32>
    %1093 = vector.extract_strided_slice %1092 {offsets = [0, 0], sizes = [2, 32], strides = [1, 1]} : vector<2x128xf32> to vector<2x32xf32>
    %1094 = vector.extract_strided_slice %1092 {offsets = [0, 32], sizes = [2, 32], strides = [1, 1]} : vector<2x128xf32> to vector<2x32xf32>
    %1095 = vector.extract_strided_slice %1092 {offsets = [0, 64], sizes = [2, 32], strides = [1, 1]} : vector<2x128xf32> to vector<2x32xf32>
    %1096 = vector.extract_strided_slice %1092 {offsets = [0, 96], sizes = [2, 32], strides = [1, 1]} : vector<2x128xf32> to vector<2x32xf32>
    %1097 = arith.mulf %1094, %986 : vector<2x32xf32>
    %1098 = arith.mulf %1093, %1095 : vector<2x32xf32>
    %1099 = arith.addf %1097, %1098 : vector<2x32xf32>
    %1100 = math.tanh %1099 : vector<2x32xf32>
    %1101 = arith.mulf %1096, %1100 : vector<2x32xf32>
    %1102 = math.tanh %1101 : vector<2x32xf32>
    %c0_381 = arith.constant 0 : index
    %c0_382 = arith.constant 0 : index
    %1103 = vector.load %arg16[%c0_381, %c0_382] : memref<32x64xf32, #tpu.memory_space<vmem>>, vector<32x64xf32>
    %cst_383 = arith.constant dense<0.000000e+00> : vector<2x64xf32>
    %1104 = tpu.matmul %1102, %1103, %cst_383 {dimension_numbers = #tpu.dot_dimension_numbers<[1], [0], [0], [1], [0, 0, 1, 1], [], []>} : vector<2x32xf32>, vector<32x64xf32>, vector<2x64xf32> -> vector<2x64xf32>
    %c0_384 = arith.constant 0 : index
    %c0_385 = arith.constant 0 : index
    %1105 = vector.load %arg17[%c0_384, %c0_385] : memref<16x64xf32, #tpu.memory_space<vmem>>, vector<16x64xf32>
    %cst_386 = arith.constant dense<0.000000e+00> : vector<2x64xf32>
    %1106 = tpu.matmul %1018, %1105, %cst_386 {dimension_numbers = #tpu.dot_dimension_numbers<[1], [0], [0], [1], [0, 0, 1, 1], [], []>} : vector<2x16xf32>, vector<16x64xf32>, vector<2x64xf32> -> vector<2x64xf32>
    %1107 = arith.addf %1104, %1106 : vector<2x64xf32>
    %c0_387 = arith.constant 0 : index
    %c0_388 = arith.constant 0 : index
    %1108 = vector.load %arg18[%c0_387, %c0_388] : memref<1x64xf32, #tpu.memory_space<vmem>>, vector<1x64xf32>
    %1109 = vector.broadcast %1108 : vector<1x64xf32> to vector<2x64xf32>
    %1110 = arith.addf %1107, %1109 : vector<2x64xf32>
    %1111 = arith.negf %1110 : vector<2x64xf32>
    %1112 = math.exp %1111 : vector<2x64xf32>
    %cst_389 = arith.constant 1.000000e+00 : f32
    %1113 = vector.broadcast %cst_389 : f32 to vector<2x64xf32>
    %1114 = arith.addf %1113, %1112 : vector<2x64xf32>
    %1115 = arith.divf %1113, %1114 : vector<2x64xf32>
    %cst_390 = arith.constant 2.000000e+00 : f32
    %1116 = vector.broadcast %cst_390 : f32 to vector<2x64xf32>
    %1117 = arith.mulf %1116, %1115 : vector<2x64xf32>
    %cst_391 = arith.constant 1.000000e+00 : f32
    %1118 = vector.broadcast %cst_391 : f32 to vector<2x64xf32>
    %1119 = arith.subf %1117, %1118 : vector<2x64xf32>
    %1120 = vector.shape_cast %11 : vector<1x64xi1> to vector<1x64xi1>
    %1121 = vector.broadcast %1120 : vector<1x64xi1> to vector<2x64xi1>
    %1122 = arith.select %1121, %1119, %1115 : vector<2x64xi1>, vector<2x64xf32>
    %1123 = vector.extract_strided_slice %1122 {offsets = [0, 0], sizes = [2, 16], strides = [1, 1]} : vector<2x64xf32> to vector<2x16xf32>
    %1124 = vector.extract_strided_slice %1122 {offsets = [0, 16], sizes = [2, 16], strides = [1, 1]} : vector<2x64xf32> to vector<2x16xf32>
    %1125 = vector.extract_strided_slice %1122 {offsets = [0, 32], sizes = [2, 16], strides = [1, 1]} : vector<2x64xf32> to vector<2x16xf32>
    %1126 = vector.extract_strided_slice %1122 {offsets = [0, 48], sizes = [2, 16], strides = [1, 1]} : vector<2x64xf32> to vector<2x16xf32>
    %1127 = arith.mulf %1124, %1016 : vector<2x16xf32>
    %1128 = arith.mulf %1123, %1125 : vector<2x16xf32>
    %1129 = arith.addf %1127, %1128 : vector<2x16xf32>
    %1130 = math.tanh %1129 : vector<2x16xf32>
    %1131 = arith.mulf %1126, %1130 : vector<2x16xf32>
    %c0_392 = arith.constant 0 : index
    %c0_393 = arith.constant 0 : index
    %1132 = vector.load %arg19[%c0_392, %c0_393] : memref<16x64xf32, #tpu.memory_space<vmem>>, vector<16x64xf32>
    %cst_394 = arith.constant dense<0.000000e+00> : vector<2x64xf32>
    %1133 = tpu.matmul %1131, %1132, %cst_394 {dimension_numbers = #tpu.dot_dimension_numbers<[1], [0], [0], [1], [0, 0, 1, 1], [], []>} : vector<2x16xf32>, vector<16x64xf32>, vector<2x64xf32> -> vector<2x64xf32>
    %c0_395 = arith.constant 0 : index
    %c0_396 = arith.constant 0 : index
    %1134 = vector.load %arg20[%c0_395, %c0_396] : memref<16x64xf32, #tpu.memory_space<vmem>>, vector<16x64xf32>
    %cst_397 = arith.constant dense<0.000000e+00> : vector<2x64xf32>
    %1135 = tpu.matmul %1047, %1134, %cst_397 {dimension_numbers = #tpu.dot_dimension_numbers<[1], [0], [0], [1], [0, 0, 1, 1], [], []>} : vector<2x16xf32>, vector<16x64xf32>, vector<2x64xf32> -> vector<2x64xf32>
    %1136 = arith.addf %1133, %1135 : vector<2x64xf32>
    %c0_398 = arith.constant 0 : index
    %c0_399 = arith.constant 0 : index
    %1137 = vector.load %arg21[%c0_398, %c0_399] : memref<1x64xf32, #tpu.memory_space<vmem>>, vector<1x64xf32>
    %1138 = vector.broadcast %1137 : vector<1x64xf32> to vector<2x64xf32>
    %1139 = arith.addf %1136, %1138 : vector<2x64xf32>
    %1140 = arith.negf %1139 : vector<2x64xf32>
    %1141 = math.exp %1140 : vector<2x64xf32>
    %cst_400 = arith.constant 1.000000e+00 : f32
    %1142 = vector.broadcast %cst_400 : f32 to vector<2x64xf32>
    %1143 = arith.addf %1142, %1141 : vector<2x64xf32>
    %1144 = arith.divf %1142, %1143 : vector<2x64xf32>
    %cst_401 = arith.constant 2.000000e+00 : f32
    %1145 = vector.broadcast %cst_401 : f32 to vector<2x64xf32>
    %1146 = arith.mulf %1145, %1144 : vector<2x64xf32>
    %cst_402 = arith.constant 1.000000e+00 : f32
    %1147 = vector.broadcast %cst_402 : f32 to vector<2x64xf32>
    %1148 = arith.subf %1146, %1147 : vector<2x64xf32>
    %1149 = vector.shape_cast %11 : vector<1x64xi1> to vector<1x64xi1>
    %1150 = vector.broadcast %1149 : vector<1x64xi1> to vector<2x64xi1>
    %1151 = arith.select %1150, %1148, %1144 : vector<2x64xi1>, vector<2x64xf32>
    %1152 = vector.extract_strided_slice %1151 {offsets = [0, 0], sizes = [2, 16], strides = [1, 1]} : vector<2x64xf32> to vector<2x16xf32>
    %1153 = vector.extract_strided_slice %1151 {offsets = [0, 16], sizes = [2, 16], strides = [1, 1]} : vector<2x64xf32> to vector<2x16xf32>
    %1154 = vector.extract_strided_slice %1151 {offsets = [0, 32], sizes = [2, 16], strides = [1, 1]} : vector<2x64xf32> to vector<2x16xf32>
    %1155 = vector.extract_strided_slice %1151 {offsets = [0, 48], sizes = [2, 16], strides = [1, 1]} : vector<2x64xf32> to vector<2x16xf32>
    %1156 = arith.mulf %1153, %1045 : vector<2x16xf32>
    %1157 = arith.mulf %1152, %1154 : vector<2x16xf32>
    %1158 = arith.addf %1156, %1157 : vector<2x16xf32>
    %1159 = math.tanh %1158 : vector<2x16xf32>
    %1160 = arith.mulf %1155, %1159 : vector<2x16xf32>
    %1161 = math.tanh %1160 : vector<2x16xf32>
    %c0_403 = arith.constant 0 : index
    %c0_404 = arith.constant 0 : index
    %1162 = vector.load %arg11[%c0_403, %c0_404] : memref<32x128xf32, #tpu.memory_space<vmem>>, vector<32x128xf32>
    %cst_405 = arith.constant dense<0.000000e+00> : vector<2x128xf32>
    %1163 = tpu.matmul %1072, %1162, %cst_405 {dimension_numbers = #tpu.dot_dimension_numbers<[1], [0], [0], [1], [0, 0, 1, 1], [], []>} : vector<2x32xf32>, vector<32x128xf32>, vector<2x128xf32> -> vector<2x128xf32>
    %1164 = arith.addf %475, %1163 : vector<2x128xf32>
    %1165 = arith.negf %1164 : vector<2x128xf32>
    %1166 = math.exp %1165 : vector<2x128xf32>
    %cst_406 = arith.constant 1.000000e+00 : f32
    %1167 = vector.broadcast %cst_406 : f32 to vector<2x128xf32>
    %1168 = arith.addf %1167, %1166 : vector<2x128xf32>
    %1169 = arith.divf %1167, %1168 : vector<2x128xf32>
    %cst_407 = arith.constant 2.000000e+00 : f32
    %1170 = vector.broadcast %cst_407 : f32 to vector<2x128xf32>
    %1171 = arith.mulf %1170, %1169 : vector<2x128xf32>
    %cst_408 = arith.constant 1.000000e+00 : f32
    %1172 = vector.broadcast %cst_408 : f32 to vector<2x128xf32>
    %1173 = arith.subf %1171, %1172 : vector<2x128xf32>
    %1174 = vector.shape_cast %5 : vector<1x128xi1> to vector<1x128xi1>
    %1175 = vector.broadcast %1174 : vector<1x128xi1> to vector<2x128xi1>
    %1176 = arith.select %1175, %1173, %1169 : vector<2x128xi1>, vector<2x128xf32>
    %1177 = vector.extract_strided_slice %1176 {offsets = [0, 0], sizes = [2, 32], strides = [1, 1]} : vector<2x128xf32> to vector<2x32xf32>
    %1178 = vector.extract_strided_slice %1176 {offsets = [0, 32], sizes = [2, 32], strides = [1, 1]} : vector<2x128xf32> to vector<2x32xf32>
    %1179 = vector.extract_strided_slice %1176 {offsets = [0, 64], sizes = [2, 32], strides = [1, 1]} : vector<2x128xf32> to vector<2x32xf32>
    %1180 = vector.extract_strided_slice %1176 {offsets = [0, 96], sizes = [2, 32], strides = [1, 1]} : vector<2x128xf32> to vector<2x32xf32>
    %1181 = arith.mulf %1178, %1070 : vector<2x32xf32>
    %1182 = arith.mulf %1177, %1179 : vector<2x32xf32>
    %1183 = arith.addf %1181, %1182 : vector<2x32xf32>
    %1184 = math.tanh %1183 : vector<2x32xf32>
    %1185 = arith.mulf %1180, %1184 : vector<2x32xf32>
    %c0_409 = arith.constant 0 : index
    %c0_410 = arith.constant 0 : index
    %1186 = vector.load %arg13[%c0_409, %c0_410] : memref<32x128xf32, #tpu.memory_space<vmem>>, vector<32x128xf32>
    %cst_411 = arith.constant dense<0.000000e+00> : vector<2x128xf32>
    %1187 = tpu.matmul %1185, %1186, %cst_411 {dimension_numbers = #tpu.dot_dimension_numbers<[1], [0], [0], [1], [0, 0, 1, 1], [], []>} : vector<2x32xf32>, vector<32x128xf32>, vector<2x128xf32> -> vector<2x128xf32>
    %c0_412 = arith.constant 0 : index
    %c0_413 = arith.constant 0 : index
    %1188 = vector.load %arg14[%c0_412, %c0_413] : memref<32x128xf32, #tpu.memory_space<vmem>>, vector<32x128xf32>
    %cst_414 = arith.constant dense<0.000000e+00> : vector<2x128xf32>
    %1189 = tpu.matmul %1101, %1188, %cst_414 {dimension_numbers = #tpu.dot_dimension_numbers<[1], [0], [0], [1], [0, 0, 1, 1], [], []>} : vector<2x32xf32>, vector<32x128xf32>, vector<2x128xf32> -> vector<2x128xf32>
    %1190 = arith.addf %1187, %1189 : vector<2x128xf32>
    %c0_415 = arith.constant 0 : index
    %c0_416 = arith.constant 0 : index
    %1191 = vector.load %arg15[%c0_415, %c0_416] : memref<1x128xf32, #tpu.memory_space<vmem>>, vector<1x128xf32>
    %1192 = vector.broadcast %1191 : vector<1x128xf32> to vector<2x128xf32>
    %1193 = arith.addf %1190, %1192 : vector<2x128xf32>
    %1194 = arith.negf %1193 : vector<2x128xf32>
    %1195 = math.exp %1194 : vector<2x128xf32>
    %cst_417 = arith.constant 1.000000e+00 : f32
    %1196 = vector.broadcast %cst_417 : f32 to vector<2x128xf32>
    %1197 = arith.addf %1196, %1195 : vector<2x128xf32>
    %1198 = arith.divf %1196, %1197 : vector<2x128xf32>
    %cst_418 = arith.constant 2.000000e+00 : f32
    %1199 = vector.broadcast %cst_418 : f32 to vector<2x128xf32>
    %1200 = arith.mulf %1199, %1198 : vector<2x128xf32>
    %cst_419 = arith.constant 1.000000e+00 : f32
    %1201 = vector.broadcast %cst_419 : f32 to vector<2x128xf32>
    %1202 = arith.subf %1200, %1201 : vector<2x128xf32>
    %1203 = vector.shape_cast %5 : vector<1x128xi1> to vector<1x128xi1>
    %1204 = vector.broadcast %1203 : vector<1x128xi1> to vector<2x128xi1>
    %1205 = arith.select %1204, %1202, %1198 : vector<2x128xi1>, vector<2x128xf32>
    %1206 = vector.extract_strided_slice %1205 {offsets = [0, 0], sizes = [2, 32], strides = [1, 1]} : vector<2x128xf32> to vector<2x32xf32>
    %1207 = vector.extract_strided_slice %1205 {offsets = [0, 32], sizes = [2, 32], strides = [1, 1]} : vector<2x128xf32> to vector<2x32xf32>
    %1208 = vector.extract_strided_slice %1205 {offsets = [0, 64], sizes = [2, 32], strides = [1, 1]} : vector<2x128xf32> to vector<2x32xf32>
    %1209 = vector.extract_strided_slice %1205 {offsets = [0, 96], sizes = [2, 32], strides = [1, 1]} : vector<2x128xf32> to vector<2x32xf32>
    %1210 = arith.mulf %1207, %1099 : vector<2x32xf32>
    %1211 = arith.mulf %1206, %1208 : vector<2x32xf32>
    %1212 = arith.addf %1210, %1211 : vector<2x32xf32>
    %1213 = math.tanh %1212 : vector<2x32xf32>
    %1214 = arith.mulf %1209, %1213 : vector<2x32xf32>
    %1215 = math.tanh %1214 : vector<2x32xf32>
    %c0_420 = arith.constant 0 : index
    %c0_421 = arith.constant 0 : index
    %1216 = vector.load %arg16[%c0_420, %c0_421] : memref<32x64xf32, #tpu.memory_space<vmem>>, vector<32x64xf32>
    %cst_422 = arith.constant dense<0.000000e+00> : vector<2x64xf32>
    %1217 = tpu.matmul %1215, %1216, %cst_422 {dimension_numbers = #tpu.dot_dimension_numbers<[1], [0], [0], [1], [0, 0, 1, 1], [], []>} : vector<2x32xf32>, vector<32x64xf32>, vector<2x64xf32> -> vector<2x64xf32>
    %c0_423 = arith.constant 0 : index
    %c0_424 = arith.constant 0 : index
    %1218 = vector.load %arg17[%c0_423, %c0_424] : memref<16x64xf32, #tpu.memory_space<vmem>>, vector<16x64xf32>
    %cst_425 = arith.constant dense<0.000000e+00> : vector<2x64xf32>
    %1219 = tpu.matmul %1131, %1218, %cst_425 {dimension_numbers = #tpu.dot_dimension_numbers<[1], [0], [0], [1], [0, 0, 1, 1], [], []>} : vector<2x16xf32>, vector<16x64xf32>, vector<2x64xf32> -> vector<2x64xf32>
    %1220 = arith.addf %1217, %1219 : vector<2x64xf32>
    %c0_426 = arith.constant 0 : index
    %c0_427 = arith.constant 0 : index
    %1221 = vector.load %arg18[%c0_426, %c0_427] : memref<1x64xf32, #tpu.memory_space<vmem>>, vector<1x64xf32>
    %1222 = vector.broadcast %1221 : vector<1x64xf32> to vector<2x64xf32>
    %1223 = arith.addf %1220, %1222 : vector<2x64xf32>
    %1224 = arith.negf %1223 : vector<2x64xf32>
    %1225 = math.exp %1224 : vector<2x64xf32>
    %cst_428 = arith.constant 1.000000e+00 : f32
    %1226 = vector.broadcast %cst_428 : f32 to vector<2x64xf32>
    %1227 = arith.addf %1226, %1225 : vector<2x64xf32>
    %1228 = arith.divf %1226, %1227 : vector<2x64xf32>
    %cst_429 = arith.constant 2.000000e+00 : f32
    %1229 = vector.broadcast %cst_429 : f32 to vector<2x64xf32>
    %1230 = arith.mulf %1229, %1228 : vector<2x64xf32>
    %cst_430 = arith.constant 1.000000e+00 : f32
    %1231 = vector.broadcast %cst_430 : f32 to vector<2x64xf32>
    %1232 = arith.subf %1230, %1231 : vector<2x64xf32>
    %1233 = vector.shape_cast %11 : vector<1x64xi1> to vector<1x64xi1>
    %1234 = vector.broadcast %1233 : vector<1x64xi1> to vector<2x64xi1>
    %1235 = arith.select %1234, %1232, %1228 : vector<2x64xi1>, vector<2x64xf32>
    %1236 = vector.extract_strided_slice %1235 {offsets = [0, 0], sizes = [2, 16], strides = [1, 1]} : vector<2x64xf32> to vector<2x16xf32>
    %1237 = vector.extract_strided_slice %1235 {offsets = [0, 16], sizes = [2, 16], strides = [1, 1]} : vector<2x64xf32> to vector<2x16xf32>
    %1238 = vector.extract_strided_slice %1235 {offsets = [0, 32], sizes = [2, 16], strides = [1, 1]} : vector<2x64xf32> to vector<2x16xf32>
    %1239 = vector.extract_strided_slice %1235 {offsets = [0, 48], sizes = [2, 16], strides = [1, 1]} : vector<2x64xf32> to vector<2x16xf32>
    %1240 = arith.mulf %1237, %1129 : vector<2x16xf32>
    %1241 = arith.mulf %1236, %1238 : vector<2x16xf32>
    %1242 = arith.addf %1240, %1241 : vector<2x16xf32>
    %1243 = math.tanh %1242 : vector<2x16xf32>
    %1244 = arith.mulf %1239, %1243 : vector<2x16xf32>
    %c0_431 = arith.constant 0 : index
    %c0_432 = arith.constant 0 : index
    %1245 = vector.load %arg19[%c0_431, %c0_432] : memref<16x64xf32, #tpu.memory_space<vmem>>, vector<16x64xf32>
    %cst_433 = arith.constant dense<0.000000e+00> : vector<2x64xf32>
    %1246 = tpu.matmul %1244, %1245, %cst_433 {dimension_numbers = #tpu.dot_dimension_numbers<[1], [0], [0], [1], [0, 0, 1, 1], [], []>} : vector<2x16xf32>, vector<16x64xf32>, vector<2x64xf32> -> vector<2x64xf32>
    %c0_434 = arith.constant 0 : index
    %c0_435 = arith.constant 0 : index
    %1247 = vector.load %arg20[%c0_434, %c0_435] : memref<16x64xf32, #tpu.memory_space<vmem>>, vector<16x64xf32>
    %cst_436 = arith.constant dense<0.000000e+00> : vector<2x64xf32>
    %1248 = tpu.matmul %1160, %1247, %cst_436 {dimension_numbers = #tpu.dot_dimension_numbers<[1], [0], [0], [1], [0, 0, 1, 1], [], []>} : vector<2x16xf32>, vector<16x64xf32>, vector<2x64xf32> -> vector<2x64xf32>
    %1249 = arith.addf %1246, %1248 : vector<2x64xf32>
    %c0_437 = arith.constant 0 : index
    %c0_438 = arith.constant 0 : index
    %1250 = vector.load %arg21[%c0_437, %c0_438] : memref<1x64xf32, #tpu.memory_space<vmem>>, vector<1x64xf32>
    %1251 = vector.broadcast %1250 : vector<1x64xf32> to vector<2x64xf32>
    %1252 = arith.addf %1249, %1251 : vector<2x64xf32>
    %1253 = arith.negf %1252 : vector<2x64xf32>
    %1254 = math.exp %1253 : vector<2x64xf32>
    %cst_439 = arith.constant 1.000000e+00 : f32
    %1255 = vector.broadcast %cst_439 : f32 to vector<2x64xf32>
    %1256 = arith.addf %1255, %1254 : vector<2x64xf32>
    %1257 = arith.divf %1255, %1256 : vector<2x64xf32>
    %cst_440 = arith.constant 2.000000e+00 : f32
    %1258 = vector.broadcast %cst_440 : f32 to vector<2x64xf32>
    %1259 = arith.mulf %1258, %1257 : vector<2x64xf32>
    %cst_441 = arith.constant 1.000000e+00 : f32
    %1260 = vector.broadcast %cst_441 : f32 to vector<2x64xf32>
    %1261 = arith.subf %1259, %1260 : vector<2x64xf32>
    %1262 = vector.shape_cast %11 : vector<1x64xi1> to vector<1x64xi1>
    %1263 = vector.broadcast %1262 : vector<1x64xi1> to vector<2x64xi1>
    %1264 = arith.select %1263, %1261, %1257 : vector<2x64xi1>, vector<2x64xf32>
    %1265 = vector.extract_strided_slice %1264 {offsets = [0, 0], sizes = [2, 16], strides = [1, 1]} : vector<2x64xf32> to vector<2x16xf32>
    %1266 = vector.extract_strided_slice %1264 {offsets = [0, 16], sizes = [2, 16], strides = [1, 1]} : vector<2x64xf32> to vector<2x16xf32>
    %1267 = vector.extract_strided_slice %1264 {offsets = [0, 32], sizes = [2, 16], strides = [1, 1]} : vector<2x64xf32> to vector<2x16xf32>
    %1268 = vector.extract_strided_slice %1264 {offsets = [0, 48], sizes = [2, 16], strides = [1, 1]} : vector<2x64xf32> to vector<2x16xf32>
    %1269 = arith.mulf %1266, %1158 : vector<2x16xf32>
    %1270 = arith.mulf %1265, %1267 : vector<2x16xf32>
    %1271 = arith.addf %1269, %1270 : vector<2x16xf32>
    %1272 = math.tanh %1271 : vector<2x16xf32>
    %1273 = arith.mulf %1268, %1272 : vector<2x16xf32>
    %1274 = math.tanh %1273 : vector<2x16xf32>
    %c0_442 = arith.constant 0 : index
    %c0_443 = arith.constant 0 : index
    %1275 = vector.load %arg11[%c0_442, %c0_443] : memref<32x128xf32, #tpu.memory_space<vmem>>, vector<32x128xf32>
    %cst_444 = arith.constant dense<0.000000e+00> : vector<2x128xf32>
    %1276 = tpu.matmul %1185, %1275, %cst_444 {dimension_numbers = #tpu.dot_dimension_numbers<[1], [0], [0], [1], [0, 0, 1, 1], [], []>} : vector<2x32xf32>, vector<32x128xf32>, vector<2x128xf32> -> vector<2x128xf32>
    %1277 = arith.addf %475, %1276 : vector<2x128xf32>
    %1278 = arith.negf %1277 : vector<2x128xf32>
    %1279 = math.exp %1278 : vector<2x128xf32>
    %cst_445 = arith.constant 1.000000e+00 : f32
    %1280 = vector.broadcast %cst_445 : f32 to vector<2x128xf32>
    %1281 = arith.addf %1280, %1279 : vector<2x128xf32>
    %1282 = arith.divf %1280, %1281 : vector<2x128xf32>
    %cst_446 = arith.constant 2.000000e+00 : f32
    %1283 = vector.broadcast %cst_446 : f32 to vector<2x128xf32>
    %1284 = arith.mulf %1283, %1282 : vector<2x128xf32>
    %cst_447 = arith.constant 1.000000e+00 : f32
    %1285 = vector.broadcast %cst_447 : f32 to vector<2x128xf32>
    %1286 = arith.subf %1284, %1285 : vector<2x128xf32>
    %1287 = vector.shape_cast %5 : vector<1x128xi1> to vector<1x128xi1>
    %1288 = vector.broadcast %1287 : vector<1x128xi1> to vector<2x128xi1>
    %1289 = arith.select %1288, %1286, %1282 : vector<2x128xi1>, vector<2x128xf32>
    %1290 = vector.extract_strided_slice %1289 {offsets = [0, 0], sizes = [2, 32], strides = [1, 1]} : vector<2x128xf32> to vector<2x32xf32>
    %1291 = vector.extract_strided_slice %1289 {offsets = [0, 32], sizes = [2, 32], strides = [1, 1]} : vector<2x128xf32> to vector<2x32xf32>
    %1292 = vector.extract_strided_slice %1289 {offsets = [0, 64], sizes = [2, 32], strides = [1, 1]} : vector<2x128xf32> to vector<2x32xf32>
    %1293 = vector.extract_strided_slice %1289 {offsets = [0, 96], sizes = [2, 32], strides = [1, 1]} : vector<2x128xf32> to vector<2x32xf32>
    %1294 = arith.mulf %1291, %1183 : vector<2x32xf32>
    %1295 = arith.mulf %1290, %1292 : vector<2x32xf32>
    %1296 = arith.addf %1294, %1295 : vector<2x32xf32>
    %1297 = math.tanh %1296 : vector<2x32xf32>
    %1298 = arith.mulf %1293, %1297 : vector<2x32xf32>
    %c0_448 = arith.constant 0 : index
    %c0_449 = arith.constant 0 : index
    %1299 = vector.load %arg13[%c0_448, %c0_449] : memref<32x128xf32, #tpu.memory_space<vmem>>, vector<32x128xf32>
    %cst_450 = arith.constant dense<0.000000e+00> : vector<2x128xf32>
    %1300 = tpu.matmul %1298, %1299, %cst_450 {dimension_numbers = #tpu.dot_dimension_numbers<[1], [0], [0], [1], [0, 0, 1, 1], [], []>} : vector<2x32xf32>, vector<32x128xf32>, vector<2x128xf32> -> vector<2x128xf32>
    %c0_451 = arith.constant 0 : index
    %c0_452 = arith.constant 0 : index
    %1301 = vector.load %arg14[%c0_451, %c0_452] : memref<32x128xf32, #tpu.memory_space<vmem>>, vector<32x128xf32>
    %cst_453 = arith.constant dense<0.000000e+00> : vector<2x128xf32>
    %1302 = tpu.matmul %1214, %1301, %cst_453 {dimension_numbers = #tpu.dot_dimension_numbers<[1], [0], [0], [1], [0, 0, 1, 1], [], []>} : vector<2x32xf32>, vector<32x128xf32>, vector<2x128xf32> -> vector<2x128xf32>
    %1303 = arith.addf %1300, %1302 : vector<2x128xf32>
    %c0_454 = arith.constant 0 : index
    %c0_455 = arith.constant 0 : index
    %1304 = vector.load %arg15[%c0_454, %c0_455] : memref<1x128xf32, #tpu.memory_space<vmem>>, vector<1x128xf32>
    %1305 = vector.broadcast %1304 : vector<1x128xf32> to vector<2x128xf32>
    %1306 = arith.addf %1303, %1305 : vector<2x128xf32>
    %1307 = arith.negf %1306 : vector<2x128xf32>
    %1308 = math.exp %1307 : vector<2x128xf32>
    %cst_456 = arith.constant 1.000000e+00 : f32
    %1309 = vector.broadcast %cst_456 : f32 to vector<2x128xf32>
    %1310 = arith.addf %1309, %1308 : vector<2x128xf32>
    %1311 = arith.divf %1309, %1310 : vector<2x128xf32>
    %cst_457 = arith.constant 2.000000e+00 : f32
    %1312 = vector.broadcast %cst_457 : f32 to vector<2x128xf32>
    %1313 = arith.mulf %1312, %1311 : vector<2x128xf32>
    %cst_458 = arith.constant 1.000000e+00 : f32
    %1314 = vector.broadcast %cst_458 : f32 to vector<2x128xf32>
    %1315 = arith.subf %1313, %1314 : vector<2x128xf32>
    %1316 = vector.shape_cast %5 : vector<1x128xi1> to vector<1x128xi1>
    %1317 = vector.broadcast %1316 : vector<1x128xi1> to vector<2x128xi1>
    %1318 = arith.select %1317, %1315, %1311 : vector<2x128xi1>, vector<2x128xf32>
    %1319 = vector.extract_strided_slice %1318 {offsets = [0, 0], sizes = [2, 32], strides = [1, 1]} : vector<2x128xf32> to vector<2x32xf32>
    %1320 = vector.extract_strided_slice %1318 {offsets = [0, 32], sizes = [2, 32], strides = [1, 1]} : vector<2x128xf32> to vector<2x32xf32>
    %1321 = vector.extract_strided_slice %1318 {offsets = [0, 64], sizes = [2, 32], strides = [1, 1]} : vector<2x128xf32> to vector<2x32xf32>
    %1322 = vector.extract_strided_slice %1318 {offsets = [0, 96], sizes = [2, 32], strides = [1, 1]} : vector<2x128xf32> to vector<2x32xf32>
    %1323 = arith.mulf %1320, %1212 : vector<2x32xf32>
    %1324 = arith.mulf %1319, %1321 : vector<2x32xf32>
    %1325 = arith.addf %1323, %1324 : vector<2x32xf32>
    %1326 = math.tanh %1325 : vector<2x32xf32>
    %1327 = arith.mulf %1322, %1326 : vector<2x32xf32>
    %1328 = math.tanh %1327 : vector<2x32xf32>
    %c0_459 = arith.constant 0 : index
    %c0_460 = arith.constant 0 : index
    %1329 = vector.load %arg16[%c0_459, %c0_460] : memref<32x64xf32, #tpu.memory_space<vmem>>, vector<32x64xf32>
    %cst_461 = arith.constant dense<0.000000e+00> : vector<2x64xf32>
    %1330 = tpu.matmul %1328, %1329, %cst_461 {dimension_numbers = #tpu.dot_dimension_numbers<[1], [0], [0], [1], [0, 0, 1, 1], [], []>} : vector<2x32xf32>, vector<32x64xf32>, vector<2x64xf32> -> vector<2x64xf32>
    %c0_462 = arith.constant 0 : index
    %c0_463 = arith.constant 0 : index
    %1331 = vector.load %arg17[%c0_462, %c0_463] : memref<16x64xf32, #tpu.memory_space<vmem>>, vector<16x64xf32>
    %cst_464 = arith.constant dense<0.000000e+00> : vector<2x64xf32>
    %1332 = tpu.matmul %1244, %1331, %cst_464 {dimension_numbers = #tpu.dot_dimension_numbers<[1], [0], [0], [1], [0, 0, 1, 1], [], []>} : vector<2x16xf32>, vector<16x64xf32>, vector<2x64xf32> -> vector<2x64xf32>
    %1333 = arith.addf %1330, %1332 : vector<2x64xf32>
    %c0_465 = arith.constant 0 : index
    %c0_466 = arith.constant 0 : index
    %1334 = vector.load %arg18[%c0_465, %c0_466] : memref<1x64xf32, #tpu.memory_space<vmem>>, vector<1x64xf32>
    %1335 = vector.broadcast %1334 : vector<1x64xf32> to vector<2x64xf32>
    %1336 = arith.addf %1333, %1335 : vector<2x64xf32>
    %1337 = arith.negf %1336 : vector<2x64xf32>
    %1338 = math.exp %1337 : vector<2x64xf32>
    %cst_467 = arith.constant 1.000000e+00 : f32
    %1339 = vector.broadcast %cst_467 : f32 to vector<2x64xf32>
    %1340 = arith.addf %1339, %1338 : vector<2x64xf32>
    %1341 = arith.divf %1339, %1340 : vector<2x64xf32>
    %cst_468 = arith.constant 2.000000e+00 : f32
    %1342 = vector.broadcast %cst_468 : f32 to vector<2x64xf32>
    %1343 = arith.mulf %1342, %1341 : vector<2x64xf32>
    %cst_469 = arith.constant 1.000000e+00 : f32
    %1344 = vector.broadcast %cst_469 : f32 to vector<2x64xf32>
    %1345 = arith.subf %1343, %1344 : vector<2x64xf32>
    %1346 = vector.shape_cast %11 : vector<1x64xi1> to vector<1x64xi1>
    %1347 = vector.broadcast %1346 : vector<1x64xi1> to vector<2x64xi1>
    %1348 = arith.select %1347, %1345, %1341 : vector<2x64xi1>, vector<2x64xf32>
    %1349 = vector.extract_strided_slice %1348 {offsets = [0, 0], sizes = [2, 16], strides = [1, 1]} : vector<2x64xf32> to vector<2x16xf32>
    %1350 = vector.extract_strided_slice %1348 {offsets = [0, 16], sizes = [2, 16], strides = [1, 1]} : vector<2x64xf32> to vector<2x16xf32>
    %1351 = vector.extract_strided_slice %1348 {offsets = [0, 32], sizes = [2, 16], strides = [1, 1]} : vector<2x64xf32> to vector<2x16xf32>
    %1352 = vector.extract_strided_slice %1348 {offsets = [0, 48], sizes = [2, 16], strides = [1, 1]} : vector<2x64xf32> to vector<2x16xf32>
    %1353 = arith.mulf %1350, %1242 : vector<2x16xf32>
    %1354 = arith.mulf %1349, %1351 : vector<2x16xf32>
    %1355 = arith.addf %1353, %1354 : vector<2x16xf32>
    %1356 = math.tanh %1355 : vector<2x16xf32>
    %1357 = arith.mulf %1352, %1356 : vector<2x16xf32>
    %c0_470 = arith.constant 0 : index
    %c0_471 = arith.constant 0 : index
    %1358 = vector.load %arg19[%c0_470, %c0_471] : memref<16x64xf32, #tpu.memory_space<vmem>>, vector<16x64xf32>
    %cst_472 = arith.constant dense<0.000000e+00> : vector<2x64xf32>
    %1359 = tpu.matmul %1357, %1358, %cst_472 {dimension_numbers = #tpu.dot_dimension_numbers<[1], [0], [0], [1], [0, 0, 1, 1], [], []>} : vector<2x16xf32>, vector<16x64xf32>, vector<2x64xf32> -> vector<2x64xf32>
    %c0_473 = arith.constant 0 : index
    %c0_474 = arith.constant 0 : index
    %1360 = vector.load %arg20[%c0_473, %c0_474] : memref<16x64xf32, #tpu.memory_space<vmem>>, vector<16x64xf32>
    %cst_475 = arith.constant dense<0.000000e+00> : vector<2x64xf32>
    %1361 = tpu.matmul %1273, %1360, %cst_475 {dimension_numbers = #tpu.dot_dimension_numbers<[1], [0], [0], [1], [0, 0, 1, 1], [], []>} : vector<2x16xf32>, vector<16x64xf32>, vector<2x64xf32> -> vector<2x64xf32>
    %1362 = arith.addf %1359, %1361 : vector<2x64xf32>
    %c0_476 = arith.constant 0 : index
    %c0_477 = arith.constant 0 : index
    %1363 = vector.load %arg21[%c0_476, %c0_477] : memref<1x64xf32, #tpu.memory_space<vmem>>, vector<1x64xf32>
    %1364 = vector.broadcast %1363 : vector<1x64xf32> to vector<2x64xf32>
    %1365 = arith.addf %1362, %1364 : vector<2x64xf32>
    %1366 = arith.negf %1365 : vector<2x64xf32>
    %1367 = math.exp %1366 : vector<2x64xf32>
    %cst_478 = arith.constant 1.000000e+00 : f32
    %1368 = vector.broadcast %cst_478 : f32 to vector<2x64xf32>
    %1369 = arith.addf %1368, %1367 : vector<2x64xf32>
    %1370 = arith.divf %1368, %1369 : vector<2x64xf32>
    %cst_479 = arith.constant 2.000000e+00 : f32
    %1371 = vector.broadcast %cst_479 : f32 to vector<2x64xf32>
    %1372 = arith.mulf %1371, %1370 : vector<2x64xf32>
    %cst_480 = arith.constant 1.000000e+00 : f32
    %1373 = vector.broadcast %cst_480 : f32 to vector<2x64xf32>
    %1374 = arith.subf %1372, %1373 : vector<2x64xf32>
    %1375 = vector.shape_cast %11 : vector<1x64xi1> to vector<1x64xi1>
    %1376 = vector.broadcast %1375 : vector<1x64xi1> to vector<2x64xi1>
    %1377 = arith.select %1376, %1374, %1370 : vector<2x64xi1>, vector<2x64xf32>
    %1378 = vector.extract_strided_slice %1377 {offsets = [0, 0], sizes = [2, 16], strides = [1, 1]} : vector<2x64xf32> to vector<2x16xf32>
    %1379 = vector.extract_strided_slice %1377 {offsets = [0, 16], sizes = [2, 16], strides = [1, 1]} : vector<2x64xf32> to vector<2x16xf32>
    %1380 = vector.extract_strided_slice %1377 {offsets = [0, 32], sizes = [2, 16], strides = [1, 1]} : vector<2x64xf32> to vector<2x16xf32>
    %1381 = vector.extract_strided_slice %1377 {offsets = [0, 48], sizes = [2, 16], strides = [1, 1]} : vector<2x64xf32> to vector<2x16xf32>
    %1382 = arith.mulf %1379, %1271 : vector<2x16xf32>
    %1383 = arith.mulf %1378, %1380 : vector<2x16xf32>
    %1384 = arith.addf %1382, %1383 : vector<2x16xf32>
    %1385 = math.tanh %1384 : vector<2x16xf32>
    %1386 = arith.mulf %1381, %1385 : vector<2x16xf32>
    %1387 = math.tanh %1386 : vector<2x16xf32>
    %1388 = tpu.concatenate %596, %709, %822, %935, %1048, %1161, %1274, %1387 in 1 : vector<2x16xf32>, vector<2x16xf32>, vector<2x16xf32>, vector<2x16xf32>, vector<2x16xf32>, vector<2x16xf32>, vector<2x16xf32>, vector<2x16xf32> -> vector<2x128xf32>
    %c0_481 = arith.constant 0 : index
    %c0_482 = arith.constant 0 : index
    %1389 = vector.load %arg22[%c0_481, %c0_482] : memref<2x128xf32, #tpu.memory_space<vmem>>, vector<2x128xf32>
    tpu.vector_store %arg22[%c0_481, %c0_482], %1388 {strides = array<i32>} : memref<2x128xf32, #tpu.memory_space<vmem>>, vector<2x128xf32>,
    return
  }
}

</mosaic_0001>

<bundles_post_ra>
// kernel: lstmvae_forward.1
= control target key start
LH: loop header
LB: loop body
LE: loop exit
PB: predicated region body
PF: predicated region fallthrough
CT: control target
= control target key end

     0   :  { %s11794_s0 = inlined_call_operand.vmem [shape: f32[16,4], index: 0, kind: input, shape index: {}]   ;;  %s11795_s1 = inlined_call_operand.vmem [shape: f32[2,8], index: 1, kind: input, shape index: {}]   ;;  %s11796_s2 = inlined_call_operand.vmem [shape: f32[4,128], index: 2, kind: input, shape index: {}]   ;;  %s11797_s3 = inlined_call_operand.vmem [shape: f32[32,128], index: 3, kind: input, shape index: {}]   ;;  %s11798_s4 = inlined_call_operand.vmem [shape: f32[1,128], index: 4, kind: input, shape index: {}]   ;;  %s11799_s5 = inlined_call_operand.vmem [shape: f32[32,128], index: 5, kind: input, shape index: {}]   ;;  %s11800_s6 = inlined_call_operand.vmem [shape: f32[32,128], index: 6, kind: input, shape index: {}]   ;;  %s11801_s7 = inlined_call_operand.vmem [shape: f32[1,128], index: 7, kind: input, shape index: {}]   ;;  %s11802_s8 = inlined_call_operand.vmem [shape: f32[32,16], index: 8, kind: input, shape index: {}]   ;;  %s11803_s9 = inlined_call_operand.hbm [shape: f32[1,16], index: 9, kind: input, shape index: {}]   ;;  %s11804_s10 = inlined_call_operand.hbm [shape: f32[8,128], index: 10, kind: input, shape index: {}]   ;;  %s11805_s11 = inlined_call_operand.vmem [shape: f32[32,128], index: 11, kind: input, shape index: {}]   ;;  %s11806_s12 = inlined_call_operand.hbm [shape: f32[1,128], index: 12, kind: input, shape index: {}]   ;;  %s11807_s13 = inlined_call_operand.vmem [shape: f32[32,128], index: 13, kind: input, shape index: {}]   ;;  %s11808_s14 = inlined_call_operand.vmem [shape: f32[32,128], index: 14, kind: input, shape index: {}]   ;;  %s11809_s15 = inlined_call_operand.hbm [shape: f32[1,128], index: 15, kind: input, shape index: {}]   ;;  %s11810_s16 = inlined_call_operand.hbm [shape: f32[32,64], index: 16, kind: input, shape index: {}]   ;;  %s11811_s17 = inlined_call_operand.hbm [shape: f32[16,64], index: 17, kind: input, shape index: {}]   ;;  %s11812_s18 = inlined_call_operand.hbm [shape: f32[1,64], index: 18, kind: input, shape index: {}]   ;;  %s11813_s19 = inlined_call_operand.hbm [shape: f32[16,64], index: 19, kind: input, shape index: {}]   ;;  %s11814_s20 = inlined_call_operand.hbm [shape: f32[16,64], index: 20, kind: input, shape index: {}]   ;;  %s11815_s21 = inlined_call_operand.hbm [shape: f32[1,64], index: 21, kind: input, shape index: {}]   ;;  %s11816_s22 = inlined_call_operand.vmem [shape: f32[2,128], index: 22, kind: output, shape index: {0}]   ;;  %s11817_s23 = inlined_call_operand.vmem [shape: f32[2,16], index: 23, kind: output, shape index: {1}]  }
   0x1   :  { %11823 = sst [smem:[#allocation24_spill]] %s11794_s0 }
   0x2   :  { %11824 = sst [smem:[#allocation25_spill]] %s11795_s1 }
   0x3   :  { %11825 = sst [smem:[#allocation26_spill]] %s11796_s2 }
   0x4   :  { %11826 = sst [smem:[#allocation27_spill]] %s11797_s3 }
   0x5   :  { %11827 = sst [smem:[#allocation28_spill]] %s11798_s4 }
   0x6   :  { %11828 = sst [smem:[#allocation29_spill]] %s11799_s5 }
   0x7   :  { %11829 = sst [smem:[#allocation30_spill]] %s11800_s6 }
   0x8   :  { %11830 = sst [smem:[#allocation31_spill]] %s11801_s7 }
   0x9   :  { %29 = vsyncpa [#allocation3], 0 }
   0xa   :  { %30 = vsyncpa [#allocation5], 0 }
   0xb   :  { %31 = vsyncpa [#allocation8], 0 }
   0xc   :  { %32 = vsyncpa [#allocation11], 0 }
   0xd   :  { %33 = vsyncpa [#allocation14], 0 }
   0xe   :  { %34 = vsyncpa [#allocation17], 0  ;;  %s9807_s4 = smov [#allocation4]   ;;  %s9808_s24 = smov [#allocation7]  }
   0xf   :  { %s69_s30 = sshll.u32 %s9807_s4, 4  ;;  %s95_s25 = sshll.u32 %s9808_s24, 4  ;;  %s70_s30 = int_to_ptr.vmem [resolvable:$true] %s69_s30  ;;  %s96_s25 = int_to_ptr.vmem [resolvable:$true] %s95_s25 }
  0x10   :  { %s9603_s5 = scalar_lea.vmem %s70_s30, 128  ;;  %p9608_p1 = scmp.lt.s32.totalorder %s70_s30, %s70_s30 }
  0x11   :  { %p9604_p0 = scmp.ne.s32.totalorder %s70_s30, %s9603_s5  ;;  %p9609_p2 = scmp.lt.s32.totalorder %s9603_s5, %s9603_s5 }
  0x13   :  { %p9610_p3 = por %p9609_p2, %p9608_p1 }
  0x15   :  { %p9611_p4 = pnand %p9610_p3, %p9604_p0 }
  0x17   :  { %9614 = shalt.err (!%p9611_p4)
}
  0x18   :  { %72 = dma.hbm_to_vmem [thread:$0]  %s11804_s10, 128, %s70_s30, [#allocation5]  }
  0x19   :  { %s9623_s2 = scalar_lea.vmem %s96_s25, 16  ;;  %s9627_s6 = scalar_lea.vmem %s96_s25, 32 }
  0x1a   :  { %p9624_p5 = scmp.ne.s32.totalorder %s96_s25, %s9623_s2  ;;  %p9628_p6 = scmp.lt.s32.totalorder %s96_s25, %s96_s25 }
  0x1b   :  { %p9629_p7 = scmp.lt.s32.totalorder %s9627_s6, %s9623_s2 }
  0x1d   :  { %p9630_p8 = por %p9629_p7, %p9628_p6 }
  0x1f   :  { %p9631_p9 = pnand %p9630_p8, %p9624_p5 }
  0x21   :  { %9634 = shalt.err (!%p9631_p9)
}
  0x22   :  { %98 = dma.hbm_to_vmem [thread:$0]  %s11809_s15, 16, %s96_s25, [#allocation8]  }
  0x23   :  { %s9809_s28 = smov [#allocation10]   ;;  %s9810_s3 = smov [#allocation13]  }
  0x24   :  { %s116_s29 = sshll.u32 %s9809_s28, 4  ;;  %s138_s0 = sshll.u32 %s9810_s3, 4  ;;  %s117_s29 = int_to_ptr.vmem [resolvable:$true] %s116_s29  ;;  %s139_s0 = int_to_ptr.vmem [resolvable:$true] %s138_s0 }
  0x25   :  { %s9643_s4 = scalar_lea.vmem %s117_s29, 256  ;;  %p9648_p11 = scmp.lt.s32.totalorder %s117_s29, %s117_s29 }
  0x26   :  { %p9644_p10 = scmp.ne.s32.totalorder %s117_s29, %s9643_s4  ;;  %p9649_p12 = scmp.lt.s32.totalorder %s9643_s4, %s9643_s4 }
  0x28   :  { %p9650_p13 = por %p9649_p12, %p9648_p11 }
  0x2a   :  { %p9651_p0 = pnand %p9650_p13, %p9644_p10 }
  0x2c   :  { %9654 = shalt.err (!%p9651_p0)
}
  0x2d   :  { %s9811_s10 = smov 128   ;;  %s9812_s30 = smov 8  }
  0x2e   :  { %122 = dma.hbm_to_vmem [thread:$0]  %s11811_s17, 256, %s117_s29, [#allocation11], %s9811_s10, %s9811_s10, %s9812_s30  }
  0x2f   :  { %s9663_s25 = scalar_lea.vmem %s139_s0, 256  ;;  %p9668_p2 = scmp.lt.s32.totalorder %s139_s0, %s139_s0 }
  0x30   :  { %p9664_p1 = scmp.ne.s32.totalorder %s139_s0, %s9663_s25  ;;  %p9669_p3 = scmp.lt.s32.totalorder %s9663_s25, %s9663_s25 }
  0x32   :  { %p9670_p4 = por %p9669_p3, %p9668_p2 }
  0x34   :  { %p9671_p5 = pnand %p9670_p4, %p9664_p1 }
  0x36   :  { %9674 = shalt.err (!%p9671_p5)
}
  0x37   :  { %144 = dma.hbm_to_vmem [thread:$0]  %s11813_s19, 256, %s139_s0, [#allocation14], %s9811_s10, %s9811_s10, %s9812_s30  }
  0x38   :  { %s9813_s26 = smov [#allocation2]   ;;  %s9814_s6 = smov [#allocation6]  }
  0x39   :  { %s59_s2 = sshll.u32 %s9813_s26, 4  ;;  %s81_s27 = sshll.u32 %s9814_s6, 4  ;;  %s60_s2 = int_to_ptr.vmem [resolvable:$true] %s59_s2  ;;  %s82_s27 = int_to_ptr.vmem [resolvable:$true] %s81_s27 }
  0x3a   :  { %s9683_s17 = scalar_lea.vmem %s60_s2, 16  ;;  %s9687_s7 = scalar_lea.vmem %s60_s2, 32 }
  0x3b   :  { %p9684_p6 = scmp.ne.s32.totalorder %s60_s2, %s9683_s17  ;;  %p9688_p7 = scmp.lt.s32.totalorder %s60_s2, %s60_s2 }
  0x3c   :  { %p9689_p8 = scmp.lt.s32.totalorder %s9687_s7, %s9683_s17 }
  0x3e   :  { %p9690_p9 = por %p9689_p8, %p9688_p7 }
  0x40   :  { %p9691_p10 = pnand %p9690_p9, %p9684_p6 }
  0x42   :  { %9694 = shalt.err (!%p9691_p10)
}
  0x43   :  { %62 = dma.hbm_to_vmem [thread:$0]  %s11803_s9, 16, %s60_s2, [#allocation3]  }
  0x44   :  { %s9703_s3 = scalar_lea.vmem %s82_s27, 16  ;;  %s9707_s19 = scalar_lea.vmem %s82_s27, 32 }
  0x45   :  { %p9704_p11 = scmp.ne.s32.totalorder %s82_s27, %s9703_s3  ;;  %p9708_p12 = scmp.lt.s32.totalorder %s82_s27, %s82_s27 }
  0x46   :  { %p9709_p13 = scmp.lt.s32.totalorder %s9707_s19, %s9703_s3 }
  0x48   :  { %p9710_p0 = por %p9709_p13, %p9708_p12 }
  0x4a   :  { %p9711_p1 = pnand %p9710_p0, %p9704_p11 }
  0x4c   :  { %9714 = shalt.err (!%p9711_p1)
}
  0x4d   :  { %84 = dma.hbm_to_vmem [thread:$0]  %s11806_s12, 16, %s82_s27, [#allocation5]  }
  0x4e   :  { %s9815_s24 = smov [#allocation9]   ;;  %s9816_s25 = smov [#allocation12]  }
  0x4f   :  { %s104_s15 = sshll.u32 %s9815_s24, 4  ;;  %s129_s5 = sshll.u32 %s9816_s25, 4  ;;  %s105_s15 = int_to_ptr.vmem [resolvable:$true] %s104_s15  ;;  %s130_s5 = int_to_ptr.vmem [resolvable:$true] %s129_s5 }
  0x50   :  { %s9723_s1 = scalar_lea.vmem %s105_s15, 512  ;;  %p9728_p3 = scmp.lt.s32.totalorder %s105_s15, %s105_s15 }
  0x51   :  { %p9724_p2 = scmp.ne.s32.totalorder %s105_s15, %s9723_s1  ;;  %p9729_p4 = scmp.lt.s32.totalorder %s9723_s1, %s9723_s1 }
  0x53   :  { %p9730_p5 = por %p9729_p4, %p9728_p3 }
  0x55   :  { %p9731_p6 = pnand %p9730_p5, %p9724_p2 }
  0x57   :  { %9734 = shalt.err (!%p9731_p6)
}
  0x58   :  { %110 = dma.hbm_to_vmem [thread:$0]  %s11810_s16, 512, %s105_s15, [#allocation8], %s9811_s10, %s9811_s10, %s9812_s30  }
  0x59   :  { %s9743_s12 = scalar_lea.vmem %s130_s5, 16  ;;  %s9747_s2 = scalar_lea.vmem %s130_s5, 32 }
  0x5a   :  { %p9744_p7 = scmp.ne.s32.totalorder %s130_s5, %s9743_s12  ;;  %p9748_p8 = scmp.lt.s32.totalorder %s130_s5, %s130_s5 }
  0x5b   :  { %p9749_p9 = scmp.lt.s32.totalorder %s9747_s2, %s9743_s12 }
  0x5d   :  { %p9750_p10 = por %p9749_p9, %p9748_p8 }
  0x5f   :  { %p9751_p11 = pnand %p9750_p10, %p9744_p7 }
  0x61   :  { %9754 = shalt.err (!%p9751_p11)
}
  0x62   :  { %132 = dma.hbm_to_vmem [thread:$0]  %s11812_s18, 16, %s130_s5, [#allocation11]  }
  0x63   :  { %s9817_s17 = smov [#allocation15]   ;;  %s9818_s28 = smov [#allocation16]  }
  0x64   :  { %s150_s7 = sshll.u32 %s9817_s17, 4  ;;  %s163_s29 = sshll.u32 %s9818_s28, 4  ;;  %s151_s7 = int_to_ptr.vmem [resolvable:$true] %s150_s7  ;;  %s164_s29 = int_to_ptr.vmem [resolvable:$true] %s163_s29 }
  0x65   :  { %s9763_s3 = scalar_lea.vmem %s151_s7, 256  ;;  %p9768_p13 = scmp.lt.s32.totalorder %s151_s7, %s151_s7 }
  0x66   :  { %p9764_p12 = scmp.ne.s32.totalorder %s151_s7, %s9763_s3  ;;  %p9769_p0 = scmp.lt.s32.totalorder %s9763_s3, %s9763_s3 }
  0x68   :  { %p9770_p1 = por %p9769_p0, %p9768_p13 }
  0x6a   :  { %p9771_p2 = pnand %p9770_p1, %p9764_p12 }
  0x6c   :  { %9774 = shalt.err (!%p9771_p2)
}
  0x6d   :  { %156 = dma.hbm_to_vmem [thread:$0]  %s11814_s20, 256, %s151_s7, [#allocation14], %s9811_s10, %s9811_s10, %s9812_s30  }
  0x6e   :  { %s9783_s18 = scalar_lea.vmem %s164_s29, 16  ;;  %s9787_s0 = scalar_lea.vmem %s164_s29, 32 }
  0x6f   :  { %p9784_p3 = scmp.ne.s32.totalorder %s164_s29, %s9783_s18  ;;  %p9788_p4 = scmp.lt.s32.totalorder %s164_s29, %s164_s29 }
  0x70   :  { %p9789_p5 = scmp.lt.s32.totalorder %s9787_s0, %s9783_s18 }
  0x72   :  { %p9790_p6 = por %p9789_p5, %p9788_p4 }
  0x74   :  { %p9791_p7 = pnand %p9790_p6, %p9784_p3 }
  0x76   :  { %9794 = shalt.err (!%p9791_p7)
}
  0x77   :  { %166 = dma.hbm_to_vmem [thread:$0]  %s11815_s21, 16, %s164_s29, [#allocation17]  }
  0x78   :  { %9795 = dma.done.wait [#allocation3], 16  }
  0x79   :  { %9796 = vsyncadd [#allocation3], 4294967280 }
  0x7a   :  { %9797 = dma.done.wait [#allocation5], 144  }
  0x7b   :  { %9798 = vsyncadd [#allocation5], 4294967152 }
  0x7c   :  { %9799 = dma.done.wait [#allocation8], 528  }
  0x7d   :  { %9800 = vsyncadd [#allocation8], 4294966768 }
  0x7e   :  { %9801 = dma.done.wait [#allocation11], 272  }
  0x7f   :  { %9802 = vsyncadd [#allocation11], 4294967024 }
  0x80   :  { %9803 = dma.done.wait [#allocation14], 512  }
  0x81   :  { %9804 = vsyncadd [#allocation14], 4294966784 }
  0x82   :  { %9805 = dma.done.wait [#allocation17], 16  }
  0x83   :  { %9806 = vsyncadd [#allocation17], 4294967280  ;;  %v9819_v0 = vmov 0.0   ;;  %vm9820_vm0 = vmmov 0   ;;  %vm222_vm1 = vcmask 1043456   ;;  %vm215_vm2 = vcmask 31744  }
  0x84   :  { %8386 = vmatprep.subr.mxu1 %v9819_v0  ;;  %8394 = vmatprep.mubr.msk.f32.mxu1 %vm9820_vm0, %v9819_v0  ;;  %s11831_s10 = sld [smem:[#allocation26_spill]]  ;;  %v197_v19 = vlaneseq  ;;  %s9821_s18 = smov 64   ;;  %vm305_vm6 = vcmask 261120   ;;  %vm2646_vm7 = vcmask 123904   ;;  %vm2670_vm8 = vcmask 64512  }
  0x85   :  { %s11832_s5 = sld [smem:[#allocation27_spill]]  ;;  %s9822_s0 = smov 32   ;;  %vm3039_vm12 = vcmask 130048   ;;  %vm7812_vm13 = vcmask 392192   ;;  %vm7814_vm14 = vcmask 523264   ;;  %vm7816_vm15 = vcmask 654336  }
  0x86   :  { %s11833_s26 = sld [smem:[#allocation24_spill]]  ;;  %v10045_v20 = vand.u32 127, %v197_v19  ;;  %s9823_s28 = smov 120  }
  0x87   :  { %s11834_s19 = sld [smem:[#allocation28_spill]]  ;;  %s9825_s29 = smov 16  }
  0x88   :  { %vm199_vm3 = vcmp.ge.s32.totalorder %v10045_v20, 64  ;;  %vm200_vm4 = vcmp.lt.s32.totalorder %v10045_v20, 96  ;;  %s11837_s20 = sld [smem:[#allocation30_spill]]  ;;  %vm202_vm9 = vcmp.ge.s32.totalorder %v10045_v20, 32  ;;  %vm203_vm10 = vcmp.lt.s32.totalorder %v10045_v20, 48  ;;  %s9826_s3 = smov 80  }
  0x89   :  { %vm10049_vm5 = vmand %vm199_vm3, %vm200_vm4  ;;  %s11838_s1 = sld [smem:[#allocation29_spill]] }
  0x8a   :  { %v207_v1 = vld [vmem:[%s11831_s10] sm:$0xf]  ;;  %s11840_s7 = sld [smem:[#allocation25_spill]]  ;;  %vm10763_vm11 = vmand %vm202_vm9, %vm203_vm10 }
  0x8b   :  { %v10000_v2 = vld [vmem:[%s11832_s5 + $0x18] sm:$0xff]  ;;  %8381 = vmatprep.subr.msk.mxu0 %vm222_vm1, %v207_v1  ;;  %v10012_v5 = vld [vmem:[%s11832_s5 + $0x10] sm:$0xff]  ;;  %v10018_v6 = vld [vmem:[%s11832_s5 + $0x8] sm:$0xff] }
  0x8c   :  { %v205_v3 = vld [vmem:[%s11833_s26] sm:$0xff]  ;;  %8387 = vmatpush3.msra.mxu1 %v10000_v2  ;;  %v206_v4 = vld [vmem:[%s11833_s26 + $0x8] sm:$0xff]  ;;  %8382 = vmatpush3.msk.msra.mxu0 %vm222_vm1, %v207_v1  ;;  %vm7820_vm1 = vcmask 916480  }
  0x8d   :  { %8383 = vmatprep.mubr.msk.f32.mxu0 %vm215_vm2, %v205_v3  ;;  %8388 = vmatprep.subr.mxu1 %v9819_v0  ;;  %v10026_v7 = vld [vmem:[%s11832_s5] sm:$0xff] }
  0x8e   :  { %8384 = vmatmul.mubr.msk.f32.vlgmr.msra.gmra.mxu0 %vm215_vm2, %v206_v4  ;;  %8389 = vmatpush3.msra.mxu1 %v10012_v5  ;;  %v7837_v8 = vld [vmem:[%s11834_s19] ss:$0 sm:$0xff]  ;;  %v10063_v31 = vld [vmem:[%s11837_s20 + $0x18] sm:$0xff]  ;;  %v10068_v32 = vld [vmem:[%s11837_s20 + $0x10] sm:$0xff]  ;;  %s11839_s19 = sld [smem:[#allocation31_spill]] }
  0x8f   :  { %8397 = vmatprep.subr.mxu0 %v9819_v0  ;;  %8390 = vmatprep.subr.mxu1 %v9819_v0  ;;  %v10074_v33 = vld [vmem:[%s11838_s1 + $0x18] sm:$0xff]  ;;  %v10079_v34 = vld [vmem:[%s11838_s1 + $0x10] sm:$0xff]  ;;  %v10085_v35 = vld [vmem:[%s11837_s20 + $0x8] sm:$0xff] }
  0x90   :  { %8405 = vmatprep.mubr.msk.f32.mxu0 %vm9820_vm0, %v9819_v0  ;;  %8391 = vmatpush3.msra.mxu1 %v10018_v6  ;;  %v10093_v36 = vld [vmem:[%s11838_s1 + $0x8] sm:$0xff]  ;;  %v10099_v37 = vld [vmem:[%s11837_s20] sm:$0xff] }
  0x91   :  { %8392 = vmatprep.subr.mxu1 %v9819_v0  ;;  %8398 = vmatpush3.msra.mxu0 %v10063_v31  ;;  %v10109_v38 = vld [vmem:[%s11838_s1] sm:$0xff] }
  0x92   :  { %8393 = vmatpush3.msra.mxu1 %v10026_v7  ;;  %8399 = vmatprep.subr.mxu0 %v9819_v0 }
  0x93   :  { %8395 = vmatmul.mubr.f32.vlgmr.msra.gmra.mxu1 %v9819_v0  ;;  %8408 = vmatprep.subr.mxu1 %v9819_v0 }
  0x94   :  { %8416 = vmatprep.mubr.msk.f32.mxu1 %vm9820_vm0, %v9819_v0  ;;  %8409 = vmatpush3.msra.mxu1 %v10074_v33  ;;  %v10154_v46 = vld [vmem:[%s11839_s19] ss:$0 sm:$0xff] }
  0x95   :  { %8400 = vmatpush3.msra.mxu0 %v10068_v32  ;;  %8410 = vmatprep.subr.mxu1 %v9819_v0 }
  0x96   :  { %8401 = vmatprep.subr.mxu0 %v9819_v0  ;;  %8411 = vmatpush3.msra.mxu1 %v10079_v34 }
  0x97   :  { %8402 = vmatpush3.msra.mxu0 %v10085_v35  ;;  %8412 = vmatprep.subr.mxu1 %v9819_v0 }
  0x98   :  { %8403 = vmatprep.subr.mxu0 %v9819_v0  ;;  %8413 = vmatpush3.msra.mxu1 %v10093_v36 }
  0x99   :  { %8404 = vmatpush3.msra.mxu0 %v10099_v37  ;;  %8414 = vmatprep.subr.mxu1 %v9819_v0 }
  0x9a   :  { %8406 = vmatmul.mubr.f32.vlgmr.msra.gmra.mxu0 %v9819_v0  ;;  %8419 = vmatprep.subr.mxu0 %v9819_v0 }
  0x9b   :  { %8420 = vmatpush3.msra.mxu0 %v10000_v2  ;;  %8415 = vmatpush3.msra.mxu1 %v10109_v38 }
  0x9c   :  { %8421 = vmatprep.subr.mxu0 %v9819_v0  ;;  %8427 = vmatprep.mubr.msk.f32.mxu0 %vm9820_vm0, %v9819_v0 }
  0x9d   :  { %8422 = vmatpush3.msra.mxu0 %v10012_v5  ;;  %8430 = vmatprep.subr.mxu1 %v9819_v0 }
  0x9e   :  { %8423 = vmatprep.subr.mxu0 %v9819_v0 }
  0x9f   :  { %8424 = vmatpush3.msra.mxu0 %v10018_v6 }
  0xa0   :  { %8425 = vmatprep.subr.mxu0 %v9819_v0 }
  0xa1   :  { %8426 = vmatpush3.msra.mxu0 %v10026_v7 }
  0xa2   :  { %8441 = vmatprep.subr.mxu0 %v9819_v0 }
 0x14e   :  { %v8385_v9 = vpop.f32.mrf.mxu0 }
 0x14f   :  { %v10040_v10 = vadd.f32 %v8385_v9, %v7837_v8 }
 0x150   :  { %v292_v11 = vpop.f32.mrf.mxu0 }
 0x151   :  { %v10042_v12 = vadd.f32 %v7837_v8, %v292_v11 }
 0x153   :  { %v375_v13 = vpop.f32.mrf.mxu1 }
 0x154   :  { %v379_v14 = vadd.f32 %v375_v13, %v10042_v12 }
 0x155   :  { %v8396_v15 = vpop.f32.mrf.mxu1 }
 0x156   :  { %v7841_v16 = vmul.f32 -1.442695, %v379_v14 }
 0x158   :  { %9208 = vpow2.f32 %v7841_v16 }
 0x15a   :  { %v482_v42 = vpop.f32.mrf.mxu0 }
 0x15c   :  { %v8407_v43 = vpop.f32.mrf.mxu0 }
 0x165   :  { %v9209_v17 = vpop.eup %9208 }
 0x166   :  { %v383_v18 = vadd.f32 1.0, %v9209_v17 }
 0x168   :  { %9210 = vrcp.f32 %v383_v18 }
 0x175   :  { %v9211_v21 = vpop.eup %9210 }
 0x176   :  { %v386_v22 = vmul.f32 2.0, %v9211_v21 }
 0x178   :  { %v7842_v24 = vadd.f32 -1.0, %v386_v22 }
 0x17a   :  { %v390_v25 = vsel %vm10049_vm5, %v7842_v24, %v9211_v21 }
 0x17b   :  { %393 = vrot.lane.b32.xlu0 %v390_v25, %s9821_s18  ;;  %v391_v28 = vmul.f32 0.0, %v390_v25 }
 0x1ed   :  { %v394_v26 = vpop.permute.xlu0 %393 }
 0x1ee   :  { %v396_v27 = vmul.f32 %v394_v26, %v390_v25 }
 0x1f0   :  { %398 = vrot.lane.b32.xlu0 %v396_v27, %s9822_s0 }
 0x262   :  { %v399_v29 = vpop.permute.xlu0 %398 }
 0x263   :  { %v10057_v30 = vadd.f32 %v399_v29, %v391_v28 }
 0x265   :  { %9212 = vtanh.f32 %v10057_v30  ;;  %v679_v15 = vrot.slane %v10057_v30, 6 }
 0x272   :  { %v9213_v39 = vpop.eup %9212 }
 0x273   :  { %404 = vrot.lane.b32.xlu1 %v9213_v39, %s9821_s18 }
 0x2e5   :  { %v405_v40 = vpop.permute.xlu1 %404 }
 0x2e6   :  { %v407_v41 = vmul.f32 %v405_v40, %v390_v25 }
 0x2e8   :  { %487 = vrot.lane.b32.xlu1 %v407_v41, %s9822_s0 }
 0x35a   :  { %v488_v44 = vpop.permute.xlu1 %487 }
 0x35b   :  { %8417 = vmatmul.mubr.msk.f32.vlgmr.msra.gmra.mxu1 %vm305_vm6, %v488_v44  ;;  %8428 = vmatmul.mubr.msk.f32.vlgmr.msra.gmra.mxu0 %vm305_vm6, %v488_v44 }
 0x35c   :  { %8431 = vmatpush3.msra.mxu1 %v10063_v31  ;;  %8442 = vmatpush3.msra.mxu0 %v10074_v33 }
 0x35d   :  { %8432 = vmatprep.subr.mxu1 %v9819_v0  ;;  %8443 = vmatprep.subr.mxu0 %v9819_v0 }
 0x35e   :  { %8433 = vmatpush3.msra.mxu1 %v10068_v32  ;;  %8444 = vmatpush3.msra.mxu0 %v10079_v34 }
 0x35f   :  { %8434 = vmatprep.subr.mxu1 %v9819_v0  ;;  %8445 = vmatprep.subr.mxu0 %v9819_v0 }
 0x360   :  { %8435 = vmatpush3.msra.mxu1 %v10085_v35  ;;  %8438 = vmatprep.mubr.msk.f32.mxu1 %vm9820_vm0, %v9819_v0 }
 0x361   :  { %8436 = vmatprep.subr.mxu1 %v9819_v0  ;;  %8446 = vmatpush3.msra.mxu0 %v10093_v36 }
 0x362   :  { %8437 = vmatpush3.msra.mxu1 %v10099_v37  ;;  %8447 = vmatprep.subr.mxu0 %v9819_v0 }
 0x363   :  { %8452 = vmatprep.subr.mxu1 %v9819_v0  ;;  %8448 = vmatpush3.msra.mxu0 %v10109_v38 }
 0x364   :  { %8449 = vmatprep.mubr.msk.f32.mxu0 %vm9820_vm0, %v9819_v0  ;;  %8463 = vmatprep.subr.mxu0 %v9819_v0 }
 0x41b   :  { %v557_v45 = vpop.f32.mrf.mxu1  ;;  %v661_v47 = vpop.f32.mrf.mxu0 }
 0x41c   :  { %v558_v48 = vadd.f32 %v557_v45, %v482_v42  ;;  %v666_v49 = vrot.slane %v661_v47, 6 }
 0x41d   :  { %v8418_v50 = vpop.f32.mrf.mxu1  ;;  %v8429_v51 = vpop.f32.mrf.mxu0 }
 0x41e   :  { %v568_v52 = vadd.f32 %v10154_v46, %v558_v48  ;;  %v668_v53 = vadd.f32 %v666_v49, %v10042_v12 }
 0x420   :  { %v7845_v54 = vmul.f32 -1.442695, %v568_v52  ;;  %v7848_v55 = vmul.f32 -1.442695, %v668_v53 }
 0x422   :  { %9214 = vpow2.f32 %v7845_v54 }
 0x423   :  { %9216 = vpow2.f32 %v7848_v55 }
 0x42f   :  { %v9215_v56 = vpop.eup %9214 }
 0x430   :  { %v9217_v57 = vpop.eup %9216  ;;  %v572_v58 = vadd.f32 1.0, %v9215_v56 }
 0x431   :  { %v672_v59 = vadd.f32 1.0, %v9217_v57 }
 0x432   :  { %9218 = vrcp.f32 %v572_v58 }
 0x433   :  { %9220 = vrcp.f32 %v672_v59 }
 0x43f   :  { %v9219_v60 = vpop.eup %9218 }
 0x440   :  { %v9221_v61 = vpop.eup %9220  ;;  %v575_v62 = vmul.f32 2.0, %v9219_v60 }
 0x441   :  { %v675_v63 = vmul.f32 2.0, %v9221_v61 }
 0x442   :  { %v7846_v1 = vadd.f32 -1.0, %v575_v62 }
 0x443   :  { %v7849_v3 = vadd.f32 -1.0, %v675_v63 }
 0x444   :  { %v577_v4 = vsel %vm10049_vm5, %v7846_v1, %v9219_v60 }
 0x445   :  { %v677_v8 = vsel %vm10049_vm5, %v7849_v3, %v9221_v61  ;;  %580 = vrot.lane.b32.xlu0 %v577_v4, %s9821_s18  ;;  %v578_v16 = vmul.f32 0.0, %v577_v4 }
 0x446   :  { %683 = vrot.lane.b32.xlu1 %v677_v8, %s9821_s18  ;;  %v681_v17 = vmul.f32 %v679_v15, %v677_v8 }
 0x4b7   :  { %v581_v9 = vpop.permute.xlu0 %580 }
 0x4b8   :  { %v684_v11 = vpop.permute.xlu1 %683  ;;  %v583_v13 = vmul.f32 %v581_v9, %v577_v4 }
 0x4b9   :  { %v686_v14 = vmul.f32 %v684_v11, %v677_v8 }
 0x4ba   :  { %585 = vrot.lane.b32.xlu0 %v583_v13, %s9822_s0 }
 0x4bb   :  { %688 = vrot.lane.b32.xlu1 %v686_v14, %s9822_s0 }
 0x52c   :  { %v586_v18 = vpop.permute.xlu0 %585 }
 0x52d   :  { %v689_v19 = vpop.permute.xlu1 %688  ;;  %v10167_v21 = vadd.f32 %v586_v18, %v578_v16 }
 0x52e   :  { %v10169_v22 = vadd.f32 %v689_v19, %v681_v17 }
 0x52f   :  { %9222 = vtanh.f32 %v10167_v21 }
 0x530   :  { %9224 = vtanh.f32 %v10169_v22  ;;  %v960_v16 = vrot.slane %v10169_v22, 6 }
 0x53c   :  { %v9223_v24 = vpop.eup %9222 }
 0x53d   :  { %v9225_v25 = vpop.eup %9224  ;;  %591 = vrot.lane.b32.xlu0 %v9223_v24, %s9821_s18 }
 0x53e   :  { %694 = vrot.lane.b32.xlu1 %v9225_v25, %s9821_s18 }
 0x5af   :  { %v592_v26 = vpop.permute.xlu0 %591 }
 0x5b0   :  { %v695_v27 = vpop.permute.xlu1 %694  ;;  %v594_v28 = vmul.f32 %v592_v26, %v577_v4 }
 0x5b1   :  { %v697_v29 = vmul.f32 %v695_v27, %v677_v8 }
 0x5b2   :  { %699 = vrot.lane.b32.xlu0 %v594_v28, %s9822_s0 }
 0x5b3   :  { %v774_v30 = vrot.slane %v697_v29, 2 }
 0x5b5   :  { %775 = vrot.lane.b32.xlu1 %v774_v30, %s9822_s0 }
 0x624   :  { %v700_v39 = vpop.permute.xlu0 %699 }
 0x625   :  { %8439 = vmatmul.mubr.msk.f32.vlgmr.msra.gmra.mxu1 %vm305_vm6, %v700_v39 }
 0x626   :  { %8453 = vmatpush3.msra.mxu1 %v10000_v2  ;;  %8460 = vmatprep.mubr.msk.f32.mxu1 %vm9820_vm0, %v9819_v0 }
 0x627   :  { %v776_v40 = vpop.permute.xlu1 %775  ;;  %8454 = vmatprep.subr.mxu1 %v9819_v0 }
 0x628   :  { %8450 = vmatmul.mubr.msk.f32.vlgmr.msra.gmra.mxu0 %vm305_vm6, %v776_v40  ;;  %8455 = vmatpush3.msra.mxu1 %v10012_v5 }
 0x629   :  { %8456 = vmatprep.subr.mxu1 %v9819_v0  ;;  %8464 = vmatpush3.msra.mxu0 %v10063_v31 }
 0x62a   :  { %8457 = vmatpush3.msra.mxu1 %v10018_v6  ;;  %8465 = vmatprep.subr.mxu0 %v9819_v0 }
 0x62b   :  { %8458 = vmatprep.subr.mxu1 %v9819_v0  ;;  %8466 = vmatpush3.msra.mxu0 %v10068_v32 }
 0x62c   :  { %8459 = vmatpush3.msra.mxu1 %v10026_v7  ;;  %8467 = vmatprep.subr.mxu0 %v9819_v0 }
 0x62d   :  { %8461 = vmatmul.mubr.msk.f32.vlgmr.msra.gmra.mxu1 %vm305_vm6, %v776_v40  ;;  %8468 = vmatpush3.msra.mxu0 %v10085_v35 }
 0x62e   :  { %8469 = vmatprep.subr.mxu0 %v9819_v0  ;;  %8471 = vmatprep.mubr.msk.f32.mxu0 %vm9820_vm0, %v9819_v0 }
 0x62f   :  { %8470 = vmatpush3.msra.mxu0 %v10099_v37  ;;  %8474 = vmatprep.subr.mxu1 %v9819_v0 }
 0x630   :  { %8485 = vmatprep.subr.mxu0 %v9819_v0  ;;  %8475 = vmatpush3.msra.mxu1 %v10074_v33 }
 0x631   :  { %8476 = vmatprep.subr.mxu1 %v9819_v0  ;;  %8482 = vmatprep.mubr.msk.f32.mxu1 %vm9820_vm0, %v9819_v0 }
 0x632   :  { %8477 = vmatpush3.msra.mxu1 %v10079_v34 }
 0x633   :  { %8478 = vmatprep.subr.mxu1 %v9819_v0 }
 0x634   :  { %8479 = vmatpush3.msra.mxu1 %v10093_v36 }
 0x635   :  { %8480 = vmatprep.subr.mxu1 %v9819_v0 }
 0x636   :  { %8481 = vmatpush3.msra.mxu1 %v10109_v38 }
 0x637   :  { %8496 = vmatprep.subr.mxu1 %v9819_v0 }
 0x6e5   :  { %v769_v41 = vpop.f32.mrf.mxu1 }
 0x6e7   :  { %v8440_v42 = vpop.f32.mrf.mxu1 }
 0x6e8   :  { %v845_v43 = vpop.f32.mrf.mxu0 }
 0x6e9   :  { %v846_v44 = vadd.f32 %v845_v43, %v769_v41 }
 0x6ea   :  { %v8451_v45 = vpop.f32.mrf.mxu0 }
 0x6eb   :  { %v849_v47 = vadd.f32 %v10154_v46, %v846_v44 }
 0x6ed   :  { %v7852_v48 = vmul.f32 -1.442695, %v849_v47  ;;  %v942_v49 = vpop.f32.mrf.mxu1 }
 0x6ee   :  { %v947_v50 = vrot.slane %v942_v49, 4 }
 0x6ef   :  { %9226 = vpow2.f32 %v7852_v48  ;;  %v8462_v51 = vpop.f32.mrf.mxu1 }
 0x6f0   :  { %v949_v52 = vadd.f32 %v947_v50, %v10042_v12 }
 0x6f2   :  { %v7855_v53 = vmul.f32 -1.442695, %v949_v52 }
 0x6f4   :  { %9228 = vpow2.f32 %v7855_v53 }
 0x6fc   :  { %v9227_v54 = vpop.eup %9226 }
 0x6fd   :  { %v853_v55 = vadd.f32 1.0, %v9227_v54 }
 0x6ff   :  { %9230 = vrcp.f32 %v853_v55 }
 0x701   :  { %v9229_v56 = vpop.eup %9228 }
 0x702   :  { %v953_v57 = vadd.f32 1.0, %v9229_v56 }
 0x704   :  { %9232 = vrcp.f32 %v953_v57 }
 0x70c   :  { %v9231_v58 = vpop.eup %9230 }
 0x70d   :  { %v856_v59 = vmul.f32 2.0, %v9231_v58 }
 0x70f   :  { %v7853_v60 = vadd.f32 -1.0, %v856_v59 }
 0x711   :  { %v9233_v61 = vpop.eup %9232  ;;  %v858_v62 = vsel %vm10049_vm5, %v7853_v60, %v9231_v58 }
 0x712   :  { %861 = vrot.lane.b32.xlu0 %v858_v62, %s9821_s18  ;;  %v956_v63 = vmul.f32 2.0, %v9233_v61  ;;  %v859_v13 = vmul.f32 %v858_v62, %v10167_v21 }
 0x714   :  { %v7856_v1 = vadd.f32 -1.0, %v956_v63 }
 0x716   :  { %v958_v3 = vsel %vm10049_vm5, %v7856_v1, %v9233_v61 }
 0x717   :  { %964 = vrot.lane.b32.xlu1 %v958_v3, %s9821_s18  ;;  %v962_v17 = vmul.f32 %v960_v16, %v958_v3 }
 0x784   :  { %v862_v4 = vpop.permute.xlu0 %861 }
 0x785   :  { %v864_v8 = vmul.f32 %v862_v4, %v858_v62 }
 0x787   :  { %866 = vrot.lane.b32.xlu0 %v864_v8, %s9822_s0 }
 0x789   :  { %v965_v9 = vpop.permute.xlu1 %964 }
 0x78a   :  { %v967_v11 = vmul.f32 %v965_v9, %v958_v3 }
 0x78c   :  { %969 = vrot.lane.b32.xlu1 %v967_v11, %s9822_s0 }
 0x7f9   :  { %v867_v14 = vpop.permute.xlu0 %866 }
 0x7fa   :  { %v10221_v15 = vadd.f32 %v867_v14, %v859_v13 }
 0x7fc   :  { %9234 = vtanh.f32 %v10221_v15 }
 0x7fe   :  { %v970_v18 = vpop.permute.xlu1 %969 }
 0x7ff   :  { %v10225_v19 = vadd.f32 %v970_v18, %v962_v17 }
 0x801   :  { %9236 = vtanh.f32 %v10225_v19  ;;  %v1241_v8 = vrot.slane %v10225_v19, 6 }
 0x809   :  { %v9235_v24 = vpop.eup %9234 }
 0x80a   :  { %872 = vrot.lane.b32.xlu0 %v9235_v24, %s9821_s18 }
 0x80e   :  { %v9237_v25 = vpop.eup %9236 }
 0x80f   :  { %975 = vrot.lane.b32.xlu1 %v9237_v25, %s9821_s18 }
 0x87c   :  { %v873_v21 = vpop.permute.xlu0 %872 }
 0x87d   :  { %v875_v26 = vmul.f32 %v873_v21, %v858_v62 }
 0x87f   :  { %980 = vrot.lane.b32.xlu0 %v875_v26, %s9822_s0 }
 0x881   :  { %v976_v27 = vpop.permute.xlu1 %975 }
 0x882   :  { %v978_v22 = vmul.f32 %v976_v27, %v958_v3 }
 0x884   :  { %v1055_v28 = vrot.slane %v978_v22, 4 }
 0x886   :  { %1056 = vrot.lane.b32.xlu1 %v1055_v28, %s9822_s0 }
 0x8f1   :  { %v981_v29 = vpop.permute.xlu0 %980 }
 0x8f2   :  { %8472 = vmatmul.mubr.msk.f32.vlgmr.msra.gmra.mxu0 %vm305_vm6, %v981_v29 }
 0x8f3   :  { %8486 = vmatpush3.msra.mxu0 %v10000_v2  ;;  %8493 = vmatprep.mubr.msk.f32.mxu0 %vm9820_vm0, %v9819_v0 }
 0x8f4   :  { %8487 = vmatprep.subr.mxu0 %v9819_v0 }
 0x8f5   :  { %8488 = vmatpush3.msra.mxu0 %v10012_v5 }
 0x8f6   :  { %8489 = vmatprep.subr.mxu0 %v9819_v0 }
 0x8f7   :  { %8490 = vmatpush3.msra.mxu0 %v10018_v6 }
 0x8f8   :  { %8491 = vmatprep.subr.mxu0 %v9819_v0  ;;  %v1057_v30 = vpop.permute.xlu1 %1056 }
 0x8f9   :  { %8492 = vmatpush3.msra.mxu0 %v10026_v7  ;;  %8483 = vmatmul.mubr.msk.f32.vlgmr.msra.gmra.mxu1 %vm305_vm6, %v1057_v30 }
 0x8fa   :  { %8494 = vmatmul.mubr.msk.f32.vlgmr.msra.gmra.mxu0 %vm305_vm6, %v1057_v30  ;;  %8497 = vmatpush3.msra.mxu1 %v10063_v31 }
 0x8fb   :  { %8498 = vmatprep.subr.mxu1 %v9819_v0  ;;  %8507 = vmatprep.subr.mxu0 %v9819_v0 }
 0x8fc   :  { %8499 = vmatpush3.msra.mxu1 %v10068_v32  ;;  %8508 = vmatpush3.msra.mxu0 %v10074_v33 }
 0x8fd   :  { %8500 = vmatprep.subr.mxu1 %v9819_v0  ;;  %8509 = vmatprep.subr.mxu0 %v9819_v0 }
 0x8fe   :  { %8501 = vmatpush3.msra.mxu1 %v10085_v35  ;;  %8510 = vmatpush3.msra.mxu0 %v10079_v34 }
 0x8ff   :  { %8502 = vmatprep.subr.mxu1 %v9819_v0  ;;  %8511 = vmatprep.subr.mxu0 %v9819_v0 }
 0x900   :  { %8503 = vmatpush3.msra.mxu1 %v10099_v37  ;;  %8504 = vmatprep.mubr.msk.f32.mxu1 %vm9820_vm0, %v9819_v0 }
 0x901   :  { %8512 = vmatpush3.msra.mxu0 %v10093_v36  ;;  %8518 = vmatprep.subr.mxu1 %v9819_v0 }
 0x902   :  { %8513 = vmatprep.subr.mxu0 %v9819_v0  ;;  %8515 = vmatprep.mubr.msk.f32.mxu0 %vm9820_vm0, %v9819_v0 }
 0x903   :  { %8514 = vmatpush3.msra.mxu0 %v10109_v38 }
 0x904   :  { %8529 = vmatprep.subr.mxu0 %v9819_v0 }
 0x9b2   :  { %v1050_v39 = vpop.f32.mrf.mxu0 }
 0x9b4   :  { %v8473_v40 = vpop.f32.mrf.mxu0 }
 0x9b9   :  { %v1126_v41 = vpop.f32.mrf.mxu1 }
 0x9ba   :  { %v1127_v42 = vadd.f32 %v1126_v41, %v1050_v39  ;;  %v1223_v43 = vpop.f32.mrf.mxu0 }
 0x9bb   :  { %v1228_v44 = vrot.slane %v1223_v43, 2  ;;  %v8484_v45 = vpop.f32.mrf.mxu1 }
 0x9bc   :  { %v1130_v47 = vadd.f32 %v10154_v46, %v1127_v42  ;;  %v8495_v48 = vpop.f32.mrf.mxu0 }
 0x9bd   :  { %v1230_v49 = vadd.f32 %v1228_v44, %v10042_v12 }
 0x9be   :  { %v7859_v50 = vmul.f32 -1.442695, %v1130_v47 }
 0x9bf   :  { %v7862_v51 = vmul.f32 -1.442695, %v1230_v49 }
 0x9c0   :  { %9238 = vpow2.f32 %v7859_v50 }
 0x9c1   :  { %9240 = vpow2.f32 %v7862_v51 }
 0x9cd   :  { %v9239_v52 = vpop.eup %9238 }
 0x9ce   :  { %v9241_v53 = vpop.eup %9240  ;;  %v1134_v54 = vadd.f32 1.0, %v9239_v52 }
 0x9cf   :  { %v1234_v55 = vadd.f32 1.0, %v9241_v53 }
 0x9d0   :  { %9242 = vrcp.f32 %v1134_v54 }
 0x9d1   :  { %9244 = vrcp.f32 %v1234_v55 }
 0x9dd   :  { %v9243_v56 = vpop.eup %9242 }
 0x9de   :  { %v9245_v57 = vpop.eup %9244  ;;  %v1137_v58 = vmul.f32 2.0, %v9243_v56 }
 0x9df   :  { %v1237_v59 = vmul.f32 2.0, %v9245_v57 }
 0x9e0   :  { %v7860_v60 = vadd.f32 -1.0, %v1137_v58 }
 0x9e1   :  { %v7863_v61 = vadd.f32 -1.0, %v1237_v59 }
 0x9e2   :  { %v1139_v62 = vsel %vm10049_vm5, %v7860_v60, %v9243_v56 }
 0x9e3   :  { %v1239_v12 = vsel %vm10049_vm5, %v7863_v61, %v9245_v57  ;;  %1142 = vrot.lane.b32.xlu1 %v1139_v62, %s9821_s18  ;;  %v1140_v9 = vmul.f32 %v1139_v62, %v10221_v15 }
 0x9e4   :  { %1245 = vrot.lane.b32.xlu0 %v1239_v12, %s9821_s18  ;;  %v1243_v11 = vmul.f32 %v1241_v8, %v1239_v12 }
 0xa55   :  { %v1143_v63 = vpop.permute.xlu1 %1142 }
 0xa56   :  { %v1246_v1 = vpop.permute.xlu0 %1245  ;;  %v1145_v3 = vmul.f32 %v1143_v63, %v1139_v62 }
 0xa57   :  { %v1248_v4 = vmul.f32 %v1246_v1, %v1239_v12 }
 0xa58   :  { %1147 = vrot.lane.b32.xlu1 %v1145_v3, %s9822_s0 }
 0xa59   :  { %1250 = vrot.lane.b32.xlu0 %v1248_v4, %s9822_s0 }
 0xaca   :  { %v1148_v13 = vpop.permute.xlu1 %1147 }
 0xacb   :  { %v1251_v14 = vpop.permute.xlu0 %1250  ;;  %v10277_v16 = vadd.f32 %v1148_v13, %v1140_v9 }
 0xacc   :  { %v10279_v17 = vadd.f32 %v1251_v14, %v1243_v11 }
 0xacd   :  { %9246 = vtanh.f32 %v10277_v16 }
 0xace   :  { %9248 = vtanh.f32 %v10279_v17  ;;  %v1519_v1 = vrot.slane %v10279_v17, 6 }
 0xada   :  { %v9247_v18 = vpop.eup %9246 }
 0xadb   :  { %v9249_v24 = vpop.eup %9248  ;;  %1153 = vrot.lane.b32.xlu1 %v9247_v18, %s9821_s18 }
 0xadc   :  { %1256 = vrot.lane.b32.xlu0 %v9249_v24, %s9821_s18 }
 0xb4d   :  { %v1154_v19 = vpop.permute.xlu1 %1153 }
 0xb4e   :  { %v1257_v25 = vpop.permute.xlu0 %1256  ;;  %v1156_v15 = vmul.f32 %v1154_v19, %v1139_v62 }
 0xb4f   :  { %v1259_v21 = vmul.f32 %v1257_v25, %v1239_v12 }
 0xb50   :  { %1261 = vrot.lane.b32.xlu0 %v1156_v15, %s9822_s0 }
 0xb51   :  { %v1336_v26 = vrot.slane %v1259_v21, 6 }
 0xb53   :  { %1337 = vrot.lane.b32.xlu1 %v1336_v26, %s9822_s0 }
 0xbc2   :  { %v1262_v27 = vpop.permute.xlu0 %1261 }
 0xbc3   :  { %8505 = vmatmul.mubr.msk.f32.vlgmr.msra.gmra.mxu1 %vm305_vm6, %v1262_v27 }
 0xbc4   :  { %8519 = vmatpush3.msra.mxu1 %v10000_v2  ;;  %8526 = vmatprep.mubr.msk.f32.mxu1 %vm9820_vm0, %v9819_v0 }
 0xbc5   :  { %8520 = vmatprep.subr.mxu1 %v9819_v0  ;;  %v1338_v22 = vpop.permute.xlu1 %1337 }
 0xbc6   :  { %8516 = vmatmul.mubr.msk.f32.vlgmr.msra.gmra.mxu0 %vm305_vm6, %v1338_v22  ;;  %8521 = vmatpush3.msra.mxu1 %v10012_v5 }
 0xbc7   :  { %8522 = vmatprep.subr.mxu1 %v9819_v0  ;;  %8530 = vmatpush3.msra.mxu0 %v10063_v31 }
 0xbc8   :  { %8523 = vmatpush3.msra.mxu1 %v10018_v6  ;;  %8531 = vmatprep.subr.mxu0 %v9819_v0 }
 0xbc9   :  { %8524 = vmatprep.subr.mxu1 %v9819_v0  ;;  %8532 = vmatpush3.msra.mxu0 %v10068_v32 }
 0xbca   :  { %8525 = vmatpush3.msra.mxu1 %v10026_v7  ;;  %8533 = vmatprep.subr.mxu0 %v9819_v0 }
 0xbcb   :  { %8527 = vmatmul.mubr.msk.f32.vlgmr.msra.gmra.mxu1 %vm305_vm6, %v1338_v22  ;;  %8540 = vmatprep.subr.mxu1 %v9819_v0 }
 0xbcc   :  { %8534 = vmatpush3.msra.mxu0 %v10085_v35  ;;  %8541 = vmatpush3.msra.mxu1 %v10074_v33 }
 0xbcd   :  { %8535 = vmatprep.subr.mxu0 %v9819_v0  ;;  %8542 = vmatprep.subr.mxu1 %v9819_v0 }
 0xbce   :  { %8536 = vmatpush3.msra.mxu0 %v10099_v37  ;;  %8543 = vmatpush3.msra.mxu1 %v10079_v34 }
 0xbcf   :  { %8537 = vmatprep.mubr.msk.f32.mxu0 %vm9820_vm0, %v9819_v0  ;;  %8544 = vmatprep.subr.mxu1 %v9819_v0 }
 0xbd0   :  { %8551 = vmatprep.subr.mxu0 %v9819_v0  ;;  %8545 = vmatpush3.msra.mxu1 %v10093_v36 }
 0xbd1   :  { %8546 = vmatprep.subr.mxu1 %v9819_v0  ;;  %8548 = vmatprep.mubr.msk.f32.mxu1 %vm9820_vm0, %v9819_v0 }
 0xbd2   :  { %8547 = vmatpush3.msra.mxu1 %v10109_v38 }
 0xbd3   :  { %8562 = vmatprep.subr.mxu1 %v9819_v0 }
 0xc83   :  { %v1331_v28 = vpop.f32.mrf.mxu1 }
 0xc85   :  { %v8506_v29 = vpop.f32.mrf.mxu1 }
 0xc86   :  { %v1407_v30 = vpop.f32.mrf.mxu0 }
 0xc87   :  { %v1408_v39 = vadd.f32 %v1407_v30, %v1331_v28 }
 0xc88   :  { %v8517_v40 = vpop.f32.mrf.mxu0 }
 0xc89   :  { %v1411_v41 = vadd.f32 %v10154_v46, %v1408_v39 }
 0xc8b   :  { %v7866_v42 = vmul.f32 -1.442695, %v1411_v41  ;;  %v1504_v43 = vpop.f32.mrf.mxu1 }
 0xc8c   :  { %v1508_v44 = vadd.f32 %v1504_v43, %v10040_v10 }
 0xc8d   :  { %9250 = vpow2.f32 %v7866_v42  ;;  %v8528_v45 = vpop.f32.mrf.mxu1 }
 0xc8e   :  { %v7869_v47 = vmul.f32 -1.442695, %v1508_v44 }
 0xc90   :  { %9252 = vpow2.f32 %v7869_v47 }
 0xc9a   :  { %v9251_v48 = vpop.eup %9250 }
 0xc9b   :  { %v1415_v49 = vadd.f32 1.0, %v9251_v48 }
 0xc9d   :  { %v9253_v50 = vpop.eup %9252  ;;  %9254 = vrcp.f32 %v1415_v49 }
 0xc9e   :  { %v1512_v51 = vadd.f32 1.0, %v9253_v50 }
 0xca0   :  { %9256 = vrcp.f32 %v1512_v51 }
 0xcaa   :  { %v9255_v52 = vpop.eup %9254 }
 0xcab   :  { %v1418_v53 = vmul.f32 2.0, %v9255_v52 }
 0xcad   :  { %v9257_v54 = vpop.eup %9256  ;;  %v7867_v55 = vadd.f32 -1.0, %v1418_v53 }
 0xcae   :  { %v1515_v56 = vmul.f32 2.0, %v9257_v54 }
 0xcaf   :  { %v1420_v57 = vsel %vm10049_vm5, %v7867_v55, %v9255_v52 }
 0xcb0   :  { %1423 = vrot.lane.b32.xlu0 %v1420_v57, %s9821_s18  ;;  %v7870_v58 = vadd.f32 -1.0, %v1515_v56  ;;  %v1421_v63 = vmul.f32 %v1420_v57, %v10277_v16 }
 0xcb2   :  { %v1517_v59 = vsel %vm10049_vm5, %v7870_v58, %v9257_v54 }
 0xcb3   :  { %1523 = vrot.lane.b32.xlu1 %v1517_v59, %s9821_s18  ;;  %v1521_v8 = vmul.f32 %v1519_v1, %v1517_v59 }
 0xd22   :  { %v1424_v60 = vpop.permute.xlu0 %1423 }
 0xd23   :  { %v1426_v61 = vmul.f32 %v1424_v60, %v1420_v57 }
 0xd25   :  { %1428 = vrot.lane.b32.xlu0 %v1426_v61, %s9822_s0  ;;  %v1524_v62 = vpop.permute.xlu1 %1523 }
 0xd26   :  { %v1526_v12 = vmul.f32 %v1524_v62, %v1517_v59 }
 0xd28   :  { %1528 = vrot.lane.b32.xlu1 %v1526_v12, %s9822_s0 }
 0xd97   :  { %v1429_v3 = vpop.permute.xlu0 %1428 }
 0xd98   :  { %v10332_v4 = vadd.f32 %v1429_v3, %v1421_v63 }
 0xd9a   :  { %9258 = vtanh.f32 %v10332_v4  ;;  %v1529_v9 = vpop.permute.xlu1 %1528 }
 0xd9b   :  { %v10335_v11 = vadd.f32 %v1529_v9, %v1521_v8 }
 0xd9d   :  { %9260 = vtanh.f32 %v10335_v11 }
 0xda7   :  { %v9259_v13 = vpop.eup %9258 }
 0xda8   :  { %1434 = vrot.lane.b32.xlu0 %v9259_v13, %s9821_s18  ;;  %v10401_v13 = vld [vmem:[%s11832_s5 + $0x18] sm:$0xff] }
 0xdaa   :  { %v9261_v14 = vpop.eup %9260 }
 0xdab   :  { %1534 = vrot.lane.b32.xlu1 %v9261_v14, %s9821_s18  ;;  %v10410_v14 = vld [vmem:[%s11832_s5 + $0x10] sm:$0xff] }
 0xe1a   :  { %v1435_v16 = vpop.permute.xlu0 %1434 }
 0xe1b   :  { %v1437_v18 = vmul.f32 %v1435_v16, %v1420_v57  ;;  %v10417_v16 = vld [vmem:[%s11832_s5 + $0x8] sm:$0xff] }
 0xe1d   :  { %1539 = vrot.lane.b32.xlu0 %v1437_v18, %s9822_s0  ;;  %v1535_v17 = vpop.permute.xlu1 %1534 }
 0xe1e   :  { %v1537_v24 = vmul.f32 %v1535_v17, %v1517_v59  ;;  %v1799_v59 = vrot.slane %v10335_v11, 6  ;;  %v10425_v17 = vld [vmem:[%s11832_s5] sm:$0xff] }
 0xe20   :  { %1614 = vrot.lane.b32.xlu1 %v1537_v24, %s9822_s0 }
 0xe8f   :  { %v1540_v19 = vpop.permute.xlu0 %1539 }
 0xe90   :  { %8538 = vmatmul.mubr.msk.f32.vlgmr.msra.gmra.mxu0 %vm305_vm6, %v1540_v19 }
 0xe91   :  { %8552 = vmatpush3.msra.mxu0 %v10000_v2  ;;  %8559 = vmatprep.mubr.msk.f32.mxu0 %vm9820_vm0, %v9819_v0 }
 0xe92   :  { %8553 = vmatprep.subr.mxu0 %v9819_v0  ;;  %v1615_v25 = vpop.permute.xlu1 %1614 }
 0xe93   :  { %8554 = vmatpush3.msra.mxu0 %v10012_v5  ;;  %8549 = vmatmul.mubr.msk.f32.vlgmr.msra.gmra.mxu1 %vm305_vm6, %v1615_v25 }
 0xe94   :  { %8555 = vmatprep.subr.mxu0 %v9819_v0  ;;  %8563 = vmatpush3.msra.mxu1 %v10063_v31 }
 0xe95   :  { %8556 = vmatpush3.msra.mxu0 %v10018_v6  ;;  %8564 = vmatprep.subr.mxu1 %v9819_v0 }
 0xe96   :  { %8557 = vmatprep.subr.mxu0 %v9819_v0  ;;  %8565 = vmatpush3.msra.mxu1 %v10068_v32 }
 0xe97   :  { %8558 = vmatpush3.msra.mxu0 %v10026_v7  ;;  %8566 = vmatprep.subr.mxu1 %v9819_v0 }
 0xe98   :  { %8560 = vmatmul.mubr.msk.f32.vlgmr.msra.gmra.mxu0 %vm305_vm6, %v1615_v25  ;;  %8567 = vmatpush3.msra.mxu1 %v10085_v35 }
 0xe99   :  { %8568 = vmatprep.subr.mxu1 %v9819_v0  ;;  %8573 = vmatprep.subr.mxu0 %v9819_v0 }
 0xe9a   :  { %8569 = vmatpush3.msra.mxu1 %v10099_v37  ;;  %8570 = vmatprep.mubr.msk.f32.mxu1 %vm9820_vm0, %v9819_v0 }
 0xe9b   :  { %8574 = vmatpush3.msra.mxu0 %v10074_v33  ;;  %8584 = vmatprep.subr.mxu1 %v9819_v0 }
 0xe9c   :  { %8575 = vmatprep.subr.mxu0 %v9819_v0  ;;  %8581 = vmatprep.mubr.msk.f32.mxu0 %vm9820_vm0, %v9819_v0 }
 0xe9d   :  { %8576 = vmatpush3.msra.mxu0 %v10079_v34 }
 0xe9e   :  { %8577 = vmatprep.subr.mxu0 %v9819_v0 }
 0xe9f   :  { %8578 = vmatpush3.msra.mxu0 %v10093_v36 }
 0xea0   :  { %8579 = vmatprep.subr.mxu0 %v9819_v0 }
 0xea1   :  { %8580 = vmatpush3.msra.mxu0 %v10109_v38 }
 0xea2   :  { %8595 = vmatprep.subr.mxu0 %v9819_v0 }
 0xf50   :  { %v1609_v2 = vpop.f32.mrf.mxu0 }
 0xf52   :  { %v8539_v5 = vpop.f32.mrf.mxu0 }
 0xf53   :  { %v1684_v6 = vpop.f32.mrf.mxu1 }
 0xf54   :  { %v1685_v7 = vadd.f32 %v1684_v6, %v1609_v2 }
 0xf55   :  { %v8550_v15 = vpop.f32.mrf.mxu1 }
 0xf56   :  { %v1688_v21 = vadd.f32 %v10154_v46, %v1685_v7 }
 0xf58   :  { %v7873_v26 = vmul.f32 -1.442695, %v1688_v21  ;;  %v1781_v27 = vpop.f32.mrf.mxu0 }
 0xf59   :  { %v1786_v22 = vrot.slane %v1781_v27, 6 }
 0xf5a   :  { %9262 = vpow2.f32 %v7873_v26  ;;  %v8561_v28 = vpop.f32.mrf.mxu0 }
 0xf5b   :  { %v1788_v29 = vadd.f32 %v1786_v22, %v10040_v10 }
 0xf5d   :  { %v7876_v30 = vmul.f32 -1.442695, %v1788_v29 }
 0xf5f   :  { %9264 = vpow2.f32 %v7876_v30 }
 0xf67   :  { %v9263_v39 = vpop.eup %9262 }
 0xf68   :  { %v1692_v40 = vadd.f32 1.0, %v9263_v39 }
 0xf6a   :  { %9266 = vrcp.f32 %v1692_v40 }
 0xf6c   :  { %v9265_v41 = vpop.eup %9264 }
 0xf6d   :  { %v1792_v42 = vadd.f32 1.0, %v9265_v41 }
 0xf6f   :  { %9268 = vrcp.f32 %v1792_v42 }
 0xf77   :  { %v9267_v43 = vpop.eup %9266 }
 0xf78   :  { %v1695_v44 = vmul.f32 2.0, %v9267_v43 }
 0xf7a   :  { %v7874_v45 = vadd.f32 -1.0, %v1695_v44 }
 0xf7c   :  { %v9269_v47 = vpop.eup %9268  ;;  %v1697_v48 = vsel %vm10049_vm5, %v7874_v45, %v9267_v43 }
 0xf7d   :  { %1700 = vrot.lane.b32.xlu0 %v1697_v48, %s9821_s18  ;;  %v1795_v49 = vmul.f32 2.0, %v9269_v47  ;;  %v1698_v56 = vmul.f32 %v1697_v48, %v10332_v4 }
 0xf7f   :  { %v7877_v50 = vadd.f32 -1.0, %v1795_v49 }
 0xf81   :  { %v1797_v51 = vsel %vm10049_vm5, %v7877_v50, %v9269_v47 }
 0xf82   :  { %1803 = vrot.lane.b32.xlu1 %v1797_v51, %s9821_s18  ;;  %v1801_v60 = vmul.f32 %v1799_v59, %v1797_v51 }
 0xfef   :  { %v1701_v52 = vpop.permute.xlu0 %1700 }
 0xff0   :  { %v1703_v53 = vmul.f32 %v1701_v52, %v1697_v48 }
 0xff2   :  { %1705 = vrot.lane.b32.xlu0 %v1703_v53, %s9822_s0 }
 0xff4   :  { %v1804_v54 = vpop.permute.xlu1 %1803 }
 0xff5   :  { %v1806_v55 = vmul.f32 %v1804_v54, %v1797_v51 }
 0xff7   :  { %1808 = vrot.lane.b32.xlu1 %v1806_v55, %s9822_s0 }
0x1064   :  { %v1706_v57 = vpop.permute.xlu0 %1705 }
0x1065   :  { %v10386_v58 = vadd.f32 %v1706_v57, %v1698_v56 }
0x1067   :  { %9270 = vtanh.f32 %v10386_v58 }
0x1069   :  { %v1809_v61 = vpop.permute.xlu1 %1808 }
0x106a   :  { %v10390_v62 = vadd.f32 %v1809_v61, %v1801_v60  ;;  %v9536_v60 = vld [vmem:[%s11837_s20 + $0x18] sm:$0xff]  ;;  %v9537_v61 = vld [vmem:[%s11837_s20 + $0x10] sm:$0xff] }
0x106c   :  { %9272 = vtanh.f32 %v10390_v62  ;;  %v2080_v43 = vrot.slane %v10390_v62, 6  ;;  %v9538_v62 = vld [vmem:[%s11837_s20 + $0x8] sm:$0xff] }
0x1074   :  { %v9271_v12 = vpop.eup %9270 }
0x1075   :  { %1711 = vrot.lane.b32.xlu0 %v9271_v12, %s9821_s18  ;;  %v9539_v12 = vld [vmem:[%s11837_s20] sm:$0xff] }
0x1079   :  { %v9273_v63 = vpop.eup %9272 }
0x107a   :  { %1814 = vrot.lane.b32.xlu1 %v9273_v63, %s9821_s18  ;;  %v9540_v63 = vld [vmem:[%s11838_s1 + $0x18] sm:$0xff] }
0x10e7   :  { %v1712_v1 = vpop.permute.xlu0 %1711 }
0x10e8   :  { %v1714_v3 = vmul.f32 %v1712_v1, %v1697_v48  ;;  %v9541_v1 = vld [vmem:[%s11838_s1 + $0x10] sm:$0xff] }
0x10ea   :  { %1819 = vrot.lane.b32.xlu0 %v1714_v3, %s9822_s0  ;;  %v9542_v3 = vld [vmem:[%s11838_s1 + $0x8] sm:$0xff] }
0x10ec   :  { %v1815_v4 = vpop.permute.xlu1 %1814 }
0x10ed   :  { %v1817_v8 = vmul.f32 %v1815_v4, %v1797_v51  ;;  %v9543_v4 = vld [vmem:[%s11838_s1] sm:$0xff] }
0x10ef   :  { %v1894_v9 = vrot.slane %v1817_v8, 2 }
0x10f1   :  { %1895 = vrot.lane.b32.xlu1 %v1894_v9, %s9822_s0 }
0x115c   :  { %v1820_v11 = vpop.permute.xlu0 %1819 }
0x115d   :  { %8571 = vmatmul.mubr.msk.f32.vlgmr.msra.gmra.mxu1 %vm305_vm6, %v1820_v11 }
0x115e   :  { %8585 = vmatpush3.msra.mxu1 %v10401_v13  ;;  %8592 = vmatprep.mubr.msk.f32.mxu1 %vm9820_vm0, %v9819_v0 }
0x115f   :  { %8586 = vmatprep.subr.mxu1 %v9819_v0 }
0x1160   :  { %8587 = vmatpush3.msra.mxu1 %v10410_v14 }
0x1161   :  { %8588 = vmatprep.subr.mxu1 %v9819_v0 }
0x1162   :  { %8589 = vmatpush3.msra.mxu1 %v10417_v16 }
0x1163   :  { %v1896_v18 = vpop.permute.xlu1 %1895  ;;  %8590 = vmatprep.subr.mxu1 %v9819_v0 }
0x1164   :  { %8582 = vmatmul.mubr.msk.f32.vlgmr.msra.gmra.mxu0 %vm305_vm6, %v1896_v18  ;;  %8591 = vmatpush3.msra.mxu1 %v10425_v17 }
0x1165   :  { %8593 = vmatmul.mubr.msk.f32.vlgmr.msra.gmra.mxu1 %vm305_vm6, %v1896_v18  ;;  %8596 = vmatpush3.msra.mxu0 %v10063_v31 }
0x1166   :  { %8597 = vmatprep.subr.mxu0 %v9819_v0  ;;  %8606 = vmatprep.subr.mxu1 %v9819_v0 }
0x1167   :  { %8598 = vmatpush3.msra.mxu0 %v10068_v32  ;;  %8607 = vmatpush3.msra.mxu1 %v10074_v33 }
0x1168   :  { %8599 = vmatprep.subr.mxu0 %v9819_v0  ;;  %8608 = vmatprep.subr.mxu1 %v9819_v0 }
0x1169   :  { %8600 = vmatpush3.msra.mxu0 %v10085_v35  ;;  %8609 = vmatpush3.msra.mxu1 %v10079_v34 }
0x116a   :  { %8601 = vmatprep.subr.mxu0 %v9819_v0  ;;  %8603 = vmatprep.mubr.msk.f32.mxu0 %vm9820_vm0, %v9819_v0 }
0x116b   :  { %8602 = vmatpush3.msra.mxu0 %v10099_v37  ;;  %8610 = vmatprep.subr.mxu1 %v9819_v0 }
0x116c   :  { %8617 = vmatprep.subr.mxu0 %v9819_v0  ;;  %8611 = vmatpush3.msra.mxu1 %v10093_v36 }
0x116d   :  { %8612 = vmatprep.subr.mxu1 %v9819_v0  ;;  %8614 = vmatprep.mubr.msk.f32.mxu1 %vm9820_vm0, %v9819_v0 }
0x116e   :  { %8613 = vmatpush3.msra.mxu1 %v10109_v38 }
0x116f   :  { %8628 = vmatprep.subr.mxu1 %v9819_v0 }
0x121d   :  { %v1889_v31 = vpop.f32.mrf.mxu1 }
0x121f   :  { %v8572_v32 = vpop.f32.mrf.mxu1 }
0x1224   :  { %v1965_v33 = vpop.f32.mrf.mxu0 }
0x1225   :  { %v1966_v34 = vadd.f32 %v1965_v33, %v1889_v31  ;;  %v2062_v35 = vpop.f32.mrf.mxu1 }
0x1226   :  { %v2067_v37 = vrot.slane %v2062_v35, 4  ;;  %v8583_v24 = vpop.f32.mrf.mxu0 }
0x1227   :  { %v1969_v19 = vadd.f32 %v10154_v46, %v1966_v34  ;;  %v8594_v25 = vpop.f32.mrf.mxu1 }
0x1228   :  { %v2069_v36 = vadd.f32 %v2067_v37, %v10040_v10 }
0x1229   :  { %v7880_v2 = vmul.f32 -1.442695, %v1969_v19 }
0x122a   :  { %v7883_v5 = vmul.f32 -1.442695, %v2069_v36 }
0x122b   :  { %9274 = vpow2.f32 %v7880_v2 }
0x122c   :  { %9276 = vpow2.f32 %v7883_v5 }
0x1238   :  { %v9275_v6 = vpop.eup %9274 }
0x1239   :  { %v9277_v38 = vpop.eup %9276  ;;  %v1973_v7 = vadd.f32 1.0, %v9275_v6 }
0x123a   :  { %v2073_v15 = vadd.f32 1.0, %v9277_v38 }
0x123b   :  { %9278 = vrcp.f32 %v1973_v7 }
0x123c   :  { %9280 = vrcp.f32 %v2073_v15 }
0x1248   :  { %v9279_v21 = vpop.eup %9278 }
0x1249   :  { %v9281_v26 = vpop.eup %9280  ;;  %v1976_v27 = vmul.f32 2.0, %v9279_v21 }
0x124a   :  { %v2076_v22 = vmul.f32 2.0, %v9281_v26 }
0x124b   :  { %v7881_v28 = vadd.f32 -1.0, %v1976_v27 }
0x124c   :  { %v7884_v29 = vadd.f32 -1.0, %v2076_v22 }
0x124d   :  { %v1978_v46 = vsel %vm10049_vm5, %v7881_v28, %v9279_v21 }
0x124e   :  { %1981 = vrot.lane.b32.xlu0 %v1978_v46, %s9821_s18  ;;  %v2078_v30 = vsel %vm10049_vm5, %v7884_v29, %v9281_v26  ;;  %v1979_v44 = vmul.f32 %v1978_v46, %v10386_v58 }
0x124f   :  { %2084 = vrot.lane.b32.xlu1 %v2078_v30, %s9821_s18  ;;  %v2082_v47 = vmul.f32 %v2080_v43, %v2078_v30 }
0x12c0   :  { %v1982_v39 = vpop.permute.xlu0 %1981 }
0x12c1   :  { %v1984_v40 = vmul.f32 %v1982_v39, %v1978_v46  ;;  %v2085_v41 = vpop.permute.xlu1 %2084 }
0x12c2   :  { %v2087_v42 = vmul.f32 %v2085_v41, %v2078_v30 }
0x12c3   :  { %1986 = vrot.lane.b32.xlu0 %v1984_v40, %s9822_s0 }
0x12c4   :  { %2089 = vrot.lane.b32.xlu1 %v2087_v42, %s9822_s0 }
0x1335   :  { %v1987_v45 = vpop.permute.xlu0 %1986 }
0x1336   :  { %v10462_v48 = vadd.f32 %v1987_v45, %v1979_v44  ;;  %v2090_v49 = vpop.permute.xlu1 %2089 }
0x1337   :  { %v10464_v50 = vadd.f32 %v2090_v49, %v2082_v47 }
0x1338   :  { %9282 = vtanh.f32 %v10462_v48 }
0x1339   :  { %9284 = vtanh.f32 %v10464_v50 }
0x1345   :  { %v9283_v51 = vpop.eup %9282 }
0x1346   :  { %v9285_v52 = vpop.eup %9284  ;;  %1992 = vrot.lane.b32.xlu0 %v9283_v51, %s9821_s18 }
0x1347   :  { %2095 = vrot.lane.b32.xlu1 %v9285_v52, %s9821_s18 }
0x13b8   :  { %v1993_v53 = vpop.permute.xlu0 %1992 }
0x13b9   :  { %v1995_v54 = vmul.f32 %v1993_v53, %v1978_v46  ;;  %v2096_v55 = vpop.permute.xlu1 %2095 }
0x13ba   :  { %v2098_v56 = vmul.f32 %v2096_v55, %v2078_v30  ;;  %v2361_v30 = vrot.slane %v10464_v50, 6 }
0x13bb   :  { %2100 = vrot.lane.b32.xlu0 %v1995_v54, %s9822_s0 }
0x13bc   :  { %v2175_v57 = vrot.slane %v2098_v56, 4 }
0x13be   :  { %2176 = vrot.lane.b32.xlu1 %v2175_v57, %s9822_s0 }
0x142d   :  { %v2101_v58 = vpop.permute.xlu0 %2100 }
0x142e   :  { %8604 = vmatmul.mubr.msk.f32.vlgmr.msra.gmra.mxu0 %vm305_vm6, %v2101_v58 }
0x142f   :  { %8618 = vmatpush3.msra.mxu0 %v10401_v13  ;;  %8625 = vmatprep.mubr.msk.f32.mxu0 %vm9820_vm0, %v9819_v0 }
0x1430   :  { %8619 = vmatprep.subr.mxu0 %v9819_v0  ;;  %v2177_v59 = vpop.permute.xlu1 %2176 }
0x1431   :  { %8620 = vmatpush3.msra.mxu0 %v10410_v14  ;;  %8615 = vmatmul.mubr.msk.f32.vlgmr.msra.gmra.mxu1 %vm305_vm6, %v2177_v59 }
0x1432   :  { %8621 = vmatprep.subr.mxu0 %v9819_v0  ;;  %8629 = vmatpush3.msra.mxu1 %v9536_v60 }
0x1433   :  { %8622 = vmatpush3.msra.mxu0 %v10417_v16  ;;  %8630 = vmatprep.subr.mxu1 %v9819_v0  ;;  %v10524_v16 = vld [vmem:[%s11839_s19] ss:$0 sm:$0xff] }
0x1434   :  { %8623 = vmatprep.subr.mxu0 %v9819_v0  ;;  %8631 = vmatpush3.msra.mxu1 %v9537_v61 }
0x1435   :  { %8624 = vmatpush3.msra.mxu0 %v10425_v17  ;;  %8632 = vmatprep.subr.mxu1 %v9819_v0 }
0x1436   :  { %8626 = vmatmul.mubr.msk.f32.vlgmr.msra.gmra.mxu0 %vm305_vm6, %v2177_v59  ;;  %8633 = vmatpush3.msra.mxu1 %v9538_v62 }
0x1437   :  { %8634 = vmatprep.subr.mxu1 %v9819_v0  ;;  %8639 = vmatprep.subr.mxu0 %v9819_v0 }
0x1438   :  { %8635 = vmatpush3.msra.mxu1 %v9539_v12  ;;  %8636 = vmatprep.mubr.msk.f32.mxu1 %vm9820_vm0, %v9819_v0 }
0x1439   :  { %8640 = vmatpush3.msra.mxu0 %v9540_v63  ;;  %8647 = vmatprep.mubr.msk.f32.mxu0 %vm9820_vm0, %v9819_v0 }
0x143a   :  { %8641 = vmatprep.subr.mxu0 %v9819_v0  ;;  %8650 = vmatprep.subr.mxu1 %v9819_v0 }
0x143b   :  { %8642 = vmatpush3.msra.mxu0 %v9541_v1 }
0x143c   :  { %8643 = vmatprep.subr.mxu0 %v9819_v0 }
0x143d   :  { %8644 = vmatpush3.msra.mxu0 %v9542_v3 }
0x143e   :  { %8645 = vmatprep.subr.mxu0 %v9819_v0 }
0x143f   :  { %8646 = vmatpush3.msra.mxu0 %v9543_v4 }
0x1440   :  { %8661 = vmatprep.subr.mxu0 %v9819_v0 }
0x14ee   :  { %v2170_v8 = vpop.f32.mrf.mxu0 }
0x14f0   :  { %v8605_v9 = vpop.f32.mrf.mxu0 }
0x14f1   :  { %v2246_v11 = vpop.f32.mrf.mxu1 }
0x14f2   :  { %v2247_v13 = vadd.f32 %v2246_v11, %v2170_v8 }
0x14f3   :  { %v8616_v14 = vpop.f32.mrf.mxu1 }
0x14f4   :  { %v2250_v18 = vadd.f32 %v10524_v16, %v2247_v13  ;;  %v2562_v13 = vld [vmem:[%s11802_s8 + $0x18] sm:$0xff]  ;;  %v2561_v14 = vld [vmem:[%s11802_s8 + $0x10] sm:$0xff] }
0x14f6   :  { %v7887_v17 = vmul.f32 -1.442695, %v2250_v18  ;;  %v2343_v31 = vpop.f32.mrf.mxu0  ;;  %v2559_v18 = vld [vmem:[%s11802_s8] sm:$0xff] }
0x14f7   :  { %v2348_v32 = vrot.slane %v2343_v31, 2 }
0x14f8   :  { %9286 = vpow2.f32 %v7887_v17  ;;  %v8627_v33 = vpop.f32.mrf.mxu0 }
0x14f9   :  { %v2350_v34 = vadd.f32 %v2348_v32, %v10040_v10  ;;  %v2651_v32 = vld [vmem:[%s11840_s7] sm:$0x3] }
0x14fb   :  { %v7890_v35 = vmul.f32 -1.442695, %v2350_v34 }
0x14fd   :  { %9288 = vpow2.f32 %v7890_v35  ;;  %v2662_v35 = vld [vmem:[#allocation4] sm:$0xff] }
0x1505   :  { %v9287_v37 = vpop.eup %9286 }
0x1506   :  { %v2254_v24 = vadd.f32 1.0, %v9287_v37  ;;  %v7896_v37 = vld [vmem:[#allocation2] ss:$0 sm:$0xff] }
0x1508   :  { %9290 = vrcp.f32 %v2254_v24 }
0x150a   :  { %v9289_v19 = vpop.eup %9288 }
0x150b   :  { %v2354_v25 = vadd.f32 1.0, %v9289_v19 }
0x150d   :  { %9292 = vrcp.f32 %v2354_v25 }
0x1515   :  { %v9291_v36 = vpop.eup %9290 }
0x1516   :  { %v2257_v2 = vmul.f32 2.0, %v9291_v36 }
0x1518   :  { %v7888_v5 = vadd.f32 -1.0, %v2257_v2 }
0x151a   :  { %v9293_v6 = vpop.eup %9292  ;;  %v2259_v38 = vsel %vm10049_vm5, %v7888_v5, %v9291_v36 }
0x151b   :  { %2262 = vrot.lane.b32.xlu1 %v2259_v38, %s9821_s18  ;;  %v2357_v7 = vmul.f32 2.0, %v9293_v6  ;;  %v2260_v28 = vmul.f32 %v2259_v38, %v10462_v48 }
0x151d   :  { %v7891_v15 = vadd.f32 -1.0, %v2357_v7 }
0x151f   :  { %v2359_v10 = vsel %vm10049_vm5, %v7891_v15, %v9293_v6 }
0x1520   :  { %2365 = vrot.lane.b32.xlu0 %v2359_v10, %s9821_s18  ;;  %v2363_v39 = vmul.f32 %v2361_v30, %v2359_v10 }
0x158d   :  { %v2263_v21 = vpop.permute.xlu1 %2262 }
0x158e   :  { %v2265_v26 = vmul.f32 %v2263_v21, %v2259_v38  ;;  %v10585_v21 = vld [vmem:[%s11805_s11 + $0x18] sm:$0xff] }
0x1590   :  { %2267 = vrot.lane.b32.xlu1 %v2265_v26, %s9822_s0  ;;  %v10590_v26 = vld [vmem:[%s11805_s11 + $0x10] sm:$0xff] }
0x1592   :  { %v2366_v27 = vpop.permute.xlu0 %2365 }
0x1593   :  { %v2368_v22 = vmul.f32 %v2366_v27, %v2359_v10  ;;  %v10599_v27 = vld [vmem:[%s11805_s11 + $0x8] sm:$0xff] }
0x1595   :  { %2370 = vrot.lane.b32.xlu0 %v2368_v22, %s9822_s0  ;;  %v10606_v22 = vld [vmem:[%s11805_s11] sm:$0xff] }
0x1602   :  { %v2268_v29 = vpop.permute.xlu1 %2267 }
0x1603   :  { %v2270_v46 = vadd.f32 %v2268_v29, %v2260_v28 }
0x1605   :  { %9294 = vtanh.f32 %v2270_v46 }
0x1607   :  { %v2371_v40 = vpop.permute.xlu0 %2370 }
0x1608   :  { %v2373_v41 = vadd.f32 %v2371_v40, %v2363_v39 }
0x160a   :  { %9296 = vtanh.f32 %v2373_v41 }
0x1612   :  { %v9295_v42 = vpop.eup %9294 }
0x1613   :  { %2273 = vrot.lane.b32.xlu1 %v9295_v42, %s9821_s18 }
0x1617   :  { %v9297_v43 = vpop.eup %9296 }
0x1618   :  { %2376 = vrot.lane.b32.xlu0 %v9297_v43, %s9821_s18 }
0x1685   :  { %v2274_v44 = vpop.permute.xlu1 %2273 }
0x1686   :  { %v2276_v45 = vmul.f32 %v2274_v44, %v2259_v38 }
0x1688   :  { %2381 = vrot.lane.b32.xlu0 %v2276_v45, %s9822_s0 }
0x168a   :  { %v2377_v47 = vpop.permute.xlu0 %2376 }
0x168b   :  { %v2379_v48 = vmul.f32 %v2377_v47, %v2359_v10 }
0x168d   :  { %v2456_v49 = vrot.slane %v2379_v48, 6 }
0x168f   :  { %2457 = vrot.lane.b32.xlu1 %v2456_v49, %s9822_s0 }
0x16fa   :  { %v2382_v50 = vpop.permute.xlu0 %2381 }
0x16fb   :  { %8637 = vmatmul.mubr.msk.f32.vlgmr.msra.gmra.mxu1 %vm305_vm6, %v2382_v50 }
0x16fc   :  { %8658 = vmatprep.mubr.msk.f32.mxu1 %vm9820_vm0, %v9819_v0  ;;  %8651 = vmatpush3.msra.mxu1 %v2562_v13 }
0x16fd   :  { %8652 = vmatprep.subr.mxu1 %v9819_v0 }
0x16fe   :  { %8653 = vmatpush3.msra.mxu1 %v2561_v14 }
0x16ff   :  { %8654 = vmatprep.subr.mxu1 %v9819_v0 }
0x1701   :  { %v2458_v51 = vpop.permute.xlu1 %2457 }
0x1702   :  { %8648 = vmatmul.mubr.msk.f32.vlgmr.msra.gmra.mxu0 %vm305_vm6, %v2458_v51 }
0x1703   :  { %8663 = vmatprep.mubr.msk.f32.mxu0 %vm9820_vm0, %v9819_v0  ;;  %8662 = vmatpush3.msra.mxu0 %v2662_v35 }
0x1704   :  { %8666 = vmatprep.subr.mxu0 %v9819_v0 }
0x17bb   :  { %v2451_v52 = vpop.f32.mrf.mxu1 }
0x17bd   :  { %v8638_v53 = vpop.f32.mrf.mxu1 }
0x17c2   :  { %v2527_v54 = vpop.f32.mrf.mxu0 }
0x17c3   :  { %v2528_v55 = vadd.f32 %v2527_v54, %v2451_v52 }
0x17c4   :  { %v8649_v56 = vpop.f32.mrf.mxu0 }
0x17c5   :  { %v2531_v57 = vadd.f32 %v10524_v16, %v2528_v55  ;;  %v2560_v16 = vld [vmem:[%s11802_s8 + $0x8] sm:$0xff]  ;;  %v10628_v55 = vld [vmem:[%s11808_s14 + $0x18] sm:$0xff]  ;;  %v10633_v56 = vld [vmem:[%s11808_s14 + $0x10] sm:$0xff] }
0x17c6   :  { %8655 = vmatpush3.msra.mxu1 %v2560_v16 }
0x17c7   :  { %v7894_v58 = vmul.f32 -1.442695, %v2531_v57  ;;  %8656 = vmatprep.subr.mxu1 %v9819_v0  ;;  %v10638_v57 = vld [vmem:[%s11807_s13 + $0x18] sm:$0xff] }
0x17c8   :  { %8657 = vmatpush3.msra.mxu1 %v2559_v18 }
0x17c9   :  { %9298 = vpow2.f32 %v7894_v58  ;;  %8677 = vmatprep.subr.mxu1 %v9819_v0  ;;  %v10645_v58 = vld [vmem:[%s11807_s13 + $0x10] sm:$0xff] }
0x17d6   :  { %v9299_v59 = vpop.eup %9298 }
0x17d7   :  { %v2535_v60 = vadd.f32 1.0, %v9299_v59  ;;  %v10652_v59 = vld [vmem:[%s11808_s14 + $0x8] sm:$0xff] }
0x17d9   :  { %9300 = vrcp.f32 %v2535_v60  ;;  %v10657_v60 = vld [vmem:[%s11807_s13 + $0x8] sm:$0xff] }
0x17e6   :  { %v9301_v61 = vpop.eup %9300 }
0x17e7   :  { %v2538_v62 = vmul.f32 2.0, %v9301_v61 }
0x17e9   :  { %v7895_v12 = vadd.f32 -1.0, %v2538_v62  ;;  %v10671_v62 = vld [vmem:[%s11807_s13] sm:$0xff] }
0x17eb   :  { %v2540_v63 = vsel %vm10049_vm5, %v7895_v12, %v9301_v61  ;;  %v10666_v61 = vld [vmem:[%s11808_s14] sm:$0xff] }
0x17ec   :  { %2543 = vrot.lane.b32.xlu0 %v2540_v63, %s9821_s18  ;;  %v2541_v4 = vmul.f32 %v2540_v63, %v2270_v46  ;;  %v7898_v46 = vld [vmem:[#allocation6] ss:$0 sm:$0xff] }
0x185e   :  { %v2544_v1 = vpop.permute.xlu0 %2543 }
0x185f   :  { %v2546_v3 = vmul.f32 %v2544_v1, %v2540_v63 }
0x1861   :  { %2548 = vrot.lane.b32.xlu1 %v2546_v3, %s9822_s0 }
0x18d3   :  { %v2549_v8 = vpop.permute.xlu1 %2548 }
0x18d4   :  { %v2551_v9 = vadd.f32 %v2549_v8, %v2541_v4 }
0x18d6   :  { %9302 = vtanh.f32 %v2551_v9 }
0x18e3   :  { %v9303_v11 = vpop.eup %9302 }
0x18e4   :  { %2554 = vrot.lane.b32.xlu0 %v9303_v11, %s9821_s18  ;;  %v10692_v11 = vld [vmem:[#allocation7] ss:$0 sm:$0xff] }
0x18e8   :  { %2653 = vrot.lane.b32.xlu0 %v2651_v32, %s9812_s30 }
0x1956   :  { %v2555_v17 = vpop.permute.xlu0 %2554 }
0x1957   :  { %v2557_v31 = vmul.f32 %v2555_v17, %v2540_v63 }
0x1959   :  { %9304 = vtanh.f32 %v2557_v31 }
0x195a   :  { %v2654_v6 = vpop.permute.xlu0 %2653 }
0x1966   :  { %v9305_v33 = vpop.eup %9304 }
0x1967   :  { %2571 = vrot.lane.b32.xlu1 %v9305_v33, %s9822_s0 }
0x19d9   :  { %v2572_v34 = vpop.permute.xlu1 %2571 }
0x19da   :  { %8659 = vmatmul.mubr.msk.f32.vlgmr.msra.gmra.mxu1 %vm305_vm6, %v2572_v34 }
0x19db   :  { %8685 = vmatprep.mubr.msk.f32.mxu1 %vm9820_vm0, %v9819_v0  ;;  %8678 = vmatpush3.msra.mxu1 %v10628_v55 }
0x19dc   :  { %8679 = vmatprep.subr.mxu1 %v9819_v0 }
0x19dd   :  { %8680 = vmatpush3.msra.mxu1 %v10633_v56 }
0x19de   :  { %8681 = vmatprep.subr.mxu1 %v9819_v0 }
0x19df   :  { %8682 = vmatpush3.msra.mxu1 %v10652_v59 }
0x19e0   :  { %8683 = vmatprep.subr.mxu1 %v9819_v0 }
0x19e1   :  { %8684 = vmatpush3.msra.mxu1 %v10666_v61 }
0x19e2   :  { %8686 = vmatmul.mubr.f32.vlgmr.msra.gmra.mxu1 %v9819_v0  ;;  %8699 = vmatprep.subr.mxu1 %v9819_v0 }
0x19e3   :  { %8703 = vmatprep.mubr.msk.f32.mxu1 %vm9820_vm0, %v9819_v0 }
0x1a9a   :  { %v2641_v24 = vpop.f32.mrf.mxu1 }
0x1a9b   :  { %v2642_v19 = vadd.f32 %v7896_v37, %v2641_v24 }
0x1a9c   :  { %v8660_v25 = vpop.f32.mrf.mxu1 }
0x1a9d   :  { %v2645_v36 = vmax.f32 %v2642_v19, 0.0 }
0x1a9f   :  { %2647 = vst.msk [vmem:[%s11817_s23] sm:$0x3] %vm2646_vm7, %v2645_v36  ;;  %v2648_v2 = vmul.f32 0.5, %v2645_v36 }
0x1aa1   :  { %v2649_v5 = vmul.f32 1.442695, %v2648_v2 }
0x1aa2   :  { %v2919_v3 = vpop.f32.mrf.mxu1 }
0x1aa3   :  { %9306 = vpow2.f32 %v2649_v5  ;;  %v10703_v5 = vld [vmem:[#allocation10 + $0x8] sm:$0xff] }
0x1aa4   :  { %v8687_v4 = vpop.f32.mrf.mxu1  ;;  %8700 = vmatpush3.msra.mxu1 %v10703_v5 }
0x1aa5   :  { %8701 = vmatprep.subr.mxu1 %v9819_v0 }
0x1ab0   :  { %v9307_v38 = vpop.eup %9306 }
0x1ab1   :  { %v2656_v7 = vmul.f32 %v9307_v38, %v2654_v6  ;;  %v10705_v6 = vld [vmem:[#allocation10] sm:$0xff]  ;;  %v10709_v38 = vld [vmem:[#allocation9 + $0x18] sm:$0xff] }
0x1ab2   :  { %8702 = vmatpush3.msra.mxu1 %v10705_v6 }
0x1ab3   :  { %2658 = vrot.lane.b32.xlu1 %v2656_v7, %s9823_s28  ;;  %8704 = vmatmul.mubr.f32.vlgmr.msra.gmra.mxu1 %v9819_v0  ;;  %v10714_v7 = vld [vmem:[#allocation9 + $0x10] sm:$0xff]  ;;  %s9824_s28 = smov 96  }
0x1ab4   :  { %8706 = vmatprep.subr.mxu1 %v9819_v0  ;;  %8714 = vmatprep.mubr.msk.f32.mxu1 %vm9820_vm0, %v9819_v0 }
0x1ab5   :  { %8707 = vmatpush3.msra.mxu1 %v10709_v38 }
0x1ab6   :  { %8708 = vmatprep.subr.mxu1 %v9819_v0 }
0x1ab7   :  { %8709 = vmatpush3.msra.mxu1 %v10714_v7 }
0x1ab8   :  { %8710 = vmatprep.subr.mxu1 %v9819_v0 }
0x1b25   :  { %v2659_v15 = vpop.permute.xlu1 %2658 }
0x1b26   :  { %v2661_v10 = vadd.f32 %v2659_v15, %v2645_v36  ;;  %v10720_v15 = vld [vmem:[#allocation9 + $0x8] sm:$0xff] }
0x1b27   :  { %8711 = vmatpush3.msra.mxu1 %v10720_v15 }
0x1b28   :  { %8664 = vmatmul.mubr.msk.f32.vlgmr.msra.gmra.mxu0 %vm2670_vm8, %v2661_v10  ;;  %v10724_v10 = vld [vmem:[#allocation9] sm:$0xff]  ;;  %8712 = vmatprep.subr.mxu1 %v9819_v0 }
0x1b29   :  { %8667 = vmatpush3.msra.mxu0 %v10585_v21  ;;  %8674 = vmatprep.mubr.msk.f32.mxu0 %vm9820_vm0, %v9819_v0 }
0x1b2a   :  { %8668 = vmatprep.subr.mxu0 %v9819_v0  ;;  %8713 = vmatpush3.msra.mxu1 %v10724_v10 }
0x1b2b   :  { %8669 = vmatpush3.msra.mxu0 %v10590_v26  ;;  %8731 = vmatprep.subr.mxu1 %v9819_v0 }
0x1b2c   :  { %8670 = vmatprep.subr.mxu0 %v9819_v0 }
0x1b2d   :  { %8671 = vmatpush3.msra.mxu0 %v10599_v27 }
0x1b2e   :  { %8672 = vmatprep.subr.mxu0 %v9819_v0 }
0x1b2f   :  { %8673 = vmatpush3.msra.mxu0 %v10606_v22 }
0x1b30   :  { %8675 = vmatmul.mubr.f32.vlgmr.msra.gmra.mxu0 %v9819_v0  ;;  %8688 = vmatprep.subr.mxu0 %v9819_v0 }
0x1b31   :  { %8696 = vmatprep.mubr.msk.f32.mxu0 %vm9820_vm0, %v9819_v0  ;;  %8689 = vmatpush3.msra.mxu0 %v10638_v57 }
0x1b32   :  { %8690 = vmatprep.subr.mxu0 %v9819_v0 }
0x1b33   :  { %8691 = vmatpush3.msra.mxu0 %v10645_v58 }
0x1b34   :  { %8692 = vmatprep.subr.mxu0 %v9819_v0 }
0x1b35   :  { %8693 = vmatpush3.msra.mxu0 %v10657_v60 }
0x1b36   :  { %8694 = vmatprep.subr.mxu0 %v9819_v0 }
0x1b37   :  { %8695 = vmatpush3.msra.mxu0 %v10671_v62 }
0x1b38   :  { %8717 = vmatprep.subr.mxu0 %v9819_v0 }
0x1be8   :  { %v2740_v28 = vpop.f32.mrf.mxu0 }
0x1be9   :  { %v10615_v30 = vadd.f32 %v7898_v46, %v2740_v28 }
0x1bea   :  { %v8665_v29 = vpop.f32.mrf.mxu0 }
0x1bf0   :  { %v2814_v39 = vpop.f32.mrf.mxu0 }
0x1bf1   :  { %v2818_v40 = vadd.f32 %v2814_v39, %v10615_v30  ;;  %v3108_v39 = vpop.f32.mrf.mxu1 }
0x1bf2   :  { %v8676_v41 = vpop.f32.mrf.mxu0 }
0x1bf3   :  { %v7900_v42 = vmul.f32 -1.442695, %v2818_v40  ;;  %v8705_v40 = vpop.f32.mrf.mxu1 }
0x1bf5   :  { %9308 = vpow2.f32 %v7900_v42 }
0x1c02   :  { %v9309_v43 = vpop.eup %9308 }
0x1c03   :  { %v2822_v44 = vadd.f32 1.0, %v9309_v43  ;;  %v10757_v43 = vld [vmem:[#allocation12] ss:$0 sm:$0xff] }
0x1c05   :  { %9310 = vrcp.f32 %v2822_v44 }
0x1c12   :  { %v9311_v45 = vpop.eup %9310 }
0x1c13   :  { %v2825_v47 = vmul.f32 2.0, %v9311_v45 }
0x1c15   :  { %v7901_v48 = vadd.f32 -1.0, %v2825_v47 }
0x1c17   :  { %v2827_v49 = vsel %vm10049_vm5, %v7901_v48, %v9311_v45 }
0x1c18   :  { %2830 = vrot.lane.b32.xlu0 %v2827_v49, %s9821_s18  ;;  %v2828_v52 = vmul.f32 0.0, %v2827_v49 }
0x1c8a   :  { %v2831_v50 = vpop.permute.xlu0 %2830 }
0x1c8b   :  { %v2833_v51 = vmul.f32 %v2831_v50, %v2827_v49 }
0x1c8d   :  { %2835 = vrot.lane.b32.xlu1 %v2833_v51, %s9822_s0 }
0x1cff   :  { %v2836_v53 = vpop.permute.xlu1 %2835 }
0x1d00   :  { %v10622_v54 = vadd.f32 %v2836_v53, %v2828_v52 }
0x1d02   :  { %9312 = vtanh.f32 %v10622_v54 }
0x1d0f   :  { %v9313_v12 = vpop.eup %9312 }
0x1d10   :  { %2841 = vrot.lane.b32.xlu0 %v9313_v12, %s9821_s18 }
0x1d82   :  { %v2842_v63 = vpop.permute.xlu0 %2841 }
0x1d83   :  { %v2844_v1 = vmul.f32 %v2842_v63, %v2827_v49 }
0x1d85   :  { %2924 = vrot.lane.b32.xlu1 %v2844_v1, %s9822_s0 }
0x1df7   :  { %v10686_v8 = vpop.permute.xlu1 %2924 }
0x1df8   :  { %8697 = vmatmul.mubr.msk.f32.vlgmr.msra.gmra.mxu0 %vm305_vm6, %v10686_v8 }
0x1df9   :  { %8721 = vmatprep.mubr.msk.f32.mxu0 %vm9820_vm0, %v9819_v0 }
0x1eb8   :  { %v2994_v9 = vpop.f32.mrf.mxu0 }
0x1eb9   :  { %v2995_v13 = vadd.f32 %v2994_v9, %v2919_v3 }
0x1eba   :  { %v8698_v14 = vpop.f32.mrf.mxu0 }
0x1ebb   :  { %v3005_v16 = vadd.f32 %v10692_v11, %v2995_v13 }
0x1ebd   :  { %v7904_v18 = vmul.f32 -1.442695, %v3005_v16 }
0x1ebf   :  { %9314 = vpow2.f32 %v7904_v18 }
0x1ecc   :  { %v9315_v17 = vpop.eup %9314 }
0x1ecd   :  { %v3009_v31 = vadd.f32 1.0, %v9315_v17 }
0x1ecf   :  { %9316 = vrcp.f32 %v3009_v31 }
0x1edc   :  { %v9317_v32 = vpop.eup %9316 }
0x1edd   :  { %v3012_v33 = vmul.f32 2.0, %v9317_v32 }
0x1edf   :  { %v7905_v34 = vadd.f32 -1.0, %v3012_v33 }
0x1ee1   :  { %v3014_v35 = vsel %vm10049_vm5, %v7905_v34, %v9317_v32 }
0x1ee2   :  { %3017 = vrot.lane.b32.xlu0 %v3014_v35, %s9821_s18  ;;  %v3015_v19 = vmul.f32 0.0, %v3014_v35 }
0x1f54   :  { %v3018_v37 = vpop.permute.xlu0 %3017 }
0x1f55   :  { %v3020_v24 = vmul.f32 %v3018_v37, %v3014_v35 }
0x1f57   :  { %3022 = vrot.lane.b32.xlu1 %v3020_v24, %s9822_s0 }
0x1fc9   :  { %v3023_v25 = vpop.permute.xlu1 %3022 }
0x1fca   :  { %v10699_v36 = vadd.f32 %v3023_v25, %v3015_v19 }
0x1fcc   :  { %9318 = vtanh.f32 %v10699_v36 }
0x1fd9   :  { %v9319_v2 = vpop.eup %9318 }
0x1fda   :  { %3028 = vrot.lane.b32.xlu0 %v9319_v2, %s9821_s18  ;;  %v10782_v2 = vld [vmem:[#allocation15 + $0x8] sm:$0xff] }
0x1fdb   :  { %8718 = vmatpush3.msra.mxu0 %v10782_v2 }
0x1fdc   :  { %8719 = vmatprep.subr.mxu0 %v9819_v0 }
0x204c   :  { %v3029_v28 = vpop.permute.xlu0 %3028 }
0x204d   :  { %v10730_v29 = vmul.f32 %v3029_v28, %v3014_v35  ;;  %v10784_v28 = vld [vmem:[#allocation15] sm:$0xff] }
0x204e   :  { %8720 = vmatpush3.msra.mxu0 %v10784_v28 }
0x204f   :  { %9320 = vtanh.f32 %v10730_v29  ;;  %8722 = vmatmul.mubr.f32.vlgmr.msra.gmra.mxu0 %v9819_v0  ;;  %8724 = vmatprep.subr.mxu0 %v9819_v0 }
0x2050   :  { %8728 = vmatprep.mubr.msk.f32.mxu0 %vm9820_vm0, %v9819_v0 }
0x205c   :  { %v9321_v46 = vpop.eup %9320 }
0x205d   :  { %3113 = vrot.lane.b32.xlu1 %v9321_v46, %s9822_s0 }
0x20cf   :  { %v3114_v41 = vpop.permute.xlu1 %3113 }
0x20d0   :  { %8715 = vmatmul.mubr.msk.f32.vlgmr.msra.gmra.mxu1 %vm305_vm6, %v3114_v41 }
0x20d1   :  { %8732 = vmatpush3.msra.mxu1 %v10585_v21  ;;  %8739 = vmatprep.mubr.msk.f32.mxu1 %vm9820_vm0, %v9819_v0 }
0x20d2   :  { %8733 = vmatprep.subr.mxu1 %v9819_v0 }
0x20d3   :  { %8734 = vmatpush3.msra.mxu1 %v10590_v26 }
0x20d4   :  { %8735 = vmatprep.subr.mxu1 %v9819_v0 }
0x20d5   :  { %8736 = vmatpush3.msra.mxu1 %v10599_v27 }
0x20d6   :  { %8737 = vmatprep.subr.mxu1 %v9819_v0 }
0x20d7   :  { %8738 = vmatpush3.msra.mxu1 %v10606_v22 }
0x20d8   :  { %8740 = vmatmul.mubr.msk.f32.vlgmr.msra.gmra.mxu1 %vm305_vm6, %v10686_v8  ;;  %8753 = vmatprep.subr.mxu1 %v9819_v0 }
0x20d9   :  { %8754 = vmatpush3.msra.mxu1 %v10638_v57  ;;  %8761 = vmatprep.mubr.msk.f32.mxu1 %vm9820_vm0, %v9819_v0 }
0x20da   :  { %8755 = vmatprep.subr.mxu1 %v9819_v0 }
0x20db   :  { %8756 = vmatpush3.msra.mxu1 %v10645_v58 }
0x20dc   :  { %8757 = vmatprep.subr.mxu1 %v9819_v0 }
0x20dd   :  { %8758 = vmatpush3.msra.mxu1 %v10657_v60 }
0x20de   :  { %8759 = vmatprep.subr.mxu1 %v9819_v0 }
0x20df   :  { %8760 = vmatpush3.msra.mxu1 %v10671_v62 }
0x20e0   :  { %8782 = vmatprep.subr.mxu1 %v9819_v0 }
0x2190   :  { %v3183_v42 = vpop.f32.mrf.mxu1 }
0x2191   :  { %v3184_v44 = vadd.f32 %v3183_v42, %v3108_v39  ;;  %v10789_v39 = vld [vmem:[#allocation13 + $0x8] sm:$0xff] }
0x2192   :  { %v8716_v45 = vpop.f32.mrf.mxu1  ;;  %8725 = vmatpush3.msra.mxu0 %v10789_v39 }
0x2193   :  { %v3194_v47 = vadd.f32 %v10757_v43, %v3184_v44  ;;  %8726 = vmatprep.subr.mxu0 %v9819_v0 }
0x2195   :  { %v7908_v48 = vmul.f32 -1.442695, %v3194_v47  ;;  %v3293_v47 = vpop.f32.mrf.mxu0 }
0x2197   :  { %9322 = vpow2.f32 %v7908_v48  ;;  %v8723_v48 = vpop.f32.mrf.mxu0 }
0x2198   :  { %v3473_v49 = vpop.f32.mrf.mxu1 }
0x2199   :  { %v3477_v50 = vadd.f32 %v3473_v49, %v10615_v30 }
0x219a   :  { %v8741_v51 = vpop.f32.mrf.mxu1 }
0x219b   :  { %v7915_v52 = vmul.f32 -1.442695, %v3477_v50 }
0x219d   :  { %9324 = vpow2.f32 %v7915_v52 }
0x21a4   :  { %v9323_v53 = vpop.eup %9322 }
0x21a5   :  { %v3198_v12 = vadd.f32 1.0, %v9323_v53 }
0x21a7   :  { %9326 = vrcp.f32 %v3198_v12 }
0x21aa   :  { %v9325_v63 = vpop.eup %9324 }
0x21ab   :  { %v3481_v1 = vadd.f32 1.0, %v9325_v63 }
0x21ad   :  { %9328 = vrcp.f32 %v3481_v1 }
0x21b4   :  { %v9327_v3 = vpop.eup %9326 }
0x21b5   :  { %v3201_v4 = vmul.f32 2.0, %v9327_v3 }
0x21b7   :  { %v7909_v9 = vadd.f32 -1.0, %v3201_v4 }
0x21b9   :  { %v3205_v13 = vsel %vm10763_vm11, %v7909_v9, %v9327_v3 }
0x21ba   :  { %v9329_v14 = vpop.eup %9328  ;;  %3208 = vrot.lane.b32.xlu0 %v3205_v13, %s9824_s28  ;;  %v3206_v34 = vmul.f32 0.0, %v3205_v13 }
0x21bb   :  { %v3484_v16 = vmul.f32 2.0, %v9329_v14 }
0x21bd   :  { %v7916_v18 = vadd.f32 -1.0, %v3484_v16 }
0x21bf   :  { %v3486_v17 = vsel %vm10049_vm5, %v7916_v18, %v9329_v14 }
0x21c0   :  { %3489 = vrot.lane.b32.xlu1 %v3486_v17, %s9821_s18  ;;  %v3487_v24 = vmul.f32 %v3486_v17, %v10622_v54  ;;  %v10794_v54 = vld [vmem:[#allocation13] sm:$0xff] }
0x21c1   :  { %8727 = vmatpush3.msra.mxu0 %v10794_v54 }
0x21c2   :  { %8742 = vmatprep.subr.mxu0 %v9819_v0 }
0x222c   :  { %v3209_v20 = vpop.permute.xlu0 %3208 }
0x222d   :  { %v3211_v31 = vmul.f32 %v3209_v20, %v3205_v13 }
0x222f   :  { %3213 = vrot.lane.b32.xlu0 %v3211_v31, %s9825_s29 }
0x2232   :  { %v3490_v32 = vpop.permute.xlu1 %3489 }
0x2233   :  { %v3492_v33 = vmul.f32 %v3490_v32, %v3486_v17 }
0x2235   :  { %3494 = vrot.lane.b32.xlu1 %v3492_v33, %s9822_s0 }
0x22a1   :  { %v3214_v35 = vpop.permute.xlu0 %3213 }
0x22a2   :  { %v10775_v37 = vadd.f32 %v3214_v35, %v3206_v34 }
0x22a4   :  { %9330 = vtanh.f32 %v10775_v37 }
0x22a7   :  { %v3495_v19 = vpop.permute.xlu1 %3494 }
0x22a8   :  { %v10779_v25 = vadd.f32 %v3495_v19, %v3487_v24  ;;  %v10851_v24 = vld [vmem:[#allocation16] ss:$0 sm:$0xff] }
0x22aa   :  { %9332 = vtanh.f32 %v10779_v25 }
0x22b1   :  { %v9331_v46 = vpop.eup %9330 }
0x22b2   :  { %3219 = vrot.lane.b32.xlu0 %v9331_v46, %s9822_s0 }
0x22b7   :  { %v9333_v40 = vpop.eup %9332 }
0x22b8   :  { %3500 = vrot.lane.b32.xlu1 %v9333_v40, %s9821_s18 }
0x22bc   :  { %3505 = vrot.lane.b32.xlu1 %v10730_v29, %s9822_s0 }
0x2324   :  { %v3220_v41 = vpop.permute.xlu0 %3219 }
0x2325   :  { %v3222_v42 = vmul.f32 %v3220_v41, %v3205_v13 }
0x2327   :  { %3298 = vrot.lane.b32.xlu0 %v3222_v42, %s9826_s3 }
0x232a   :  { %v3501_v44 = vpop.permute.xlu1 %3500 }
0x232b   :  { %v3503_v45 = vmul.f32 %v3501_v44, %v3486_v17 }
0x232d   :  { %3580 = vrot.lane.b32.xlu0 %v3503_v45, %s9822_s0 }
0x232e   :  { %v3506_v50 = vpop.permute.xlu1 %3505 }
0x2399   :  { %v3299_v49 = vpop.permute.xlu0 %3298 }
0x239a   :  { %8729 = vmatmul.mubr.msk.f32.vlgmr.msra.gmra.mxu0 %vm3039_vm12, %v3299_v49 }
0x239b   :  { %8743 = vmatpush3.msra.mxu0 %v10628_v55  ;;  %8750 = vmatprep.mubr.msk.f32.mxu0 %vm9820_vm0, %v9819_v0 }
0x239c   :  { %8744 = vmatprep.subr.mxu0 %v9819_v0 }
0x239d   :  { %8745 = vmatpush3.msra.mxu0 %v10633_v56 }
0x239e   :  { %8746 = vmatprep.subr.mxu0 %v9819_v0 }
0x239f   :  { %8747 = vmatpush3.msra.mxu0 %v10652_v59  ;;  %v10815_v29 = vpop.permute.xlu0 %3580 }
0x23a0   :  { %8748 = vmatprep.subr.mxu0 %v9819_v0  ;;  %8762 = vmatmul.mubr.msk.f32.vlgmr.msra.gmra.mxu1 %vm305_vm6, %v10815_v29 }
0x23a1   :  { %8749 = vmatpush3.msra.mxu0 %v10666_v61  ;;  %8783 = vmatpush3.msra.mxu1 %v10782_v2 }
0x23a2   :  { %8751 = vmatmul.mubr.msk.f32.vlgmr.msra.gmra.mxu0 %vm305_vm6, %v3506_v50  ;;  %8764 = vmatprep.subr.mxu0 %v9819_v0 }
0x23a3   :  { %8765 = vmatpush3.msra.mxu0 %v10703_v5  ;;  %8768 = vmatprep.mubr.msk.f32.mxu0 %vm9820_vm0, %v9819_v0 }
0x23a4   :  { %8766 = vmatprep.subr.mxu0 %v9819_v0  ;;  %8784 = vmatprep.subr.mxu1 %v9819_v0 }
0x23a5   :  { %8767 = vmatpush3.msra.mxu0 %v10705_v6  ;;  %8785 = vmatpush3.msra.mxu1 %v10784_v28 }
0x23a6   :  { %8769 = vmatmul.mubr.msk.f32.vlgmr.msra.gmra.mxu0 %vm3039_vm12, %v3299_v49  ;;  %8771 = vmatprep.subr.mxu0 %v9819_v0 }
0x23a7   :  { %8772 = vmatpush3.msra.mxu0 %v10709_v38  ;;  %8779 = vmatprep.mubr.msk.f32.mxu0 %vm9820_vm0, %v9819_v0 }
0x23a8   :  { %8773 = vmatprep.subr.mxu0 %v9819_v0  ;;  %8786 = vmatprep.mubr.msk.f32.mxu1 %vm9820_vm0, %v9819_v0 }
0x23a9   :  { %8774 = vmatpush3.msra.mxu0 %v10714_v7  ;;  %8789 = vmatprep.subr.mxu1 %v9819_v0 }
0x23aa   :  { %8775 = vmatprep.subr.mxu0 %v9819_v0 }
0x23ab   :  { %8776 = vmatpush3.msra.mxu0 %v10720_v15 }
0x23ac   :  { %8777 = vmatprep.subr.mxu0 %v9819_v0 }
0x23ad   :  { %8778 = vmatpush3.msra.mxu0 %v10724_v10 }
0x23ae   :  { %8796 = vmatprep.subr.mxu0 %v9819_v0 }
0x245a   :  { %v3368_v51 = vpop.f32.mrf.mxu0 }
0x245b   :  { %v3369_v35 = vadd.f32 %v3368_v51, %v3293_v47 }
0x245c   :  { %v8730_v52 = vpop.f32.mrf.mxu0 }
0x245d   :  { %v3379_v19 = vadd.f32 %v10851_v24, %v3369_v35 }
0x245f   :  { %v7912_v46 = vmul.f32 -1.442695, %v3379_v19 }
0x2460   :  { %v3650_v53 = vpop.f32.mrf.mxu1 }
0x2462   :  { %v3575_v12 = vpop.f32.mrf.mxu0  ;;  %v8763_v63 = vpop.f32.mrf.mxu1 }
0x2463   :  { %v3651_v1 = vadd.f32 %v3650_v53, %v3575_v12 }
0x2464   :  { %v8752_v3 = vpop.f32.mrf.mxu0 }
0x2465   :  { %v3654_v4 = vadd.f32 %v10692_v11, %v3651_v1 }
0x2466   :  { %v3748_v9 = vpop.f32.mrf.mxu0 }
0x2467   :  { %v7919_v13 = vmul.f32 -1.442695, %v3654_v4 }
0x2468   :  { %v8770_v14 = vpop.f32.mrf.mxu0 }
0x2469   :  { %9334 = vpow2.f32 %v7919_v13 }
0x2476   :  { %v9335_v16 = vpop.eup %9334 }
0x2477   :  { %v3658_v18 = vadd.f32 1.0, %v9335_v16 }
0x2479   :  { %9336 = vrcp.f32 %v3658_v18 }
0x247a   :  { %9338 = vpow2.f32 %v7912_v46 }
0x2486   :  { %v9337_v17 = vpop.eup %9336 }
0x2487   :  { %v3661_v20 = vmul.f32 2.0, %v9337_v17  ;;  %v9339_v40 = vpop.eup %9338 }
0x2488   :  { %v3383_v41 = vadd.f32 1.0, %v9339_v40 }
0x2489   :  { %v7920_v31 = vadd.f32 -1.0, %v3661_v20 }
0x248a   :  { %9340 = vrcp.f32 %v3383_v41 }
0x248b   :  { %v3663_v32 = vsel %vm10049_vm5, %v7920_v31, %v9337_v17 }
0x248c   :  { %3666 = vrot.lane.b32.xlu1 %v3663_v32, %s9821_s18  ;;  %v3664_v42 = vmul.f32 %v3663_v32, %v10699_v36 }
0x2497   :  { %v9341_v48 = vpop.eup %9340 }
0x2498   :  { %v3386_v49 = vmul.f32 2.0, %v9341_v48 }
0x249a   :  { %v7913_v47 = vadd.f32 -1.0, %v3386_v49 }
0x249c   :  { %v10861_v51 = vsel %vm10763_vm11, %v7913_v47, %v9341_v48 }
0x24fe   :  { %v3667_v33 = vpop.permute.xlu1 %3666 }
0x24ff   :  { %v3669_v34 = vmul.f32 %v3667_v33, %v3663_v32 }
0x2501   :  { %3671 = vrot.lane.b32.xlu0 %v3669_v34, %s9822_s0 }
0x2573   :  { %v3672_v44 = vpop.permute.xlu0 %3671 }
0x2574   :  { %v10855_v45 = vadd.f32 %v3672_v44, %v3664_v42 }
0x2576   :  { %9342 = vtanh.f32 %v10855_v45 }
0x2583   :  { %v9343_v50 = vpop.eup %9342 }
0x2584   :  { %3677 = vrot.lane.b32.xlu1 %v9343_v50, %s9821_s18  ;;  %v3389_v50 = vmul.f32 0.0, %v10861_v51 }
0x2588   :  { %3391 = vrot.lane.b32.xlu1 %v10861_v51, %s9824_s28 }
0x25f6   :  { %v3678_v52 = vpop.permute.xlu1 %3677 }
0x25f7   :  { %v10865_v36 = vmul.f32 %v3678_v52, %v3663_v32 }
0x25f9   :  { %9344 = vtanh.f32 %v10865_v36 }
0x25fa   :  { %v3392_v35 = vpop.permute.xlu1 %3391 }
0x25fb   :  { %v3394_v41 = vmul.f32 %v3392_v35, %v10861_v51 }
0x2606   :  { %v9345_v53 = vpop.eup %9344 }
0x2607   :  { %3753 = vrot.lane.b32.xlu0 %v9345_v53, %s9822_s0 }
0x2679   :  { %v3754_v12 = vpop.permute.xlu0 %3753 }
0x267a   :  { %8780 = vmatmul.mubr.msk.f32.vlgmr.msra.gmra.mxu0 %vm305_vm6, %v3754_v12 }
0x267b   :  { %8797 = vmatpush3.msra.mxu0 %v10585_v21  ;;  %8804 = vmatprep.mubr.msk.f32.mxu0 %vm9820_vm0, %v9819_v0 }
0x267c   :  { %8798 = vmatprep.subr.mxu0 %v9819_v0 }
0x267d   :  { %8799 = vmatpush3.msra.mxu0 %v10590_v26 }
0x267e   :  { %8800 = vmatprep.subr.mxu0 %v9819_v0 }
0x267f   :  { %8801 = vmatpush3.msra.mxu0 %v10599_v27 }
0x2680   :  { %8802 = vmatprep.subr.mxu0 %v9819_v0 }
0x2681   :  { %8803 = vmatpush3.msra.mxu0 %v10606_v22 }
0x2682   :  { %8805 = vmatmul.mubr.msk.f32.vlgmr.msra.gmra.mxu0 %vm305_vm6, %v10815_v29  ;;  %8818 = vmatprep.subr.mxu0 %v9819_v0 }
0x2683   :  { %8819 = vmatpush3.msra.mxu0 %v10638_v57  ;;  %8826 = vmatprep.mubr.msk.f32.mxu0 %vm9820_vm0, %v9819_v0 }
0x2684   :  { %8820 = vmatprep.subr.mxu0 %v9819_v0 }
0x2685   :  { %8821 = vmatpush3.msra.mxu0 %v10645_v58 }
0x2686   :  { %8822 = vmatprep.subr.mxu0 %v9819_v0 }
0x2687   :  { %8823 = vmatpush3.msra.mxu0 %v10657_v60 }
0x2688   :  { %8824 = vmatprep.subr.mxu0 %v9819_v0 }
0x2689   :  { %8825 = vmatpush3.msra.mxu0 %v10671_v62 }
0x268a   :  { %8847 = vmatprep.subr.mxu0 %v9819_v0 }
0x273a   :  { %v3823_v29 = vpop.f32.mrf.mxu0 }
0x273b   :  { %v3824_v63 = vadd.f32 %v3823_v29, %v3748_v9 }
0x273c   :  { %v8781_v1 = vpop.f32.mrf.mxu0 }
0x273d   :  { %v3827_v3 = vadd.f32 %v10757_v43, %v3824_v63 }
0x273f   :  { %v7923_v4 = vmul.f32 -1.442695, %v3827_v3 }
0x2741   :  { %9346 = vpow2.f32 %v7923_v4 }
0x2742   :  { %v4098_v13 = vpop.f32.mrf.mxu0 }
0x2743   :  { %v4102_v14 = vadd.f32 %v4098_v13, %v10615_v30 }
0x2744   :  { %v8806_v16 = vpop.f32.mrf.mxu0 }
0x2745   :  { %v7930_v18 = vmul.f32 -1.442695, %v4102_v14 }
0x2747   :  { %9348 = vpow2.f32 %v7930_v18 }
0x274e   :  { %v9347_v17 = vpop.eup %9346 }
0x274f   :  { %v3831_v20 = vadd.f32 1.0, %v9347_v17 }
0x2751   :  { %9350 = vrcp.f32 %v3831_v20 }
0x2754   :  { %v9349_v31 = vpop.eup %9348 }
0x2755   :  { %v4106_v32 = vadd.f32 1.0, %v9349_v31 }
0x2757   :  { %9352 = vrcp.f32 %v4106_v32 }
0x275e   :  { %v9351_v33 = vpop.eup %9350 }
0x275f   :  { %v3834_v34 = vmul.f32 2.0, %v9351_v33 }
0x2761   :  { %v7924_v9 = vadd.f32 -1.0, %v3834_v34 }
0x2763   :  { %v3836_v19 = vsel %vm10763_vm11, %v7924_v9, %v9351_v33 }
0x2764   :  { %v9353_v46 = vpop.eup %9352  ;;  %3839 = vrot.lane.b32.xlu0 %v3836_v19, %s9824_s28  ;;  %v3837_v63 = vmul.f32 %v3836_v19, %v10775_v37 }
0x2765   :  { %v4109_v40 = vmul.f32 2.0, %v9353_v46 }
0x2767   :  { %v7931_v42 = vadd.f32 -1.0, %v4109_v40 }
0x2768   :  { %3396 = vrot.lane.b32.xlu0 %v3394_v41, %s9825_s29 }
0x2769   :  { %v4111_v44 = vsel %vm10049_vm5, %v7931_v42, %v9353_v46 }
0x276a   :  { %4114 = vrot.lane.b32.xlu1 %v4111_v44, %s9821_s18  ;;  %v4112_v4 = vmul.f32 %v4111_v44, %v10779_v25 }
0x27d6   :  { %v3840_v48 = vpop.permute.xlu0 %3839 }
0x27d7   :  { %v3842_v49 = vmul.f32 %v3840_v48, %v3836_v19 }
0x27d9   :  { %3844 = vrot.lane.b32.xlu1 %v3842_v49, %s9825_s29 }
0x27da   :  { %v3397_v47 = vpop.permute.xlu0 %3396 }
0x27db   :  { %v10904_v52 = vadd.f32 %v3397_v47, %v3389_v50 }
0x27dc   :  { %v4115_v53 = vpop.permute.xlu1 %4114 }
0x27dd   :  { %9354 = vtanh.f32 %v10904_v52  ;;  %v4117_v12 = vmul.f32 %v4115_v53, %v4111_v44 }
0x27df   :  { %4119 = vrot.lane.b32.xlu0 %v4117_v12, %s9822_s0 }
0x27ea   :  { %v9355_v29 = vpop.eup %9354 }
0x27eb   :  { %3402 = vrot.lane.b32.xlu1 %v9355_v29, %s9822_s0 }
0x284b   :  { %v3845_v1 = vpop.permute.xlu1 %3844 }
0x284c   :  { %v10910_v3 = vadd.f32 %v3845_v1, %v3837_v63 }
0x284e   :  { %9356 = vtanh.f32 %v10910_v3 }
0x2851   :  { %v4120_v13 = vpop.permute.xlu0 %4119 }
0x2852   :  { %v10914_v14 = vadd.f32 %v4120_v13, %v4112_v4 }
0x2854   :  { %9358 = vtanh.f32 %v10914_v14 }
0x285b   :  { %v9357_v16 = vpop.eup %9356 }
0x285c   :  { %3850 = vrot.lane.b32.xlu0 %v9357_v16, %s9822_s0 }
0x285d   :  { %v3403_v18 = vpop.permute.xlu1 %3402 }
0x285e   :  { %v10919_v17 = vmul.f32 %v3403_v18, %v10861_v51 }
0x2860   :  { %3855 = vrot.lane.b32.xlu0 %v10919_v17, %s9826_s3 }
0x2861   :  { %v9359_v37 = vpop.eup %9358 }
0x2862   :  { %4125 = vrot.lane.b32.xlu1 %v9359_v37, %s9821_s18 }
0x2864   :  { %4130 = vrot.lane.b32.xlu0 %v10865_v36, %s9822_s0 }
0x28ce   :  { %v3851_v25 = vpop.permute.xlu0 %3850 }
0x28cf   :  { %v3853_v20 = vmul.f32 %v3851_v25, %v3836_v19 }
0x28d1   :  { %3930 = vrot.lane.b32.xlu1 %v3853_v20, %s9826_s3 }
0x28d2   :  { %v3856_v31 = vpop.permute.xlu0 %3855 }
0x28d3   :  { %8787 = vmatmul.mubr.msk.f32.vlgmr.msra.gmra.mxu1 %vm3039_vm12, %v3856_v31 }
0x28d4   :  { %v4126_v32 = vpop.permute.xlu1 %4125  ;;  %8790 = vmatpush3.msra.mxu1 %v10789_v39  ;;  %8793 = vmatprep.mubr.msk.f32.mxu1 %vm9820_vm0, %v9819_v0 }
0x28d5   :  { %v4128_v51 = vmul.f32 %v4126_v32, %v4111_v44  ;;  %8791 = vmatprep.subr.mxu1 %v9819_v0 }
0x28d6   :  { %8792 = vmatpush3.msra.mxu1 %v10794_v54  ;;  %v4131_v34 = vpop.permute.xlu0 %4130 }
0x28d7   :  { %4205 = vrot.lane.b32.xlu1 %v4128_v51, %s9822_s0  ;;  %8807 = vmatprep.subr.mxu1 %v9819_v0 }
0x2943   :  { %v3931_v36 = vpop.permute.xlu1 %3930 }
0x2944   :  { %8794 = vmatmul.mubr.msk.f32.vlgmr.msra.gmra.mxu1 %vm3039_vm12, %v3931_v36 }
0x2945   :  { %8808 = vmatpush3.msra.mxu1 %v10628_v55  ;;  %8815 = vmatprep.mubr.msk.f32.mxu1 %vm9820_vm0, %v9819_v0 }
0x2946   :  { %8809 = vmatprep.subr.mxu1 %v9819_v0 }
0x2947   :  { %8810 = vmatpush3.msra.mxu1 %v10633_v56 }
0x2948   :  { %8811 = vmatprep.subr.mxu1 %v9819_v0 }
0x2949   :  { %8812 = vmatpush3.msra.mxu1 %v10652_v59  ;;  %v10943_v33 = vpop.permute.xlu1 %4205 }
0x294a   :  { %8813 = vmatprep.subr.mxu1 %v9819_v0  ;;  %8827 = vmatmul.mubr.msk.f32.vlgmr.msra.gmra.mxu0 %vm305_vm6, %v10943_v33 }
0x294b   :  { %8814 = vmatpush3.msra.mxu1 %v10666_v61  ;;  %8848 = vmatpush3.msra.mxu0 %v10782_v2 }
0x294c   :  { %8816 = vmatmul.mubr.msk.f32.vlgmr.msra.gmra.mxu1 %vm305_vm6, %v4131_v34  ;;  %8829 = vmatprep.subr.mxu1 %v9819_v0 }
0x294d   :  { %8830 = vmatpush3.msra.mxu1 %v10703_v5  ;;  %8833 = vmatprep.mubr.msk.f32.mxu1 %vm9820_vm0, %v9819_v0 }
0x294e   :  { %8831 = vmatprep.subr.mxu1 %v9819_v0  ;;  %8849 = vmatprep.subr.mxu0 %v9819_v0 }
0x294f   :  { %8832 = vmatpush3.msra.mxu1 %v10705_v6  ;;  %8850 = vmatpush3.msra.mxu0 %v10784_v28 }
0x2950   :  { %8834 = vmatmul.mubr.msk.f32.vlgmr.msra.gmra.mxu1 %vm3039_vm12, %v3931_v36  ;;  %8836 = vmatprep.subr.mxu1 %v9819_v0 }
0x2951   :  { %8837 = vmatpush3.msra.mxu1 %v10709_v38  ;;  %8844 = vmatprep.mubr.msk.f32.mxu1 %vm9820_vm0, %v9819_v0 }
0x2952   :  { %8838 = vmatprep.subr.mxu1 %v9819_v0  ;;  %8851 = vmatprep.mubr.msk.f32.mxu0 %vm9820_vm0, %v9819_v0 }
0x2953   :  { %8839 = vmatpush3.msra.mxu1 %v10714_v7  ;;  %8854 = vmatprep.subr.mxu0 %v9819_v0 }
0x2954   :  { %8840 = vmatprep.subr.mxu1 %v9819_v0 }
0x2955   :  { %8841 = vmatpush3.msra.mxu1 %v10720_v15 }
0x2956   :  { %8842 = vmatprep.subr.mxu1 %v9819_v0 }
0x2957   :  { %8843 = vmatpush3.msra.mxu1 %v10724_v10 }
0x2958   :  { %8861 = vmatprep.subr.mxu1 %v9819_v0 }
0x2993   :  { %v3925_v55 = vpop.f32.mrf.mxu1 }
0x2995   :  { %v8788_v56 = vpop.f32.mrf.mxu1 }
0x2a04   :  { %v4000_v59 = vpop.f32.mrf.mxu1 }
0x2a06   :  { %v8795_v61 = vpop.f32.mrf.mxu1 }
0x2a0a   :  { %v4275_v9 = vpop.f32.mrf.mxu0 }
0x2a0c   :  { %v4200_v35 = vpop.f32.mrf.mxu1  ;;  %v8828_v19 = vpop.f32.mrf.mxu0 }
0x2a0d   :  { %v4276_v46 = vadd.f32 %v4275_v9, %v4200_v35 }
0x2a0e   :  { %v8817_v40 = vpop.f32.mrf.mxu1 }
0x2a0f   :  { %v4279_v41 = vadd.f32 %v10692_v11, %v4276_v46  ;;  %v4001_v11 = vadd.f32 %v4000_v59, %v3925_v55 }
0x2a10   :  { %v4373_v42 = vpop.f32.mrf.mxu1 }
0x2a11   :  { %v7934_v44 = vmul.f32 -1.442695, %v4279_v41  ;;  %v4004_v4 = vadd.f32 %v10851_v24, %v4001_v11 }
0x2a12   :  { %v8835_v48 = vpop.f32.mrf.mxu1 }
0x2a13   :  { %9360 = vpow2.f32 %v7934_v44  ;;  %v7927_v13 = vmul.f32 -1.442695, %v4004_v4 }
0x2a20   :  { %v9361_v49 = vpop.eup %9360 }
0x2a21   :  { %v4283_v50 = vadd.f32 1.0, %v9361_v49 }
0x2a23   :  { %9362 = vrcp.f32 %v4283_v50 }
0x2a24   :  { %9364 = vpow2.f32 %v7927_v13 }
0x2a30   :  { %v9363_v47 = vpop.eup %9362 }
0x2a31   :  { %v4286_v53 = vmul.f32 2.0, %v9363_v47  ;;  %v9365_v16 = vpop.eup %9364 }
0x2a32   :  { %v4008_v18 = vadd.f32 1.0, %v9365_v16 }
0x2a33   :  { %v7935_v12 = vadd.f32 -1.0, %v4286_v53 }
0x2a34   :  { %9366 = vrcp.f32 %v4008_v18 }
0x2a35   :  { %v4288_v29 = vsel %vm10049_vm5, %v7935_v12, %v9363_v47 }
0x2a36   :  { %4291 = vrot.lane.b32.xlu0 %v4288_v29, %s9821_s18  ;;  %v4289_v37 = vmul.f32 %v4288_v29, %v10855_v45 }
0x2a41   :  { %v9367_v31 = vpop.eup %9366 }
0x2a42   :  { %v4011_v32 = vmul.f32 2.0, %v9367_v31 }
0x2a44   :  { %v7928_v36 = vadd.f32 -1.0, %v4011_v32 }
0x2a46   :  { %v10987_v34 = vsel %vm10763_vm11, %v7928_v36, %v9367_v31 }
0x2aa8   :  { %v4292_v63 = vpop.permute.xlu0 %4291 }
0x2aa9   :  { %v4294_v1 = vmul.f32 %v4292_v63, %v4288_v29 }
0x2aab   :  { %4296 = vrot.lane.b32.xlu1 %v4294_v1, %s9822_s0 }
0x2b1d   :  { %v4297_v25 = vpop.permute.xlu1 %4296 }
0x2b1e   :  { %v10981_v20 = vadd.f32 %v4297_v25, %v4289_v37 }
0x2b20   :  { %9368 = vtanh.f32 %v10981_v20 }
0x2b2d   :  { %v9369_v51 = vpop.eup %9368 }
0x2b2e   :  { %4302 = vrot.lane.b32.xlu0 %v9369_v51, %s9821_s18 }
0x2b32   :  { %4016 = vrot.lane.b32.xlu0 %v10987_v34, %s9824_s28 }
0x2ba0   :  { %v4303_v55 = vpop.permute.xlu0 %4302 }
0x2ba1   :  { %v10991_v45 = vmul.f32 %v4303_v55, %v4288_v29  ;;  %v4014_v29 = vmul.f32 %v10987_v34, %v10904_v52 }
0x2ba3   :  { %9370 = vtanh.f32 %v10991_v45 }
0x2bb0   :  { %v9371_v56 = vpop.eup %9370 }
0x2bb1   :  { %4378 = vrot.lane.b32.xlu1 %v9371_v56, %s9822_s0 }
0x2c23   :  { %v4379_v59 = vpop.permute.xlu1 %4378 }
0x2c24   :  { %8845 = vmatmul.mubr.msk.f32.vlgmr.msra.gmra.mxu1 %vm305_vm6, %v4379_v59 }
0x2c25   :  { %8862 = vmatpush3.msra.mxu1 %v10585_v21  ;;  %8869 = vmatprep.mubr.msk.f32.mxu1 %vm9820_vm0, %v9819_v0 }
0x2c26   :  { %8863 = vmatprep.subr.mxu1 %v9819_v0 }
0x2c27   :  { %8864 = vmatpush3.msra.mxu1 %v10590_v26 }
0x2c28   :  { %8865 = vmatprep.subr.mxu1 %v9819_v0 }
0x2c29   :  { %8866 = vmatpush3.msra.mxu1 %v10599_v27 }
0x2c2a   :  { %8867 = vmatprep.subr.mxu1 %v9819_v0 }
0x2c2b   :  { %8868 = vmatpush3.msra.mxu1 %v10606_v22 }
0x2c2c   :  { %8870 = vmatmul.mubr.msk.f32.vlgmr.msra.gmra.mxu1 %vm305_vm6, %v10943_v33  ;;  %8883 = vmatprep.subr.mxu1 %v9819_v0 }
0x2c2d   :  { %8884 = vmatpush3.msra.mxu1 %v10638_v57  ;;  %8891 = vmatprep.mubr.msk.f32.mxu1 %vm9820_vm0, %v9819_v0 }
0x2c2e   :  { %8885 = vmatprep.subr.mxu1 %v9819_v0 }
0x2c2f   :  { %8886 = vmatpush3.msra.mxu1 %v10645_v58 }
0x2c30   :  { %8887 = vmatprep.subr.mxu1 %v9819_v0 }
0x2c31   :  { %8888 = vmatpush3.msra.mxu1 %v10657_v60 }
0x2c32   :  { %8889 = vmatprep.subr.mxu1 %v9819_v0 }
0x2c33   :  { %8890 = vmatpush3.msra.mxu1 %v10671_v62 }
0x2c34   :  { %8912 = vmatprep.subr.mxu1 %v9819_v0 }
0x2ce4   :  { %v4448_v21 = vpop.f32.mrf.mxu1 }
0x2ce5   :  { %v4449_v26 = vadd.f32 %v4448_v21, %v4373_v42  ;;  %v4017_v42 = vpop.permute.xlu0 %4016  ;;  %v11066_v21 = vld [vmem:[%s11808_s14 + $0x18] sm:$0xff] }
0x2ce6   :  { %v8846_v27 = vpop.f32.mrf.mxu1  ;;  %v4019_v49 = vmul.f32 %v4017_v42, %v10987_v34 }
0x2ce7   :  { %v4452_v22 = vadd.f32 %v10757_v43, %v4449_v26 }
0x2ce9   :  { %v7938_v57 = vmul.f32 -1.442695, %v4452_v22  ;;  %v11093_v22 = vld [vmem:[%s11808_s14] sm:$0xff] }
0x2ceb   :  { %9372 = vpow2.f32 %v7938_v57 }
0x2cec   :  { %v4723_v33 = vpop.f32.mrf.mxu1 }
0x2ced   :  { %v4727_v58 = vadd.f32 %v4723_v33, %v10615_v30 }
0x2cee   :  { %v8871_v61 = vpop.f32.mrf.mxu1 }
0x2cef   :  { %v7945_v9 = vmul.f32 -1.442695, %v4727_v58  ;;  %v11121_v61 = vld [vmem:[#allocation7] ss:$0 sm:$0xff] }
0x2cf1   :  { %9374 = vpow2.f32 %v7945_v9 }
0x2cf8   :  { %v9373_v60 = vpop.eup %9372 }
0x2cf9   :  { %v4456_v35 = vadd.f32 1.0, %v9373_v60 }
0x2cfb   :  { %9376 = vrcp.f32 %v4456_v35 }
0x2cfe   :  { %v9375_v19 = vpop.eup %9374 }
0x2cff   :  { %v4731_v62 = vadd.f32 1.0, %v9375_v19 }
0x2d01   :  { %9378 = vrcp.f32 %v4731_v62 }
0x2d08   :  { %v9377_v46 = vpop.eup %9376 }
0x2d09   :  { %v4459_v40 = vmul.f32 2.0, %v9377_v46 }
0x2d0b   :  { %v7939_v41 = vadd.f32 -1.0, %v4459_v40 }
0x2d0d   :  { %v4461_v43 = vsel %vm10763_vm11, %v7939_v41, %v9377_v46 }
0x2d0e   :  { %v9379_v44 = vpop.eup %9378  ;;  %4464 = vrot.lane.b32.xlu1 %v4461_v43, %s9824_s28  ;;  %v4462_v16 = vmul.f32 %v4461_v43, %v10910_v3 }
0x2d0f   :  { %v4734_v48 = vmul.f32 2.0, %v9379_v44 }
0x2d11   :  { %v7946_v50 = vadd.f32 -1.0, %v4734_v48 }
0x2d12   :  { %4021 = vrot.lane.b32.xlu1 %v4019_v49, %s9825_s29 }
0x2d13   :  { %v4736_v47 = vsel %vm10049_vm5, %v7946_v50, %v9379_v44 }
0x2d14   :  { %4739 = vrot.lane.b32.xlu0 %v4736_v47, %s9821_s18  ;;  %v4737_v52 = vmul.f32 %v4736_v47, %v10914_v14 }
0x2d80   :  { %v4465_v53 = vpop.permute.xlu1 %4464 }
0x2d81   :  { %v4467_v12 = vmul.f32 %v4465_v53, %v4461_v43 }
0x2d83   :  { %4469 = vrot.lane.b32.xlu0 %v4467_v12, %s9825_s29 }
0x2d84   :  { %v4022_v63 = vpop.permute.xlu1 %4021 }
0x2d85   :  { %v11031_v1 = vadd.f32 %v4022_v63, %v4014_v29 }
0x2d86   :  { %v4740_v11 = vpop.permute.xlu0 %4739 }
0x2d87   :  { %9380 = vtanh.f32 %v11031_v1  ;;  %v4742_v4 = vmul.f32 %v4740_v11, %v4736_v47 }
0x2d89   :  { %4744 = vrot.lane.b32.xlu1 %v4742_v4, %s9822_s0 }
0x2d94   :  { %v9381_v13 = vpop.eup %9380 }
0x2d95   :  { %4027 = vrot.lane.b32.xlu0 %v9381_v13, %s9822_s0 }
0x2df5   :  { %v4470_v18 = vpop.permute.xlu0 %4469 }
0x2df6   :  { %v11037_v37 = vadd.f32 %v4470_v18, %v4462_v16 }
0x2df8   :  { %9382 = vtanh.f32 %v11037_v37 }
0x2dfb   :  { %v4745_v25 = vpop.permute.xlu1 %4744 }
0x2dfc   :  { %v11041_v31 = vadd.f32 %v4745_v25, %v4737_v52  ;;  %v11150_v25 = vld [vmem:[%s11805_s11 + $0x18] sm:$0xff] }
0x2dfe   :  { %9384 = vtanh.f32 %v11041_v31 }
0x2e05   :  { %v9383_v32 = vpop.eup %9382 }
0x2e06   :  { %4475 = vrot.lane.b32.xlu1 %v9383_v32, %s9822_s0  ;;  %v11159_v32 = vld [vmem:[%s11805_s11 + $0x10] sm:$0xff] }
0x2e07   :  { %v4028_v51 = vpop.permute.xlu0 %4027 }
0x2e08   :  { %v11046_v36 = vmul.f32 %v4028_v51, %v10987_v34  ;;  %v11166_v51 = vld [vmem:[%s11805_s11 + $0x8] sm:$0xff] }
0x2e0a   :  { %4480 = vrot.lane.b32.xlu1 %v11046_v36, %s9826_s3 }
0x2e0b   :  { %v9385_v3 = vpop.eup %9384 }
0x2e0c   :  { %4750 = vrot.lane.b32.xlu0 %v9385_v3, %s9821_s18  ;;  %v11173_v3 = vld [vmem:[%s11805_s11] sm:$0xff] }
0x2e0e   :  { %4755 = vrot.lane.b32.xlu1 %v10991_v45, %s9822_s0 }
0x2e78   :  { %v4476_v14 = vpop.permute.xlu1 %4475 }
0x2e79   :  { %v4478_v55 = vmul.f32 %v4476_v14, %v4461_v43  ;;  %v11182_v14 = vld [vmem:[%s11807_s13 + $0x18] sm:$0xff] }
0x2e7b   :  { %4555 = vrot.lane.b32.xlu0 %v4478_v55, %s9826_s3  ;;  %v11191_v55 = vld [vmem:[%s11807_s13 + $0x10] sm:$0xff] }
0x2e7c   :  { %v4481_v56 = vpop.permute.xlu1 %4480 }
0x2e7d   :  { %8852 = vmatmul.mubr.msk.f32.vlgmr.msra.gmra.mxu0 %vm3039_vm12, %v4481_v56  ;;  %v11198_v56 = vld [vmem:[%s11807_s13 + $0x8] sm:$0xff] }
0x2e7e   :  { %v4751_v59 = vpop.permute.xlu0 %4750  ;;  %8855 = vmatpush3.msra.mxu0 %v10789_v39  ;;  %8858 = vmatprep.mubr.msk.f32.mxu0 %vm9820_vm0, %v9819_v0  ;;  %v11075_v39 = vld [vmem:[%s11808_s14 + $0x10] sm:$0xff] }
0x2e7f   :  { %v4753_v34 = vmul.f32 %v4751_v59, %v4736_v47  ;;  %8856 = vmatprep.subr.mxu0 %v9819_v0  ;;  %v11205_v59 = vld [vmem:[%s11807_s13] sm:$0xff] }
0x2e80   :  { %8857 = vmatpush3.msra.mxu0 %v10794_v54  ;;  %v11082_v54 = vld [vmem:[%s11808_s14 + $0x8] sm:$0xff]  ;;  %v4756_v27 = vpop.permute.xlu1 %4755 }
0x2e81   :  { %4830 = vrot.lane.b32.xlu0 %v4753_v34, %s9822_s0  ;;  %8872 = vmatprep.subr.mxu0 %v9819_v0 }
0x2eed   :  { %v4556_v45 = vpop.permute.xlu0 %4555 }
0x2eee   :  { %8859 = vmatmul.mubr.msk.f32.vlgmr.msra.gmra.mxu0 %vm3039_vm12, %v4556_v45 }
0x2eef   :  { %8873 = vmatpush3.msra.mxu0 %v11066_v21  ;;  %8880 = vmatprep.mubr.msk.f32.mxu0 %vm9820_vm0, %v9819_v0 }
0x2ef0   :  { %8874 = vmatprep.subr.mxu0 %v9819_v0 }
0x2ef1   :  { %8875 = vmatpush3.msra.mxu0 %v11075_v39 }
0x2ef2   :  { %8876 = vmatprep.subr.mxu0 %v9819_v0 }
0x2ef3   :  { %8877 = vmatpush3.msra.mxu0 %v11082_v54  ;;  %v11085_v26 = vpop.permute.xlu0 %4830 }
0x2ef4   :  { %8878 = vmatprep.subr.mxu0 %v9819_v0  ;;  %8892 = vmatmul.mubr.msk.f32.vlgmr.msra.gmra.mxu1 %vm305_vm6, %v11085_v26 }
0x2ef5   :  { %8879 = vmatpush3.msra.mxu0 %v11093_v22  ;;  %8913 = vmatpush3.msra.mxu1 %v10782_v2 }
0x2ef6   :  { %8881 = vmatmul.mubr.msk.f32.vlgmr.msra.gmra.mxu0 %vm305_vm6, %v4756_v27  ;;  %8894 = vmatprep.subr.mxu0 %v9819_v0  ;;  %v11210_v27 = vld [vmem:[#allocation12] ss:$0 sm:$0xff] }
0x2ef7   :  { %8895 = vmatpush3.msra.mxu0 %v10703_v5  ;;  %8898 = vmatprep.mubr.msk.f32.mxu0 %vm9820_vm0, %v9819_v0 }
0x2ef8   :  { %8896 = vmatprep.subr.mxu0 %v9819_v0  ;;  %8914 = vmatprep.subr.mxu1 %v9819_v0 }
0x2ef9   :  { %8897 = vmatpush3.msra.mxu0 %v10705_v6  ;;  %8915 = vmatpush3.msra.mxu1 %v10784_v28 }
0x2efa   :  { %8899 = vmatmul.mubr.msk.f32.vlgmr.msra.gmra.mxu0 %vm3039_vm12, %v4556_v45  ;;  %8901 = vmatprep.subr.mxu0 %v9819_v0 }
0x2efb   :  { %8902 = vmatpush3.msra.mxu0 %v10709_v38  ;;  %8909 = vmatprep.mubr.msk.f32.mxu0 %vm9820_vm0, %v9819_v0 }
0x2efc   :  { %8903 = vmatprep.subr.mxu0 %v9819_v0  ;;  %8916 = vmatprep.mubr.msk.f32.mxu1 %vm9820_vm0, %v9819_v0 }
0x2efd   :  { %8904 = vmatpush3.msra.mxu0 %v10714_v7  ;;  %8919 = vmatprep.subr.mxu1 %v9819_v0 }
0x2efe   :  { %8905 = vmatprep.subr.mxu0 %v9819_v0 }
0x2eff   :  { %8906 = vmatpush3.msra.mxu0 %v10720_v15 }
0x2f00   :  { %8907 = vmatprep.subr.mxu0 %v9819_v0 }
0x2f01   :  { %8908 = vmatpush3.msra.mxu0 %v10724_v10 }
0x2f02   :  { %8926 = vmatprep.subr.mxu0 %v9819_v0 }
0x2f3d   :  { %v4550_v5 = vpop.f32.mrf.mxu0 }
0x2f3f   :  { %v8853_v6 = vpop.f32.mrf.mxu0 }
0x2fae   :  { %v4625_v38 = vpop.f32.mrf.mxu0 }
0x2faf   :  { %v4626_v44 = vadd.f32 %v4625_v38, %v4550_v5 }
0x2fb0   :  { %v8860_v2 = vpop.f32.mrf.mxu0 }
0x2fb1   :  { %v4629_v48 = vadd.f32 %v10851_v24, %v4626_v44 }
0x2fb3   :  { %v7942_v49 = vmul.f32 -1.442695, %v4629_v48 }
0x2fb4   :  { %v4900_v28 = vpop.f32.mrf.mxu1 }
0x2fb6   :  { %v4825_v57 = vpop.f32.mrf.mxu0  ;;  %v8893_v33 = vpop.f32.mrf.mxu1 }
0x2fb7   :  { %v4901_v7 = vadd.f32 %v4900_v28, %v4825_v57 }
0x2fb8   :  { %v8882_v58 = vpop.f32.mrf.mxu0 }
0x2fb9   :  { %v4904_v9 = vadd.f32 %v11121_v61, %v4901_v7 }
0x2fba   :  { %v11124_v15 = vpop.f32.mrf.mxu0 }
0x2fbb   :  { %v7949_v60 = vmul.f32 -1.442695, %v4904_v9 }
0x2fbc   :  { %v8900_v35 = vpop.f32.mrf.mxu0 }
0x2fbd   :  { %9386 = vpow2.f32 %v7949_v60 }
0x2fca   :  { %v9387_v10 = vpop.eup %9386 }
0x2fcb   :  { %v4908_v19 = vadd.f32 1.0, %v9387_v10 }
0x2fcd   :  { %9388 = vrcp.f32 %v4908_v19 }
0x2fce   :  { %9390 = vpow2.f32 %v7942_v49 }
0x2fda   :  { %v9389_v62 = vpop.eup %9388 }
0x2fdb   :  { %v4911_v46 = vmul.f32 2.0, %v9389_v62  ;;  %v9391_v50 = vpop.eup %9390 }
0x2fdc   :  { %v4633_v47 = vadd.f32 1.0, %v9391_v50 }
0x2fdd   :  { %v7950_v40 = vadd.f32 -1.0, %v4911_v46 }
0x2fde   :  { %9392 = vrcp.f32 %v4633_v47 }
0x2fdf   :  { %v4913_v41 = vsel %vm10049_vm5, %v7950_v40, %v9389_v62 }
0x2fe0   :  { %4916 = vrot.lane.b32.xlu1 %v4913_v41, %s9821_s18  ;;  %v4914_v53 = vmul.f32 %v4913_v41, %v10981_v20 }
0x2feb   :  { %v9393_v63 = vpop.eup %9392 }
0x2fec   :  { %v4636_v11 = vmul.f32 2.0, %v9393_v63 }
0x2fee   :  { %v7943_v13 = vadd.f32 -1.0, %v4636_v11 }
0x2ff0   :  { %v11138_v24 = vsel %vm10763_vm11, %v7943_v13, %v9393_v63 }
0x2ff1   :  { %v4639_v48 = vmul.f32 %v11138_v24, %v11031_v1 }
0x3052   :  { %v4917_v42 = vpop.permute.xlu1 %4916 }
0x3053   :  { %v4919_v43 = vmul.f32 %v4917_v42, %v4913_v41 }
0x3055   :  { %4921 = vrot.lane.b32.xlu0 %v4919_v43, %s9822_s0 }
0x30c7   :  { %v4922_v12 = vpop.permute.xlu0 %4921 }
0x30c8   :  { %v11132_v29 = vadd.f32 %v4922_v12, %v4914_v53 }
0x30ca   :  { %9394 = vtanh.f32 %v11132_v29 }
0x30d7   :  { %v9395_v4 = vpop.eup %9394 }
0x30d8   :  { %4927 = vrot.lane.b32.xlu1 %v9395_v4, %s9821_s18 }
0x30dc   :  { %4641 = vrot.lane.b32.xlu1 %v11138_v24, %s9824_s28 }
0x314a   :  { %v4928_v16 = vpop.permute.xlu1 %4927 }
0x314b   :  { %v11142_v20 = vmul.f32 %v4928_v16, %v4913_v41 }
0x314d   :  { %9396 = vtanh.f32 %v11142_v20 }
0x314e   :  { %v4642_v10 = vpop.permute.xlu1 %4641 }
0x314f   :  { %v4644_v40 = vmul.f32 %v4642_v10, %v11138_v24 }
0x315a   :  { %v9397_v18 = vpop.eup %9396 }
0x315b   :  { %5003 = vrot.lane.b32.xlu0 %v9397_v18, %s9822_s0 }
0x31cd   :  { %v5004_v52 = vpop.permute.xlu0 %5003 }
0x31ce   :  { %8910 = vmatmul.mubr.msk.f32.vlgmr.msra.gmra.mxu0 %vm305_vm6, %v5004_v52 }
0x31cf   :  { %8927 = vmatpush3.msra.mxu0 %v11150_v25  ;;  %8934 = vmatprep.mubr.msk.f32.mxu0 %vm9820_vm0, %v9819_v0 }
0x31d0   :  { %8928 = vmatprep.subr.mxu0 %v9819_v0 }
0x31d1   :  { %8929 = vmatpush3.msra.mxu0 %v11159_v32 }
0x31d2   :  { %8930 = vmatprep.subr.mxu0 %v9819_v0 }
0x31d3   :  { %8931 = vmatpush3.msra.mxu0 %v11166_v51 }
0x31d4   :  { %8932 = vmatprep.subr.mxu0 %v9819_v0 }
0x31d5   :  { %8933 = vmatpush3.msra.mxu0 %v11173_v3 }
0x31d6   :  { %8935 = vmatmul.mubr.msk.f32.vlgmr.msra.gmra.mxu0 %vm305_vm6, %v11085_v26  ;;  %8948 = vmatprep.subr.mxu0 %v9819_v0 }
0x31d7   :  { %8949 = vmatpush3.msra.mxu0 %v11182_v14  ;;  %8956 = vmatprep.mubr.msk.f32.mxu0 %vm9820_vm0, %v9819_v0 }
0x31d8   :  { %8950 = vmatprep.subr.mxu0 %v9819_v0 }
0x31d9   :  { %8951 = vmatpush3.msra.mxu0 %v11191_v55 }
0x31da   :  { %8952 = vmatprep.subr.mxu0 %v9819_v0 }
0x31db   :  { %8953 = vmatpush3.msra.mxu0 %v11198_v56 }
0x31dc   :  { %8954 = vmatprep.subr.mxu0 %v9819_v0 }
0x31dd   :  { %8955 = vmatpush3.msra.mxu0 %v11205_v59 }
0x31de   :  { %8977 = vmatprep.subr.mxu0 %v9819_v0 }
0x328e   :  { %v5073_v34 = vpop.f32.mrf.mxu0 }
0x328f   :  { %v5074_v45 = vadd.f32 %v5073_v34, %v11124_v15 }
0x3290   :  { %v8911_v26 = vpop.f32.mrf.mxu0 }
0x3291   :  { %v5077_v5 = vadd.f32 %v11210_v27, %v5074_v45 }
0x3293   :  { %v7953_v6 = vmul.f32 -1.442695, %v5077_v5 }
0x3295   :  { %9398 = vpow2.f32 %v7953_v6  ;;  %v11249_v6 = vld [vmem:[#allocation13 + $0x8] sm:$0xff] }
0x3296   :  { %v5348_v38 = vpop.f32.mrf.mxu0 }
0x3297   :  { %v5352_v2 = vadd.f32 %v5348_v38, %v10615_v30  ;;  %v11255_v38 = vld [vmem:[#allocation13] sm:$0xff] }
0x3298   :  { %v8936_v28 = vpop.f32.mrf.mxu0 }
0x3299   :  { %v7960_v57 = vmul.f32 -1.442695, %v5352_v2 }
0x329b   :  { %9400 = vpow2.f32 %v7960_v57  ;;  %v11274_v57 = vld [vmem:[#allocation15 + $0x8] sm:$0xff] }
0x32a2   :  { %v9399_v33 = vpop.eup %9398 }
0x32a3   :  { %v5081_v7 = vadd.f32 1.0, %v9399_v33  ;;  %v11279_v33 = vld [vmem:[#allocation10 + $0x8] sm:$0xff] }
0x32a5   :  { %9402 = vrcp.f32 %v5081_v7  ;;  %v11286_v7 = vld [vmem:[#allocation10] sm:$0xff] }
0x32a8   :  { %v9401_v58 = vpop.eup %9400 }
0x32a9   :  { %v5356_v9 = vadd.f32 1.0, %v9401_v58  ;;  %v11289_v58 = vld [vmem:[#allocation15] sm:$0xff] }
0x32ab   :  { %9404 = vrcp.f32 %v5356_v9  ;;  %v11294_v9 = vld [vmem:[#allocation9 + $0x18] sm:$0xff] }
0x32b2   :  { %v9403_v15 = vpop.eup %9402 }
0x32b3   :  { %v5084_v60 = vmul.f32 2.0, %v9403_v15 }
0x32b5   :  { %v7954_v35 = vadd.f32 -1.0, %v5084_v60  ;;  %v11307_v60 = vld [vmem:[#allocation9 + $0x8] sm:$0xff] }
0x32b7   :  { %v5086_v19 = vsel %vm10763_vm11, %v7954_v35, %v9403_v15  ;;  %v11302_v15 = vld [vmem:[#allocation9 + $0x10] sm:$0xff]  ;;  %v11311_v35 = vld [vmem:[#allocation9] sm:$0xff] }
0x32b8   :  { %v9405_v62 = vpop.eup %9404  ;;  %5089 = vrot.lane.b32.xlu0 %v5086_v19, %s9824_s28  ;;  %v5087_v63 = vmul.f32 %v5086_v19, %v11037_v37 }
0x32b9   :  { %v5359_v46 = vmul.f32 2.0, %v9405_v62 }
0x32bb   :  { %v7961_v41 = vadd.f32 -1.0, %v5359_v46 }
0x32bc   :  { %4646 = vrot.lane.b32.xlu0 %v4644_v40, %s9825_s29 }
0x32bd   :  { %v5361_v42 = vsel %vm10049_vm5, %v7961_v41, %v9405_v62 }
0x32be   :  { %5364 = vrot.lane.b32.xlu1 %v5361_v42, %s9821_s18  ;;  %v5362_v1 = vmul.f32 %v5361_v42, %v11041_v31 }
0x332a   :  { %v5090_v43 = vpop.permute.xlu0 %5089 }
0x332b   :  { %v5092_v44 = vmul.f32 %v5090_v43, %v5086_v19 }
0x332d   :  { %5094 = vrot.lane.b32.xlu1 %v5092_v44, %s9825_s29 }
0x332e   :  { %v4647_v49 = vpop.permute.xlu0 %4646 }
0x332f   :  { %v11225_v50 = vadd.f32 %v4647_v49, %v4639_v48 }
0x3330   :  { %v5365_v47 = vpop.permute.xlu1 %5364 }
0x3331   :  { %9406 = vtanh.f32 %v11225_v50  ;;  %v5367_v53 = vmul.f32 %v5365_v47, %v5361_v42 }
0x3333   :  { %5369 = vrot.lane.b32.xlu0 %v5367_v53, %s9822_s0 }
0x333e   :  { %v9407_v12 = vpop.eup %9406 }
0x333f   :  { %4652 = vrot.lane.b32.xlu1 %v9407_v12, %s9822_s0 }
0x339f   :  { %v5095_v11 = vpop.permute.xlu1 %5094 }
0x33a0   :  { %v11231_v4 = vadd.f32 %v5095_v11, %v5087_v63 }
0x33a2   :  { %9408 = vtanh.f32 %v11231_v4 }
0x33a5   :  { %v5370_v13 = vpop.permute.xlu0 %5369 }
0x33a6   :  { %v11235_v16 = vadd.f32 %v5370_v13, %v5362_v1 }
0x33a8   :  { %9410 = vtanh.f32 %v11235_v16 }
0x33af   :  { %v9409_v18 = vpop.eup %9408 }
0x33b0   :  { %5100 = vrot.lane.b32.xlu0 %v9409_v18, %s9822_s0 }
0x33b1   :  { %v4653_v52 = vpop.permute.xlu1 %4652 }
0x33b2   :  { %v11240_v34 = vmul.f32 %v4653_v52, %v11138_v24 }
0x33b4   :  { %5105 = vrot.lane.b32.xlu0 %v11240_v34, %s9826_s3 }
0x33b5   :  { %v9411_v37 = vpop.eup %9410 }
0x33b6   :  { %5375 = vrot.lane.b32.xlu1 %v9411_v37, %s9821_s18 }
0x33b8   :  { %5380 = vrot.lane.b32.xlu0 %v11142_v20, %s9822_s0 }
0x3422   :  { %v5101_v31 = vpop.permute.xlu0 %5100 }
0x3423   :  { %v5103_v45 = vmul.f32 %v5101_v31, %v5086_v19 }
0x3425   :  { %5180 = vrot.lane.b32.xlu1 %v5103_v45, %s9826_s3  ;;  %v11320_v45 = vld [vmem:[#allocation16] ss:$0 sm:$0xff] }
0x3426   :  { %v5106_v26 = vpop.permute.xlu0 %5105 }
0x3427   :  { %8917 = vmatmul.mubr.msk.f32.vlgmr.msra.gmra.mxu1 %vm3039_vm12, %v5106_v26 }
0x3428   :  { %v5376_v5 = vpop.permute.xlu1 %5375  ;;  %8920 = vmatpush3.msra.mxu1 %v11249_v6  ;;  %8923 = vmatprep.mubr.msk.f32.mxu1 %vm9820_vm0, %v9819_v0 }
0x3429   :  { %v5378_v24 = vmul.f32 %v5376_v5, %v5361_v42  ;;  %8921 = vmatprep.subr.mxu1 %v9819_v0 }
0x342a   :  { %8922 = vmatpush3.msra.mxu1 %v11255_v38  ;;  %v5381_v28 = vpop.permute.xlu0 %5380 }
0x342b   :  { %5455 = vrot.lane.b32.xlu1 %v5378_v24, %s9822_s0  ;;  %8937 = vmatprep.subr.mxu1 %v9819_v0 }
0x3497   :  { %v5181_v20 = vpop.permute.xlu1 %5180 }
0x3498   :  { %8924 = vmatmul.mubr.msk.f32.vlgmr.msra.gmra.mxu1 %vm3039_vm12, %v5181_v20 }
0x3499   :  { %8938 = vmatpush3.msra.mxu1 %v11066_v21  ;;  %8945 = vmatprep.mubr.msk.f32.mxu1 %vm9820_vm0, %v9819_v0 }
0x349a   :  { %8939 = vmatprep.subr.mxu1 %v9819_v0 }
0x349b   :  { %8940 = vmatpush3.msra.mxu1 %v11075_v39 }
0x349c   :  { %8941 = vmatprep.subr.mxu1 %v9819_v0 }
0x349d   :  { %8942 = vmatpush3.msra.mxu1 %v11082_v54  ;;  %v11268_v2 = vpop.permute.xlu1 %5455 }
0x349e   :  { %8943 = vmatprep.subr.mxu1 %v9819_v0  ;;  %8957 = vmatmul.mubr.msk.f32.vlgmr.msra.gmra.mxu0 %vm305_vm6, %v11268_v2 }
0x349f   :  { %8944 = vmatpush3.msra.mxu1 %v11093_v22  ;;  %8978 = vmatpush3.msra.mxu0 %v11274_v57 }
0x34a0   :  { %8946 = vmatmul.mubr.msk.f32.vlgmr.msra.gmra.mxu1 %vm305_vm6, %v5381_v28  ;;  %8959 = vmatprep.subr.mxu1 %v9819_v0 }
0x34a1   :  { %8960 = vmatpush3.msra.mxu1 %v11279_v33  ;;  %8963 = vmatprep.mubr.msk.f32.mxu1 %vm9820_vm0, %v9819_v0 }
0x34a2   :  { %8961 = vmatprep.subr.mxu1 %v9819_v0  ;;  %8979 = vmatprep.subr.mxu0 %v9819_v0 }
0x34a3   :  { %8962 = vmatpush3.msra.mxu1 %v11286_v7  ;;  %8980 = vmatpush3.msra.mxu0 %v11289_v58 }
0x34a4   :  { %8964 = vmatmul.mubr.msk.f32.vlgmr.msra.gmra.mxu1 %vm3039_vm12, %v5181_v20  ;;  %8966 = vmatprep.subr.mxu1 %v9819_v0 }
0x34a5   :  { %8967 = vmatpush3.msra.mxu1 %v11294_v9  ;;  %8974 = vmatprep.mubr.msk.f32.mxu1 %vm9820_vm0, %v9819_v0 }
0x34a6   :  { %8968 = vmatprep.subr.mxu1 %v9819_v0  ;;  %8981 = vmatprep.mubr.msk.f32.mxu0 %vm9820_vm0, %v9819_v0 }
0x34a7   :  { %8969 = vmatpush3.msra.mxu1 %v11302_v15  ;;  %8984 = vmatprep.subr.mxu0 %v9819_v0 }
0x34a8   :  { %8970 = vmatprep.subr.mxu1 %v9819_v0 }
0x34a9   :  { %8971 = vmatpush3.msra.mxu1 %v11307_v60 }
0x34aa   :  { %8972 = vmatprep.subr.mxu1 %v9819_v0 }
0x34ab   :  { %8973 = vmatpush3.msra.mxu1 %v11311_v35 }
0x34ac   :  { %8991 = vmatprep.subr.mxu1 %v9819_v0 }
0x34e7   :  { %v5175_v10 = vpop.f32.mrf.mxu1 }
0x34e9   :  { %v8918_v19 = vpop.f32.mrf.mxu1 }
0x3558   :  { %v5250_v62 = vpop.f32.mrf.mxu1 }
0x3559   :  { %v5251_v31 = vadd.f32 %v5250_v62, %v5175_v10 }
0x355a   :  { %v8925_v46 = vpop.f32.mrf.mxu1 }
0x355b   :  { %v5254_v26 = vadd.f32 %v11320_v45, %v5251_v31 }
0x355d   :  { %v7957_v5 = vmul.f32 -1.442695, %v5254_v26 }
0x355e   :  { %v5525_v40 = vpop.f32.mrf.mxu0 }
0x3560   :  { %v5450_v41 = vpop.f32.mrf.mxu1  ;;  %v8958_v42 = vpop.f32.mrf.mxu0 }
0x3561   :  { %v5526_v43 = vadd.f32 %v5525_v40, %v5450_v41 }
0x3562   :  { %v8947_v44 = vpop.f32.mrf.mxu1 }
0x3563   :  { %v5529_v48 = vadd.f32 %v11121_v61, %v5526_v43 }
0x3564   :  { %v5623_v49 = vpop.f32.mrf.mxu1 }
0x3565   :  { %v7964_v47 = vmul.f32 -1.442695, %v5529_v48 }
0x3566   :  { %v8965_v53 = vpop.f32.mrf.mxu1 }
0x3567   :  { %9412 = vpow2.f32 %v7964_v47 }
0x3574   :  { %v9413_v12 = vpop.eup %9412 }
0x3575   :  { %v5533_v63 = vadd.f32 1.0, %v9413_v12 }
0x3577   :  { %9414 = vrcp.f32 %v5533_v63 }
0x3578   :  { %9416 = vpow2.f32 %v7957_v5 }
0x3584   :  { %v9415_v11 = vpop.eup %9414 }
0x3585   :  { %v5536_v1 = vmul.f32 2.0, %v9415_v11  ;;  %v9417_v24 = vpop.eup %9416 }
0x3586   :  { %v5258_v20 = vadd.f32 1.0, %v9417_v24 }
0x3587   :  { %v7965_v13 = vadd.f32 -1.0, %v5536_v1 }
0x3588   :  { %9418 = vrcp.f32 %v5258_v20 }
0x3589   :  { %v5538_v18 = vsel %vm10049_vm5, %v7965_v13, %v9415_v11 }
0x358a   :  { %5541 = vrot.lane.b32.xlu0 %v5538_v18, %s9821_s18  ;;  %v5539_v28 = vmul.f32 %v5538_v18, %v11132_v29 }
0x3595   :  { %v9419_v40 = vpop.eup %9418 }
0x3596   :  { %v5261_v41 = vmul.f32 2.0, %v9419_v40 }
0x3598   :  { %v7958_v10 = vadd.f32 -1.0, %v5261_v41 }
0x359a   :  { %v11330_v62 = vsel %vm10763_vm11, %v7958_v10, %v9419_v40 }
0x35fc   :  { %v5542_v52 = vpop.permute.xlu0 %5541 }
0x35fd   :  { %v5544_v37 = vmul.f32 %v5542_v52, %v5538_v18 }
0x35ff   :  { %5546 = vrot.lane.b32.xlu1 %v5544_v37, %s9822_s0 }
0x3671   :  { %v5547_v19 = vpop.permute.xlu1 %5546 }
0x3672   :  { %v11324_v46 = vadd.f32 %v5547_v19, %v5539_v28 }
0x3674   :  { %9420 = vtanh.f32 %v11324_v46 }
0x3681   :  { %v9421_v42 = vpop.eup %9420 }
0x3682   :  { %5552 = vrot.lane.b32.xlu0 %v9421_v42, %s9821_s18 }
0x3686   :  { %5266 = vrot.lane.b32.xlu0 %v11330_v62, %s9824_s28 }
0x36f4   :  { %v5553_v43 = vpop.permute.xlu0 %5552 }
0x36f5   :  { %v11334_v29 = vmul.f32 %v5553_v43, %v5538_v18 }
0x36f7   :  { %9422 = vtanh.f32 %v11334_v29 }
0x36f8   :  { %v5267_v20 = vpop.permute.xlu0 %5266 }
0x36f9   :  { %v5269_v41 = vmul.f32 %v5267_v20, %v11330_v62 }
0x3704   :  { %v9423_v44 = vpop.eup %9422 }
0x3705   :  { %5628 = vrot.lane.b32.xlu1 %v9423_v44, %s9822_s0 }
0x3777   :  { %v5629_v48 = vpop.permute.xlu1 %5628 }
0x3778   :  { %8975 = vmatmul.mubr.msk.f32.vlgmr.msra.gmra.mxu1 %vm305_vm6, %v5629_v48  ;;  %v5264_v48 = vmul.f32 %v11330_v62, %v11225_v50 }
0x3779   :  { %8992 = vmatpush3.msra.mxu1 %v11150_v25  ;;  %8999 = vmatprep.mubr.msk.f32.mxu1 %vm9820_vm0, %v9819_v0 }
0x377a   :  { %8993 = vmatprep.subr.mxu1 %v9819_v0 }
0x377b   :  { %8994 = vmatpush3.msra.mxu1 %v11159_v32 }
0x377c   :  { %8995 = vmatprep.subr.mxu1 %v9819_v0 }
0x377d   :  { %8996 = vmatpush3.msra.mxu1 %v11166_v51 }
0x377e   :  { %8997 = vmatprep.subr.mxu1 %v9819_v0 }
0x377f   :  { %8998 = vmatpush3.msra.mxu1 %v11173_v3 }
0x3780   :  { %9000 = vmatmul.mubr.msk.f32.vlgmr.msra.gmra.mxu1 %vm305_vm6, %v11268_v2  ;;  %9013 = vmatprep.subr.mxu1 %v9819_v0 }
0x3781   :  { %9014 = vmatpush3.msra.mxu1 %v11182_v14  ;;  %9021 = vmatprep.mubr.msk.f32.mxu1 %vm9820_vm0, %v9819_v0 }
0x3782   :  { %9015 = vmatprep.subr.mxu1 %v9819_v0 }
0x3783   :  { %9016 = vmatpush3.msra.mxu1 %v11191_v55 }
0x3784   :  { %9017 = vmatprep.subr.mxu1 %v9819_v0 }
0x3785   :  { %9018 = vmatpush3.msra.mxu1 %v11198_v56 }
0x3786   :  { %9019 = vmatprep.subr.mxu1 %v9819_v0 }
0x3787   :  { %9020 = vmatpush3.msra.mxu1 %v11205_v59 }
0x3788   :  { %9042 = vmatprep.subr.mxu1 %v9819_v0 }
0x3838   :  { %v5698_v2 = vpop.f32.mrf.mxu1 }
0x3839   :  { %v5699_v47 = vadd.f32 %v5698_v2, %v5623_v49 }
0x383a   :  { %v8976_v53 = vpop.f32.mrf.mxu1 }
0x383b   :  { %v5702_v12 = vadd.f32 %v11210_v27, %v5699_v47 }
0x383d   :  { %v7968_v63 = vmul.f32 -1.442695, %v5702_v12 }
0x383f   :  { %9424 = vpow2.f32 %v7968_v63 }
0x3840   :  { %v5973_v11 = vpop.f32.mrf.mxu1 }
0x3841   :  { %v5977_v1 = vadd.f32 %v5973_v11, %v10615_v30 }
0x3842   :  { %v9001_v13 = vpop.f32.mrf.mxu1 }
0x3843   :  { %v7975_v18 = vmul.f32 -1.442695, %v5977_v1 }
0x3845   :  { %9426 = vpow2.f32 %v7975_v18 }
0x384c   :  { %v9425_v52 = vpop.eup %9424 }
0x384d   :  { %v5706_v37 = vadd.f32 1.0, %v9425_v52 }
0x384f   :  { %9428 = vrcp.f32 %v5706_v37 }
0x3852   :  { %v9427_v31 = vpop.eup %9426 }
0x3853   :  { %v5981_v26 = vadd.f32 1.0, %v9427_v31 }
0x3855   :  { %9430 = vrcp.f32 %v5981_v26 }
0x385c   :  { %v9429_v5 = vpop.eup %9428 }
0x385d   :  { %v5709_v24 = vmul.f32 2.0, %v9429_v5 }
0x385f   :  { %v7969_v49 = vadd.f32 -1.0, %v5709_v24 }
0x3861   :  { %v5711_v28 = vsel %vm10763_vm11, %v7969_v49, %v9429_v5 }
0x3862   :  { %v9431_v19 = vpop.eup %9430  ;;  %5714 = vrot.lane.b32.xlu1 %v5711_v28, %s9824_s28  ;;  %v5712_v11 = vmul.f32 %v5711_v28, %v11231_v4 }
0x3863   :  { %v5984_v40 = vmul.f32 2.0, %v9431_v19 }
0x3865   :  { %v7976_v42 = vadd.f32 -1.0, %v5984_v40 }
0x3866   :  { %5271 = vrot.lane.b32.xlu1 %v5269_v41, %s9825_s29 }
0x3867   :  { %v5986_v10 = vsel %vm10049_vm5, %v7976_v42, %v9431_v19 }
0x3868   :  { %5989 = vrot.lane.b32.xlu0 %v5986_v10, %s9821_s18  ;;  %v5987_v50 = vmul.f32 %v5986_v10, %v11235_v16 }
0x38d4   :  { %v5715_v43 = vpop.permute.xlu1 %5714 }
0x38d5   :  { %v5717_v44 = vmul.f32 %v5715_v43, %v5711_v28 }
0x38d7   :  { %5719 = vrot.lane.b32.xlu0 %v5717_v44, %s9825_s29 }
0x38d8   :  { %v5272_v2 = vpop.permute.xlu1 %5271 }
0x38d9   :  { %v11374_v47 = vadd.f32 %v5272_v2, %v5264_v48 }
0x38da   :  { %v5990_v53 = vpop.permute.xlu0 %5989 }
0x38db   :  { %9432 = vtanh.f32 %v11374_v47  ;;  %v5992_v12 = vmul.f32 %v5990_v53, %v5986_v10 }
0x38dd   :  { %5994 = vrot.lane.b32.xlu1 %v5992_v12, %s9822_s0 }
0x38e8   :  { %v9433_v63 = vpop.eup %9432 }
0x38e9   :  { %5277 = vrot.lane.b32.xlu0 %v9433_v63, %s9822_s0 }
0x3949   :  { %v5720_v1 = vpop.permute.xlu0 %5719 }
0x394a   :  { %v11380_v13 = vadd.f32 %v5720_v1, %v5712_v11 }
0x394c   :  { %9434 = vtanh.f32 %v11380_v13 }
0x394f   :  { %v5995_v18 = vpop.permute.xlu1 %5994 }
0x3950   :  { %v11384_v52 = vadd.f32 %v5995_v18, %v5987_v50 }
0x3952   :  { %9436 = vtanh.f32 %v11384_v52 }
0x3959   :  { %v9435_v37 = vpop.eup %9434 }
0x395a   :  { %5725 = vrot.lane.b32.xlu1 %v9435_v37, %s9822_s0 }
0x395b   :  { %v5278_v31 = vpop.permute.xlu0 %5277 }
0x395c   :  { %v11389_v26 = vmul.f32 %v5278_v31, %v11330_v62 }
0x395e   :  { %5730 = vrot.lane.b32.xlu1 %v11389_v26, %s9826_s3 }
0x395f   :  { %v9437_v4 = vpop.eup %9436 }
0x3960   :  { %6000 = vrot.lane.b32.xlu0 %v9437_v4, %s9821_s18 }
0x3962   :  { %6005 = vrot.lane.b32.xlu1 %v11334_v29, %s9822_s0 }
0x39cc   :  { %v5726_v16 = vpop.permute.xlu1 %5725 }
0x39cd   :  { %v5728_v5 = vmul.f32 %v5726_v16, %v5711_v28 }
0x39cf   :  { %5805 = vrot.lane.b32.xlu0 %v5728_v5, %s9826_s3 }
0x39d0   :  { %v5731_v24 = vpop.permute.xlu1 %5730 }
0x39d1   :  { %8982 = vmatmul.mubr.msk.f32.vlgmr.msra.gmra.mxu0 %vm3039_vm12, %v5731_v24 }
0x39d2   :  { %v6001_v49 = vpop.permute.xlu0 %6000  ;;  %8985 = vmatpush3.msra.mxu0 %v11249_v6  ;;  %8988 = vmatprep.mubr.msk.f32.mxu0 %vm9820_vm0, %v9819_v0 }
0x39d3   :  { %v6003_v62 = vmul.f32 %v6001_v49, %v5986_v10  ;;  %8986 = vmatprep.subr.mxu0 %v9819_v0 }
0x39d4   :  { %8987 = vmatpush3.msra.mxu0 %v11255_v38  ;;  %v6006_v28 = vpop.permute.xlu1 %6005 }
0x39d5   :  { %6080 = vrot.lane.b32.xlu0 %v6003_v62, %s9822_s0  ;;  %9002 = vmatprep.subr.mxu0 %v9819_v0 }
0x3a41   :  { %v5806_v29 = vpop.permute.xlu0 %5805 }
0x3a42   :  { %8989 = vmatmul.mubr.msk.f32.vlgmr.msra.gmra.mxu0 %vm3039_vm12, %v5806_v29 }
0x3a43   :  { %9003 = vmatpush3.msra.mxu0 %v11066_v21  ;;  %9010 = vmatprep.mubr.msk.f32.mxu0 %vm9820_vm0, %v9819_v0 }
0x3a44   :  { %9004 = vmatprep.subr.mxu0 %v9819_v0 }
0x3a45   :  { %9005 = vmatpush3.msra.mxu0 %v11075_v39 }
0x3a46   :  { %9006 = vmatprep.subr.mxu0 %v9819_v0 }
0x3a47   :  { %9007 = vmatpush3.msra.mxu0 %v11082_v54  ;;  %v11413_v20 = vpop.permute.xlu0 %6080 }
0x3a48   :  { %9008 = vmatprep.subr.mxu0 %v9819_v0  ;;  %9022 = vmatmul.mubr.msk.f32.vlgmr.msra.gmra.mxu1 %vm305_vm6, %v11413_v20 }
0x3a49   :  { %9009 = vmatpush3.msra.mxu0 %v11093_v22  ;;  %9043 = vmatpush3.msra.mxu1 %v11274_v57 }
0x3a4a   :  { %9011 = vmatmul.mubr.msk.f32.vlgmr.msra.gmra.mxu0 %vm305_vm6, %v6006_v28  ;;  %9024 = vmatprep.subr.mxu0 %v9819_v0 }
0x3a4b   :  { %9025 = vmatpush3.msra.mxu0 %v11279_v33  ;;  %9028 = vmatprep.mubr.msk.f32.mxu0 %vm9820_vm0, %v9819_v0 }
0x3a4c   :  { %9026 = vmatprep.subr.mxu0 %v9819_v0  ;;  %9044 = vmatprep.subr.mxu1 %v9819_v0 }
0x3a4d   :  { %9027 = vmatpush3.msra.mxu0 %v11286_v7  ;;  %9045 = vmatpush3.msra.mxu1 %v11289_v58 }
0x3a4e   :  { %9029 = vmatmul.mubr.msk.f32.vlgmr.msra.gmra.mxu0 %vm3039_vm12, %v5806_v29  ;;  %9031 = vmatprep.subr.mxu0 %v9819_v0 }
0x3a4f   :  { %9032 = vmatpush3.msra.mxu0 %v11294_v9  ;;  %9039 = vmatprep.mubr.msk.f32.mxu0 %vm9820_vm0, %v9819_v0 }
0x3a50   :  { %9033 = vmatprep.subr.mxu0 %v9819_v0  ;;  %9046 = vmatprep.mubr.msk.f32.mxu1 %vm9820_vm0, %v9819_v0 }
0x3a51   :  { %9034 = vmatpush3.msra.mxu0 %v11302_v15  ;;  %9049 = vmatprep.subr.mxu1 %v9819_v0 }
0x3a52   :  { %9035 = vmatprep.subr.mxu0 %v9819_v0 }
0x3a53   :  { %9036 = vmatpush3.msra.mxu0 %v11307_v60 }
0x3a54   :  { %9037 = vmatprep.subr.mxu0 %v9819_v0 }
0x3a55   :  { %9038 = vmatpush3.msra.mxu0 %v11311_v35 }
0x3a56   :  { %9056 = vmatprep.subr.mxu0 %v9819_v0 }
0x3a91   :  { %v5800_v21 = vpop.f32.mrf.mxu0 }
0x3a93   :  { %v8983_v39 = vpop.f32.mrf.mxu0 }
0x3b02   :  { %v5875_v54 = vpop.f32.mrf.mxu0 }
0x3b04   :  { %v8990_v22 = vpop.f32.mrf.mxu0 }
0x3b08   :  { %v6150_v19 = vpop.f32.mrf.mxu1 }
0x3b0a   :  { %v6075_v40 = vpop.f32.mrf.mxu0  ;;  %v9023_v41 = vpop.f32.mrf.mxu1 }
0x3b0b   :  { %v6151_v42 = vadd.f32 %v6150_v19, %v6075_v40 }
0x3b0c   :  { %v9012_v10 = vpop.f32.mrf.mxu0 }
0x3b0d   :  { %v6154_v43 = vadd.f32 %v11121_v61, %v6151_v42  ;;  %v5876_v61 = vadd.f32 %v5875_v54, %v5800_v21 }
0x3b0e   :  { %v6248_v44 = vpop.f32.mrf.mxu0 }
0x3b0f   :  { %v7979_v48 = vmul.f32 -1.442695, %v6154_v43  ;;  %v5879_v31 = vadd.f32 %v11320_v45, %v5876_v61 }
0x3b10   :  { %v9030_v2 = vpop.f32.mrf.mxu0 }
0x3b11   :  { %9438 = vpow2.f32 %v7979_v48  ;;  %v7972_v4 = vmul.f32 -1.442695, %v5879_v31 }
0x3b1e   :  { %v9439_v53 = vpop.eup %9438 }
0x3b1f   :  { %v6158_v12 = vadd.f32 1.0, %v9439_v53 }
0x3b21   :  { %9440 = vrcp.f32 %v6158_v12 }
0x3b22   :  { %9442 = vpow2.f32 %v7972_v4 }
0x3b2e   :  { %v9441_v63 = vpop.eup %9440 }
0x3b2f   :  { %v6161_v11 = vmul.f32 2.0, %v9441_v63  ;;  %v9443_v16 = vpop.eup %9442 }
0x3b30   :  { %v5883_v5 = vadd.f32 1.0, %v9443_v16 }
0x3b31   :  { %v7980_v1 = vadd.f32 -1.0, %v6161_v11 }
0x3b32   :  { %9444 = vrcp.f32 %v5883_v5 }
0x3b33   :  { %v6163_v50 = vsel %vm10049_vm5, %v7980_v1, %v9441_v63 }
0x3b34   :  { %6166 = vrot.lane.b32.xlu1 %v6163_v50, %s9821_s18  ;;  %v6164_v24 = vmul.f32 %v6163_v50, %v11324_v46 }
0x3b3f   :  { %v9445_v29 = vpop.eup %9444 }
0x3b40   :  { %v5886_v28 = vmul.f32 2.0, %v9445_v29 }
0x3b42   :  { %v7973_v22 = vadd.f32 -1.0, %v5886_v28 }
0x3b44   :  { %v11457_v21 = vsel %vm10763_vm11, %v7973_v22, %v9445_v29 }
0x3b45   :  { %v5889_v61 = vmul.f32 %v11457_v21, %v11374_v47 }
0x3ba6   :  { %v6167_v18 = vpop.permute.xlu1 %6166 }
0x3ba7   :  { %v6169_v37 = vmul.f32 %v6167_v18, %v6163_v50 }
0x3ba9   :  { %6171 = vrot.lane.b32.xlu0 %v6169_v37, %s9822_s0 }
0x3c1b   :  { %v6172_v49 = vpop.permute.xlu0 %6171 }
0x3c1c   :  { %v11451_v62 = vadd.f32 %v6172_v49, %v6164_v24 }
0x3c1e   :  { %9446 = vtanh.f32 %v11451_v62 }
0x3c2b   :  { %v9447_v39 = vpop.eup %9446 }
0x3c2c   :  { %6177 = vrot.lane.b32.xlu1 %v9447_v39, %s9821_s18 }
0x3c30   :  { %5891 = vrot.lane.b32.xlu1 %v11457_v21, %s9824_s28 }
0x3c9e   :  { %v6178_v54 = vpop.permute.xlu1 %6177 }
0x3c9f   :  { %v11461_v46 = vmul.f32 %v6178_v54, %v6163_v50 }
0x3ca1   :  { %9448 = vtanh.f32 %v11461_v46 }
0x3ca2   :  { %v5892_v53 = vpop.permute.xlu1 %5891 }
0x3ca3   :  { %v5894_v11 = vmul.f32 %v5892_v53, %v11457_v21 }
0x3cae   :  { %v9449_v19 = vpop.eup %9448 }
0x3caf   :  { %6253 = vrot.lane.b32.xlu0 %v9449_v19, %s9822_s0 }
0x3d21   :  { %v6254_v40 = vpop.permute.xlu0 %6253 }
0x3d22   :  { %9040 = vmatmul.mubr.msk.f32.vlgmr.msra.gmra.mxu0 %vm305_vm6, %v6254_v40 }
0x3d23   :  { %9057 = vmatpush3.msra.mxu0 %v11150_v25  ;;  %9064 = vmatprep.mubr.msk.f32.mxu0 %vm9820_vm0, %v9819_v0 }
0x3d24   :  { %9058 = vmatprep.subr.mxu0 %v9819_v0 }
0x3d25   :  { %9059 = vmatpush3.msra.mxu0 %v11159_v32 }
0x3d26   :  { %9060 = vmatprep.subr.mxu0 %v9819_v0 }
0x3d27   :  { %9061 = vmatpush3.msra.mxu0 %v11166_v51 }
0x3d28   :  { %9062 = vmatprep.subr.mxu0 %v9819_v0 }
0x3d29   :  { %9063 = vmatpush3.msra.mxu0 %v11173_v3 }
0x3d2a   :  { %9065 = vmatmul.mubr.msk.f32.vlgmr.msra.gmra.mxu0 %vm305_vm6, %v11413_v20  ;;  %9078 = vmatprep.subr.mxu0 %v9819_v0 }
0x3d2b   :  { %9079 = vmatpush3.msra.mxu0 %v11182_v14  ;;  %9086 = vmatprep.mubr.msk.f32.mxu0 %vm9820_vm0, %v9819_v0 }
0x3d2c   :  { %9080 = vmatprep.subr.mxu0 %v9819_v0 }
0x3d2d   :  { %9081 = vmatpush3.msra.mxu0 %v11191_v55 }
0x3d2e   :  { %9082 = vmatprep.subr.mxu0 %v9819_v0 }
0x3d2f   :  { %9083 = vmatpush3.msra.mxu0 %v11198_v56 }
0x3d30   :  { %9084 = vmatprep.subr.mxu0 %v9819_v0 }
0x3d31   :  { %9085 = vmatpush3.msra.mxu0 %v11205_v59 }
0x3d32   :  { %9107 = vmatprep.subr.mxu0 %v9819_v0 }
0x3de2   :  { %v6323_v25 = vpop.f32.mrf.mxu0 }
0x3de3   :  { %v6324_v32 = vadd.f32 %v6323_v25, %v6248_v44 }
0x3de4   :  { %v9041_v51 = vpop.f32.mrf.mxu0 }
0x3de5   :  { %v6327_v3 = vadd.f32 %v11210_v27, %v6324_v32 }
0x3de7   :  { %v7983_v14 = vmul.f32 -1.442695, %v6327_v3  ;;  %v11536_v3 = vld [vmem:[%s11808_s14 + $0x18] sm:$0xff] }
0x3de9   :  { %9450 = vpow2.f32 %v7983_v14 }
0x3dea   :  { %v6598_v20 = vpop.f32.mrf.mxu0 }
0x3deb   :  { %v6602_v55 = vadd.f32 %v6598_v20, %v10615_v30 }
0x3dec   :  { %v9066_v41 = vpop.f32.mrf.mxu0 }
0x3ded   :  { %v7990_v42 = vmul.f32 -1.442695, %v6602_v55  ;;  %v11563_v55 = vld [vmem:[%s11808_s14] sm:$0xff] }
0x3def   :  { %9452 = vpow2.f32 %v7990_v42 }
0x3df6   :  { %v9451_v56 = vpop.eup %9450 }
0x3df7   :  { %v6331_v10 = vadd.f32 1.0, %v9451_v56 }
0x3df9   :  { %9454 = vrcp.f32 %v6331_v10  ;;  %v11591_v10 = vld [vmem:[#allocation7] ss:$0 sm:$0xff] }
0x3dfc   :  { %v9453_v43 = vpop.eup %9452 }
0x3dfd   :  { %v6606_v59 = vadd.f32 1.0, %v9453_v43 }
0x3dff   :  { %9456 = vrcp.f32 %v6606_v59 }
0x3e06   :  { %v9455_v48 = vpop.eup %9454 }
0x3e07   :  { %v6334_v2 = vmul.f32 2.0, %v9455_v48 }
0x3e09   :  { %v7984_v44 = vadd.f32 -1.0, %v6334_v2 }
0x3e0b   :  { %v6336_v27 = vsel %vm10763_vm11, %v7984_v44, %v9455_v48 }
0x3e0c   :  { %v9457_v12 = vpop.eup %9456  ;;  %6339 = vrot.lane.b32.xlu0 %v6336_v27, %s9824_s28  ;;  %v6337_v49 = vmul.f32 %v6336_v27, %v11380_v13 }
0x3e0d   :  { %v6609_v63 = vmul.f32 2.0, %v9457_v12 }
0x3e0f   :  { %v7991_v1 = vadd.f32 -1.0, %v6609_v63 }
0x3e10   :  { %5896 = vrot.lane.b32.xlu0 %v5894_v11, %s9825_s29 }
0x3e11   :  { %v6611_v50 = vsel %vm10049_vm5, %v7991_v1, %v9457_v12 }
0x3e12   :  { %6614 = vrot.lane.b32.xlu1 %v6611_v50, %s9821_s18  ;;  %v6612_v47 = vmul.f32 %v6611_v50, %v11384_v52 }
0x3e7e   :  { %v6340_v18 = vpop.permute.xlu0 %6339 }
0x3e7f   :  { %v6342_v37 = vmul.f32 %v6340_v18, %v6336_v27 }
0x3e81   :  { %6344 = vrot.lane.b32.xlu1 %v6342_v37, %s9825_s29 }
0x3e82   :  { %v5897_v31 = vpop.permute.xlu0 %5896 }
0x3e83   :  { %v11501_v4 = vadd.f32 %v5897_v31, %v5889_v61 }
0x3e84   :  { %v6615_v16 = vpop.permute.xlu1 %6614 }
0x3e85   :  { %9458 = vtanh.f32 %v11501_v4  ;;  %v6617_v5 = vmul.f32 %v6615_v16, %v6611_v50 }
0x3e87   :  { %6619 = vrot.lane.b32.xlu0 %v6617_v5, %s9822_s0 }
0x3e92   :  { %v9459_v24 = vpop.eup %9458 }
0x3e93   :  { %5902 = vrot.lane.b32.xlu1 %v9459_v24, %s9822_s0 }
0x3ef3   :  { %v6345_v29 = vpop.permute.xlu1 %6344 }
0x3ef4   :  { %v11507_v28 = vadd.f32 %v6345_v29, %v6337_v49 }
0x3ef6   :  { %9460 = vtanh.f32 %v11507_v28 }
0x3ef9   :  { %v6620_v39 = vpop.permute.xlu0 %6619 }
0x3efa   :  { %v11511_v22 = vadd.f32 %v6620_v39, %v6612_v47 }
0x3efc   :  { %9462 = vtanh.f32 %v11511_v22 }
0x3f03   :  { %v9461_v54 = vpop.eup %9460 }
0x3f04   :  { %6350 = vrot.lane.b32.xlu0 %v9461_v54, %s9822_s0 }
0x3f05   :  { %v5903_v19 = vpop.permute.xlu1 %5902 }
0x3f06   :  { %v11516_v40 = vmul.f32 %v5903_v19, %v11457_v21 }
0x3f08   :  { %6355 = vrot.lane.b32.xlu0 %v11516_v40, %s9826_s3 }
0x3f09   :  { %v9463_v13 = vpop.eup %9462 }
0x3f0a   :  { %6625 = vrot.lane.b32.xlu1 %v9463_v13, %s9821_s18  ;;  %v9575_v13 = vld [vmem:[%s11805_s11 + $0x18] sm:$0xff] }
0x3f0c   :  { %6630 = vrot.lane.b32.xlu0 %v11461_v46, %s9822_s0 }
0x3f76   :  { %v6351_v52 = vpop.permute.xlu0 %6350 }
0x3f77   :  { %v6353_v25 = vmul.f32 %v6351_v52, %v6336_v27  ;;  %v9576_v52 = vld [vmem:[%s11805_s11 + $0x10] sm:$0xff] }
0x3f79   :  { %6430 = vrot.lane.b32.xlu1 %v6353_v25, %s9826_s3  ;;  %v9577_v25 = vld [vmem:[%s11805_s11 + $0x8] sm:$0xff] }
0x3f7a   :  { %v6356_v32 = vpop.permute.xlu0 %6355 }
0x3f7b   :  { %9047 = vmatmul.mubr.msk.f32.vlgmr.msra.gmra.mxu1 %vm3039_vm12, %v6356_v32  ;;  %v9578_v32 = vld [vmem:[%s11805_s11] sm:$0xff] }
0x3f7c   :  { %v6626_v51 = vpop.permute.xlu1 %6625  ;;  %9050 = vmatpush3.msra.mxu1 %v11249_v6  ;;  %9053 = vmatprep.mubr.msk.f32.mxu1 %vm9820_vm0, %v9819_v0  ;;  %v11545_v6 = vld [vmem:[%s11808_s14 + $0x10] sm:$0xff] }
0x3f7d   :  { %v6628_v21 = vmul.f32 %v6626_v51, %v6611_v50  ;;  %9051 = vmatprep.subr.mxu1 %v9819_v0  ;;  %v9579_v51 = vld [vmem:[%s11807_s13 + $0x18] sm:$0xff] }
0x3f7e   :  { %9052 = vmatpush3.msra.mxu1 %v11255_v38  ;;  %v11552_v38 = vld [vmem:[%s11808_s14 + $0x8] sm:$0xff]  ;;  %v6631_v20 = vpop.permute.xlu0 %6630 }
0x3f7f   :  { %6705 = vrot.lane.b32.xlu1 %v6628_v21, %s9822_s0  ;;  %9067 = vmatprep.subr.mxu1 %v9819_v0  ;;  %v9580_v21 = vld [vmem:[%s11807_s13 + $0x10] sm:$0xff] }
0x3feb   :  { %v6431_v46 = vpop.permute.xlu1 %6430 }
0x3fec   :  { %9054 = vmatmul.mubr.msk.f32.vlgmr.msra.gmra.mxu1 %vm3039_vm12, %v6431_v46 }
0x3fed   :  { %9068 = vmatpush3.msra.mxu1 %v11536_v3  ;;  %9075 = vmatprep.mubr.msk.f32.mxu1 %vm9820_vm0, %v9819_v0 }
0x3fee   :  { %9069 = vmatprep.subr.mxu1 %v9819_v0 }
0x3fef   :  { %9070 = vmatpush3.msra.mxu1 %v11545_v6 }
0x3ff0   :  { %9071 = vmatprep.subr.mxu1 %v9819_v0 }
0x3ff1   :  { %9072 = vmatpush3.msra.mxu1 %v11552_v38  ;;  %v11555_v14 = vpop.permute.xlu1 %6705 }
0x3ff2   :  { %9073 = vmatprep.subr.mxu1 %v9819_v0  ;;  %9087 = vmatmul.mubr.msk.f32.vlgmr.msra.gmra.mxu0 %vm305_vm6, %v11555_v14 }
0x3ff3   :  { %9074 = vmatpush3.msra.mxu1 %v11563_v55  ;;  %9108 = vmatpush3.msra.mxu0 %v11274_v57 }
0x3ff4   :  { %9076 = vmatmul.mubr.msk.f32.vlgmr.msra.gmra.mxu1 %vm305_vm6, %v6631_v20  ;;  %9089 = vmatprep.subr.mxu1 %v9819_v0 }
0x3ff5   :  { %9090 = vmatpush3.msra.mxu1 %v11279_v33  ;;  %9093 = vmatprep.mubr.msk.f32.mxu1 %vm9820_vm0, %v9819_v0 }
0x3ff6   :  { %9091 = vmatprep.subr.mxu1 %v9819_v0  ;;  %9109 = vmatprep.subr.mxu0 %v9819_v0 }
0x3ff7   :  { %9092 = vmatpush3.msra.mxu1 %v11286_v7  ;;  %9110 = vmatpush3.msra.mxu0 %v11289_v58 }
0x3ff8   :  { %9094 = vmatmul.mubr.msk.f32.vlgmr.msra.gmra.mxu1 %vm3039_vm12, %v6431_v46  ;;  %9096 = vmatprep.subr.mxu1 %v9819_v0  ;;  %v9581_v46 = vld [vmem:[%s11807_s13 + $0x8] sm:$0xff] }
0x3ff9   :  { %9097 = vmatpush3.msra.mxu1 %v11294_v9  ;;  %9104 = vmatprep.mubr.msk.f32.mxu1 %vm9820_vm0, %v9819_v0 }
0x3ffa   :  { %9098 = vmatprep.subr.mxu1 %v9819_v0  ;;  %9111 = vmatprep.mubr.msk.f32.mxu0 %vm9820_vm0, %v9819_v0 }
0x3ffb   :  { %9099 = vmatpush3.msra.mxu1 %v11302_v15  ;;  %9114 = vmatprep.subr.mxu0 %v9819_v0 }
0x3ffc   :  { %9100 = vmatprep.subr.mxu1 %v9819_v0 }
0x3ffd   :  { %9101 = vmatpush3.msra.mxu1 %v11307_v60 }
0x3ffe   :  { %9102 = vmatprep.subr.mxu1 %v9819_v0 }
0x3fff   :  { %9103 = vmatpush3.msra.mxu1 %v11311_v35 }
0x4000   :  { %9121 = vmatprep.subr.mxu1 %v9819_v0 }
0x403b   :  { %v6425_v57 = vpop.f32.mrf.mxu1 }
0x403d   :  { %v9048_v33 = vpop.f32.mrf.mxu1 }
0x40ac   :  { %v6500_v7 = vpop.f32.mrf.mxu1 }
0x40ad   :  { %v6501_v1 = vadd.f32 %v6500_v7, %v6425_v57  ;;  %v11656_v7 = vld [vmem:[#allocation12] ss:$0 sm:$0xff] }
0x40ae   :  { %v9055_v58 = vpop.f32.mrf.mxu1 }
0x40af   :  { %v6504_v50 = vadd.f32 %v11320_v45, %v6501_v1 }
0x40b1   :  { %v7987_v18 = vmul.f32 -1.442695, %v6504_v50 }
0x40b2   :  { %v6775_v9 = vpop.f32.mrf.mxu0 }
0x40b4   :  { %v6700_v41 = vpop.f32.mrf.mxu1  ;;  %v9088_v42 = vpop.f32.mrf.mxu0 }
0x40b5   :  { %v6776_v15 = vadd.f32 %v6775_v9, %v6700_v41 }
0x40b6   :  { %v9077_v56 = vpop.f32.mrf.mxu1 }
0x40b7   :  { %v6779_v43 = vadd.f32 %v11591_v10, %v6776_v15 }
0x40b8   :  { %v11594_v60 = vpop.f32.mrf.mxu1 }
0x40b9   :  { %v7994_v59 = vmul.f32 -1.442695, %v6779_v43 }
0x40ba   :  { %v9095_v48 = vpop.f32.mrf.mxu1 }
0x40bb   :  { %9464 = vpow2.f32 %v7994_v59 }
0x40c8   :  { %v9465_v35 = vpop.eup %9464 }
0x40c9   :  { %v6783_v2 = vadd.f32 1.0, %v9465_v35 }
0x40cb   :  { %9466 = vrcp.f32 %v6783_v2 }
0x40cc   :  { %9468 = vpow2.f32 %v7987_v18 }
0x40d8   :  { %v9467_v44 = vpop.eup %9466 }
0x40d9   :  { %v6786_v53 = vmul.f32 2.0, %v9467_v44  ;;  %v9469_v37 = vpop.eup %9468 }
0x40da   :  { %v6508_v61 = vadd.f32 1.0, %v9469_v37 }
0x40db   :  { %v7995_v27 = vadd.f32 -1.0, %v6786_v53 }
0x40dc   :  { %9470 = vrcp.f32 %v6508_v61 }
0x40dd   :  { %v6788_v12 = vsel %vm10049_vm5, %v7995_v27, %v9467_v44 }
0x40de   :  { %6791 = vrot.lane.b32.xlu0 %v6788_v12, %s9821_s18  ;;  %v6789_v31 = vmul.f32 %v6788_v12, %v11451_v62 }
0x40e9   :  { %v9471_v24 = vpop.eup %9470 }
0x40ea   :  { %v6511_v49 = vmul.f32 2.0, %v9471_v24 }
0x40ec   :  { %v7988_v47 = vadd.f32 -1.0, %v6511_v49 }
0x40ee   :  { %v11608_v45 = vsel %vm10763_vm11, %v7988_v47, %v9471_v24 }
0x40ef   :  { %v6514_v37 = vmul.f32 %v11608_v45, %v11501_v4 }
0x4150   :  { %v6792_v63 = vpop.permute.xlu0 %6791 }
0x4151   :  { %v6794_v11 = vmul.f32 %v6792_v63, %v6788_v12 }
0x4153   :  { %6796 = vrot.lane.b32.xlu1 %v6794_v11, %s9822_s0 }
0x41c5   :  { %v6797_v16 = vpop.permute.xlu1 %6796 }
0x41c6   :  { %v11602_v5 = vadd.f32 %v6797_v16, %v6789_v31 }
0x41c8   :  { %9472 = vtanh.f32 %v11602_v5 }
0x41d5   :  { %v9473_v29 = vpop.eup %9472 }
0x41d6   :  { %6802 = vrot.lane.b32.xlu0 %v9473_v29, %s9821_s18 }
0x41da   :  { %6516 = vrot.lane.b32.xlu0 %v11608_v45, %s9824_s28 }
0x4248   :  { %v6803_v39 = vpop.permute.xlu0 %6802 }
0x4249   :  { %v11612_v62 = vmul.f32 %v6803_v39, %v6788_v12 }
0x424b   :  { %9474 = vtanh.f32 %v11612_v62 }
0x424c   :  { %v6517_v53 = vpop.permute.xlu0 %6516 }
0x424d   :  { %v6519_v63 = vmul.f32 %v6517_v53, %v11608_v45 }
0x4258   :  { %v9475_v54 = vpop.eup %9474 }
0x4259   :  { %6878 = vrot.lane.b32.xlu1 %v9475_v54, %s9822_s0 }
0x42cb   :  { %v6879_v19 = vpop.permute.xlu1 %6878 }
0x42cc   :  { %9105 = vmatmul.mubr.msk.f32.vlgmr.msra.gmra.mxu1 %vm305_vm6, %v6879_v19 }
0x42cd   :  { %9122 = vmatpush3.msra.mxu1 %v9575_v13  ;;  %9129 = vmatprep.mubr.msk.f32.mxu1 %vm9820_vm0, %v9819_v0 }
0x42ce   :  { %9123 = vmatprep.subr.mxu1 %v9819_v0 }
0x42cf   :  { %9124 = vmatpush3.msra.mxu1 %v9576_v52 }
0x42d0   :  { %9125 = vmatprep.subr.mxu1 %v9819_v0 }
0x42d1   :  { %9126 = vmatpush3.msra.mxu1 %v9577_v25 }
0x42d2   :  { %9127 = vmatprep.subr.mxu1 %v9819_v0 }
0x42d3   :  { %9128 = vmatpush3.msra.mxu1 %v9578_v32 }
0x42d4   :  { %9130 = vmatmul.mubr.msk.f32.vlgmr.msra.gmra.mxu1 %vm305_vm6, %v11555_v14  ;;  %9143 = vmatprep.subr.mxu1 %v9819_v0  ;;  %v9582_v14 = vld [vmem:[%s11807_s13] sm:$0xff]  ;;  %s9827_s13 = smov 112  }
0x42d5   :  { %9144 = vmatpush3.msra.mxu1 %v9579_v51  ;;  %9151 = vmatprep.mubr.msk.f32.mxu1 %vm9820_vm0, %v9819_v0 }
0x42d6   :  { %9145 = vmatprep.subr.mxu1 %v9819_v0 }
0x42d7   :  { %9146 = vmatpush3.msra.mxu1 %v9580_v21 }
0x42d8   :  { %9147 = vmatprep.subr.mxu1 %v9819_v0 }
0x42d9   :  { %9148 = vmatpush3.msra.mxu1 %v9581_v46  ;;  %v11692_v46 = vld [vmem:[#allocation13 + $0x8] sm:$0xff] }
0x42da   :  { %9149 = vmatprep.subr.mxu1 %v9819_v0 }
0x42db   :  { %9150 = vmatpush3.msra.mxu1 %v9582_v14  ;;  %v11698_v14 = vld [vmem:[#allocation13] sm:$0xff] }
0x42dc   :  { %9172 = vmatprep.subr.mxu1 %v9819_v0 }
0x438c   :  { %v6948_v20 = vpop.f32.mrf.mxu1 }
0x438d   :  { %v6949_v57 = vadd.f32 %v6948_v20, %v11594_v60 }
0x438e   :  { %v9106_v33 = vpop.f32.mrf.mxu1 }
0x438f   :  { %v6952_v58 = vadd.f32 %v11656_v7, %v6949_v57  ;;  %v9587_v33 = vld [vmem:[#allocation10 + $0x8] sm:$0xff] }
0x4391   :  { %v7998_v9 = vmul.f32 -1.442695, %v6952_v58  ;;  %v9591_v58 = vld [vmem:[#allocation9 + $0x10] sm:$0xff] }
0x4393   :  { %9476 = vpow2.f32 %v7998_v9  ;;  %v9592_v9 = vld [vmem:[#allocation9 + $0x8] sm:$0xff] }
0x4394   :  { %v7223_v41 = vpop.f32.mrf.mxu1 }
0x4395   :  { %v7227_v42 = vadd.f32 %v7223_v41, %v10615_v30  ;;  %v9593_v41 = vld [vmem:[#allocation9] sm:$0xff] }
0x4396   :  { %v9131_v15 = vpop.f32.mrf.mxu1 }
0x4397   :  { %v8005_v56 = vmul.f32 -1.442695, %v7227_v42 }
0x4399   :  { %9478 = vpow2.f32 %v8005_v56 }
0x43a0   :  { %v9477_v43 = vpop.eup %9476 }
0x43a1   :  { %v6956_v59 = vadd.f32 1.0, %v9477_v43 }
0x43a3   :  { %9480 = vrcp.f32 %v6956_v59 }
0x43a6   :  { %v9479_v48 = vpop.eup %9478 }
0x43a7   :  { %v7231_v35 = vadd.f32 1.0, %v9479_v48 }
0x43a9   :  { %9482 = vrcp.f32 %v7231_v35 }
0x43b0   :  { %v9481_v60 = vpop.eup %9480 }
0x43b1   :  { %v6959_v2 = vmul.f32 2.0, %v9481_v60 }
0x43b3   :  { %v7999_v44 = vadd.f32 -1.0, %v6959_v2 }
0x43b5   :  { %v6961_v27 = vsel %vm10763_vm11, %v7999_v44, %v9481_v60 }
0x43b6   :  { %v9483_v12 = vpop.eup %9482  ;;  %6964 = vrot.lane.b32.xlu1 %v6961_v27, %s9824_s28  ;;  %v6962_v29 = vmul.f32 %v6961_v27, %v11507_v28 }
0x43b7   :  { %v7234_v30 = vmul.f32 2.0, %v9483_v12 }
0x43b9   :  { %v8006_v11 = vadd.f32 -1.0, %v7234_v30 }
0x43ba   :  { %6521 = vrot.lane.b32.xlu1 %v6519_v63, %s9825_s29 }
0x43bb   :  { %v7236_v1 = vsel %vm10049_vm5, %v8006_v11, %v9483_v12 }
0x43bc   :  { %7239 = vrot.lane.b32.xlu0 %v7236_v1, %s9821_s18  ;;  %v7237_v4 = vmul.f32 %v7236_v1, %v11511_v22 }
0x4428   :  { %v6965_v50 = vpop.permute.xlu1 %6964 }
0x4429   :  { %v6967_v18 = vmul.f32 %v6965_v50, %v6961_v27 }
0x442b   :  { %6969 = vrot.lane.b32.xlu0 %v6967_v18, %s9825_s29 }
0x442c   :  { %v6522_v61 = vpop.permute.xlu1 %6521 }
0x442d   :  { %v11671_v31 = vadd.f32 %v6522_v61, %v6514_v37 }
0x442e   :  { %v7240_v16 = vpop.permute.xlu0 %7239 }
0x442f   :  { %9484 = vtanh.f32 %v11671_v31  ;;  %v7242_v24 = vmul.f32 %v7240_v16, %v7236_v1  ;;  %v11735_v16 = vld [vmem:[#allocation16] ss:$0 sm:$0xff] }
0x4431   :  { %7244 = vrot.lane.b32.xlu1 %v7242_v24, %s9822_s0 }
0x443c   :  { %v9485_v49 = vpop.eup %9484 }
0x443d   :  { %6527 = vrot.lane.b32.xlu0 %v9485_v49, %s9822_s0 }
0x449d   :  { %v6970_v47 = vpop.permute.xlu0 %6969 }
0x449e   :  { %v11677_v39 = vadd.f32 %v6970_v47, %v6962_v29 }
0x44a0   :  { %9486 = vtanh.f32 %v11677_v39 }
0x44a3   :  { %v7245_v54 = vpop.permute.xlu1 %7244 }
0x44a4   :  { %v7247_v19 = vadd.f32 %v7245_v54, %v7237_v4 }
0x44a6   :  { %9488 = vtanh.f32 %v7247_v19 }
0x44ad   :  { %v9487_v13 = vpop.eup %9486 }
0x44ae   :  { %6975 = vrot.lane.b32.xlu1 %v9487_v13, %s9822_s0 }
0x44af   :  { %v6528_v52 = vpop.permute.xlu0 %6527 }
0x44b0   :  { %v11683_v25 = vmul.f32 %v6528_v52, %v11608_v45 }
0x44b2   :  { %6980 = vrot.lane.b32.xlu1 %v11683_v25, %s9826_s3 }
0x44b3   :  { %v9489_v28 = vpop.eup %9488 }
0x44b4   :  { %7250 = vrot.lane.b32.xlu0 %v9489_v28, %s9821_s18 }
0x44b6   :  { %7255 = vrot.lane.b32.xlu1 %v11612_v62, %s9822_s0 }
0x4520   :  { %v6976_v22 = vpop.permute.xlu1 %6975 }
0x4521   :  { %v6978_v32 = vmul.f32 %v6976_v22, %v6961_v27 }
0x4523   :  { %7055 = vrot.lane.b32.xlu0 %v6978_v32, %s9826_s3 }
0x4524   :  { %v6981_v51 = vpop.permute.xlu1 %6980 }
0x4525   :  { %9112 = vmatmul.mubr.msk.f32.vlgmr.msra.gmra.mxu0 %vm3039_vm12, %v6981_v51 }
0x4526   :  { %v7251_v21 = vpop.permute.xlu0 %7250  ;;  %9115 = vmatpush3.msra.mxu0 %v11692_v46  ;;  %9118 = vmatprep.mubr.msk.f32.mxu0 %vm9820_vm0, %v9819_v0 }
0x4527   :  { %v7253_v45 = vmul.f32 %v7251_v21, %v7236_v1  ;;  %9116 = vmatprep.subr.mxu0 %v9819_v0 }
0x4528   :  { %9117 = vmatpush3.msra.mxu0 %v11698_v14  ;;  %v7256_v57 = vpop.permute.xlu1 %7255 }
0x4529   :  { %7330 = vrot.lane.b32.xlu0 %v7253_v45, %s9822_s0  ;;  %9132 = vmatprep.subr.mxu0 %v9819_v0 }
0x4595   :  { %v7056_v62 = vpop.permute.xlu0 %7055 }
0x4596   :  { %9119 = vmatmul.mubr.msk.f32.vlgmr.msra.gmra.mxu0 %vm3039_vm12, %v7056_v62 }
0x4597   :  { %9133 = vmatpush3.msra.mxu0 %v11536_v3  ;;  %9140 = vmatprep.mubr.msk.f32.mxu0 %vm9820_vm0, %v9819_v0  ;;  %v9586_v3 = vld [vmem:[#allocation15 + $0x8] sm:$0xff] }
0x4598   :  { %9134 = vmatprep.subr.mxu0 %v9819_v0 }
0x4599   :  { %9135 = vmatpush3.msra.mxu0 %v11545_v6  ;;  %v9588_v6 = vld [vmem:[#allocation10] sm:$0xff] }
0x459a   :  { %9136 = vmatprep.subr.mxu0 %v9819_v0 }
0x459b   :  { %9137 = vmatpush3.msra.mxu0 %v11552_v38  ;;  %v7331_v20 = vpop.permute.xlu0 %7330  ;;  %v9589_v38 = vld [vmem:[#allocation15] sm:$0xff] }
0x459c   :  { %9138 = vmatprep.subr.mxu0 %v9819_v0  ;;  %9152 = vmatmul.mubr.msk.f32.vlgmr.msra.gmra.mxu1 %vm305_vm6, %v7331_v20 }
0x459d   :  { %9139 = vmatpush3.msra.mxu0 %v11563_v55  ;;  %9173 = vmatpush3.msra.mxu1 %v9586_v3  ;;  %v9590_v55 = vld [vmem:[#allocation9 + $0x18] sm:$0xff] }
0x459e   :  { %9141 = vmatmul.mubr.msk.f32.vlgmr.msra.gmra.mxu0 %vm305_vm6, %v7256_v57  ;;  %9154 = vmatprep.subr.mxu0 %v9819_v0 }
0x459f   :  { %9155 = vmatpush3.msra.mxu0 %v9587_v33  ;;  %9158 = vmatprep.mubr.msk.f32.mxu0 %vm9820_vm0, %v9819_v0 }
0x45a0   :  { %9156 = vmatprep.subr.mxu0 %v9819_v0  ;;  %9174 = vmatprep.subr.mxu1 %v9819_v0 }
0x45a1   :  { %9157 = vmatpush3.msra.mxu0 %v9588_v6  ;;  %9175 = vmatpush3.msra.mxu1 %v9589_v38 }
0x45a2   :  { %9159 = vmatmul.mubr.msk.f32.vlgmr.msra.gmra.mxu0 %vm3039_vm12, %v7056_v62  ;;  %9161 = vmatprep.subr.mxu0 %v9819_v0 }
0x45a3   :  { %9162 = vmatpush3.msra.mxu0 %v9590_v55  ;;  %9169 = vmatprep.mubr.msk.f32.mxu0 %vm9820_vm0, %v9819_v0 }
0x45a4   :  { %9163 = vmatprep.subr.mxu0 %v9819_v0  ;;  %9176 = vmatprep.mubr.msk.f32.mxu1 %vm9820_vm0, %v9819_v0 }
0x45a5   :  { %9164 = vmatpush3.msra.mxu0 %v9591_v58  ;;  %9179 = vmatprep.subr.mxu1 %v9819_v0 }
0x45a6   :  { %9165 = vmatprep.subr.mxu0 %v9819_v0 }
0x45a7   :  { %9166 = vmatpush3.msra.mxu0 %v9592_v9 }
0x45a8   :  { %9167 = vmatprep.subr.mxu0 %v9819_v0 }
0x45a9   :  { %9168 = vmatpush3.msra.mxu0 %v9593_v41 }
0x45e5   :  { %v7050_v42 = vpop.f32.mrf.mxu0 }
0x45e7   :  { %v9113_v15 = vpop.f32.mrf.mxu0 }
0x4656   :  { %v7125_v56 = vpop.f32.mrf.mxu0 }
0x4658   :  { %v9120_v43 = vpop.f32.mrf.mxu0 }
0x465c   :  { %v7400_v59 = vpop.f32.mrf.mxu1 }
0x465e   :  { %v7325_v48 = vpop.f32.mrf.mxu0  ;;  %v9153_v35 = vpop.f32.mrf.mxu1 }
0x465f   :  { %v7401_v60 = vadd.f32 %v7400_v59, %v7325_v48 }
0x4660   :  { %v9142_v2 = vpop.f32.mrf.mxu0 }
0x4661   :  { %v7404_v44 = vadd.f32 %v11591_v10, %v7401_v60  ;;  %v7126_v10 = vadd.f32 %v7125_v56, %v7050_v42 }
0x4662   :  { %v7498_v53 = vpop.f32.mrf.mxu0 }
0x4663   :  { %v8009_v27 = vmul.f32 -1.442695, %v7404_v44  ;;  %v7129_v24 = vadd.f32 %v11735_v16, %v7126_v10 }
0x4664   :  { %v9160_v12 = vpop.f32.mrf.mxu0 }
0x4665   :  { %9490 = vpow2.f32 %v8009_v27  ;;  %v8002_v49 = vmul.f32 -1.442695, %v7129_v24 }
0x4672   :  { %v9491_v30 = vpop.eup %9490 }
0x4673   :  { %v7408_v63 = vadd.f32 1.0, %v9491_v30 }
0x4675   :  { %9492 = vrcp.f32 %v7408_v63 }
0x4676   :  { %9494 = vpow2.f32 %v8002_v49 }
0x4682   :  { %v9493_v11 = vpop.eup %9492 }
0x4683   :  { %v7411_v1 = vmul.f32 2.0, %v9493_v11  ;;  %v9495_v29 = vpop.eup %9494 }
0x4684   :  { %v7133_v47 = vadd.f32 1.0, %v9495_v29 }
0x4685   :  { %v8010_v50 = vadd.f32 -1.0, %v7411_v1 }
0x4686   :  { %9496 = vrcp.f32 %v7133_v47 }
0x4687   :  { %v7413_v18 = vsel %vm10049_vm5, %v8010_v50, %v9493_v11 }
0x4688   :  { %7416 = vrot.lane.b32.xlu1 %v7413_v18, %s9821_s18  ;;  %v7414_v4 = vmul.f32 %v7413_v18, %v11602_v5 }
0x4693   :  { %v9497_v19 = vpop.eup %9496 }
0x4694   :  { %v7136_v13 = vmul.f32 2.0, %v9497_v19 }
0x4696   :  { %v8003_v28 = vadd.f32 -1.0, %v7136_v13 }
0x4698   :  { %v7138_v22 = vsel %vm10763_vm11, %v8003_v28, %v9497_v19 }
0x4699   :  { %v7139_v62 = vmul.f32 %v7138_v22, %v11671_v31 }
0x46fa   :  { %v7417_v37 = vpop.permute.xlu1 %7416 }
0x46fb   :  { %v7419_v61 = vmul.f32 %v7417_v37, %v7413_v18 }
0x46fd   :  { %7421 = vrot.lane.b32.xlu0 %v7419_v61, %s9822_s0 }
0x476f   :  { %v7422_v23 = vpop.permute.xlu0 %7421 }
0x4770   :  { %v7424_v54 = vadd.f32 %v7422_v23, %v7414_v4 }
0x4772   :  { %9498 = vtanh.f32 %v7424_v54 }
0x477f   :  { %v9499_v52 = vpop.eup %9498 }
0x4780   :  { %7427 = vrot.lane.b32.xlu1 %v9499_v52, %s9821_s18 }
0x4784   :  { %7141 = vrot.lane.b32.xlu1 %v7138_v22, %s9824_s28 }
0x47f2   :  { %v7428_v32 = vpop.permute.xlu1 %7427 }
0x47f3   :  { %v7430_v51 = vmul.f32 %v7428_v32, %v7413_v18 }
0x47f5   :  { %9500 = vtanh.f32 %v7430_v51 }
0x47f6   :  { %v7142_v21 = vpop.permute.xlu1 %7141 }
0x47f7   :  { %v7144_v45 = vmul.f32 %v7142_v21, %v7138_v22 }
0x47f9   :  { %7146 = vrot.lane.b32.xlu1 %v7144_v45, %s9825_s29 }
0x4802   :  { %v9501_v5 = vpop.eup %9500 }
0x4803   :  { %7503 = vrot.lane.b32.xlu0 %v9501_v5, %s9822_s0 }
0x486b   :  { %v7147_v20 = vpop.permute.xlu1 %7146 }
0x486c   :  { %v11746_v57 = vadd.f32 %v7147_v20, %v7139_v62 }
0x486e   :  { %9502 = vtanh.f32 %v11746_v57 }
0x4875   :  { %v7504_v3 = vpop.permute.xlu0 %7503 }
0x4876   :  { %9170 = vmatmul.mubr.msk.f32.vlgmr.msra.gmra.mxu0 %vm305_vm6, %v7504_v3 }
0x487b   :  { %v9503_v33 = vpop.eup %9502 }
0x487c   :  { %7152 = vrot.lane.b32.xlu1 %v9503_v33, %s9822_s0 }
0x48ee   :  { %v7153_v6 = vpop.permute.xlu1 %7152 }
0x48ef   :  { %v11751_v38 = vmul.f32 %v7153_v6, %v7138_v22 }
0x48f1   :  { %7605 = vrot.lane.b32.xlu1 %v11751_v38, %s9826_s3 }
0x4936   :  { %v7573_v55 = vpop.f32.mrf.mxu0 }
0x4937   :  { %v7574_v58 = vadd.f32 %v7573_v55, %v7498_v53 }
0x4938   :  { %v9171_v31 = vpop.f32.mrf.mxu0 }
0x4939   :  { %v7577_v9 = vadd.f32 %v11656_v7, %v7574_v58 }
0x493b   :  { %v8013_v41 = vmul.f32 -1.442695, %v7577_v9 }
0x493d   :  { %9504 = vpow2.f32 %v8013_v41 }
0x494a   :  { %v9505_v42 = vpop.eup %9504 }
0x494b   :  { %v7581_v15 = vadd.f32 1.0, %v9505_v42 }
0x494d   :  { %9506 = vrcp.f32 %v7581_v15 }
0x495a   :  { %v9507_v56 = vpop.eup %9506 }
0x495b   :  { %v7584_v43 = vmul.f32 2.0, %v9507_v56 }
0x495d   :  { %v8014_v59 = vadd.f32 -1.0, %v7584_v43 }
0x495f   :  { %v7586_v48 = vsel %vm10763_vm11, %v8014_v59, %v9507_v56 }
0x4960   :  { %7589 = vrot.lane.b32.xlu0 %v7586_v48, %s9824_s28  ;;  %v7587_v53 = vmul.f32 %v7586_v48, %v11677_v39 }
0x4963   :  { %v7606_v35 = vpop.permute.xlu1 %7605 }
0x4964   :  { %9177 = vmatmul.mubr.msk.f32.vlgmr.msra.gmra.mxu1 %vm3039_vm12, %v7606_v35 }
0x4965   :  { %9180 = vmatpush3.msra.mxu1 %v11692_v46  ;;  %9183 = vmatprep.mubr.msk.f32.mxu1 %vm9820_vm0, %v9819_v0  ;;  %vm7818_vm0 = vcmask 785408  }
0x4966   :  { %9181 = vmatprep.subr.mxu1 %v9819_v0 }
0x4967   :  { %9182 = vmatpush3.msra.mxu1 %v11698_v14 }
0x49d2   :  { %v7590_v7 = vpop.permute.xlu0 %7589 }
0x49d3   :  { %v7592_v60 = vmul.f32 %v7590_v7, %v7586_v48 }
0x49d5   :  { %7594 = vrot.lane.b32.xlu0 %v7592_v60, %s9825_s29 }
0x4a24   :  { %v7675_v2 = vpop.f32.mrf.mxu1 }
0x4a26   :  { %v9178_v44 = vpop.f32.mrf.mxu1 }
0x4a47   :  { %v7595_v27 = vpop.permute.xlu0 %7594 }
0x4a48   :  { %v7597_v12 = vadd.f32 %v7595_v27, %v7587_v53 }
0x4a4a   :  { %9508 = vtanh.f32 %v7597_v12 }
0x4a57   :  { %v9509_v30 = vpop.eup %9508 }
0x4a58   :  { %7600 = vrot.lane.b32.xlu0 %v9509_v30, %s9822_s0 }
0x4aca   :  { %v7601_v46 = vpop.permute.xlu0 %7600 }
0x4acb   :  { %v7603_v63 = vmul.f32 %v7601_v46, %v7586_v48 }
0x4acd   :  { %7680 = vrot.lane.b32.xlu0 %v7603_v63, %s9826_s3 }
0x4b3f   :  { %v7681_v0 = vpop.permute.xlu0 %7680 }
0x4b40   :  { %9184 = vmatmul.mubr.msk.f32.vlgmr.msra.gmra.mxu1 %vm3039_vm12, %v7681_v0 }
0x4c00   :  { %v7750_v14 = vpop.f32.mrf.mxu1 }
0x4c01   :  { %v7751_v11 = vadd.f32 %v7750_v14, %v7675_v2 }
0x4c02   :  { %v9185_v1 = vpop.f32.mrf.mxu1 }
0x4c03   :  { %v7754_v50 = vadd.f32 %v11735_v16, %v7751_v11 }
0x4c05   :  { %v8017_v18 = vmul.f32 -1.442695, %v7754_v50 }
0x4c07   :  { %9510 = vpow2.f32 %v8017_v18 }
0x4c14   :  { %v9511_v39 = vpop.eup %9510 }
0x4c15   :  { %v7758_v37 = vadd.f32 1.0, %v9511_v39 }
0x4c17   :  { %9512 = vrcp.f32 %v7758_v37 }
0x4c18   :  { %9514 = vtanh.f32 %v10919_v17 }
0x4c19   :  { %9516 = vtanh.f32 %v11240_v34 }
0x4c1a   :  { %9518 = vtanh.f32 %v11683_v25 }
0x4c24   :  { %v9513_v61 = vpop.eup %9512 }
0x4c25   :  { %v7761_v10 = vmul.f32 2.0, %v9513_v61  ;;  %v9515_v47 = vpop.eup %9514 }
0x4c26   :  { %v9517_v4 = vpop.eup %9516 }
0x4c27   :  { %v8018_v24 = vadd.f32 -1.0, %v7761_v10  ;;  %v9519_v8 = vpop.eup %9518 }
0x4c29   :  { %v7763_v49 = vsel %vm10763_vm11, %v8018_v24, %v9513_v61 }
0x4c2a   :  { %7766 = vrot.lane.b32.xlu1 %v7763_v49, %s9824_s28  ;;  %v7764_v23 = vmul.f32 %v7763_v49, %v11746_v57 }
0x4c9c   :  { %v7767_v29 = vpop.permute.xlu1 %7766 }
0x4c9d   :  { %v7769_v16 = vmul.f32 %v7767_v29, %v7763_v49 }
0x4c9f   :  { %7771 = vrot.lane.b32.xlu0 %v7769_v16, %s9825_s29 }
0x4ca3   :  { %7783 = vrot.lane.b32.xlu0 %v9515_v47, %s9826_s3  ;;  %s9828_s3 = smov 48  }
0x4ca7   :  { %7791 = vrot.lane.b32.xlu0 %v9517_v4, %s9827_s13 }
0x4cab   :  { %7799 = vrot.lane.b32.xlu0 %v9519_v8, %s9822_s0 }
0x4d11   :  { %v7772_v17 = vpop.permute.xlu0 %7771 }
0x4d12   :  { %v7774_v54 = vadd.f32 %v7772_v17, %v7764_v23 }
0x4d14   :  { %9520 = vtanh.f32 %v7774_v54 }
0x4d15   :  { %9522 = vtanh.f32 %v11046_v36 }
0x4d16   :  { %9524 = vtanh.f32 %v11516_v40  ;;  %v7784_v40 = vpop.permute.xlu0 %7783 }
0x4d17   :  { %9526 = vtanh.f32 %v11751_v38 }
0x4d1a   :  { %v7792_v51 = vpop.permute.xlu0 %7791 }
0x4d1e   :  { %v7800_v20 = vpop.permute.xlu0 %7799 }
0x4d21   :  { %v9521_v34 = vpop.eup %9520 }
0x4d22   :  { %7777 = vrot.lane.b32.xlu1 %v9521_v34, %s9822_s0  ;;  %v9523_v25 = vpop.eup %9522 }
0x4d23   :  { %v9525_v19 = vpop.eup %9524 }
0x4d24   :  { %v9527_v13 = vpop.eup %9526 }
0x4d26   :  { %7787 = vrot.lane.b32.xlu1 %v9523_v25, %s9824_s28 }
0x4d2a   :  { %7795 = vrot.lane.b32.xlu1 %v9525_v19, %s9825_s29 }
0x4d2e   :  { %7803 = vrot.lane.b32.xlu1 %v9527_v13, %s9828_s3 }
0x4d94   :  { %v7778_v52 = vpop.permute.xlu1 %7777 }
0x4d95   :  { %v7780_v28 = vmul.f32 %v7778_v52, %v7763_v49 }
0x4d97   :  { %9528 = vtanh.f32 %v7780_v28 }
0x4d98   :  { %9530 = vtanh.f32 %v11389_v26  ;;  %v7788_v22 = vpop.permute.xlu1 %7787 }
0x4d99   :  { %v7810_v32 = vsel %vm3039_vm12, %v7784_v40, %v7788_v22 }
0x4d9a   :  { %v7811_v21 = vsel %vm305_vm6, %v7810_v32, %v7792_v51 }
0x4d9c   :  { %v7796_v45 = vpop.permute.xlu1 %7795 }
0x4da0   :  { %v7804_v3 = vpop.permute.xlu1 %7803 }
0x4da4   :  { %v9529_v36 = vpop.eup %9528 }
0x4da5   :  { %7807 = vrot.lane.b32.xlu0 %v9529_v36, %s9821_s18  ;;  %v9531_v5 = vpop.eup %9530 }
0x4da6   :  { %v7813_v62 = vsel %vm7812_vm13, %v7811_v21, %v9531_v5 }
0x4da7   :  { %v7815_v57 = vsel %vm7814_vm14, %v7813_v62, %v7796_v45 }
0x4da8   :  { %v7817_v33 = vsel %vm7816_vm15, %v7815_v57, %v7800_v20 }
0x4da9   :  { %v7819_v26 = vsel %vm7818_vm0, %v7817_v33, %v7804_v3 }
0x4e17   :  { %v7808_v6 = vpop.permute.xlu0 %7807 }
0x4e18   :  { %v7821_v38 = vsel %vm7820_vm1, %v7819_v26, %v7808_v6 }
0x4e19   :  { %7822 = vst [vmem:[%s11816_s22] sm:$0x3] %v7821_v38 }
0x4e1a   :  { %7831 = vsyncpa [#allocation3], 1 }
0x4e1b   :  { %7832 = vsyncpa [#allocation5], 1 }
0x4e1c   :  { %7833 = vsyncpa [#allocation8], 1 }
0x4e1d   :  { %7834 = vsyncpa [#allocation11], 1 }
0x4e1e   :  { %7835 = vsyncpa [#allocation14], 1 }
0x4e1f   :  { %7836 = vsyncpa [#allocation17], 1 }

</bundles_post_ra>
